<compile_context>
chip_gen: v6e
topology: v6e:2x2x1
jax: 0.10.0
libtpu: 0.0.40
codegen_flags: <defaults>
</compile_context>

<pallas_src>
import jax
import jax.numpy as jnp
from jax.experimental import pallas as pl
from jax.experimental.pallas import tpu as pltpu


# ----------------------------------------------------------------------------
# Pallas kernel: fused 2x bilinear upsample + 3x3 conv + folded BN + PReLU.
# One grid step = (batch n, output row-tile t).  Output is stored NCHW.
# ----------------------------------------------------------------------------
def _fused_upsample_conv_bn_prelu_kernel(x_ref, w_ref, shift_ref, alpha_ref,
                                         o_ref, upad_ref):
    # x_ref    : (1, H+2, W+2, Cin)   f32 low-res input, edge-replicate padded,
    #                                 resident across all row-tiles of batch n.
    # w_ref    : (3, 3*Cin, Cout)     BN-folded conv weights grouped by dy
    #                                 (bf16 on the fast path, f32 otherwise).
    # shift_ref: (1, Cout) f32        folded conv-bias + BatchNorm shift.
    # alpha_ref: (1, Cout) f32        PReLU slope (broadcast if single-param).
    # o_ref    : (1, Cout, TH2, W2)   NCHW output tile.
    # upad_ref : (TH2+2, W2+2, Cin)   scratch (matmul-operand dtype): upsampled
    #                                 tile with the conv's zero-pad columns.
    Cout, TH2, W2 = o_ref.shape[1], o_ref.shape[2], o_ref.shape[3]
    Cin = x_ref.shape[3]
    W = W2 // 2
    TL = TH2 // 2
    t = pl.program_id(1)
    H2 = TH2 * pl.num_programs(1)            # total number of upsampled rows
    cdt = upad_ref.dtype

    # -- low-res rows (TL+2, incl. upsample/conv halo) needed by this tile ----
    xs = x_ref[0, pl.ds(t * TL, TL + 2)]                  # (TL+2, W+2, Cin) f32

    # -- 2x bilinear upsample along H (align_corners=False), plus conv halo ---
    #   up[2k]   = 0.25*xp[k]   + 0.75*xp[k+1]
    #   up[2k+1] = 0.75*xp[k+1] + 0.25*xp[k+2]     (xp = edge-replicate padded)
    p0 = xs[0:TL + 1]                                     # (TL+1, W+2, Cin)
    p1 = xs[1:TL + 2]
    odd_r = 0.75 * p0 + 0.25 * p1                         # up-rows 2k-1
    even_r = 0.25 * p0 + 0.75 * p1                        # up-rows 2k
    uh = jnp.stack([odd_r, even_r], axis=1).reshape(TH2 + 2, W + 2, Cin)
    # Up-rows falling outside [0, H2) are the 3x3 conv's zero padding.
    g = jax.lax.broadcasted_iota(jnp.int32, (TH2 + 2, 1, 1), 0) + (t * TH2 - 1)
    uh = jnp.where((g >= 0) & (g < H2), uh, 0.0)          # (TH2+2, W+2, Cin)

    # -- 2x bilinear upsample along W (columns already edge-replicated) -------
    q0 = uh[:, 0:W]
    q1 = uh[:, 1:W + 1]
    q2 = uh[:, 2:W + 2]
    even_c = 0.25 * q0 + 0.75 * q1                        # up-cols 2l
    odd_c = 0.75 * q1 + 0.25 * q2                         # up-cols 2l+1
    uw = jnp.stack([even_c, odd_c], axis=2).reshape(TH2 + 2, W2, Cin)

    # -- conv zero padding along W via persistent pre-zeroed scratch ----------
    upad_ref[:, 0:1, :] = jnp.zeros((TH2 + 2, 1, Cin), cdt)
    upad_ref[:, W2 + 1:W2 + 2, :] = jnp.zeros((TH2 + 2, 1, Cin), cdt)
    upad_ref[:, 1:W2 + 1, :] = uw.astype(cdt)

    # -- 3x3 conv as three K=3*Cin MXU matmuls (dy loop), f32 accumulation ----
    cols3 = jnp.concatenate(
        [upad_ref[:, dx:dx + W2, :] for dx in range(3)], axis=-1
    )                                                     # (TH2+2, W2, 3*Cin)
    cm = cols3.reshape((TH2 + 2) * W2, 3 * Cin)
    y = jnp.dot(cm[0:TH2 * W2], w_ref[0],
                preferred_element_type=jnp.float32)
    y = y + jnp.dot(cm[W2:W2 + TH2 * W2], w_ref[1],
                    preferred_element_type=jnp.float32)
    y = y + jnp.dot(cm[2 * W2:2 * W2 + TH2 * W2], w_ref[2],
                    preferred_element_type=jnp.float32)   # (TH2*W2, Cout) f32

    # -- folded conv-bias + BatchNorm, then PReLU ------------------------------
    z = y + shift_ref[...]
    out = jnp.where(z > 0, z, alpha_ref[...] * z)

    # -- store NCHW directly (XLU transpose; avoids a host-side 4x-size pass) --
    o_ref[0] = out.T.reshape(Cout, TH2, W2).astype(o_ref.dtype)


# ----------------------------------------------------------------------------
# VMEM accounting + row-tile selection.
# ----------------------------------------------------------------------------
def _round_up(v, m):
    return -(-v // m) * m


def _estimate_vmem_bytes(tl, H, W, Cin, Cout, op_bytes):
    """Rough per-step VMEM working set, padded to (8, 128) vreg tiles."""
    th2, w2 = 2 * tl, 2 * W
    lane = lambda c: _round_up(max(c, 1), 128)
    sub = lambda s: _round_up(max(s, 1), 8)
    f32 = 4
    x_res = 2 * (H + 2) * sub(W + 2) * lane(Cin) * f32        # resident input (2 bufs)
    interp = 3 * (th2 + 2) * sub(W + 2) * lane(Cin) * f32     # row-upsample temporaries
    uw = (th2 + 2) * sub(w2) * lane(Cin) * f32                # col-upsampled tile
    upad = (th2 + 2) * sub(w2 + 2) * lane(Cin) * op_bytes     # zero-padded scratch
    cols = 2 * (th2 + 2) * sub(w2) * lane(3 * Cin) * op_bytes # 3-tap im2col (+flatten)
    acc = 2 * sub(th2 * w2) * lane(Cout) * f32                # matmul result + epilogue
    out_t = sub(Cout) * lane(th2 * w2) * f32                  # transposed result
    out_blk = 2 * Cout * sub(th2) * lane(w2) * f32            # output block (2 bufs)
    wgt = 2 * 3 * sub(3 * Cin) * lane(Cout) * op_bytes        # weights (2 bufs)
    return x_res + interp + uw + upad + cols + acc + out_t + out_blk + wgt


def _pick_tile_rows(H, W, Cin, Cout, N, max_tile_rows, vmem_budget_bytes,
                    op_bytes):
    """Largest valid row-tile whose working set fits the per-generation budget."""
    # Valid tiles: TL | H and (2*TL % 8 == 0 or TL == H) so the NCHW output
    # block's second-to-last dim (TH2) satisfies the (8, 128) constraint.
    valid = [d for d in range(1, H + 1)
             if H % d == 0 and ((2 * d) % 8 == 0 or d == H)]
    capped = [d for d in valid if d <= max_tile_rows] or [H]
    fits = [d for d in capped
            if _estimate_vmem_bytes(d, H, W, Cin, Cout, op_bytes)
            <= vmem_budget_bytes]
    # If nothing fits the budget, fall back to the smallest valid tile and let
    # the wrapper raise vmem_limit_bytes accordingly (no silent TL=1 collapse).
    pool = fits if fits else [min(capped)]
    if N == 1:
        # v7x shards 'parallel' grid axes across 2 TensorCores: keep >= 2 steps.
        multi = [d for d in pool if H // d >= 2]
        if multi:
            return max(multi)
    return max(pool)


# ----------------------------------------------------------------------------
# Wrapper: host-side constant folding + one-time edge pad + pallas_call.
# ----------------------------------------------------------------------------
def pp_upsample_forward(x_nchw, params, *, max_tile_rows=256,
                        vmem_budget_bytes=20 << 20, use_bf16=True):
    """pp_upsample forward: (N, Cin, H, W) f32 -> (N, Cout, 2H, 2W) f32."""
    w_oihw = jnp.asarray(params["conv_w"], jnp.float32)        # (Cout, Cin, 3, 3)
    conv_b = jnp.asarray(params["conv_b"], jnp.float32)
    gamma = jnp.asarray(params["bn_gamma"], jnp.float32)
    beta = jnp.asarray(params["bn_beta"], jnp.float32)
    rmean = jnp.asarray(params["bn_mean"], jnp.float32)
    rvar = jnp.asarray(params["bn_var"], jnp.float32)
    eps = float(params["bn_eps"])
    alpha = jnp.asarray(params["prelu_a"], jnp.float32)

    Cout, Cin = int(w_oihw.shape[0]), int(w_oihw.shape[1])
    N, _, H, W = (int(s) for s in x_nchw.shape)
    H2, W2 = 2 * H, 2 * W

    op_dtype = jnp.bfloat16 if use_bf16 else jnp.float32
    op_bytes = 2 if use_bf16 else 4

    # ---- row tiling against the VMEM budget (default sized for v7x 64 MiB;
    #      raise vmem_budget_bytes on v6e/v5e for larger tiles) ----
    TL = _pick_tile_rows(H, W, Cin, Cout, N, max_tile_rows, vmem_budget_bytes,
                         op_bytes)
    n_tiles = H // TL
    TH2 = 2 * TL
    est = _estimate_vmem_bytes(TL, H, W, Cin, Cout, op_bytes)
    vmem_limit = int(min(max(est * 3 // 2, 32 << 20), 48 << 20))

    # ---- constant folding: conv bias + eval-mode BatchNorm into W / shift ----
    scale = gamma / jnp.sqrt(rvar + eps)                               # (Cout,)
    w_dykc = (jnp.transpose(w_oihw, (2, 3, 1, 0))                      # (3,3,Cin,Cout)
              * scale[None, None, None, :]).reshape(3, 3 * Cin, Cout).astype(op_dtype)
    shift = (beta + (conv_b - rmean) * scale).reshape(1, Cout).astype(jnp.float32)
    # nn.PReLU() default is a single shared slope; broadcast to per-channel so
    # per-channel PReLU weights are also supported.
    alpha_row = jnp.broadcast_to(jnp.reshape(alpha, (-1,)),
                                 (Cout,)).reshape(1, Cout).astype(jnp.float32)

    # ---- one-time edge-replicate pad of the low-res input (no per-tile gather,
    #      no halo duplication in HBM) ----
    # TODO(synk): an NHWC end-to-end network would remove this small transpose.
    x_nhwc = jnp.transpose(x_nchw, (0, 2, 3, 1)).astype(jnp.float32)
    xp = jnp.pad(x_nhwc, ((0, 0), (1, 1), (1, 1), (0, 0)), mode="edge")

    out_nchw = pl.pallas_call(
        _fused_upsample_conv_bn_prelu_kernel,
        out_shape=jax.ShapeDtypeStruct((N, Cout, H2, W2), jnp.float32),
        grid_spec=pltpu.PrefetchScalarGridSpec(
            num_scalar_prefetch=0,
            grid=(N, n_tiles),
            in_specs=[
                # Resident per-batch block: constant index over t, so it is
                # DMA'd from HBM once per batch and reused by every row-tile.
                pl.BlockSpec((1, H + 2, W + 2, Cin), lambda n, t: (n, 0, 0, 0)),
                # Constant-index operands (weights / shift / PReLU slope).
                # (pipeline_mode=pl.Buffered(1) would drop their 2nd buffer.)
                pl.BlockSpec((3, 3 * Cin, Cout), lambda n, t: (0, 0, 0)),
                pl.BlockSpec((1, Cout), lambda n, t: (0, 0)),
                pl.BlockSpec((1, Cout), lambda n, t: (0, 0)),
            ],
            out_specs=pl.BlockSpec((1, Cout, TH2, W2),
                                   lambda n, t: (n, 0, t, 0)),
            scratch_shapes=[pltpu.VMEM((TH2 + 2, W2 + 2, Cin), op_dtype)],
        ),
        compiler_params=pltpu.CompilerParams(
            dimension_semantics=("parallel", "parallel"),
            vmem_limit_bytes=vmem_limit),
    )(xp, w_dykc, shift, alpha_row)

    return out_nchw


# ----------------------------------------------------------------------------
# Pure-JAX reference (for the self-check) and parameter init.
# ----------------------------------------------------------------------------
def _up_coords(out_size, in_size):
    # align_corners=False (modern F.upsample / F.interpolate default).
    src = (jnp.arange(out_size, dtype=jnp.float32) + 0.5) * (in_size / out_size) - 0.5
    src = jnp.maximum(src, 0.0)
    i0 = jnp.minimum(jnp.floor(src).astype(jnp.int32), in_size - 1)
    i1 = jnp.minimum(i0 + 1, in_size - 1)
    w1 = src - i0.astype(jnp.float32)
    return i0, i1, 1.0 - w1, w1


def _reference_forward(x_nchw, params):
    N, Cin, H, W = x_nchw.shape
    h0, h1, wh0, wh1 = _up_coords(2 * H, H)
    v0, v1, wv0, wv1 = _up_coords(2 * W, W)
    x = x_nchw.astype(jnp.float32)
    xh = (x[:, :, h0, :] * wh0[None, None, :, None] +
          x[:, :, h1, :] * wh1[None, None, :, None])
    p = (xh[:, :, :, v0] * wv0[None, None, None, :] +
         xh[:, :, :, v1] * wv1[None, None, None, :])
    y = jax.lax.conv_general_dilated(
        p, params["conv_w"].astype(jnp.float32), (1, 1), ((1, 1), (1, 1)),
        dimension_numbers=("NCHW", "OIHW", "NCHW"),
        precision=jax.lax.Precision.HIGHEST)
    y = y + params["conv_b"][None, :, None, None]
    scale = params["bn_gamma"] / jnp.sqrt(params["bn_var"] + params["bn_eps"])
    shift = params["bn_beta"] - params["bn_mean"] * scale
    y = y * scale[None, :, None, None] + shift[None, :, None, None]
    return jnp.where(y > 0, y, params["prelu_a"] * y)


def init_params(key, inc, outc):
    k0, k1, k2, k3, k4, k5 = jax.random.split(key, 6)
    return {
        "conv_w": 0.1 * jax.random.normal(k0, (outc, inc, 3, 3), jnp.float32),
        "conv_b": 0.1 * jax.random.normal(k1, (outc,), jnp.float32),
        "bn_gamma": 1.0 + 0.1 * jax.random.normal(k2, (outc,), jnp.float32),
        "bn_beta": 0.1 * jax.random.normal(k3, (outc,), jnp.float32),
        "bn_mean": 0.1 * jax.random.normal(k4, (outc,), jnp.float32),
        "bn_var": 1.0 + 0.1 * jnp.abs(jax.random.normal(k5, (outc,), jnp.float32)),
        "bn_eps": 1e-5,
        "prelu_a": 0.25,  # nn.PReLU() default: single shared parameter, init 0.25
    }


if __name__ == "__main__":
    key = jax.random.PRNGKey(0)
    kx, kp = jax.random.split(key)

    N, Cin, Cout, H, W = 2, 4, 8, 16, 16
    x = jax.random.normal(kx, (N, Cin, H, W), jnp.float32)
    params = init_params(kp, Cin, Cout)

    ref = _reference_forward(x, params)

    # max_tile_rows=8 -> two row-tiles per image, so the halo/tiling path is
    # exercised even at this small test size.

    # (1) f32 operands: validates the indexing / interpolation / folding logic.
    #     (MXU DEFAULT precision may round f32 operands to bf16 internally,
    #      hence the tolerance; any layout/indexing bug would be O(1).)
    out_f32 = pp_upsample_forward(x, params, max_tile_rows=8, use_bf16=False)
    jax.block_until_ready(out_f32)
    assert out_f32.shape == (N, Cout, 2 * H, 2 * W), out_f32.shape
    assert out_f32.dtype == jnp.float32
    err_f32 = float(jnp.max(jnp.abs(out_f32 - ref)))
    assert err_f32 < 3e-2, f"f32-path max |err| = {err_f32}"

    # (2) default performance path: bf16 MXU operands, f32 accumulation.
    out = pp_upsample_forward(x, params, max_tile_rows=8)
    jax.block_until_ready(out)
    assert out.shape == (N, Cout, 2 * H, 2 * W), out.shape
    assert out.dtype == jnp.float32
    err_bf16 = float(jnp.max(jnp.abs(out - ref)))
    assert err_bf16 < 5e-2, f"bf16-path max |err| = {err_bf16}"

    print("KERNEL_OK")
</pallas_src>

<mosaic_0001>
module attributes {stable_mosaic.version = 11 : i64} {
  func.func @_fused_upsample_conv_bn_prelu_kernel(%arg0: i32, %arg1: i32, %arg2: memref<1x18x18x4xf32, #tpu.memory_space<vmem>>, %arg3: memref<3x12x8xf32, #tpu.memory_space<vmem>>, %arg4: memref<1x8xf32, #tpu.memory_space<vmem>>, %arg5: memref<1x8xf32, #tpu.memory_space<vmem>>, %arg6: memref<1x8x16x32xf32, #tpu.memory_space<vmem>>, %arg7: memref<18x34x4xf32, #tpu.memory_space<vmem>>) attributes {dimension_semantics = [#tpu.dimension_semantics<parallel>, #tpu.dimension_semantics<parallel>], iteration_bounds = array<i64: 2, 2>, scalar_prefetch = 0 : i64, scratch_operands = 1 : i64, tpu.core_type = #tpu.core_type<tc>, window_params = [{transform_indices = @transform_0, window_bounds = array<i64: 1, 18, 18, 4>}, {pipeline_mode = #tpu.pipeline_mode<synchronous>, transform_indices = @transform_1, window_bounds = array<i64: 3, 12, 8>}, {pipeline_mode = #tpu.pipeline_mode<synchronous>, transform_indices = @transform_2, window_bounds = array<i64: 1, 8>}, {pipeline_mode = #tpu.pipeline_mode<synchronous>, transform_indices = @transform_3, window_bounds = array<i64: 1, 8>}, {transform_indices = @transform_4, window_bounds = array<i64: 1, 8, 16, 32>}]} {
    %c8_i32 = arith.constant 8 : i32
    %0 = arith.muli %arg1, %c8_i32 : i32
    %c0 = arith.constant 0 : index
    %1 = arith.index_cast %0 : i32 to index
    %c0_0 = arith.constant 0 : index
    %c0_1 = arith.constant 0 : index
    %2 = vector.load %arg2[%c0, %1, %c0_0, %c0_1] : memref<1x18x18x4xf32, #tpu.memory_space<vmem>>, vector<1x10x18x4xf32>
    %3 = vector.shape_cast %2 : vector<1x10x18x4xf32> to vector<10x18x4xf32>
    %4 = vector.extract_strided_slice %3 {offsets = [0, 0, 0], sizes = [9, 18, 4], strides = [1, 1, 1]} : vector<10x18x4xf32> to vector<9x18x4xf32>
    %5 = vector.extract_strided_slice %3 {offsets = [1, 0, 0], sizes = [9, 18, 4], strides = [1, 1, 1]} : vector<10x18x4xf32> to vector<9x18x4xf32>
    %cst = arith.constant 7.500000e-01 : f32
    %6 = vector.broadcast %cst : f32 to vector<9x18x4xf32>
    %7 = arith.mulf %6, %4 : vector<9x18x4xf32>
    %cst_2 = arith.constant 2.500000e-01 : f32
    %8 = vector.broadcast %cst_2 : f32 to vector<9x18x4xf32>
    %9 = arith.mulf %8, %5 : vector<9x18x4xf32>
    %10 = arith.addf %7, %9 : vector<9x18x4xf32>
    %cst_3 = arith.constant 2.500000e-01 : f32
    %11 = vector.broadcast %cst_3 : f32 to vector<9x18x4xf32>
    %12 = arith.mulf %11, %4 : vector<9x18x4xf32>
    %cst_4 = arith.constant 7.500000e-01 : f32
    %13 = vector.broadcast %cst_4 : f32 to vector<9x18x4xf32>
    %14 = arith.mulf %13, %5 : vector<9x18x4xf32>
    %15 = arith.addf %12, %14 : vector<9x18x4xf32>
    %16 = vector.shape_cast %10 : vector<9x18x4xf32> to vector<9x1x18x4xf32>
    %17 = vector.shape_cast %15 : vector<9x18x4xf32> to vector<9x1x18x4xf32>
    %18 = tpu.concatenate %16, %17 in 1 : vector<9x1x18x4xf32>, vector<9x1x18x4xf32> -> vector<9x2x18x4xf32>
    %19 = vector.shape_cast %18 : vector<9x2x18x4xf32> to vector<18x18x4xf32>
    %20 = tpu.iota {dimensions = array<i32: 0>} : vector<18x1x1xi32>
    %c16_i32 = arith.constant 16 : i32
    %21 = arith.muli %arg1, %c16_i32 : i32
    %c1_i32 = arith.constant 1 : i32
    %22 = arith.subi %21, %c1_i32 : i32
    %23 = vector.broadcast %22 : i32 to vector<18x1x1xi32>
    %24 = arith.addi %20, %23 : vector<18x1x1xi32>
    %c0_i32 = arith.constant 0 : i32
    %25 = vector.broadcast %c0_i32 : i32 to vector<18x1x1xi32>
    %26 = arith.cmpi sge, %24, %25 : vector<18x1x1xi32>
    %c32_i32 = arith.constant 32 : i32
    %27 = vector.broadcast %c32_i32 : i32 to vector<18x1x1xi32>
    %28 = arith.cmpi slt, %24, %27 : vector<18x1x1xi32>
    %29 = arith.andi %26, %28 : vector<18x1x1xi1>
    %cst_5 = arith.constant 0.000000e+00 : f32
    %30 = vector.shape_cast %29 : vector<18x1x1xi1> to vector<18x1x1xi1>
    %31 = vector.broadcast %30 : vector<18x1x1xi1> to vector<18x18x4xi1>
    %32 = vector.broadcast %cst_5 : f32 to vector<18x18x4xf32>
    %33 = arith.select %31, %19, %32 : vector<18x18x4xi1>, vector<18x18x4xf32>
    %34 = vector.extract_strided_slice %33 {offsets = [0, 0, 0], sizes = [18, 16, 4], strides = [1, 1, 1]} : vector<18x18x4xf32> to vector<18x16x4xf32>
    %35 = vector.extract_strided_slice %33 {offsets = [0, 1, 0], sizes = [18, 16, 4], strides = [1, 1, 1]} : vector<18x18x4xf32> to vector<18x16x4xf32>
    %36 = vector.extract_strided_slice %33 {offsets = [0, 2, 0], sizes = [18, 16, 4], strides = [1, 1, 1]} : vector<18x18x4xf32> to vector<18x16x4xf32>
    %cst_6 = arith.constant 2.500000e-01 : f32
    %37 = vector.broadcast %cst_6 : f32 to vector<18x16x4xf32>
    %38 = arith.mulf %37, %34 : vector<18x16x4xf32>
    %cst_7 = arith.constant 7.500000e-01 : f32
    %39 = vector.broadcast %cst_7 : f32 to vector<18x16x4xf32>
    %40 = arith.mulf %39, %35 : vector<18x16x4xf32>
    %41 = arith.addf %38, %40 : vector<18x16x4xf32>
    %cst_8 = arith.constant 7.500000e-01 : f32
    %42 = vector.broadcast %cst_8 : f32 to vector<18x16x4xf32>
    %43 = arith.mulf %42, %35 : vector<18x16x4xf32>
    %cst_9 = arith.constant 2.500000e-01 : f32
    %44 = vector.broadcast %cst_9 : f32 to vector<18x16x4xf32>
    %45 = arith.mulf %44, %36 : vector<18x16x4xf32>
    %46 = arith.addf %43, %45 : vector<18x16x4xf32>
    %47 = vector.shape_cast %41 : vector<18x16x4xf32> to vector<18x16x1x4xf32>
    %48 = vector.shape_cast %46 : vector<18x16x4xf32> to vector<18x16x1x4xf32>
    %49 = tpu.concatenate %47, %48 in 2 : vector<18x16x1x4xf32>, vector<18x16x1x4xf32> -> vector<18x16x2x4xf32>
    %50 = vector.shape_cast %49 : vector<18x16x2x4xf32> to vector<18x32x4xf32>
    %cst_10 = arith.constant 0.000000e+00 : f32
    %51 = vector.broadcast %cst_10 : f32 to vector<18x1x4xf32>
    %c0_11 = arith.constant 0 : index
    %c0_12 = arith.constant 0 : index
    %c0_13 = arith.constant 0 : index
    %52 = vector.load %arg7[%c0_11, %c0_12, %c0_13] : memref<18x34x4xf32, #tpu.memory_space<vmem>>, vector<18x1x4xf32>
    tpu.vector_store %arg7[%c0_11, %c0_12, %c0_13], %51 {strides = array<i32>} : memref<18x34x4xf32, #tpu.memory_space<vmem>>, vector<18x1x4xf32>,
    %cst_14 = arith.constant 0.000000e+00 : f32
    %53 = vector.broadcast %cst_14 : f32 to vector<18x1x4xf32>
    %c0_15 = arith.constant 0 : index
    %c33 = arith.constant 33 : index
    %c0_16 = arith.constant 0 : index
    %54 = vector.load %arg7[%c0_15, %c33, %c0_16] : memref<18x34x4xf32, #tpu.memory_space<vmem>>, vector<18x1x4xf32>
    tpu.vector_store %arg7[%c0_15, %c33, %c0_16], %53 {strides = array<i32>} : memref<18x34x4xf32, #tpu.memory_space<vmem>>, vector<18x1x4xf32>,
    %c0_17 = arith.constant 0 : index
    %c1 = arith.constant 1 : index
    %c0_18 = arith.constant 0 : index
    %55 = vector.load %arg7[%c0_17, %c1, %c0_18] : memref<18x34x4xf32, #tpu.memory_space<vmem>>, vector<18x32x4xf32>
    tpu.vector_store %arg7[%c0_17, %c1, %c0_18], %50 {strides = array<i32>} : memref<18x34x4xf32, #tpu.memory_space<vmem>>, vector<18x32x4xf32>,
    %c0_19 = arith.constant 0 : index
    %c0_20 = arith.constant 0 : index
    %c0_21 = arith.constant 0 : index
    %56 = vector.load %arg7[%c0_19, %c0_20, %c0_21] : memref<18x34x4xf32, #tpu.memory_space<vmem>>, vector<18x32x4xf32>
    %c0_22 = arith.constant 0 : index
    %c1_23 = arith.constant 1 : index
    %c0_24 = arith.constant 0 : index
    %57 = vector.load %arg7[%c0_22, %c1_23, %c0_24] : memref<18x34x4xf32, #tpu.memory_space<vmem>>, vector<18x32x4xf32>
    %c0_25 = arith.constant 0 : index
    %c2 = arith.constant 2 : index
    %c0_26 = arith.constant 0 : index
    %58 = vector.load %arg7[%c0_25, %c2, %c0_26] : memref<18x34x4xf32, #tpu.memory_space<vmem>>, vector<18x32x4xf32>
    %59 = tpu.concatenate %56, %57, %58 in 2 : vector<18x32x4xf32>, vector<18x32x4xf32>, vector<18x32x4xf32> -> vector<18x32x12xf32>
    %60 = vector.shape_cast %59 : vector<18x32x12xf32> to vector<576x12xf32>
    %61 = vector.extract_strided_slice %60 {offsets = [0, 0], sizes = [512, 12], strides = [1, 1]} : vector<576x12xf32> to vector<512x12xf32>
    %c0_27 = arith.constant 0 : index
    %c0_28 = arith.constant 0 : index
    %c0_29 = arith.constant 0 : index
    %62 = vector.load %arg3[%c0_27, %c0_28, %c0_29] : memref<3x12x8xf32, #tpu.memory_space<vmem>>, vector<1x12x8xf32>
    %63 = vector.shape_cast %62 : vector<1x12x8xf32> to vector<12x8xf32>
    %cst_30 = arith.constant dense<0.000000e+00> : vector<512x8xf32>
    %64 = tpu.matmul %61, %63, %cst_30 {dimension_numbers = #tpu.dot_dimension_numbers<[1], [0], [0], [1], [0, 0, 1, 1], [], []>} : vector<512x12xf32>, vector<12x8xf32>, vector<512x8xf32> -> vector<512x8xf32>
    %65 = vector.extract_strided_slice %60 {offsets = [32, 0], sizes = [512, 12], strides = [1, 1]} : vector<576x12xf32> to vector<512x12xf32>
    %c1_31 = arith.constant 1 : index
    %c0_32 = arith.constant 0 : index
    %c0_33 = arith.constant 0 : index
    %66 = vector.load %arg3[%c1_31, %c0_32, %c0_33] : memref<3x12x8xf32, #tpu.memory_space<vmem>>, vector<1x12x8xf32>
    %67 = vector.shape_cast %66 : vector<1x12x8xf32> to vector<12x8xf32>
    %cst_34 = arith.constant dense<0.000000e+00> : vector<512x8xf32>
    %68 = tpu.matmul %65, %67, %cst_34 {dimension_numbers = #tpu.dot_dimension_numbers<[1], [0], [0], [1], [0, 0, 1, 1], [], []>} : vector<512x12xf32>, vector<12x8xf32>, vector<512x8xf32> -> vector<512x8xf32>
    %69 = arith.addf %64, %68 : vector<512x8xf32>
    %70 = vector.extract_strided_slice %60 {offsets = [64, 0], sizes = [512, 12], strides = [1, 1]} : vector<576x12xf32> to vector<512x12xf32>
    %c2_35 = arith.constant 2 : index
    %c0_36 = arith.constant 0 : index
    %c0_37 = arith.constant 0 : index
    %71 = vector.load %arg3[%c2_35, %c0_36, %c0_37] : memref<3x12x8xf32, #tpu.memory_space<vmem>>, vector<1x12x8xf32>
    %72 = vector.shape_cast %71 : vector<1x12x8xf32> to vector<12x8xf32>
    %cst_38 = arith.constant dense<0.000000e+00> : vector<512x8xf32>
    %73 = tpu.matmul %70, %72, %cst_38 {dimension_numbers = #tpu.dot_dimension_numbers<[1], [0], [0], [1], [0, 0, 1, 1], [], []>} : vector<512x12xf32>, vector<12x8xf32>, vector<512x8xf32> -> vector<512x8xf32>
    %74 = arith.addf %69, %73 : vector<512x8xf32>
    %c0_39 = arith.constant 0 : index
    %c0_40 = arith.constant 0 : index
    %75 = vector.load %arg4[%c0_39, %c0_40] : memref<1x8xf32, #tpu.memory_space<vmem>>, vector<1x8xf32>
    %76 = vector.broadcast %75 : vector<1x8xf32> to vector<512x8xf32>
    %77 = arith.addf %74, %76 : vector<512x8xf32>
    %cst_41 = arith.constant 0.000000e+00 : f32
    %78 = vector.broadcast %cst_41 : f32 to vector<512x8xf32>
    %79 = arith.cmpf ogt, %77, %78 : vector<512x8xf32>
    %c0_42 = arith.constant 0 : index
    %c0_43 = arith.constant 0 : index
    %80 = vector.load %arg5[%c0_42, %c0_43] : memref<1x8xf32, #tpu.memory_space<vmem>>, vector<1x8xf32>
    %81 = vector.broadcast %80 : vector<1x8xf32> to vector<512x8xf32>
    %82 = arith.mulf %81, %77 : vector<512x8xf32>
    %83 = arith.select %79, %77, %82 : vector<512x8xi1>, vector<512x8xf32>
    %84 = tpu.transpose %83, [1, 0] : vector<512x8xf32> -> vector<8x512xf32>
    %85 = vector.shape_cast %84 : vector<8x512xf32> to vector<8x16x32xf32>
    %c0_44 = arith.constant 0 : index
    %c0_45 = arith.constant 0 : index
    %c0_46 = arith.constant 0 : index
    %c0_47 = arith.constant 0 : index
    %86 = vector.load %arg6[%c0_44, %c0_45, %c0_46, %c0_47] : memref<1x8x16x32xf32, #tpu.memory_space<vmem>>, vector<1x8x16x32xf32>
    %87 = vector.shape_cast %86 : vector<1x8x16x32xf32> to vector<8x16x32xf32>
    %88 = vector.shape_cast %85 : vector<8x16x32xf32> to vector<1x8x16x32xf32>
    tpu.vector_store %arg6[%c0_44, %c0_45, %c0_46, %c0_47], %88 {strides = array<i32>} : memref<1x8x16x32xf32, #tpu.memory_space<vmem>>, vector<1x8x16x32xf32>,
    return
  }
  func.func @transform_0(%arg0: i32, %arg1: i32) -> (i32, i32, i32, i32) {
    %c0_i32 = arith.constant 0 : i32
    %c0_i32_0 = arith.constant 0 : i32
    %c0_i32_1 = arith.constant 0 : i32
    %c0_i32_2 = arith.constant 0 : i32
    return %arg0, %c0_i32, %c0_i32_0, %c0_i32_1 : i32, i32, i32, i32
  }
  func.func @transform_1(%arg0: i32, %arg1: i32) -> (i32, i32, i32) {
    %c0_i32 = arith.constant 0 : i32
    %c0_i32_0 = arith.constant 0 : i32
    %c0_i32_1 = arith.constant 0 : i32
    %c0_i32_2 = arith.constant 0 : i32
    return %c0_i32, %c0_i32_0, %c0_i32_1 : i32, i32, i32
  }
  func.func @transform_2(%arg0: i32, %arg1: i32) -> (i32, i32) {
    %c0_i32 = arith.constant 0 : i32
    %c0_i32_0 = arith.constant 0 : i32
    %c0_i32_1 = arith.constant 0 : i32
    return %c0_i32, %c0_i32_0 : i32, i32
  }
  func.func @transform_3(%arg0: i32, %arg1: i32) -> (i32, i32) {
    %c0_i32 = arith.constant 0 : i32
    %c0_i32_0 = arith.constant 0 : i32
    %c0_i32_1 = arith.constant 0 : i32
    return %c0_i32, %c0_i32_0 : i32, i32
  }
  func.func @transform_4(%arg0: i32, %arg1: i32) -> (i32, i32, i32, i32) {
    %c0_i32 = arith.constant 0 : i32
    %c0_i32_0 = arith.constant 0 : i32
    %c0_i32_1 = arith.constant 0 : i32
    return %arg0, %c0_i32, %arg1, %c0_i32_0 : i32, i32, i32, i32
  }
}

</mosaic_0001>

<bundles_post_ra>
// kernel: tpu_custom_call.1
= control target key start
LH: loop header
LB: loop body
LE: loop exit
PB: predicated region body
PF: predicated region fallthrough
CT: control target
= control target key end

     0   :  { %9 = vsyncpa [#allocation4], 0  ;;  %s17352_s0 = inlined_call_operand.vmem [shape: f32[2,18,18,4], index: 0, kind: input, shape index: {}]   ;;  %s17353_s1 = inlined_call_operand.vmem [shape: f32[3,12,8], index: 1, kind: input, shape index: {}]   ;;  %s17354_s2 = inlined_call_operand.vmem [shape: f32[1,8], index: 2, kind: input, shape index: {}]   ;;  %s17355_s3 = inlined_call_operand.vmem [shape: f32[1,8], index: 3, kind: input, shape index: {}]   ;;  %s17356_s4 = inlined_call_operand.hbm [shape: f32[2,8,32,32], index: 4, kind: output, shape index: {}]  }
   0x1   :  { %11 = vsyncpa [#allocation4 + $0x1], 0  ;;  %s12850_s15 = smov 0   ;;  %s12852_s16 = smov 0  }
   0x2   :  { %s12854_s17 = smov 0   ;;  %s12856_s18 = smov 0  }
   0x3   :  { %s12858_s19 = smov 0   ;;  %s12860_s20 = smov 0  }
   0x4   :  { %s12862_s21 = smov 0   ;;  %s12864_s22 = smov 0  }
   0x5 LB: > { %s11915_s23 = sadd.s32 4294967295, %s12807_s22   ;;  %s11916_s24 = sadd.s32 4294967294, %s12807_s22   ;;  %s12807_s22 = sphi %s12864_s22, %s17_s22   ;;  %s12803_s21 = sphi %s12862_s21, %s17665_s21   ;;  %s12799_s20 = sphi %s12860_s20, %s17664_s20   ;;  %s12795_s19 = sphi %s12858_s19, %s17663_s19   ;;  %s12791_s18 = sphi %s12856_s18, %s17662_s18   ;;  %s12787_s17 = sphi %s12854_s17, %s17661_s17   ;;  %s12783_s16 = sphi %s12852_s16, %s17660_s16   ;;  %s12779_s15 = sphi %s12850_s15, %s17659_s15  }
   0x6   : > { %s26_s25 = sadd.s32 1, %s12799_s20  ;;  %s29_s26 = sadd.s32 1, %s12803_s21 }
   0x7   : > { %p27_p0 = scmp.ge.s32.totalorder %s26_s25, 2  ;;  %p137_p1 = scmp.ne.s32.totalorder %s12787_s17, %s12783_s16 }
   0x8   : > { %p138_p2 = scmp.eq.s32.totalorder %s11915_s23, 3  ;;  %p143_p5 = scmp.ne.s32.totalorder %s12783_s16, %s12779_s15 }
   0x9   : > { %s17667_s25 = smov (%p27_p0, %s26_s25), 0  ;;  %s17669_s26 = smov (!%p27_p0, %s29_s26), %s12803_s21 }
   0xa   : > { %s123_s27 = ssub.s32 %s12799_s20, %s17667_s25  ;;  %p12901_p3 = por %p138_p2, %p137_p1 }
   0xb   : > { %p31_p4 = scmp.ge.s32.totalorder %s17669_s26, 2  ;;  %p144_p6 = scmp.eq.s32.totalorder %s11916_s24, 3 }
   0xc   : > { %p11919_p7 = scmp.ge.s32.totalorder %s12807_s22, 1  ;;  %p179_p9 = scmp.lt.s32.totalorder %s12807_s22, 5 }
   0xd   : > { %s17671_s26 = smov (%p31_p4, %s17669_s26), 0  ;;  %p12910_p8 = por %p144_p6, %p143_p5 }
   0xe   : > { %s122_s30 = ssub.s32 %s12803_s21, %s17671_s26  ;;  %s127_s5 = sadd.s32 1, %s12787_s17 }
   0xf   : > { %s124_s6 = sor.u32 %s123_s27, %s122_s30  ;;  %p180_p10 = pnand %p11919_p7, %p179_p9 }
  0x10   : > { %p125_p11 = scmp.eq.s32.totalorder %s124_s6, 0 }
  0x11   : > { %183 = sbr.rel (%p180_p10) target bundleno = 1429 (0x595), region = 36 }
  0x12   : > { %s12919_s7 = scalar_select %p125_p11, %s12787_s17, %s127_s5  }
  0x16   : > { %p205_p12 = scmp.lt.s32.totalorder %s12795_s19, 1  ;;  %v1139_v0 = vlaneseq  ;;  %s11924_s8 = sshll.u32 %s12791_s18, 4  ;;  %vm6986_vm0 = vcmask 24576   ;;  %v12809_v1 = vmov 1966171168   ;;  %v12811_v5 = vmov 0.0  }
  0x17   : > { %v12926_v2 = vunpack.c.l.s4 %v12809_v1  ;;  %v12810_v3 = vmov 1983009808   ;;  %s11923_s10 = smul.u32 192, %s12791_s18  ;;  %s12931_s11 = sadd.s32 4294967295, %s11924_s8  ;;  %7014 = vst.msk [vmem:[#allocation2 + $0x189] sm:$0x1] %vm6986_vm0, %v12811_v5 }
  0x18   : > { %s12924_s9 = scalar_select %p205_p12, %s12795_s19, 1  ;;  %v12928_v4 = vunpack.c.l.s4 %v12810_v3  ;;  %6987 = vst.msk [vmem:[#allocation2] sm:$0x1] %vm6986_vm0, %v12811_v5  ;;  %6988 = vst.msk [vmem:[#allocation2 + $0x28] sm:$0x1] %vm6986_vm0, %v12811_v5  ;;  %v12971_v6 = vstv %s12931_s11  ;;  %v12973_v7 = vshrl.u32 %v1139_v0, 7 }
  0x19   : > { %6989 = vst.msk [vmem:[#allocation2 + $0x50] sm:$0x1] %vm6986_vm0, %v12811_v5  ;;  %6990 = vst.msk [vmem:[#allocation2 + $0x78] sm:$0x1] %vm6986_vm0, %v12811_v5  ;;  %v369_v8 = vadd.s32 9, %v12971_v6  ;;  %v361_v9 = vadd.s32 1, %v12971_v6  ;;  %v1138_v10 = vunpack.c.0.s8 %v12926_v2 }
  0x1a   : > { %6991 = vst.msk [vmem:[#allocation2 + $0xa0] sm:$0x1] %vm6986_vm0, %v12811_v5  ;;  %6992 = vst.msk [vmem:[#allocation2 + $0xc8] sm:$0x1] %vm6986_vm0, %v12811_v5  ;;  %s12635_s12 = smul.u32 432, %s12924_s9  ;;  %v12982_v11 = vsub.s32 0, %v12973_v7  ;;  %v7315_v12 = vunpack.c.0.s8 %v12928_v4 }
  0x1b   : > { %6993 = vst.msk [vmem:[#allocation2 + $0xf0] sm:$0x1] %vm6986_vm0, %v12811_v5  ;;  %6994 = vst.msk [vmem:[#allocation2 + $0x118] sm:$0x1] %vm6986_vm0, %v12811_v5  ;;  %vm387_vm1 = vcmp.ge.s32.totalorder %v369_v8, 0  ;;  %vm405_vm2 = vcmp.lt.s32.totalorder %v369_v8, 32  ;;  %v13025_v31 = vsub.s32 %v1138_v10, %v12973_v7 }
  0x1c   : > { %6995 = vst.msk [vmem:[#allocation2 + $0x140] sm:$0x1] %vm6986_vm0, %v12811_v5  ;;  %6996 = vst.msk [vmem:[#allocation2 + $0x168] sm:$0x1] %vm6986_vm0, %v12811_v5  ;;  %s209_s23 = scalar_lea.vmem %s17352_s0, %s12635_s12  ;;  %v12990_v13 = vadd.s32 10, %v12971_v6  ;;  %v12993_v14 = vadd.s32 2, %v12971_v6  ;;  %v13028_v32 = vsub.s32 %v7315_v12, %v12973_v7 }
  0x1d   : > { %6997 = vst.msk [vmem:[#allocation2 + $0x190] sm:$0x1] %vm6986_vm0, %v12811_v5  ;;  %6998 = vst.msk [vmem:[#allocation2 + $0x1b8] sm:$0x1] %vm6986_vm0, %v12811_v5  ;;  %s12987_s24 = scalar_lea.vmem %s209_s23, %s11923_s10  ;;  %vm379_vm3 = vcmp.ge.s32.totalorder %v361_v9, 0  ;;  %vm397_vm4 = vcmp.lt.s32.totalorder %v361_v9, 32 }
  0x1e   : > { %6999 = vst.msk [vmem:[#allocation2 + $0x1e0] sm:$0x1] %vm6986_vm0, %v12811_v5  ;;  %7000 = vst.msk [vmem:[#allocation2 + $0x208] sm:$0x1] %vm6986_vm0, %v12811_v5  ;;  %v226_v15 = vld [vmem:[%s12987_s24 + $0x60] sm:$0xff]  ;;  %v227_v16 = vld [vmem:[%s12987_s24 + $0x68] sm:$0xff] }
  0x1f   : > { %7001 = vst.msk [vmem:[#allocation2 + $0x230] sm:$0x1] %vm6986_vm0, %v12811_v5  ;;  %7002 = vst.msk [vmem:[#allocation2 + $0x258] sm:$0x1] %vm6986_vm0, %v12811_v5  ;;  %v228_v17 = vld [vmem:[%s12987_s24 + $0x70] sm:$0x3] }
  0x20   : > { %7003 = vst.msk [vmem:[#allocation2 + $0x280] sm:$0x1] %vm6986_vm0, %v12811_v5  ;;  %7004 = vst.msk [vmem:[#allocation2 + $0x2a8] sm:$0x1] %vm6986_vm0, %v12811_v5  ;;  %v229_v18 = vld [vmem:[%s12987_s24 + $0x78] sm:$0xff]  ;;  %v230_v19 = vld [vmem:[%s12987_s24 + $0x80] sm:$0xff] }
  0x21   : > { %7005 = vst.msk [vmem:[#allocation2 + $0x21] sm:$0x1] %vm6986_vm0, %v12811_v5  ;;  %7006 = vst.msk [vmem:[#allocation2 + $0x49] sm:$0x1] %vm6986_vm0, %v12811_v5  ;;  %v231_v20 = vld [vmem:[%s12987_s24 + $0x88] sm:$0x3] }
  0x22   : > { %7007 = vst.msk [vmem:[#allocation2 + $0x71] sm:$0x1] %vm6986_vm0, %v12811_v5  ;;  %7008 = vst.msk [vmem:[#allocation2 + $0x99] sm:$0x1] %vm6986_vm0, %v12811_v5  ;;  %v13001_v21 = vmul.f32 0.75, %v227_v16  ;;  %v13003_v22 = vmul.f32 0.75, %v228_v17 }
  0x23   : > { %7009 = vst.msk [vmem:[#allocation2 + $0xc1] sm:$0x1] %vm6986_vm0, %v12811_v5  ;;  %7010 = vst.msk [vmem:[#allocation2 + $0xe9] sm:$0x1] %vm6986_vm0, %v12811_v5  ;;  %vm666_vm5 = vcmask 1046528   ;;  %v13005_v23 = vmul.f32 0.75, %v229_v18 }
  0x24   : > { %7011 = vst.msk [vmem:[#allocation2 + $0x111] sm:$0x1] %vm6986_vm0, %v12811_v5  ;;  %7012 = vst.msk [vmem:[#allocation2 + $0x139] sm:$0x1] %vm6986_vm0, %v12811_v5  ;;  %v13007_v24 = vmul.f32 0.75, %v230_v19  ;;  %v13009_v25 = vmul.f32 0.75, %v231_v20 }
  0x25   : > { %7013 = vst.msk [vmem:[#allocation2 + $0x161] sm:$0x1] %vm6986_vm0, %v12811_v5  ;;  %7015 = vst.msk [vmem:[#allocation2 + $0x1b1] sm:$0x1] %vm6986_vm0, %v12811_v5  ;;  %v13011_v26 = vmul.f32 0.25, %v226_v15  ;;  %v214_v28 = vld [vmem:[%s12987_s24] sm:$0xff] }
  0x26   : > { %7016 = vst.msk [vmem:[#allocation2 + $0x1d9] sm:$0x1] %vm6986_vm0, %v12811_v5  ;;  %7017 = vst.msk [vmem:[#allocation2 + $0x201] sm:$0x1] %vm6986_vm0, %v12811_v5  ;;  %v13020_v29 = vmul.f32 0.25, %v227_v16  ;;  %v13022_v30 = vmul.f32 0.25, %v228_v17 }
  0x27   : > { %7018 = vst.msk [vmem:[#allocation2 + $0x229] sm:$0x1] %vm6986_vm0, %v12811_v5  ;;  %7019 = vst.msk [vmem:[#allocation2 + $0x251] sm:$0x1] %vm6986_vm0, %v12811_v5  ;;  %v215_v33 = vld [vmem:[%s12987_s24 + $0x8] sm:$0xff]  ;;  %v217_v35 = vld [vmem:[%s12987_s24 + $0x18] sm:$0xff]  ;;  %v343_v36 = vadd.f32 %v13011_v26, %v13005_v23 }
  0x28   : > { %7020 = vst.msk [vmem:[#allocation2 + $0x279] sm:$0x1] %vm6986_vm0, %v12811_v5  ;;  %7021 = vst.msk [vmem:[#allocation2 + $0x2a1] sm:$0x1] %vm6986_vm0, %v12811_v5  ;;  %v216_v34 = vld [vmem:[%s12987_s24 + $0x10] sm:$0x3]  ;;  %v344_v42 = vadd.f32 %v13020_v29, %v13007_v24  ;;  %v345_v43 = vadd.f32 %v13022_v30, %v13009_v25 }
  0x29   : > { %7022 = vst.msk [vmem:[#allocation2 + $0x2c9] sm:$0x1] %vm6986_vm0, %v12811_v5  ;;  %17458 = vst [vmem:[#allocation8_spill] sm:$0xff] %v12973_v7  ;;  %v13035_v37 = vmul.f32 0.75, %v226_v15  ;;  %v218_v38 = vld [vmem:[%s12987_s24 + $0x20] sm:$0xff]  ;;  %v13039_v40 = vmul.f32 0.75, %v215_v33 }
  0x2a   : > { %17459 = vst [vmem:[#allocation9_spill] sm:$0xff] %v13001_v21  ;;  %17460 = vst [vmem:[#allocation10_spill] sm:$0xff] %v13003_v22  ;;  %v219_v39 = vld [vmem:[%s12987_s24 + $0x28] sm:$0x3]  ;;  %v13041_v41 = vmul.f32 0.75, %v217_v35  ;;  %v13047_v44 = vmul.f32 0.75, %v218_v38 }
  0x2b   : > { %17461 = vst [vmem:[#allocation11_spill] sm:$0xff] %v13011_v26  ;;  %vm13015_vm6 = vmand %vm387_vm1, %vm405_vm2  ;;  %v13049_v45 = vmul.f32 0.75, %v219_v39  ;;  %v325_v47 = vmul.f32 0.25, %v214_v28  ;;  %v326_v48 = vmul.f32 0.25, %v215_v33  ;;  %v327_v49 = vmul.f32 0.25, %v216_v34  ;;  %s12812_s27 = smov 4  }
  0x2c   : > { %17464 = vst [vmem:[#allocation12_spill] sm:$0xff] %v13020_v29  ;;  %17465 = vst [vmem:[#allocation13_spill] sm:$0xff] %v13022_v30  ;;  %v495_v46 = vsel %vm13015_vm6, %v343_v36, 0.0  ;;  %v496_v50 = vsel %vm13015_vm6, %v344_v42, 0.0  ;;  %v497_v51 = vsel %vm13015_vm6, %v345_v43, 0.0  ;;  %v13075_v1 = vmul.f32 0.75, %v216_v34 }
  0x2d   : > { %17466 = vst [vmem:[#allocation14_spill] sm:$0xff] %v13028_v32  ;;  %17467 = vst [vmem:[#allocation15_spill] sm:$0xff] %v13035_v37  ;;  %v540_v52 = vmul.f32 0.25, %v495_v46  ;;  %v585_v53 = vmul.f32 0.75, %v495_v46  ;;  %v13057_v54 = vmul.f32 0.25, %v496_v50  ;;  %v13059_v55 = vmul.f32 0.75, %v496_v50 }
  0x2e   : > { %17468 = vst [vmem:[#allocation16_spill] sm:$0xff] %v13039_v40  ;;  %v13061_v56 = vmul.f32 0.75, %v497_v51  ;;  %v13063_v57 = vmul.f32 0.25, %v497_v51  ;;  %vm13067_vm7 = vmand %vm379_vm3, %vm397_vm4  ;;  %v331_v61 = vadd.f32 %v325_v47, %v13041_v41  ;;  %v332_v62 = vadd.f32 %v326_v48, %v13047_v44  ;;  %s12813_s30 = smov 8   ;;  %s12814_s9 = smov 64  }
  0x2f   : > { %v712_v59 = vrot.slane %v585_v53, 1  ;;  %v946_v60 = vrot.slane %v540_v52, 1  ;;  %v713_v63 = vrot.slane %v13059_v55, 1  ;;  %v947_v0 = vrot.slane %v13057_v54, 1  ;;  %17471 = vst [vmem:[#allocation17_spill] sm:$0xff] %v13075_v1  ;;  %s12815_s10 = smov 96  }
  0x30   : > { %v333_v2 = vadd.f32 %v327_v49, %v13049_v45  ;;  %v471_v3 = vsel %vm13067_vm7, %v331_v61, 0.0  ;;  %v472_v4 = vsel %vm13067_vm7, %v332_v62, 0.0  ;;  %v17357_v5 = vrot.slane %v13063_v57, 1  ;;  %v13370_v1 = vld [vmem:[%s12987_s24 + $0x40] sm:$0x3]  ;;  %s12816_s11 = smov 32  }
  0x31   : > { %v715_v8 = vrot.slane %v13061_v56, 1  ;;  %v714_v9 = vsel %vm666_vm5, %v712_v59, %v713_v63  ;;  %v948_v10 = vsel %vm666_vm5, %v946_v60, %v947_v0  ;;  %vm6697_vm8 = vcmask 1040384   ;;  %s202_s5 = sand.u32 1, %s12783_s16  }
  0x32   : > { %v473_v12 = vsel %vm13067_vm7, %v333_v2, 0.0  ;;  %v524_v15 = vmul.f32 0.25, %v471_v3  ;;  %v811_v16 = vadd.f32 %v714_v9, %v540_v52  ;;  %v1072_v17 = vadd.f32 %v948_v10, %v585_v53  ;;  %s11920_s6 = sshll.u32 %s202_s5, 7 }
  0x33   : > { %v13090_v18 = vmul.f32 0.25, %v472_v4  ;;  %v561_v19 = vmul.f32 0.75, %v471_v3  ;;  %v13092_v20 = vmul.f32 0.75, %v472_v4  ;;  %v13094_v27 = vmul.f32 0.75, %v473_v12 }
  0x34   : > { %v13096_v28 = vmul.f32 0.25, %v473_v12  ;;  %v906_v33 = vrot.slane %v524_v15, 1  ;;  %v2024_v34 = vrot.slane %v811_v16, %v13025_v31  ;;  %v4249_v35 = vcombine.high %v1072_v17, %v1072_v17 }
  0x35   : > { %v4256_v36 = vrot.slane %v1072_v17, %v13025_v31  ;;  %v672_v38 = vrot.slane %v561_v19, 1  ;;  %v673_v39 = vrot.slane %v13092_v20, 1  ;;  %v907_v42 = vrot.slane %v13090_v18, 1 }
  0x36   : > { %v17358_v43 = vrot.slane %v13096_v28, 1  ;;  %v950_v46 = vsel %vm666_vm5, %v947_v0, %v17357_v5  ;;  %v2032_v47 = vcombine.high %v2024_v34, %v2024_v34  ;;  %v2040_v48 = vrot.slane %v2024_v34, %v13025_v31 }
  0x37   : > { %v4263_v49 = vrot.slane %v4249_v35, %v13025_v31  ;;  %v4264_v50 = vcombine.high %v4256_v36, %v4256_v36  ;;  %v4272_v51 = vrot.slane %v4256_v36, %v13025_v31  ;;  %v674_v52 = vsel %vm666_vm5, %v672_v38, %v673_v39 }
  0x38   : > { %v908_v53 = vsel %vm666_vm5, %v906_v33, %v907_v42  ;;  %v13116_v58 = vadd.f32 %v950_v46, %v13059_v55  ;;  %v2054_v59 = vrot.slane %v2032_v47, %v13025_v31  ;;  %v2062_v60 = vcombine.high %v2040_v48, %v2040_v48 }
  0x39   : > { %v13120_v61 = vrot.slane %v4263_v49, %v13025_v31  ;;  %v4286_v62 = vrot.slane %v4264_v50, %v13025_v31  ;;  %v4294_v0 = vcombine.high %v4272_v51, %v4272_v51  ;;  %v13123_v2 = vadd.f32 %v674_v52, %v524_v15 }
  0x3a   : > { %v1048_v3 = vadd.f32 %v908_v53, %v561_v19  ;;  %v2017_v4 = vcombine.high %v811_v16, %v811_v16  ;;  %v2064_v9 = vcombine.high %v2054_v59, %v2054_v59  ;;  %vm8607_vm9 = vcmask 31744  }
  0x3b   : > { %v4296_v10 = vcombine.high %v4286_v62, %v4286_v62  ;;  %v5836_v12 = vrot.slane %v4286_v62, %v12982_v11  ;;  %v5848_v17 = vrot.slane %v13120_v61, %v12982_v11  ;;  %v5840_v33 = vrot.slane %v4294_v0, %v12982_v11 }
  0x3c   : > { %v1240_v34 = vrot.slane %v13123_v2, %v13025_v31  ;;  %v3353_v35 = vcombine.high %v1048_v3, %v1048_v3  ;;  %v3360_v36 = vrot.slane %v1048_v3, %v13025_v31  ;;  %v2031_v38 = vrot.slane %v2017_v4, %v13025_v31 }
  0x3d   : > { %v5844_v15 = vrot.slane %v4296_v10, %v12982_v11  ;;  %v6842_v16 = vsel %vm6697_vm8, %v2040_v48, %v5836_v12  ;;  %v6845_v19 = vsel %vm6697_vm8, %v2064_v9, %v5848_v17  ;;  %v6843_v46 = vsel %vm6697_vm8, %v2054_v59, %v5840_v33 }
  0x3e   : > { %v1248_v47 = vcombine.high %v1240_v34, %v1240_v34  ;;  %v1256_v50 = vrot.slane %v1240_v34, %v13025_v31  ;;  %v13139_v51 = vrot.slane %v3353_v35, %v13025_v31  ;;  %v7923_v53 = vcombine.low %v6842_v16, %v6843_v46 }
  0x3f   : > { %v6844_v52 = vsel %vm6697_vm8, %v2062_v60, %v5844_v15  ;;  %v3368_v62 = vcombine.high %v3360_v36, %v3360_v36  ;;  %v3376_v0 = vrot.slane %v3360_v36, %v13025_v31  ;;  %v2033_v17 = vcombine.high %v2031_v38, %v2031_v38 }
  0x40   : > { %v7924_v3 = vcombine.low %v6844_v52, %v6845_v19  ;;  %v1270_v48 = vrot.slane %v1248_v47, %v13025_v31  ;;  %v1278_v9 = vcombine.high %v1256_v50, %v1256_v50  ;;  %v13146_v4 = vrot.slane %v13139_v51, %v13025_v31 }
  0x41   : > { %v7931_v59 = vrot.slane %v7923_v53, %v13028_v32  ;;  %v3390_v10 = vrot.slane %v3368_v62, %v13025_v31  ;;  %v3398_v12 = vcombine.high %v3376_v0, %v3376_v0  ;;  %v2047_v35 = vrot.slane %v2031_v38, %v13025_v31 }
  0x42   : > { %v7938_v60 = vrot.slane %v7924_v3, %v13028_v32  ;;  %v1280_v33 = vcombine.high %v1270_v48, %v1270_v48  ;;  %v5336_v34 = vrot.slane %v13146_v4, %v12982_v11  ;;  %v2061_v19 = vrot.slane %v2033_v17, %v13025_v31 }
  0x43   : > { %v3400_v36 = vcombine.high %v3390_v10, %v3390_v10  ;;  %v5324_v15 = vrot.slane %v3390_v10, %v12982_v11  ;;  %v5328_v16 = vrot.slane %v3398_v12, %v12982_v11  ;;  %v2063_v52 = vcombine.high %v2047_v35, %v2047_v35 }
  0x44   : > { %v7939_v46 = vcombine.low %v7931_v59, %v7938_v60  ;;  %v6717_v47 = vsel %vm6697_vm8, %v1280_v33, %v5336_v34  ;;  %v4265_v53 = vcombine.high %v4263_v49, %v4263_v49  ;;  %v2065_v5 = vcombine.high %v2061_v19, %v2061_v19 }
  0x45   : > { %v5332_v62 = vrot.slane %v3400_v36, %v12982_v11  ;;  %v6714_v0 = vsel %vm6697_vm8, %v1256_v50, %v5324_v15  ;;  %v6715_v3 = vsel %vm6697_vm8, %v1270_v48, %v5328_v16  ;;  %v4295_v12 = vcombine.high %v13120_v61, %v13120_v61 }
  0x46   : > { %8644 = vst.msk [vmem:[#allocation2 + $0x169] sm:$0xff] %vm8607_vm9, %v7939_v46  ;;  %v7379_v38 = vcombine.low %v6714_v0, %v6715_v3  ;;  %v4293_v10 = vrot.slane %v4265_v53, %v13025_v31  ;;  %v4305_v59 = vrot.slane %v13116_v58, %v13025_v31  ;;  %v716_v50 = vsel %vm666_vm5, %v713_v63, %v715_v8 }
  0x47   : > { %v6716_v49 = vsel %vm6697_vm8, %v1278_v9, %v5332_v62  ;;  %v4298_v48 = vcombine.high %v13116_v58, %v13116_v58  ;;  %v675_v17 = vrot.slane %v13094_v27, 1  ;;  %v5856_v9 = vrot.slane %v4295_v12, %v12982_v11 }
  0x48   : > { %v7380_v60 = vcombine.low %v6716_v49, %v6717_v47  ;;  %v7387_v33 = vrot.slane %v7379_v38, %v13028_v32  ;;  %v4297_v61 = vcombine.high %v4293_v10, %v4293_v10  ;;  %v4321_v34 = vrot.slane %v4305_v59, %v13025_v31 }
  0x49   : > { %v5852_v36 = vrot.slane %v4293_v10, %v12982_v11  ;;  %v13181_v15 = vadd.f32 %v716_v50, %v13057_v54  ;;  %v13184_v55 = vrot.slane %v4298_v48, %v13025_v31  ;;  %v4313_v16 = vcombine.high %v4305_v59, %v4305_v59 }
  0x4a   : > { %v7394_v63 = vrot.slane %v7380_v60, %v13028_v32  ;;  %v5860_v8 = vrot.slane %v4297_v61, %v12982_v11  ;;  %v5864_v58 = vrot.slane %v4321_v34, %v12982_v11  ;;  %v6847_v47 = vsel %vm6697_vm8, %v2061_v19, %v5856_v9 }
  0x4b   : > { %v6846_v46 = vsel %vm6697_vm8, %v2047_v35, %v5852_v36  ;;  %v2073_v53 = vrot.slane %v13181_v15, %v13025_v31  ;;  %v13195_v54 = vrot.slane %v13184_v55, %v13025_v31  ;;  %vm388_vm10 = vcmp.ge.s32.totalorder %v12990_v13, 0  ;;  %v13214_v36 = vld [vmem:[%s12987_s24 + $0x90] sm:$0xff] }
  0x4c   : > { %vm406_vm11 = vcmp.lt.s32.totalorder %v12990_v13, 32  ;;  %v7395_v62 = vcombine.low %v7387_v33, %v7394_v63  ;;  %v6848_v0 = vsel %vm6697_vm8, %v2063_v52, %v5860_v8  ;;  %v6849_v3 = vsel %vm6697_vm8, %v2065_v5, %v5864_v58 }
  0x4d   : > { %v7940_v38 = vcombine.low %v6846_v46, %v6847_v47  ;;  %v8788_v35 = vld [vmem:[#allocation2 + $0x169] sm:$0xff]  ;;  %v7941_v19 = vcombine.low %v6848_v0, %v6849_v3  ;;  %v2081_v10 = vcombine.high %v2073_v53, %v2073_v53  ;;  %v2089_v12 = vrot.slane %v2073_v53, %v13025_v31  ;;  %v13236_v0 = vld [vmem:[%s12987_s24 + $0xa0] sm:$0x3]  ;;  %vm13263_vm12 = vmand %vm388_vm10, %vm406_vm11 }
  0x4e   : > { %v4335_v59 = vrot.slane %v4313_v16, %v13025_v31  ;;  %9040 = vrot.lane.b32.xlu0 %v8788_v35, %s12812_s27  ;;  %8612 = vst.msk [vmem:[#allocation2 + $0x29] sm:$0xff] %vm8607_vm9, %v7395_v62  ;;  %v4343_v50 = vcombine.high %v4321_v34, %v4321_v34  ;;  %v5880_v5 = vrot.slane %v13195_v54, %v12982_v11  ;;  %v13233_v62 = vld [vmem:[%s12987_s24 + $0x98] sm:$0xff]  ;;  %vm380_vm13 = vcmp.ge.s32.totalorder %v12993_v14, 0 }
  0x4f   : > { %v7948_v49 = vrot.slane %v7940_v38, %v13028_v32  ;;  %v676_v52 = vsel %vm666_vm5, %v673_v39, %v675_v17  ;;  %v7955_v48 = vrot.slane %v7941_v19, %v13028_v32  ;;  %v2103_v60 = vrot.slane %v2081_v10, %v13025_v31 }
  0x50   : > { %v2111_v33 = vcombine.high %v2089_v12, %v2089_v12  ;;  %v4345_v61 = vcombine.high %v4335_v59, %v4335_v59  ;;  %v5868_v9 = vrot.slane %v4335_v59, %v12982_v11  ;;  %v5872_v34 = vrot.slane %v4343_v50, %v12982_v11 }
  0x51   : > { %v13219_v63 = vadd.f32 %v676_v52, %v13090_v18  ;;  %v910_v39 = vsel %vm666_vm5, %v907_v42, %v17358_v43  ;;  %v7956_v17 = vcombine.low %v7948_v49, %v7955_v48  ;;  %v2113_v8 = vcombine.high %v2103_v60, %v2103_v60 }
  0x52   : > { %v5876_v58 = vrot.slane %v4345_v61, %v12982_v11  ;;  %v1049_v16 = vadd.f32 %v910_v39, %v13092_v20  ;;  %v6850_v46 = vsel %vm6697_vm8, %v2089_v12, %v5868_v9  ;;  %v6851_v47 = vsel %vm6697_vm8, %v2103_v60, %v5872_v34 }
  0x53   : > { %v1289_v53 = vrot.slane %v13219_v63, %v13025_v31  ;;  %v13239_v18 = vmul.f32 0.25, %v13214_v36  ;;  %8645 = vst.msk [vmem:[#allocation2 + $0x171] sm:$0xff] %vm8607_vm9, %v7956_v17  ;;  %v6853_v20 = vsel %vm6697_vm8, %v2113_v8, %v5880_v5  ;;  %v7957_v3 = vcombine.low %v6850_v46, %v6851_v47 }
  0x54   : > { %v6852_v42 = vsel %vm6697_vm8, %v2111_v33, %v5876_v58  ;;  %v3402_v38 = vcombine.high %v1049_v16, %v1049_v16  ;;  %v3409_v12 = vrot.slane %v1049_v16, %v13025_v31  ;;  %v13251_v52 = vmul.f32 0.25, %v13233_v62 }
  0x55   : > { %v7958_v35 = vcombine.low %v6852_v42, %v6853_v20  ;;  %v1297_v19 = vcombine.high %v1289_v53, %v1289_v53  ;;  %v1305_v10 = vrot.slane %v1289_v53, %v13025_v31  ;;  %v8756_v59 = vld [vmem:[#allocation2 + $0x29] sm:$0xff]  ;;  %v7965_v49 = vrot.slane %v7957_v3, %v13028_v32 }
  0x56   : > { %v13248_v50 = vrot.slane %v3402_v38, %v13025_v31  ;;  %v13254_v48 = vmul.f32 0.25, %v13236_v0  ;;  %8976 = vrot.lane.b32.xlu1 %v8756_v59, %s12812_s27  ;;  %v3417_v61 = vcombine.high %v3409_v12, %v3409_v12  ;;  %v13268_v34 = vrot.slane %v3409_v12, %v13025_v31 }
  0x57   : > { %v7972_v5 = vrot.slane %v7958_v35, %v13028_v32  ;;  %v1319_v60 = vrot.slane %v1297_v19, %v13025_v31  ;;  %v1327_v33 = vcombine.high %v1305_v10, %v1305_v10  ;;  %v313_v17 = vadd.f32 %v13239_v18, %v13005_v23 }
  0x58   : > { %v13272_v39 = vrot.slane %v13248_v50, %v13025_v31  ;;  %v314_v8 = vadd.f32 %v13251_v52, %v13007_v24  ;;  %v3439_v13 = vrot.slane %v3417_v61, %v13025_v31  ;;  %v315_v46 = vadd.f32 %v13254_v48, %v13009_v25 }
  0x59   : > { %v7973_v58 = vcombine.low %v7965_v49, %v7972_v5  ;;  %v1329_v16 = vcombine.high %v1319_v60, %v1319_v60  ;;  %v3447_v47 = vcombine.high %v13268_v34, %v13268_v34  ;;  %v498_v42 = vsel %vm13263_vm12, %v313_v17, 0.0 }
  0x5a   : > { %v5368_v53 = vrot.slane %v13272_v39, %v12982_v11  ;;  %v499_v23 = vsel %vm13263_vm12, %v314_v8, 0.0  ;;  %v8789_v24 = vld [vmem:[#allocation2 + $0x171] sm:$0xff]  ;;  %v3449_v20 = vcombine.high %v3439_v13, %v3439_v13  ;;  %v5356_v3 = vrot.slane %v3439_v13, %v12982_v11 }
  0x5b   : > { %8646 = vst.msk [vmem:[#allocation2 + $0x179] sm:$0xff] %vm8607_vm9, %v7973_v58  ;;  %v13293_v25 = vsel %vm13263_vm12, %v315_v46, 0.0  ;;  %v542_v38 = vmul.f32 0.25, %v498_v42  ;;  %9042 = vrot.lane.b32.xlu0 %v8789_v24, %s12812_s27  ;;  %v5360_v35 = vrot.slane %v3447_v47, %v12982_v11  ;;  %v13298_v12 = vmul.f32 0.25, %v499_v23  ;;  %v13320_v24 = vld [vmem:[%s12987_s24 + $0x30] sm:$0xff] }
  0x5c   : > { %v6725_v19 = vsel %vm6697_vm8, %v1329_v16, %v5368_v53  ;;  %v588_v59 = vmul.f32 0.75, %v498_v42  ;;  %v5364_v49 = vrot.slane %v3449_v20, %v12982_v11  ;;  %v6722_v5 = vsel %vm6697_vm8, %v1305_v10, %v5356_v3 }
  0x5d   : > { %v13302_v61 = vmul.f32 0.75, %v499_v23  ;;  %v13305_v9 = vmul.f32 0.25, %v13293_v25  ;;  %v6723_v17 = vsel %vm6697_vm8, %v1319_v60, %v5360_v35  ;;  %v951_v58 = vrot.slane %v542_v38, 1 }
  0x5e   : > { %v717_v8 = vrot.slane %v588_v59, 1  ;;  %v17360_v13 = vrot.slane %v13298_v12, 1  ;;  %v6724_v16 = vsel %vm6697_vm8, %v1327_v33, %v5364_v49  ;;  %v7413_v46 = vcombine.low %v6722_v5, %v6723_v17 }
  0x5f   : > { %v17359_v47 = vrot.slane %v13302_v61, 1  ;;  %v7414_v42 = vcombine.low %v6724_v16, %v6725_v19  ;;  %v1233_v23 = vcombine.high %v13123_v2, %v13123_v2  ;;  %v3369_v60 = vcombine.high %v13139_v51, %v13139_v51 }
  0x60   : > { %v953_v10 = vsel %vm666_vm5, %v951_v58, %v17360_v13  ;;  %v7421_v33 = vrot.slane %v7413_v46, %v13028_v32  ;;  %v3399_v35 = vcombine.high %v13146_v4, %v13146_v4  ;;  %v13338_v58 = vmul.f32 0.25, %v13320_v24 }
  0x61   : > { %v719_v20 = vsel %vm666_vm5, %v717_v8, %v17359_v47  ;;  %v1075_v3 = vadd.f32 %v953_v10, %v588_v59  ;;  %v7428_v5 = vrot.slane %v7414_v42, %v13028_v32  ;;  %v1247_v51 = vrot.slane %v1233_v23, %v13025_v31 }
  0x62   : > { %v8790_v19 = vld [vmem:[#allocation2 + $0x179] sm:$0xff]  ;;  %v13329_v2 = vadd.f32 %v719_v20, %v542_v38  ;;  %v3397_v17 = vrot.slane %v3369_v60, %v13025_v31  ;;  %v5344_v4 = vrot.slane %v3399_v35, %v12982_v11  ;;  %17474 = vst [vmem:[#allocation18_spill] sm:$0xff] %v13338_v58  ;;  %vm398_vm14 = vcmp.lt.s32.totalorder %v12993_v14, 32 }
  0x63   : > { %v8861_v49 = vld [vmem:[#allocation2 + $0x172] sm:$0xff]  ;;  %9044 = vrot.lane.b32.xlu1 %v8790_v19, %s12812_s27  ;;  %v4361_v8 = vcombine.high %v1075_v3, %v1075_v3  ;;  %v4368_v59 = vrot.slane %v1075_v3, %v13025_v31  ;;  %v7429_v16 = vcombine.low %v7421_v33, %v7428_v5  ;;  %v1249_v46 = vcombine.high %v1247_v51, %v1247_v51  ;;  %vm416_vm15 = vmand %vm380_vm13, %vm398_vm14 }
  0x64   : > { %9330 = vrot.lane.b32.xlu0 %v8861_v49, %s12813_s30  ;;  %v2122_v38 = vrot.slane %v13329_v2, %v13025_v31  ;;  %v1263_v42 = vrot.slane %v1247_v51, %v13025_v31  ;;  %v3401_v20 = vcombine.high %v3397_v17, %v3397_v17  ;;  %v2066_v14 = vcombine.high %v13181_v15, %v13181_v15 }
  0x65   : > { %v13344_v10 = vrot.slane %v4361_v8, %v13025_v31  ;;  %v4376_v23 = vcombine.high %v4368_v59, %v4368_v59  ;;  %v4384_v60 = vrot.slane %v4368_v59, %v13025_v31  ;;  %8614 = vst.msk [vmem:[#allocation2 + $0x39] sm:$0xff] %vm8607_vm9, %v7429_v16  ;;  %v1277_v33 = vrot.slane %v1249_v46, %v13025_v31 }
  0x66   : > { %v2130_v3 = vcombine.high %v2122_v38, %v2122_v38  ;;  %v2138_v35 = vrot.slane %v2122_v38, %v13025_v31  ;;  %v1279_v19 = vcombine.high %v1263_v42, %v1263_v42  ;;  %v5340_v8 = vrot.slane %v3397_v17, %v12982_v11 }
  0x67   : > { %v13352_v49 = vrot.slane %v13344_v10, %v13025_v31  ;;  %v4398_v5 = vrot.slane %v4376_v23, %v13025_v31  ;;  %v4406_v51 = vcombine.high %v4384_v60, %v4384_v60  ;;  %v1281_v43 = vcombine.high %v1277_v33, %v1277_v33 }
  0x68   : > { %v2152_v59 = vrot.slane %v2130_v3, %v13025_v31  ;;  %v2160_v16 = vcombine.high %v2138_v35, %v2138_v35  ;;  %v5348_v38 = vrot.slane %v3401_v20, %v12982_v11  ;;  %v5352_v23 = vrot.slane %v13268_v34, %v12982_v11  ;;  %v13367_v3 = vld [vmem:[%s12987_s24 + $0x38] sm:$0xff] }
  0x69   : > { %v4408_v47 = vcombine.high %v4398_v5, %v4398_v5  ;;  %v5900_v46 = vrot.slane %v4398_v5, %v12982_v11  ;;  %v5904_v13 = vrot.slane %v4406_v51, %v12982_v11  ;;  %v5912_v53 = vrot.slane %v13352_v49, %v12982_v11 }
  0x6a   : > { %v2162_v7 = vcombine.high %v2152_v59, %v2152_v59  ;;  %v6718_v17 = vsel %vm6697_vm8, %v1263_v42, %v5340_v8  ;;  %v6719_v60 = vsel %vm6697_vm8, %v1277_v33, %v5344_v4  ;;  %v6720_v40 = vsel %vm6697_vm8, %v1279_v19, %v5348_v38 }
  0x6b   : > { %v5908_v20 = vrot.slane %v4408_v47, %v12982_v11  ;;  %v6858_v5 = vsel %vm6697_vm8, %v2138_v35, %v5900_v46  ;;  %v6859_v51 = vsel %vm6697_vm8, %v2152_v59, %v5904_v13  ;;  %v6721_v34 = vsel %vm6697_vm8, %v1281_v43, %v5352_v23 }
  0x6c   : > { %v6861_v22 = vsel %vm6697_vm8, %v2162_v7, %v5912_v53  ;;  %v7991_v21 = vcombine.low %v6858_v5, %v6859_v51  ;;  %v7396_v42 = vcombine.low %v6718_v17, %v6719_v60  ;;  %v8758_v8 = vld [vmem:[#allocation2 + $0x39] sm:$0xff]  ;;  %v7397_v33 = vcombine.low %v6720_v40, %v6721_v34 }
  0x6d   : > { %v6860_v4 = vsel %vm6697_vm8, %v2160_v16, %v5908_v20  ;;  %v13380_v37 = vmul.f32 0.25, %v13367_v3  ;;  %v13383_v47 = vmul.f32 0.25, %v13370_v1  ;;  %8980 = vrot.lane.b32.xlu1 %v8758_v8, %s12812_s27  ;;  %v301_v43 = vadd.f32 %v13338_v58, %v13041_v41 }
  0x6e   : > { %v7992_v13 = vcombine.low %v6860_v4, %v6861_v22  ;;  %v7999_v35 = vrot.slane %v7991_v21, %v13028_v32  ;;  %v7404_v7 = vrot.slane %v7396_v42, %v13028_v32  ;;  %v7411_v53 = vrot.slane %v7397_v33, %v13028_v32 }
  0x6f   : > { %17475 = vst [vmem:[#allocation19_spill] sm:$0xff] %v13380_v37  ;;  %17476 = vst [vmem:[#allocation20_spill] sm:$0xff] %v13383_v47  ;;  %v302_v40 = vadd.f32 %v13380_v37, %v13047_v44  ;;  %v303_v19 = vadd.f32 %v13383_v47, %v13049_v45  ;;  %v13399_v21 = vmul.f32 0.75, %v13293_v25  ;;  %v17477_v22 = vrot.slane %v13305_v9, 1 }
  0x70   : > { %v8006_v59 = vrot.slane %v7992_v13, %v13028_v32  ;;  %v17478_v41 = vrot.slane %v13298_v12, 1  ;;  %v7412_v38 = vcombine.low %v7404_v7, %v7411_v53  ;;  %v17479_v45 = vrot.slane %v13063_v57, 1 }
  0x71   : > { %v474_v23 = vsel %vm416_vm15, %v301_v43, 0.0  ;;  %v475_v17 = vsel %vm416_vm15, %v302_v40, 0.0  ;;  %v13414_v60 = vsel %vm416_vm15, %v303_v19, 0.0  ;;  %v2080_v42 = vrot.slane %v2066_v14, %v13025_v31 }
  0x72   : > { %v955_v16 = vsel %vm666_vm5, %v17478_v41, %v17477_v22  ;;  %v13410_v46 = vadd.f32 %v17479_v45, %v13061_v56  ;;  %v8007_v25 = vcombine.low %v7999_v35, %v8006_v59  ;;  %8613 = vst.msk [vmem:[#allocation2 + $0x31] sm:$0xff] %vm8607_vm9, %v7412_v38  ;;  %v526_v20 = vmul.f32 0.25, %v474_v23 }
  0x73   : > { %v1076_v44 = vadd.f32 %v955_v16, %v13302_v61  ;;  %v13417_v5 = vmul.f32 0.25, %v475_v17  ;;  %v564_v51 = vmul.f32 0.75, %v474_v23  ;;  %v13419_v34 = vmul.f32 0.75, %v475_v17 }
  0x74   : > { %8648 = vst.msk [vmem:[#allocation2 + $0x191] sm:$0xff] %vm8607_vm9, %v8007_v25  ;;  %v720_v56 = vrot.slane %v13399_v21, 1  ;;  %v911_v33 = vrot.slane %v526_v20, 1  ;;  %v17480_v35 = vrot.slane %v13302_v61, 1  ;;  %v2082_v61 = vcombine.high %v2080_v42, %v2080_v42 }
  0x75   : > { %v4410_v57 = vcombine.high %v1076_v44, %v1076_v44  ;;  %v4417_v15 = vrot.slane %v1076_v44, %v13025_v31  ;;  %v677_v8 = vrot.slane %v564_v51, 1  ;;  %v17365_v4 = vrot.slane %v13419_v34, 1 }
  0x76   : > { %v17366_v13 = vrot.slane %v13417_v5, 1  ;;  %v721_v7 = vsel %vm666_vm5, %v17480_v35, %v720_v56  ;;  %v13457_v25 = vrot.slane %v2080_v42, %v13025_v31  ;;  %vm9544_vm15 = vcmask 64512  }
  0x77   : > { %v13431_v43 = vrot.slane %v4410_v57, %v13025_v31  ;;  %v4425_v53 = vcombine.high %v4417_v15, %v4417_v15  ;;  %v13434_v40 = vrot.slane %v4417_v15, %v13025_v31  ;;  %v679_v19 = vsel %vm666_vm5, %v677_v8, %v17365_v4 }
  0x78   : > { %v913_v59 = vsel %vm666_vm5, %v911_v33, %v17366_v13  ;;  %v13443_v22 = vadd.f32 %v721_v7, %v13298_v12  ;;  %v13445_v41 = vadd.f32 %v679_v19, %v526_v20  ;;  %v13460_v12 = vrot.slane %v2082_v61, %v13025_v31 }
  0x79   : > { %v1051_v16 = vadd.f32 %v913_v59, %v564_v51  ;;  %v13449_v38 = vrot.slane %v13431_v43, %v13025_v31  ;;  %v4447_v44 = vrot.slane %v4425_v53, %v13025_v31  ;;  %v4455_v14 = vcombine.high %v13434_v40, %v13434_v40  ;;  %v8828_v23 = vld [vmem:[#allocation2 + $0x2a] sm:$0xff]  ;;  %v8829_v59 = vld [vmem:[#allocation2 + $0x32] sm:$0xff] }
  0x7a   : > { %v2171_v45 = vrot.slane %v13443_v22, %v13025_v31  ;;  %v1338_v17 = vrot.slane %v13445_v41, %v13025_v31  ;;  %9264 = vrot.lane.b32.xlu0 %v8828_v23, %s12813_s30  ;;  %v2112_v58 = vcombine.high %v13457_v25, %v13457_v25 }
  0x7b   : > { %v3465_v20 = vcombine.high %v1051_v16, %v1051_v16  ;;  %v3472_v51 = vrot.slane %v1051_v16, %v13025_v31  ;;  %v4457_v56 = vcombine.high %v4447_v44, %v4447_v44  ;;  %v8792_v57 = vld [vmem:[#allocation2 + $0x191] sm:$0xff]  ;;  %v5932_v42 = vrot.slane %v4447_v44, %v12982_v11 }
  0x7c   : > { %v2179_v15 = vcombine.high %v2171_v45, %v2171_v45  ;;  %v2187_v8 = vrot.slane %v2171_v45, %v13025_v31  ;;  %v5936_v33 = vrot.slane %v4455_v14, %v12982_v11  ;;  %9048 = vrot.lane.b32.xlu1 %v8792_v57, %s12812_s27  ;;  %v1346_v35 = vcombine.high %v1338_v17, %v1338_v17 }
  0x7d   : > { %v1354_v7 = vrot.slane %v1338_v17, %v13025_v31  ;;  %v13472_v53 = vrot.slane %v3465_v20, %v13025_v31  ;;  %v3480_v19 = vcombine.high %v3472_v51, %v3472_v51  ;;  %v3488_v61 = vrot.slane %v3472_v51, %v13025_v31 }
  0x7e   : > { %v2201_v16 = vrot.slane %v2179_v15, %v13025_v31  ;;  %v2209_v23 = vcombine.high %v2187_v8, %v2187_v8  ;;  %v5940_v45 = vrot.slane %v4457_v56, %v12982_v11  ;;  %v1368_v44 = vrot.slane %v1346_v35, %v13025_v31  ;;  %9266 = vrot.lane.b32.xlu0 %v8829_v59, %s12813_s30 }
  0x7f   : > { %v1376_v14 = vcombine.high %v1354_v7, %v1354_v7  ;;  %v13480_v57 = vrot.slane %v13472_v53, %v13025_v31  ;;  %v3502_v17 = vrot.slane %v3480_v19, %v13025_v31  ;;  %v3510_v20 = vcombine.high %v3488_v61, %v3488_v61 }
  0x80   : > { %v2211_v4 = vcombine.high %v2201_v16, %v2201_v16  ;;  %v5944_v51 = vrot.slane %v13449_v38, %v12982_v11  ;;  %v6866_v15 = vsel %vm6697_vm8, %v2187_v8, %v5932_v42  ;;  %v1378_v13 = vcombine.high %v1368_v44, %v1368_v44 }
  0x81   : > { %v3512_v56 = vcombine.high %v3502_v17, %v3502_v17  ;;  %v5388_v35 = vrot.slane %v3502_v17, %v12982_v11  ;;  %v5400_v30 = vrot.slane %v13480_v57, %v12982_v11  ;;  %v5392_v29 = vrot.slane %v3510_v20, %v12982_v11 }
  0x82   : > { %v6867_v19 = vsel %vm6697_vm8, %v2201_v16, %v5936_v33  ;;  %v6868_v61 = vsel %vm6697_vm8, %v2209_v23, %v5940_v45  ;;  %v6869_v59 = vsel %vm6697_vm8, %v2211_v4, %v5944_v51  ;;  %v2114_v33 = vcombine.high %v13460_v12, %v13460_v12 }
  0x83   : > { %v5396_v26 = vrot.slane %v3512_v56, %v12982_v11  ;;  %v6730_v47 = vsel %vm6697_vm8, %v1354_v7, %v5388_v35  ;;  %v6733_v8 = vsel %vm6697_vm8, %v1378_v13, %v5400_v30  ;;  %v8025_v42 = vcombine.low %v6866_v15, %v6867_v19 }
  0x84   : > { %v6731_v17 = vsel %vm6697_vm8, %v1368_v44, %v5392_v29  ;;  %v8026_v37 = vcombine.low %v6868_v61, %v6869_v59  ;;  %v4314_v7 = vcombine.high %v13184_v55, %v13184_v55  ;;  %v4344_v29 = vcombine.high %v13195_v54, %v13195_v54 }
  0x85   : > { %v6732_v16 = vsel %vm6697_vm8, %v1376_v14, %v5396_v26  ;;  %v7447_v23 = vcombine.low %v6730_v47, %v6731_v17  ;;  %v8033_v4 = vrot.slane %v8025_v42, %v13028_v32  ;;  %v4353_v13 = vrot.slane %v13410_v46, %v13025_v31 }
  0x86   : > { %v7448_v45 = vcombine.low %v6732_v16, %v6733_v8  ;;  %v8040_v30 = vrot.slane %v8026_v37, %v13028_v32  ;;  %v4342_v20 = vrot.slane %v4314_v7, %v13025_v31  ;;  %v17481_v26 = vrot.slane %v13096_v28, 1 }
  0x87   : > { %v7455_v44 = vrot.slane %v7447_v23, %v13028_v32  ;;  %v1282_v55 = vcombine.high %v13219_v63, %v13219_v63  ;;  %v4360_v51 = vrot.slane %v4353_v13, %v13025_v31  ;;  %v5888_v54 = vrot.slane %v4344_v29, %v12982_v11 }
  0x88   : > { %v1050_v47 = vadd.f32 %v17481_v26, %v13094_v27  ;;  %v7462_v14 = vrot.slane %v7448_v45, %v13028_v32  ;;  %v8041_v37 = vcombine.low %v8033_v4, %v8040_v30  ;;  %v4346_v15 = vcombine.high %v4342_v20, %v4342_v20 }
  0x89   : > { %v5884_v46 = vrot.slane %v4342_v20, %v12982_v11  ;;  %v1296_v56 = vrot.slane %v1282_v55, %v13025_v31  ;;  %v3418_v35 = vcombine.high %v13248_v50, %v13248_v50  ;;  %v5896_v27 = vrot.slane %v4360_v51, %v12982_v11 }
  0x8a   : > { %v7463_v28 = vcombine.low %v7455_v44, %v7462_v14  ;;  %8650 = vst.msk [vmem:[#allocation2 + $0x1a1] sm:$0xff] %vm8607_vm9, %v8041_v37  ;;  %v6855_v63 = vsel %vm6697_vm8, %v13460_v12, %v5888_v54  ;;  %v3448_v19 = vcombine.high %v13272_v39, %v13272_v39  ;;  %v5892_v61 = vrot.slane %v4346_v15, %v12982_v11 }
  0x8b   : > { %v6854_v59 = vsel %vm6697_vm8, %v13457_v25, %v5884_v46  ;;  %v1298_v8 = vcombine.high %v1296_v56, %v1296_v56  ;;  %v1312_v42 = vrot.slane %v1296_v56, %v13025_v31  ;;  %v6857_v50 = vsel %vm6697_vm8, %v2114_v33, %v5896_v27 }
  0x8c   : > { %8616 = vst.msk [vmem:[#allocation2 + $0x51] sm:$0xff] %vm8607_vm9, %v7463_v28  ;;  %v7974_v17 = vcombine.low %v6854_v59, %v6855_v63  ;;  %v3446_v16 = vrot.slane %v3418_v35, %v13025_v31  ;;  %v3457_v12 = vrot.slane %v1050_v47, %v13025_v31  ;;  %v6856_v23 = vsel %vm6697_vm8, %v2112_v58, %v5892_v61 }
  0x8d   : > { %v1326_v39 = vrot.slane %v1298_v8, %v13025_v31  ;;  %v1328_v4 = vcombine.high %v1312_v42, %v1312_v42  ;;  %v5376_v7 = vrot.slane %v3448_v19, %v12982_v11  ;;  %v7975_v25 = vcombine.low %v6856_v23, %v6857_v50 }
  0x8e   : > { %v7982_v45 = vrot.slane %v7974_v17, %v13028_v32  ;;  %v3450_v30 = vcombine.high %v3446_v16, %v3446_v16  ;;  %v3464_v29 = vrot.slane %v3457_v12, %v13025_v31  ;;  %v5372_v33 = vrot.slane %v3446_v16, %v12982_v11 }
  0x8f   : > { %v1330_v13 = vcombine.high %v1326_v39, %v1326_v39  ;;  %v6727_v44 = vsel %vm6697_vm8, %v1326_v39, %v5376_v7  ;;  %v2115_v20 = vcombine.high %v13329_v2, %v13329_v2  ;;  %v7989_v58 = vrot.slane %v7975_v25, %v13028_v32 }
  0x90   : > { %v5380_v26 = vrot.slane %v3450_v30, %v12982_v11  ;;  %v5384_v47 = vrot.slane %v3464_v29, %v12982_v11  ;;  %v4377_v55 = vcombine.high %v13344_v10, %v13344_v10  ;;  %v6726_v14 = vsel %vm6697_vm8, %v1312_v42, %v5372_v33 }
  0x91   : > { %v2129_v37 = vrot.slane %v2115_v20, %v13025_v31  ;;  %v4407_v51 = vcombine.high %v13352_v49, %v13352_v49  ;;  %v5928_v54 = vrot.slane %v13434_v40, %v12982_v11  ;;  %v7990_v2 = vcombine.low %v7982_v45, %v7989_v58  ;;  %v8794_v59 = vld [vmem:[#allocation2 + $0x1a1] sm:$0xff] }
  0x92   : > { %v6728_v15 = vsel %vm6697_vm8, %v1328_v4, %v5380_v26  ;;  %v6729_v46 = vsel %vm6697_vm8, %v1330_v13, %v5384_v47  ;;  %v7430_v56 = vcombine.low %v6726_v14, %v6727_v44  ;;  %v4405_v63 = vrot.slane %v4377_v55, %v13025_v31 }
  0x93   : > { %v8760_v35 = vld [vmem:[#allocation2 + $0x51] sm:$0xff]  ;;  %v7431_v28 = vcombine.low %v6728_v15, %v6729_v46  ;;  %v2131_v27 = vcombine.high %v2129_v37, %v2129_v37  ;;  %v2145_v10 = vrot.slane %v2129_v37, %v13025_v31  ;;  %8647 = vst.msk [vmem:[#allocation2 + $0x181] sm:$0xff] %vm8607_vm9, %v7990_v2  ;;  %v5920_v40 = vrot.slane %v4407_v51, %v12982_v11 }
  0x94   : > { %8984 = vrot.lane.b32.xlu1 %v8760_v35, %s12812_s27  ;;  %v7438_v49 = vrot.slane %v7430_v56, %v13028_v32  ;;  %v13568_v19 = vmul.f32 0.25, %v13414_v60  ;;  %v1331_v61 = vcombine.high %v13445_v41, %v13445_v41  ;;  %v4409_v17 = vcombine.high %v4405_v63, %v4405_v63 }
  0x95   : > { %v7445_v8 = vrot.slane %v7431_v28, %v13028_v32  ;;  %v2159_v42 = vrot.slane %v2131_v27, %v13025_v31  ;;  %v2161_v50 = vcombine.high %v2145_v10, %v2145_v10  ;;  %v5916_v16 = vrot.slane %v4405_v63, %v12982_v11  ;;  %v8757_v63 = vld [vmem:[#allocation2 + $0x31] sm:$0xff] }
  0x96   : > { %v914_v12 = vrot.slane %v13568_v19, 1  ;;  %v1345_v23 = vrot.slane %v1331_v61, %v13025_v31  ;;  %v3481_v39 = vcombine.high %v13472_v53, %v13472_v53  ;;  %v5924_v41 = vrot.slane %v4409_v17, %v12982_v11  ;;  %v8860_v53 = vld [vmem:[#allocation2 + $0x16a] sm:$0xff] }
  0x97   : > { %v7446_v4 = vcombine.low %v7438_v49, %v7445_v8  ;;  %v2163_v7 = vcombine.high %v2159_v42, %v2159_v42  ;;  %v6863_v25 = vsel %vm6697_vm8, %v2159_v42, %v5920_v40  ;;  %v6862_v45 = vsel %vm6697_vm8, %v2145_v10, %v5916_v16 }
  0x98   : > { %9052 = vrot.lane.b32.xlu1 %v8794_v59, %s12812_s27  ;;  %v17482_v30 = vrot.slane %v13417_v5, 1  ;;  %v1347_v13 = vcombine.high %v1345_v23, %v1345_v23  ;;  %v1361_v33 = vrot.slane %v1345_v23, %v13025_v31  ;;  %v6864_v44 = vsel %vm6697_vm8, %v2161_v50, %v5924_v41 }
  0x99   : > { %8615 = vst.msk [vmem:[#allocation2 + $0x41] sm:$0xff] %vm8607_vm9, %v7446_v4  ;;  %v6865_v20 = vsel %vm6697_vm8, %v2163_v7, %v5928_v54  ;;  %v8008_v58 = vcombine.low %v6862_v45, %v6863_v25  ;;  %v3509_v37 = vrot.slane %v3481_v39, %v13025_v31  ;;  %v3511_v15 = vcombine.high %v13480_v57, %v13480_v57 }
  0x9a   : > { %v915_v29 = vsel %vm666_vm5, %v17482_v30, %v914_v12  ;;  %v8009_v47 = vcombine.low %v6864_v44, %v6865_v20  ;;  %v1375_v55 = vrot.slane %v1347_v13, %v13025_v31  ;;  %v1377_v14 = vcombine.high %v1361_v33, %v1361_v33  ;;  %v8862_v51 = vld [vmem:[#allocation2 + $0x17a] sm:$0xff]  ;;  %v8863_v10 = vld [vmem:[#allocation2 + $0x182] sm:$0xff] }
  0x9b   : > { %v1052_v26 = vadd.f32 %v915_v29, %v13419_v34  ;;  %v8016_v2 = vrot.slane %v8008_v58, %v13028_v32  ;;  %v13600_v56 = vmul.f32 0.75, %v13414_v60  ;;  %9332 = vrot.lane.b32.xlu0 %v8862_v51, %s12813_s30  ;;  %v3513_v28 = vcombine.high %v3509_v37, %v3509_v37  ;;  %v8791_v45 = vld [vmem:[#allocation2 + $0x181] sm:$0xff] }
  0x9c   : > { %9328 = vrot.lane.b32.xlu1 %v8860_v53, %s12813_s30  ;;  %v8023_v54 = vrot.slane %v8009_v47, %v13028_v32  ;;  %v1379_v35 = vcombine.high %v1375_v55, %v1375_v55  ;;  %v13606_v27 = vmul.f32 0.75, %v13214_v36  ;;  %v5404_v49 = vrot.slane %v3509_v37, %v12982_v11 }
  0x9d   : > { %v3521_v46 = vrot.slane %v1052_v26, %v13025_v31  ;;  %v5408_v60 = vrot.slane %v3511_v15, %v12982_v11  ;;  %v680_v40 = vrot.slane %v13600_v56, 1  ;;  %v5412_v59 = vrot.slane %v3513_v28, %v12982_v11 }
  0x9e   : > { %v8024_v61 = vcombine.low %v8016_v2, %v8023_v54  ;;  %v3514_v8 = vcombine.high %v1052_v26, %v1052_v26  ;;  %v6734_v36 = vsel %vm6697_vm8, %v1361_v33, %v5404_v49  ;;  %v17483_v16 = vrot.slane %v13419_v34, 1 }
  0x9f   : > { %v3537_v57 = vrot.slane %v3521_v46, %v13025_v31  ;;  %v3529_v42 = vcombine.high %v3521_v46, %v3521_v46  ;;  %v6735_v17 = vsel %vm6697_vm8, %v1375_v55, %v5408_v60  ;;  %9334 = vrot.lane.b32.xlu0 %v8863_v10, %s12813_s30  ;;  %v6736_v39 = vsel %vm6697_vm8, %v1377_v14, %v5412_v59 }
  0xa0   : > { %v681_v23 = vsel %vm666_vm5, %v17483_v16, %v680_v40  ;;  %8978 = vrot.lane.b32.xlu1 %v8757_v63, %s12812_s27  ;;  %8649 = vst.msk [vmem:[#allocation2 + $0x199] sm:$0xff] %vm8607_vm9, %v8024_v61  ;;  %v7464_v4 = vcombine.low %v6734_v36, %v6735_v17  ;;  %v13627_v41 = vmul.f32 0.75, %v13233_v62  ;;  %v8830_v25 = vld [vmem:[#allocation2 + $0x3a] sm:$0xff]  ;;  %v13631_v30 = vrot.slane %v3514_v8, %v13025_v31 }
  0xa1   : > { %v5416_v50 = vrot.slane %v3537_v57, %v12982_v11  ;;  %v13624_v7 = vadd.f32 %v681_v23, %v13417_v5  ;;  %v3551_v29 = vrot.slane %v3529_v42, %v13025_v31  ;;  %v3559_v13 = vcombine.high %v3537_v57, %v3537_v57  ;;  %v8759_v51 = vld [vmem:[#allocation2 + $0x41] sm:$0xff]  ;;  %v12729_v61 = vld [vmem:[%s12987_s24 + $0x78] sm:$0xff] }
  0xa2   : > { %v7472_v53 = vrot.slane %v7464_v4, %v13028_v32  ;;  %v17484_v62 = vrot.slane %v13305_v9, 1  ;;  %v13642_v20 = vrot.slane %v13631_v30, %v13025_v31  ;;  %v13651_v9 = vmul.f32 0.75, %v13236_v0 }
  0xa3   : > { %v6737_v34 = vsel %vm6697_vm8, %v1379_v35, %v5416_v50  ;;  %v1387_v5 = vrot.slane %v13624_v7, %v13025_v31  ;;  %v3561_v58 = vcombine.high %v3551_v29, %v3551_v29  ;;  %v5420_v26 = vrot.slane %v3551_v29, %v12982_v11  ;;  %9268 = vrot.lane.b32.xlu0 %v8830_v25, %s12813_s30 }
  0xa4   : > { %v7465_v33 = vcombine.low %v6736_v39, %v6737_v34  ;;  %v1077_v44 = vadd.f32 %v17484_v62, %v13399_v21  ;;  %v5424_v47 = vrot.slane %v3559_v13, %v12982_v11  ;;  %9046 = vrot.lane.b32.xlu1 %v8791_v45, %s12812_s27  ;;  %v8831_v21 = vld [vmem:[#allocation2 + $0x42] sm:$0xff]  ;;  %v5432_v15 = vrot.slane %v13642_v20, %v12982_v11 }
  0xa5   : > { %v1395_v14 = vcombine.high %v1387_v5, %v1387_v5  ;;  %v1403_v37 = vrot.slane %v1387_v5, %v13025_v31  ;;  %v5428_v2 = vrot.slane %v3561_v58, %v12982_v11  ;;  %v2164_v46 = vcombine.high %v13443_v22, %v13443_v22  ;;  %v12730_v5 = vld [vmem:[%s12987_s24 + $0x80] sm:$0xff] }
  0xa6   : > { %v7479_v55 = vrot.slane %v7465_v33, %v13028_v32  ;;  %v4426_v54 = vcombine.high %v13431_v43, %v13431_v43  ;;  %v4456_v49 = vcombine.high %v13449_v38, %v13449_v38  ;;  %v4465_v60 = vrot.slane %v1077_v44, %v13025_v31 }
  0xa7   : > { %v1417_v28 = vrot.slane %v1395_v14, %v13025_v31  ;;  %v1425_v10 = vcombine.high %v1403_v37, %v1403_v37  ;;  %v6738_v0 = vsel %vm6697_vm8, %v1403_v37, %v5420_v26  ;;  %v2178_v63 = vrot.slane %v2164_v46, %v13025_v31  ;;  %9270 = vrot.lane.b32.xlu0 %v8831_v21, %s12813_s30  ;;  %v8864_v8 = vld [vmem:[#allocation2 + $0x192] sm:$0xff]  ;;  %v8865_v44 = vld [vmem:[#allocation2 + $0x19a] sm:$0xff] }
  0xa8   : > { %v7480_v35 = vcombine.low %v7472_v53, %v7479_v55  ;;  %v4454_v57 = vrot.slane %v4426_v54, %v13025_v31  ;;  %8982 = vrot.lane.b32.xlu1 %v8759_v51, %s12812_s27  ;;  %v13673_v59 = vmul.f32 0.25, %v12729_v61  ;;  %v8793_v42 = vld [vmem:[#allocation2 + $0x199] sm:$0xff]  ;;  %v4472_v23 = vrot.slane %v4465_v60, %v13025_v31 }
  0xa9   : > { %v1427_v43 = vcombine.high %v1417_v28, %v1417_v28  ;;  %v6739_v22 = vsel %vm6697_vm8, %v1417_v28, %v5424_v47  ;;  %v6740_v40 = vsel %vm6697_vm8, %v1425_v10, %v5428_v2  ;;  %v2180_v38 = vcombine.high %v2178_v63, %v2178_v63 }
  0xaa   : > { %8617 = vst.msk [vmem:[#allocation2 + $0x59] sm:$0xff] %vm8607_vm9, %v7480_v35  ;;  %v7481_v50 = vcombine.low %v6738_v0, %v6739_v22  ;;  %v2194_v36 = vrot.slane %v2178_v63, %v13025_v31  ;;  %v4458_v17 = vcombine.high %v4454_v57, %v4454_v57  ;;  %v5948_v39 = vrot.slane %v4454_v57, %v12982_v11  ;;  %v12731_v35 = vld [vmem:[%s12987_s24 + $0x88] sm:$0x3] }
  0xab   : > { %v6741_v16 = vsel %vm6697_vm8, %v1427_v43, %v5432_v15  ;;  %v5952_v4 = vrot.slane %v4456_v49, %v12982_v11  ;;  %v2208_v34 = vrot.slane %v2180_v38, %v13025_v31  ;;  %9336 = vrot.lane.b32.xlu0 %v8864_v8, %s12813_s30  ;;  %v5960_v33 = vrot.slane %v4472_v23, %v12982_v11 }
  0xac   : > { %v7482_v25 = vcombine.low %v6740_v40, %v6741_v16  ;;  %v7489_v45 = vrot.slane %v7481_v50, %v13028_v32  ;;  %v2210_v29 = vcombine.high %v2194_v36, %v2194_v36  ;;  %9050 = vrot.lane.b32.xlu1 %v8793_v42, %s12812_s27  ;;  %v5956_v13 = vrot.slane %v4458_v17, %v12982_v11 }
  0xad   : > { %v6870_v53 = vsel %vm6697_vm8, %v2194_v36, %v5948_v39  ;;  %v13688_v62 = vmul.f32 0.25, %v12730_v5  ;;  %v2212_v26 = vcombine.high %v2208_v34, %v2208_v34  ;;  %v6871_v47 = vsel %vm6697_vm8, %v2208_v34, %v5952_v4 }
  0xae   : > { %v7496_v58 = vrot.slane %v7482_v25, %v13028_v32  ;;  %v1053_v55 = vadd.f32 %v914_v12, %v13600_v56  ;;  %v6872_v14 = vsel %vm6697_vm8, %v2210_v29, %v5956_v13  ;;  %v8042_v37 = vcombine.low %v6870_v53, %v6871_v47 }
  0xaf   : > { %v1380_v21 = vcombine.high %v13624_v7, %v13624_v7  ;;  %v3530_v51 = vcombine.high %v13631_v30, %v13631_v30  ;;  %v6873_v46 = vsel %vm6697_vm8, %v2212_v26, %v5960_v33  ;;  %v3560_v54 = vcombine.high %v13642_v20, %v13642_v20  ;;  %9338 = vrot.lane.b32.xlu0 %v8865_v44, %s12813_s30 }
  0xb0   : > { %v7497_v15 = vcombine.low %v7489_v45, %v7496_v58  ;;  %v3569_v19 = vrot.slane %v1053_v55, %v13025_v31  ;;  %v8043_v12 = vcombine.low %v6872_v14, %v6873_v46  ;;  %v8050_v56 = vrot.slane %v8042_v37, %v13028_v32 }
  0xb1   : > { %v8761_v2 = vld [vmem:[#allocation2 + $0x59] sm:$0xff]  ;;  %v1394_v7 = vrot.slane %v1380_v21, %v13025_v31  ;;  %v13709_v30 = vmul.f32 0.25, %v12731_v35  ;;  %v3558_v10 = vrot.slane %v3530_v51, %v13025_v31  ;;  %v5440_v0 = vrot.slane %v3560_v54, %v12982_v11  ;;  %v12734_v54 = vld [vmem:[%s12987_s24 + $0x28] sm:$0x3] }
  0xb2   : > { %8986 = vrot.lane.b32.xlu1 %v8761_v2, %s12812_s27  ;;  %v8832_v28 = vld [vmem:[#allocation2 + $0x52] sm:$0xff]  ;;  %8618 = vst.msk [vmem:[#allocation2 + $0x61] sm:$0xff] %vm8607_vm9, %v7497_v15  ;;  %v3576_v20 = vrot.slane %v3569_v19, %v13025_v31  ;;  %v346_v63 = vadd.f32 %v13673_v59, %v13606_v27  ;;  %v8057_v57 = vrot.slane %v8043_v12, %v13028_v32  ;;  %v371_v36 = vadd.s32 11, %v12971_v6  ;;  %v12733_v21 = vld [vmem:[%s12987_s24 + $0x20] sm:$0xff] }
  0xb3   : > { %v1396_v49 = vcombine.high %v1394_v7, %v1394_v7  ;;  %v1410_v60 = vrot.slane %v1394_v7, %v13025_v31  ;;  %v347_v43 = vadd.f32 %v13688_v62, %v13627_v41  ;;  %v3562_v22 = vcombine.high %v3558_v10, %v3558_v10  ;;  %9272 = vrot.lane.b32.xlu0 %v8832_v28, %s12813_s30  ;;  %v235_v28 = vld [vmem:[%s12987_s24 + $0xa8] sm:$0xff] }
  0xb4   : > { %v5436_v40 = vrot.slane %v3558_v10, %v12982_v11  ;;  %v5448_v61 = vrot.slane %v3576_v20, %v12982_v11  ;;  %v348_v8 = vadd.f32 %v13709_v30, %v13651_v9  ;;  %v8058_v42 = vcombine.low %v8050_v56, %v8057_v57 }
  0xb5   : > { %v1424_v50 = vrot.slane %v1396_v49, %v13025_v31  ;;  %v1426_v38 = vcombine.high %v1410_v60, %v1410_v60  ;;  %v5444_v17 = vrot.slane %v3562_v22, %v12982_v11  ;;  %v13731_v23 = vmul.f32 0.75, %v13320_v24  ;;  %v12732_v24 = vld [vmem:[%s12987_s24 + $0x18] sm:$0xff] }
  0xb6   : > { %v6742_v16 = vsel %vm6697_vm8, %v1410_v60, %v5436_v40  ;;  %v13734_v39 = vmul.f32 0.75, %v13367_v3  ;;  %8651 = vst.msk [vmem:[#allocation2 + $0x1a9] sm:$0xff] %vm8607_vm9, %v8058_v42  ;;  %vm389_vm0 = vcmp.ge.s32.totalorder %v371_v36, 0  ;;  %vm407_vm1 = vcmp.lt.s32.totalorder %v371_v36, 32 }
  0xb7   : > { %v1428_v4 = vcombine.high %v1424_v50, %v1424_v50  ;;  %v6743_v25 = vsel %vm6697_vm8, %v1424_v50, %v5440_v0  ;;  %v6744_v45 = vsel %vm6697_vm8, %v1426_v38, %v5444_v17  ;;  %vm425_vm2 = vmand %vm389_vm0, %vm407_vm1  ;;  %v13740_v29 = vmul.f32 0.75, %v13370_v1 }
  0xb8   : > { %v7498_v34 = vcombine.low %v6742_v16, %v6743_v25  ;;  %v13743_v13 = vmul.f32 0.25, %v12732_v24  ;;  %v501_v53 = vsel %vm425_vm2, %v346_v63, 0.0  ;;  %v502_v5 = vsel %vm425_vm2, %v347_v43, 0.0 }
  0xb9   : > { %v8833_v3 = vld [vmem:[#allocation2 + $0x5a] sm:$0xff]  ;;  %v6745_v33 = vsel %vm6697_vm8, %v1428_v4, %v5448_v61  ;;  %v503_v44 = vsel %vm425_vm2, %v348_v8, 0.0  ;;  %v544_v47 = vmul.f32 0.25, %v501_v53  ;;  %v13748_v1 = vmul.f32 0.25, %v502_v5 }
  0xba   : > { %17485 = vst [vmem:[#allocation21_spill] sm:$0xff] %v13743_v13  ;;  %9274 = vrot.lane.b32.xlu0 %v8833_v3, %s12813_s30  ;;  %v7499_v58 = vcombine.low %v6744_v45, %v6745_v33  ;;  %v7506_v26 = vrot.slane %v7498_v34, %v13028_v32  ;;  %v591_v55 = vmul.f32 0.75, %v501_v53  ;;  %v13750_v14 = vmul.f32 0.75, %v502_v5  ;;  %v8762_v61 = vld [vmem:[#allocation2 + $0x61] sm:$0xff] }
  0xbb   : > { %v13752_v37 = vmul.f32 0.25, %v503_v44  ;;  %v13755_v51 = vmul.f32 0.25, %v12733_v21  ;;  %v956_v15 = vrot.slane %v544_v47, 1  ;;  %v957_v46 = vrot.slane %v13748_v1, 1 }
  0xbc   : > { %v7513_v2 = vrot.slane %v7499_v58, %v13028_v32  ;;  %v13760_v19 = vmul.f32 0.25, %v12734_v54  ;;  %v722_v12 = vrot.slane %v591_v55, 1  ;;  %v723_v56 = vrot.slane %v13750_v14, 1 }
  0xbd   : > { %17486 = vst [vmem:[#allocation22_spill] sm:$0xff] %v13755_v51  ;;  %v959_v7 = vrot.slane %v13752_v37, 1  ;;  %v334_v35 = vadd.f32 %v13743_v13, %v13731_v23  ;;  %v8795_v10 = vld [vmem:[#allocation2 + $0x1a9] sm:$0xff]  ;;  %v958_v63 = vsel %vm666_vm5, %v956_v15, %v957_v46  ;;  %v335_v57 = vadd.f32 %v13755_v51, %v13734_v39 }
  0xbe   : > { %17487 = vst [vmem:[#allocation23_spill] sm:$0xff] %v13760_v19  ;;  %v8866_v20 = vld [vmem:[#allocation2 + $0x1a2] sm:$0xff]  ;;  %v7514_v0 = vcombine.low %v7506_v26, %v7513_v2  ;;  %v13772_v49 = vadd.f32 %v13760_v19, %v13740_v29  ;;  %9054 = vrot.lane.b32.xlu1 %v8795_v10, %s12812_s27  ;;  %v724_v60 = vsel %vm666_vm5, %v722_v12, %v723_v56  ;;  %v363_v40 = vadd.s32 3, %v12971_v6  ;;  %v8867_v8 = vld [vmem:[#allocation2 + $0x1aa] sm:$0xff] }
  0xbf   : > { %9340 = vrot.lane.b32.xlu0 %v8866_v20, %s12813_s30  ;;  %v1078_v43 = vadd.f32 %v958_v63, %v591_v55  ;;  %v960_v22 = vsel %vm666_vm5, %v957_v46, %v959_v7  ;;  %v815_v42 = vadd.f32 %v724_v60, %v544_v47  ;;  %v13787_v38 = vmul.f32 0.75, %v503_v44 }
  0xc0   : > { %8619 = vst.msk [vmem:[#allocation2 + $0x69] sm:$0xff] %vm8607_vm9, %v7514_v0  ;;  %v13785_v50 = vadd.f32 %v960_v22, %v13750_v14  ;;  %v13789_v36 = vmul.f32 0.25, %v235_v28  ;;  %vm381_vm3 = vcmp.ge.s32.totalorder %v363_v40, 0  ;;  %vm399_vm4 = vcmp.lt.s32.totalorder %v363_v40, 32 }
  0xc1   : > { %v4473_v17 = vcombine.high %v1078_v43, %v1078_v43  ;;  %v4480_v16 = vrot.slane %v1078_v43, %v13025_v31  ;;  %v2220_v4 = vrot.slane %v815_v42, %v13025_v31  ;;  %v2213_v25 = vcombine.high %v815_v42, %v815_v42  ;;  %vm13797_vm6 = vmand %vm381_vm3, %vm399_vm4 }
  0xc2   : > { %v13795_v45 = vrot.slane %v13785_v50, %v13025_v31  ;;  %v725_v24 = vrot.slane %v13787_v38, 1  ;;  %8988 = vrot.lane.b32.xlu1 %v8762_v61, %s12812_s27  ;;  %v477_v5 = vsel %vm13797_vm6, %v334_v35, 0.0  ;;  %v478_v61 = vsel %vm13797_vm6, %v335_v57, 0.0 }
  0xc3   : > { %9342 = vrot.lane.b32.xlu0 %v8867_v8, %s12813_s30  ;;  %v4487_v3 = vrot.slane %v4473_v17, %v13025_v31  ;;  %v4488_v33 = vcombine.high %v4480_v16, %v4480_v16  ;;  %v4496_v53 = vrot.slane %v4480_v16, %v13025_v31  ;;  %v2228_v44 = vcombine.high %v2220_v4, %v2220_v4 }
  0xc4   : > { %v2236_v58 = vrot.slane %v2220_v4, %v13025_v31  ;;  %v2227_v26 = vrot.slane %v2213_v25, %v13025_v31  ;;  %v13812_v47 = vrot.slane %v13795_v45, %v13025_v31  ;;  %v13851_v34 = vmul.f32 0.75, %v478_v61 }
  0xc5   : > { %v4503_v55 = vrot.slane %v4487_v3, %v13025_v31  ;;  %v4510_v21 = vrot.slane %v4488_v33, %v13025_v31  ;;  %v4518_v2 = vcombine.high %v4496_v53, %v4496_v53  ;;  %v4489_v15 = vcombine.high %v4487_v3, %v4487_v3 }
  0xc6   : > { %v2250_v46 = vrot.slane %v2228_v44, %v13025_v31  ;;  %v2258_v54 = vcombine.high %v2236_v58, %v2236_v58  ;;  %v2229_v12 = vcombine.high %v2227_v26, %v2227_v26  ;;  %v2243_v35 = vrot.slane %v2227_v26, %v13025_v31 }
  0xc7   : > { %v8763_v28 = vld [vmem:[#allocation2 + $0x69] sm:$0xff]  ;;  %v4520_v20 = vcombine.high %v4510_v21, %v4510_v21  ;;  %v5964_v0 = vrot.slane %v4510_v21, %v12982_v11  ;;  %v5968_v63 = vrot.slane %v4518_v2, %v12982_v11  ;;  %v5976_v60 = vrot.slane %v4503_v55, %v12982_v11 }
  0xc8   : > { %v8834_v10 = vld [vmem:[#allocation2 + $0x62] sm:$0xff]  ;;  %8990 = vrot.lane.b32.xlu1 %v8763_v28, %s12812_s27  ;;  %v2260_v43 = vcombine.high %v2250_v46, %v2250_v46  ;;  %v2257_v22 = vrot.slane %v2229_v12, %v13025_v31  ;;  %v2259_v40 = vcombine.high %v2243_v35, %v2243_v35  ;;  %v8835_v16 = vld [vmem:[#allocation2 + $0x6a] sm:$0xff]  ;;  %v4517_v4 = vrot.slane %v4489_v15, %v13025_v31 }
  0xc9   : > { %9276 = vrot.lane.b32.xlu0 %v8834_v10, %s12813_s30  ;;  %v5972_v8 = vrot.slane %v4520_v20, %v12982_v11  ;;  %v6874_v42 = vsel %vm6697_vm8, %v2236_v58, %v5964_v0  ;;  %v6875_v17 = vsel %vm6697_vm8, %v2250_v46, %v5968_v63  ;;  %v4519_v53 = vcombine.high %v4503_v55, %v4503_v55 }
  0xca   : > { %v6877_v25 = vsel %vm6697_vm8, %v2260_v43, %v5976_v60  ;;  %v8059_v3 = vcombine.low %v6874_v42, %v6875_v17  ;;  %v2261_v33 = vcombine.high %v2257_v22, %v2257_v22  ;;  %v4521_v26 = vcombine.high %v4517_v4, %v4517_v4 }
  0xcb   : > { %v6876_v44 = vsel %vm6697_vm8, %v2258_v54, %v5972_v8  ;;  %v5980_v21 = vrot.slane %v4517_v4, %v12982_v11  ;;  %v5992_v57 = vrot.slane %v13812_v47, %v12982_v11  ;;  %v5984_v15 = vrot.slane %v4519_v53, %v12982_v11 }
  0xcc   : > { %v8060_v2 = vcombine.low %v6876_v44, %v6877_v25  ;;  %v8067_v58 = vrot.slane %v8059_v3, %v13028_v32  ;;  %v13841_v46 = vsel %vm13797_vm6, %v13772_v49, 0.0  ;;  %v5988_v55 = vrot.slane %v4521_v26, %v12982_v11 }
  0xcd   : > { %9278 = vrot.lane.b32.xlu0 %v8835_v16, %s12813_s30  ;;  %v6878_v54 = vsel %vm6697_vm8, %v2243_v35, %v5980_v21  ;;  %v6881_v12 = vsel %vm6697_vm8, %v2261_v33, %v5992_v57  ;;  %v528_v28 = vmul.f32 0.25, %v477_v5  ;;  %v6879_v20 = vsel %vm6697_vm8, %v2257_v22, %v5984_v15 }
  0xce   : > { %v8074_v10 = vrot.slane %v8060_v2, %v13028_v32  ;;  %v13848_v0 = vmul.f32 0.25, %v478_v61  ;;  %v567_v63 = vmul.f32 0.75, %v477_v5  ;;  %v6880_v60 = vsel %vm6697_vm8, %v2259_v40, %v5988_v55 }
  0xcf   : > { %v8076_v43 = vcombine.low %v6878_v54, %v6879_v20  ;;  %v916_v49 = vrot.slane %v528_v28, 1  ;;  %v8077_v42 = vcombine.low %v6880_v60, %v6881_v12  ;;  %v683_v4 = vrot.slane %v13851_v34, 1 }
  0xd0   : > { %v8075_v8 = vcombine.low %v8067_v58, %v8074_v10  ;;  %v682_v17 = vrot.slane %v567_v63, 1  ;;  %v917_v35 = vrot.slane %v13848_v0, 1  ;;  %v726_v5 = vsel %vm666_vm5, %v723_v56, %v725_v24 }
  0xd1   : > { %v8084_v16 = vrot.slane %v8076_v43, %v13028_v32  ;;  %v4522_v22 = vcombine.high %v13785_v50, %v13785_v50  ;;  %v8091_v40 = vrot.slane %v8077_v42, %v13028_v32  ;;  %v13869_v25 = vadd.f32 %v726_v5, %v13748_v1 }
  0xd2   : > { %8652 = vst.msk [vmem:[#allocation2 + $0x1b9] sm:$0xff] %vm8607_vm9, %v8075_v8  ;;  %v918_v61 = vsel %vm666_vm5, %v916_v49, %v917_v35  ;;  %v4537_v3 = vcombine.high %v13795_v45, %v13795_v45  ;;  %v684_v14 = vsel %vm666_vm5, %v682_v17, %v683_v4  ;;  %v4567_v24 = vcombine.high %v13812_v47, %v13812_v47 }
  0xd3   : > { %v1054_v56 = vadd.f32 %v918_v61, %v567_v63  ;;  %v13877_v50 = vrot.slane %v4522_v22, %v13025_v31  ;;  %v8092_v33 = vcombine.low %v8084_v16, %v8091_v40  ;;  %v799_v53 = vadd.f32 %v684_v14, %v528_v28 }
  0xd4   : > { %v2269_v1 = vrot.slane %v13869_v25, %v13025_v31  ;;  %v4559_v44 = vrot.slane %v4537_v3, %v13025_v31  ;;  %v6000_v57 = vrot.slane %v4567_v24, %v12982_v11  ;;  %vm9622_vm2 = vcmask 97280  }
  0xd5   : > { %v3577_v26 = vcombine.high %v1054_v56, %v1054_v56  ;;  %v3584_v45 = vrot.slane %v1054_v56, %v13025_v31  ;;  %v13887_v21 = vrot.slane %v13877_v50, %v13025_v31  ;;  %8653 = vst.msk [vmem:[#allocation2 + $0x1c1] sm:$0xff] %vm8607_vm9, %v8092_v33  ;;  %v1436_v47 = vrot.slane %v799_v53, %v13025_v31 }
  0xd6   : > { %v2277_v2 = vcombine.high %v2269_v1, %v2269_v1  ;;  %v2285_v58 = vrot.slane %v2269_v1, %v13025_v31  ;;  %v4569_v15 = vcombine.high %v4559_v44, %v4559_v44  ;;  %v5996_v28 = vrot.slane %v4559_v44, %v12982_v11 }
  0xd7   : > { %v3591_v55 = vrot.slane %v3577_v26, %v13025_v31  ;;  %v3592_v54 = vcombine.high %v3584_v45, %v3584_v45  ;;  %v3600_v12 = vrot.slane %v3584_v45, %v13025_v31  ;;  %v1444_v10 = vcombine.high %v1436_v47, %v1436_v47 }
  0xd8   : > { %v1452_v20 = vrot.slane %v1436_v47, %v13025_v31  ;;  %v2299_v63 = vrot.slane %v2277_v2, %v13025_v31  ;;  %v2307_v60 = vcombine.high %v2285_v58, %v2285_v58  ;;  %v6004_v17 = vrot.slane %v4569_v15, %v12982_v11 }
  0xd9   : > { %v8796_v43 = vld [vmem:[#allocation2 + $0x1b9] sm:$0xff]  ;;  %v3607_v49 = vrot.slane %v3591_v55, %v13025_v31  ;;  %v3614_v8 = vrot.slane %v3592_v54, %v13025_v31  ;;  %v3622_v42 = vcombine.high %v3600_v12, %v3600_v12  ;;  %v1466_v16 = vrot.slane %v1444_v10, %v13025_v31 }
  0xda   : > { %9056 = vrot.lane.b32.xlu1 %v8796_v43, %s12812_s27  ;;  %v1474_v5 = vcombine.high %v1452_v20, %v1452_v20  ;;  %v2309_v22 = vcombine.high %v2299_v63, %v2299_v63  ;;  %v6008_v40 = vrot.slane %v13887_v21, %v12982_v11  ;;  %v6882_v33 = vsel %vm6697_vm8, %v2285_v58, %v5996_v28 }
  0xdb   : > { %v3624_v61 = vcombine.high %v3614_v8, %v3614_v8  ;;  %v5452_v3 = vrot.slane %v3614_v8, %v12982_v11  ;;  %v5456_v14 = vrot.slane %v3622_v42, %v12982_v11  ;;  %v5464_v56 = vrot.slane %v3607_v49, %v12982_v11 }
  0xdc   : > { %v1476_v24 = vcombine.high %v1466_v16, %v1466_v16  ;;  %v6883_v1 = vsel %vm6697_vm8, %v2299_v63, %v6000_v57  ;;  %v6884_v44 = vsel %vm6697_vm8, %v2307_v60, %v6004_v17  ;;  %v8797_v26 = vld [vmem:[#allocation2 + $0x1c1] sm:$0xff]  ;;  %v6885_v54 = vsel %vm6697_vm8, %v2309_v22, %v6008_v40 }
  0xdd   : > { %v8868_v45 = vld [vmem:[#allocation2 + $0x1ba] sm:$0xff]  ;;  %v5460_v47 = vrot.slane %v3624_v61, %v12982_v11  ;;  %v6746_v2 = vsel %vm6697_vm8, %v1452_v20, %v5452_v3  ;;  %v6747_v15 = vsel %vm6697_vm8, %v1466_v16, %v5456_v14  ;;  %v8093_v57 = vcombine.low %v6882_v33, %v6883_v1 }
  0xde   : > { %9058 = vrot.lane.b32.xlu1 %v8797_v26, %s12812_s27  ;;  %9344 = vrot.lane.b32.xlu0 %v8868_v45, %s12813_s30  ;;  %v6749_v58 = vsel %vm6697_vm8, %v1476_v24, %v5464_v56  ;;  %v7515_v12 = vcombine.low %v6746_v2, %v6747_v15  ;;  %v13919_v28 = vmul.f32 0.25, %v13841_v46  ;;  %v8094_v63 = vcombine.low %v6884_v44, %v6885_v54 }
  0xdf   : > { %v6748_v10 = vsel %vm6697_vm8, %v1474_v5, %v5460_v47  ;;  %v1429_v60 = vcombine.high %v799_v53, %v799_v53  ;;  %v3593_v20 = vcombine.high %v3591_v55, %v3591_v55  ;;  %v8101_v42 = vrot.slane %v8093_v57, %v13028_v32 }
  0xe0   : > { %v7516_v43 = vcombine.low %v6748_v10, %v6749_v58  ;;  %v7523_v8 = vrot.slane %v7515_v12, %v13028_v32  ;;  %v919_v17 = vrot.slane %v13919_v28, 1  ;;  %v8108_v16 = vrot.slane %v8094_v63, %v13028_v32 }
  0xe1   : > { %v1443_v22 = vrot.slane %v1429_v60, %v13025_v31  ;;  %v3621_v40 = vrot.slane %v3593_v20, %v13025_v31  ;;  %v3623_v61 = vcombine.high %v3607_v49, %v3607_v49  ;;  %v13935_v55 = vmul.f32 0.75, %v13841_v46 }
  0xe2   : > { %v7530_v3 = vrot.slane %v7516_v43, %v13028_v32  ;;  %v920_v53 = vsel %vm666_vm5, %v917_v35, %v919_v17  ;;  %v13940_v5 = vadd.f32 %v959_v7, %v13787_v38  ;;  %v8109_v14 = vcombine.low %v8101_v42, %v8108_v16 }
  0xe3   : > { %v1055_v56 = vadd.f32 %v920_v53, %v13851_v34  ;;  %v1445_v49 = vcombine.high %v1443_v22, %v1443_v22  ;;  %v1459_v24 = vrot.slane %v1443_v22, %v13025_v31  ;;  %v3625_v1 = vcombine.high %v3621_v40, %v3621_v40 }
  0xe4   : > { %v7531_v33 = vcombine.low %v7523_v8, %v7530_v3  ;;  %v5468_v44 = vrot.slane %v3621_v40, %v12982_v11  ;;  %v5472_v35 = vrot.slane %v3623_v61, %v12982_v11  ;;  %8654 = vst.msk [vmem:[#allocation2 + $0x1c9] sm:$0xff] %vm8607_vm9, %v8109_v14  ;;  %v685_v7 = vrot.slane %v13935_v55, 1 }
  0xe5   : > { %v1473_v46 = vrot.slane %v1445_v49, %v13025_v31  ;;  %v1475_v26 = vcombine.high %v1459_v24, %v1459_v24  ;;  %v3633_v37 = vrot.slane %v1055_v56, %v13025_v31  ;;  %v5476_v38 = vrot.slane %v3625_v1, %v12982_v11 }
  0xe6   : > { %8620 = vst.msk [vmem:[#allocation2 + $0x79] sm:$0xff] %vm8607_vm9, %v7531_v33  ;;  %v6750_v45 = vsel %vm6697_vm8, %v1459_v24, %v5468_v44  ;;  %v3626_v47 = vcombine.high %v1055_v56, %v1055_v56  ;;  %v2262_v2 = vcombine.high %v13869_v25, %v13869_v25  ;;  %v686_v12 = vsel %vm666_vm5, %v683_v4, %v685_v7 }
  0xe7   : > { %v1477_v15 = vcombine.high %v1473_v46, %v1473_v46  ;;  %v3649_v54 = vrot.slane %v3633_v37, %v13025_v31  ;;  %v6751_v58 = vsel %vm6697_vm8, %v1473_v46, %v5472_v35  ;;  %v6752_v57 = vsel %vm6697_vm8, %v1475_v26, %v5476_v38 }
  0xe8   : > { %v7532_v10 = vcombine.low %v6750_v45, %v6751_v58  ;;  %v800_v63 = vadd.f32 %v686_v12, %v13848_v0  ;;  %v3640_v60 = vrot.slane %v3626_v47, %v13025_v31  ;;  %v3641_v43 = vcombine.high %v3633_v37, %v3633_v37 }
  0xe9   : > { %v5480_v20 = vrot.slane %v3649_v54, %v12982_v11  ;;  %v3671_v25 = vcombine.high %v3649_v54, %v3649_v54  ;;  %v2276_v8 = vrot.slane %v2262_v2, %v13025_v31  ;;  %v4538_v4 = vcombine.high %v13877_v50, %v13877_v50 }
  0xea   : > { %v7540_v42 = vrot.slane %v7532_v10, %v13028_v32  ;;  %v1485_v16 = vrot.slane %v800_v63, %v13025_v31  ;;  %v13968_v34 = vrot.slane %v3640_v60, %v13025_v31  ;;  %v3663_v22 = vrot.slane %v3641_v43, %v13025_v31 }
  0xeb   : > { %v6753_v0 = vsel %vm6697_vm8, %v1477_v15, %v5480_v20  ;;  %v5488_v40 = vrot.slane %v3671_v25, %v12982_v11  ;;  %v2278_v61 = vcombine.high %v2276_v8, %v2276_v8  ;;  %v8869_v3 = vld [vmem:[#allocation2 + $0x1c2] sm:$0xff]  ;;  %v2292_v1 = vrot.slane %v2276_v8, %v13025_v31 }
  0xec   : > { %v7533_v53 = vcombine.low %v6752_v57, %v6753_v0  ;;  %v1493_v14 = vcombine.high %v1485_v16, %v1485_v16  ;;  %v1501_v56 = vrot.slane %v1485_v16, %v13025_v31  ;;  %v5496_v49 = vrot.slane %v13968_v34, %v12982_v11  ;;  %9346 = vrot.lane.b32.xlu0 %v8869_v3, %s12813_s30  ;;  %v14007_v3 = vld [vmem:[%s12987_s24 + $0xb0] sm:$0xff] }
  0xed   : > { %v8764_v24 = vld [vmem:[#allocation2 + $0x79] sm:$0xff]  ;;  %v3673_v33 = vcombine.high %v3663_v22, %v3663_v22  ;;  %v5484_v50 = vrot.slane %v3663_v22, %v12982_v11  ;;  %v2306_v44 = vrot.slane %v2278_v61, %v13025_v31  ;;  %v4566_v37 = vrot.slane %v4538_v4, %v13025_v31 }
  0xee   : > { %8992 = vrot.lane.b32.xlu1 %v8764_v24, %s12812_s27  ;;  %v7547_v35 = vrot.slane %v7533_v53, %v13028_v32  ;;  %v1515_v46 = vrot.slane %v1493_v14, %v13025_v31  ;;  %v1523_v26 = vcombine.high %v1501_v56, %v1501_v56  ;;  %v2308_v45 = vcombine.high %v2292_v1, %v2292_v1 }
  0xef   : > { %v5492_v7 = vrot.slane %v3673_v33, %v12982_v11  ;;  %v6754_v38 = vsel %vm6697_vm8, %v1501_v56, %v5484_v50  ;;  %v2310_v47 = vcombine.high %v2306_v44, %v2306_v44  ;;  %v4568_v58 = vcombine.high %v13887_v21, %v13887_v21 }
  0xf0   : > { %v7548_v2 = vcombine.low %v7540_v42, %v7547_v35  ;;  %v1525_v15 = vcombine.high %v1515_v46, %v1515_v46  ;;  %v6755_v54 = vsel %vm6697_vm8, %v1515_v46, %v5488_v40  ;;  %v4570_v10 = vcombine.high %v4566_v37, %v4566_v37 }
  0xf1   : > { %v6756_v12 = vsel %vm6697_vm8, %v1523_v26, %v5492_v7  ;;  %v7549_v57 = vcombine.low %v6754_v38, %v6755_v54  ;;  %v4577_v20 = vrot.slane %v13940_v5, %v13025_v31  ;;  %v6012_v25 = vrot.slane %v4566_v37, %v12982_v11 }
  0xf2   : > { %8621 = vst.msk [vmem:[#allocation2 + $0x81] sm:$0xff] %vm8607_vm9, %v7548_v2  ;;  %v6757_v43 = vsel %vm6697_vm8, %v1525_v15, %v5496_v49  ;;  %v6016_v8 = vrot.slane %v4568_v58, %v12982_v11  ;;  %v1056_v21 = vadd.f32 %v919_v17, %v13935_v55  ;;  %v6020_v5 = vrot.slane %v4570_v10, %v12982_v11 }
  0xf3   : > { %v7550_v42 = vcombine.low %v6756_v12, %v6757_v43  ;;  %v7557_v16 = vrot.slane %v7549_v57, %v13028_v32  ;;  %v4584_v4 = vrot.slane %v4577_v20, %v13025_v31  ;;  %v6886_v0 = vsel %vm6697_vm8, %v2292_v1, %v6012_v25  ;;  %v8798_v12 = vld [vmem:[#allocation2 + $0x1c9] sm:$0xff] }
  0xf4   : > { %v6887_v22 = vsel %vm6697_vm8, %v2306_v44, %v6016_v8  ;;  %v1478_v40 = vcombine.high %v800_v63, %v800_v63  ;;  %v3642_v61 = vcombine.high %v3640_v60, %v3640_v60  ;;  %v6888_v17 = vsel %vm6697_vm8, %v2308_v45, %v6020_v5  ;;  %v14018_v63 = vld [vmem:[%s12987_s24 + $0xb8] sm:$0x3]  ;;  %v14044_v25 = vld [vmem:[%s12987_s24 + $0x48] sm:$0xff]  ;;  %v14047_v8 = vld [vmem:[%s12987_s24 + $0x50] sm:$0xff] }
  0xf5   : > { %v7564_v53 = vrot.slane %v7550_v42, %v13028_v32  ;;  %v6024_v28 = vrot.slane %v4584_v4, %v12982_v11  ;;  %v8110_v55 = vcombine.low %v6886_v0, %v6887_v22  ;;  %v3672_v49 = vcombine.high %v13968_v34, %v13968_v34  ;;  %v14053_v5 = vld [vmem:[%s12987_s24 + $0x58] sm:$0x3] }
  0xf6   : > { %v1492_v14 = vrot.slane %v1478_v40, %v13025_v31  ;;  %v3670_v56 = vrot.slane %v3642_v61, %v13025_v31  ;;  %v3681_v24 = vrot.slane %v1056_v21, %v13025_v31  ;;  %v14023_v1 = vmul.f32 0.25, %v14007_v3 }
  0xf7   : > { %v7565_v60 = vcombine.low %v7557_v16, %v7564_v53  ;;  %v6889_v33 = vsel %vm6697_vm8, %v2310_v47, %v6024_v28  ;;  %v8118_v50 = vrot.slane %v8110_v55, %v13028_v32  ;;  %v5504_v45 = vrot.slane %v3672_v49, %v12982_v11 }
  0xf8   : > { %v8111_v44 = vcombine.low %v6888_v17, %v6889_v33  ;;  %v1494_v35 = vcombine.high %v1492_v14, %v1492_v14  ;;  %v1508_v46 = vrot.slane %v1492_v14, %v13025_v31  ;;  %v3674_v26 = vcombine.high %v3670_v56, %v3670_v56 }
  0xf9   : > { %v8765_v37 = vld [vmem:[#allocation2 + $0x81] sm:$0xff]  ;;  %8622 = vst.msk [vmem:[#allocation2 + $0x89] sm:$0xff] %vm8607_vm9, %v7565_v60  ;;  %v3688_v34 = vrot.slane %v3681_v24, %v13025_v31  ;;  %v5500_v38 = vrot.slane %v3670_v56, %v12982_v11  ;;  %v14031_v47 = vmul.f32 0.25, %v14018_v63  ;;  %v372_v58 = vadd.s32 12, %v12971_v6 }
  0xfa   : > { %v8836_v7 = vld [vmem:[#allocation2 + $0x7a] sm:$0xff]  ;;  %8994 = vrot.lane.b32.xlu1 %v8765_v37, %s12812_s27  ;;  %v8125_v2 = vrot.slane %v8111_v44, %v13028_v32  ;;  %v1522_v15 = vrot.slane %v1494_v35, %v13025_v31  ;;  %v1524_v54 = vcombine.high %v1508_v46, %v1508_v46  ;;  %v5508_v57 = vrot.slane %v3674_v26, %v12982_v11 }
  0xfb   : > { %9280 = vrot.lane.b32.xlu0 %v8836_v7, %s12813_s30  ;;  %v5512_v10 = vrot.slane %v3688_v34, %v12982_v11  ;;  %v6758_v20 = vsel %vm6697_vm8, %v1508_v46, %v5500_v38  ;;  %v316_v43 = vadd.f32 %v13789_v36, %v13606_v27  ;;  %v317_v4 = vadd.f32 %v14023_v1, %v13627_v41  ;;  %v8716_v7 = vld [vmem:[#allocation2 + $0x168] sm:$0xff]  ;;  %v8977_v34 = vpop.permute.xlu1 %8976 }
  0xfc   : > { %v8126_v21 = vcombine.low %v8118_v50, %v8125_v2  ;;  %v1526_v42 = vcombine.high %v1522_v15, %v1522_v15  ;;  %v6759_v16 = vsel %vm6697_vm8, %v1522_v15, %v5504_v45  ;;  %v6760_v0 = vsel %vm6697_vm8, %v1524_v54, %v5508_v57  ;;  %v8684_v38 = vld [vmem:[#allocation2 + $0x28] sm:$0xff]  ;;  %v12735_v57 = vld [vmem:[%s12987_s24] sm:$0xff] }
  0xfd   : > { %v7566_v22 = vcombine.low %v6758_v20, %v6759_v16  ;;  %v318_v40 = vadd.f32 %v14031_v47, %v13651_v9  ;;  %vm390_vm7 = vcmp.ge.s32.totalorder %v372_v58, 0  ;;  %vm408_vm10 = vcmp.lt.s32.totalorder %v372_v58, 32 }
  0xfe   : > { %9060 = vrot.lane.b32.xlu1 %v8798_v12, %s12812_s27  ;;  %8655 = vst.msk [vmem:[#allocation2 + $0x1d1] sm:$0xff] %vm8607_vm9, %v8126_v21  ;;  %v6761_v27 = vsel %vm6697_vm8, %v1526_v42, %v5512_v10  ;;  %v14062_v61 = vmul.f32 0.25, %v14044_v25  ;;  %v14065_v41 = vmul.f32 0.25, %v14047_v8  ;;  %vm426_vm11 = vmand %vm390_vm7, %vm408_vm10  ;;  %v14069_v9 = vmul.f32 0.25, %v14053_v5 }
  0xff   : > { %v7567_v53 = vcombine.low %v6760_v0, %v6761_v27  ;;  %v7574_v28 = vrot.slane %v7566_v22, %v13028_v32  ;;  %v364_v17 = vadd.s32 4, %v12971_v6  ;;  %v504_v14 = vsel %vm426_vm11, %v316_v43, 0.0 }
 0x100   : > { %v8837_v55 = vld [vmem:[#allocation2 + $0x82] sm:$0xff]  ;;  %v505_v56 = vsel %vm426_vm11, %v317_v4, 0.0  ;;  %v506_v49 = vsel %vm426_vm11, %v318_v40, 0.0  ;;  %v304_v24 = vadd.f32 %v14062_v61, %v13731_v23  ;;  %v546_v33 = vmul.f32 0.25, %v504_v14  ;;  %v9041_v23 = vpop.permute.xlu0 %9040 }
 0x101   : > { %9282 = vrot.lane.b32.xlu0 %v8837_v55, %s12813_s30  ;;  %v7581_v60 = vrot.slane %v7567_v53, %v13028_v32  ;;  %v14076_v50 = vmul.f32 0.25, %v505_v56  ;;  %v594_v44 = vmul.f32 0.75, %v504_v14  ;;  %v14078_v35 = vmul.f32 0.75, %v505_v56  ;;  %v8766_v22 = vld [vmem:[#allocation2 + $0x89] sm:$0xff] }
 0x102   : > { %v14080_v46 = vmul.f32 0.25, %v506_v49  ;;  %v305_v26 = vadd.f32 %v14065_v41, %v13734_v39  ;;  %v306_v37 = vadd.f32 %v14069_v9, %v13740_v29  ;;  %v961_v15 = vrot.slane %v546_v33, 1 }
 0x103   : > { %v7582_v45 = vcombine.low %v7574_v28, %v7581_v60  ;;  %v727_v2 = vrot.slane %v594_v44, 1  ;;  %v962_v54 = vrot.slane %v14076_v50, 1  ;;  %v17374_v58 = vrot.slane %v14078_v35, 1 }
 0x104   : > { %v17373_v12 = vrot.slane %v14080_v46, 1  ;;  %vm382_vm12 = vcmp.ge.s32.totalorder %v364_v17, 0  ;;  %vm400_vm13 = vcmp.lt.s32.totalorder %v364_v17, 32  ;;  %v14090_v39 = vmul.f32 0.75, %v12735_v57 }
 0x105   : > { %v8799_v10 = vld [vmem:[#allocation2 + $0x1d1] sm:$0xff]  ;;  %8623 = vst.msk [vmem:[#allocation2 + $0x91] sm:$0xff] %vm8607_vm9, %v7582_v45  ;;  %v963_v20 = vsel %vm666_vm5, %v961_v15, %v962_v54  ;;  %v14095_v43 = vsel %vm8607_vm9, %v8716_v7, %v9041_v23  ;;  %v14098_v21 = vsel %vm8607_vm9, %v8684_v38, %v8977_v34  ;;  %v729_v42 = vsel %vm666_vm5, %v727_v2, %v17374_v58  ;;  %vm418_vm14 = vmand %vm382_vm12, %vm400_vm13 }
 0x106   : > { %v8870_v29 = vld [vmem:[#allocation2 + $0x1ca] sm:$0xff]  ;;  %9062 = vrot.lane.b32.xlu1 %v8799_v10, %s12812_s27  ;;  %v1081_v16 = vadd.f32 %v963_v20, %v594_v44  ;;  %v965_v4 = vsel %vm666_vm5, %v962_v54, %v17373_v12  ;;  %v14109_v0 = vmul.f32 0.75, %v506_v49  ;;  %v8871_v40 = vld [vmem:[#allocation2 + $0x1d2] sm:$0xff]  ;;  %v817_v27 = vadd.f32 %v729_v42, %v546_v33 }
 0x107   : > { %9348 = vrot.lane.b32.xlu0 %v8870_v29, %s12813_s30  ;;  %v14112_v53 = vadd.f32 %v965_v4, %v14078_v35  ;;  %v480_v28 = vsel %vm418_vm14, %v304_v24, 0.0  ;;  %v481_v55 = vsel %vm418_vm14, %v305_v26, 0.0  ;;  %v14115_v60 = vsel %vm418_vm14, %v306_v37, 0.0 }
 0x108   : > { %v4585_v14 = vcombine.high %v1081_v16, %v1081_v16  ;;  %v4592_v56 = vrot.slane %v1081_v16, %v13025_v31  ;;  %v14117_v44 = vmul.f32 0.25, %v480_v28  ;;  %v2318_v17 = vrot.slane %v817_v27, %v13025_v31 }
 0x109   : > { %v2311_v23 = vcombine.high %v817_v27, %v817_v27  ;;  %v14122_v49 = vrot.slane %v14112_v53, %v13025_v31  ;;  %v14124_v33 = vmul.f32 0.25, %v481_v55  ;;  %v570_v7 = vmul.f32 0.75, %v480_v28 }
 0x10a   : > { %8996 = vrot.lane.b32.xlu1 %v8766_v22, %s12812_s27  ;;  %v4599_v24 = vrot.slane %v4585_v14, %v13025_v31  ;;  %v4600_v26 = vcombine.high %v4592_v56, %v4592_v56  ;;  %v4608_v37 = vrot.slane %v4592_v56, %v13025_v31  ;;  %v2326_v34 = vcombine.high %v2318_v17, %v2318_v17 }
 0x10b   : > { %9350 = vrot.lane.b32.xlu0 %v8871_v40, %s12813_s30  ;;  %v2334_v38 = vrot.slane %v2318_v17, %v13025_v31  ;;  %v2325_v45 = vrot.slane %v2311_v23, %v13025_v31  ;;  %v14134_v2 = vrot.slane %v14122_v49, %v13025_v31  ;;  %v14144_v14 = vmul.f32 0.75, %v481_v55 }
 0x10c   : > { %v8767_v15 = vld [vmem:[#allocation2 + $0x91] sm:$0xff]  ;;  %v4615_v57 = vrot.slane %v4599_v24, %v13025_v31  ;;  %v4622_v10 = vrot.slane %v4600_v26, %v13025_v31  ;;  %v4630_v29 = vcombine.high %v4608_v37, %v4608_v37  ;;  %v4601_v20 = vcombine.high %v4599_v24, %v4599_v24 }
 0x10d   : > { %v8838_v54 = vld [vmem:[#allocation2 + $0x8a] sm:$0xff]  ;;  %v2348_v42 = vrot.slane %v2326_v34, %v13025_v31  ;;  %v2356_v16 = vcombine.high %v2334_v38, %v2334_v38  ;;  %v2327_v4 = vcombine.high %v2325_v45, %v2325_v45  ;;  %v2341_v22 = vrot.slane %v2325_v45, %v13025_v31  ;;  %v8839_v23 = vld [vmem:[#allocation2 + $0x92] sm:$0xff] }
 0x10e   : > { %8998 = vrot.lane.b32.xlu1 %v8767_v15, %s12812_s27  ;;  %v4632_v40 = vcombine.high %v4622_v10, %v4622_v10  ;;  %v6028_v27 = vrot.slane %v4622_v10, %v12982_v11  ;;  %v6032_v28 = vrot.slane %v4630_v29, %v12982_v11  ;;  %v6040_v17 = vrot.slane %v4615_v57, %v12982_v11 }
 0x10f   : > { %9284 = vrot.lane.b32.xlu0 %v8838_v54, %s12813_s30  ;;  %v2358_v56 = vcombine.high %v2348_v42, %v2348_v42  ;;  %v2355_v24 = vrot.slane %v2327_v4, %v13025_v31  ;;  %v2357_v26 = vcombine.high %v2341_v22, %v2341_v22  ;;  %v4629_v15 = vrot.slane %v4601_v20, %v13025_v31 }
 0x110   : > { %v6036_v37 = vrot.slane %v4632_v40, %v12982_v11  ;;  %v6890_v34 = vsel %vm6697_vm8, %v2334_v38, %v6028_v27  ;;  %v6891_v45 = vsel %vm6697_vm8, %v2348_v42, %v6032_v28  ;;  %v4631_v29 = vcombine.high %v4615_v57, %v4615_v57 }
 0x111   : > { %v6893_v54 = vsel %vm6697_vm8, %v2358_v56, %v6040_v17  ;;  %v8127_v10 = vcombine.low %v6890_v34, %v6891_v45  ;;  %v2359_v55 = vcombine.high %v2355_v24, %v2355_v24  ;;  %v4633_v58 = vcombine.high %v4629_v15, %v4629_v15 }
 0x112   : > { %v6892_v12 = vsel %vm6697_vm8, %v2356_v16, %v6036_v37  ;;  %v6044_v4 = vrot.slane %v4629_v15, %v12982_v11  ;;  %v6056_v40 = vrot.slane %v14134_v2, %v12982_v11  ;;  %v6048_v20 = vrot.slane %v4631_v29, %v12982_v11 }
 0x113   : > { %9286 = vrot.lane.b32.xlu0 %v8839_v23, %s12813_s30  ;;  %v8128_v38 = vcombine.low %v6892_v12, %v6893_v54  ;;  %v8135_v42 = vrot.slane %v8127_v10, %v13028_v32  ;;  %v687_v27 = vrot.slane %v570_v7, 1  ;;  %v6052_v28 = vrot.slane %v4633_v58, %v12982_v11 }
 0x114   : > { %v6894_v57 = vsel %vm6697_vm8, %v2341_v22, %v6044_v4  ;;  %v6897_v16 = vsel %vm6697_vm8, %v2359_v55, %v6056_v40  ;;  %v17375_v56 = vrot.slane %v14144_v14, 1  ;;  %v6895_v23 = vsel %vm6697_vm8, %v2355_v24, %v6048_v20 }
 0x115   : > { %v8142_v17 = vrot.slane %v8128_v38, %v13028_v32  ;;  %v921_v37 = vrot.slane %v14117_v44, 1  ;;  %v17376_v12 = vrot.slane %v14124_v33, 1  ;;  %v6896_v34 = vsel %vm6697_vm8, %v2357_v26, %v6052_v28 }
 0x116   : > { %v8144_v45 = vcombine.low %v6894_v57, %v6895_v23  ;;  %v689_v58 = vsel %vm666_vm5, %v687_v27, %v17375_v56  ;;  %v730_v22 = vrot.slane %v14109_v0, 1  ;;  %v8145_v54 = vcombine.low %v6896_v34, %v6897_v16 }
 0x117   : > { %v8143_v15 = vcombine.low %v8135_v42, %v8142_v17  ;;  %v14174_v10 = vadd.f32 %v689_v58, %v14117_v44  ;;  %v923_v24 = vsel %vm666_vm5, %v921_v37, %v17376_v12  ;;  %v17490_v26 = vrot.slane %v14078_v35, 1 }
 0x118   : > { %v8152_v55 = vrot.slane %v8144_v45, %v13028_v32  ;;  %v1057_v29 = vadd.f32 %v923_v24, %v570_v7  ;;  %v4634_v40 = vcombine.high %v14112_v53, %v14112_v53  ;;  %v8159_v38 = vrot.slane %v8145_v54, %v13028_v32 }
 0x119   : > { %v731_v4 = vsel %vm666_vm5, %v17490_v26, %v730_v22  ;;  %8656 = vst.msk [vmem:[#allocation2 + $0x1e1] sm:$0xff] %vm8607_vm9, %v8143_v15  ;;  %v1534_v44 = vrot.slane %v14174_v10, %v13025_v31  ;;  %v4649_v7 = vcombine.high %v14122_v49, %v14122_v49  ;;  %v4679_v53 = vcombine.high %v14134_v2, %v14134_v2 }
 0x11a   : > { %v14190_v42 = vadd.f32 %v731_v4, %v14076_v50  ;;  %v3689_v20 = vcombine.high %v1057_v29, %v1057_v29  ;;  %v3696_v35 = vrot.slane %v1057_v29, %v13025_v31  ;;  %v14196_v27 = vrot.slane %v4634_v40, %v13025_v31 }
 0x11b   : > { %v8160_v28 = vcombine.low %v8152_v55, %v8159_v38  ;;  %v1542_v57 = vcombine.high %v1534_v44, %v1534_v44  ;;  %v1550_v16 = vrot.slane %v1534_v44, %v13025_v31  ;;  %v4671_v24 = vrot.slane %v4649_v7, %v13025_v31 }
 0x11c   : > { %v2367_v50 = vrot.slane %v14190_v42, %v13025_v31  ;;  %v3703_v17 = vrot.slane %v3689_v20, %v13025_v31  ;;  %v3704_v23 = vcombine.high %v3696_v35, %v3696_v35  ;;  %v3712_v49 = vrot.slane %v3696_v35, %v13025_v31 }
 0x11d   : > { %v14207_v37 = vrot.slane %v14196_v27, %v13025_v31  ;;  %8657 = vst.msk [vmem:[#allocation2 + $0x1e9] sm:$0xff] %vm8607_vm9, %v8160_v28  ;;  %v1564_v2 = vrot.slane %v1542_v57, %v13025_v31  ;;  %v1572_v34 = vcombine.high %v1550_v16, %v1550_v16  ;;  %v6064_v4 = vrot.slane %v4679_v53, %v12982_v11 }
 0x11e   : > { %v2375_v45 = vcombine.high %v2367_v50, %v2367_v50  ;;  %v2383_v58 = vrot.slane %v2367_v50, %v13025_v31  ;;  %v3719_v22 = vrot.slane %v3703_v17, %v13025_v31  ;;  %v3726_v15 = vrot.slane %v3704_v23, %v13025_v31 }
 0x11f   : > { %v3734_v54 = vcombine.high %v3712_v49, %v3712_v49  ;;  %v1574_v55 = vcombine.high %v1564_v2, %v1564_v2  ;;  %v4681_v57 = vcombine.high %v4671_v24, %v4671_v24  ;;  %v6060_v7 = vrot.slane %v4671_v24, %v12982_v11 }
 0x120   : > { %v2397_v29 = vrot.slane %v2375_v45, %v13025_v31  ;;  %v2405_v26 = vcombine.high %v2383_v58, %v2383_v58  ;;  %v8800_v40 = vld [vmem:[#allocation2 + $0x1e1] sm:$0xff]  ;;  %v3736_v38 = vcombine.high %v3726_v15, %v3726_v15  ;;  %v5516_v44 = vrot.slane %v3726_v15, %v12982_v11 }
 0x121   : > { %v5520_v20 = vrot.slane %v3734_v54, %v12982_v11  ;;  %v5528_v35 = vrot.slane %v3719_v22, %v12982_v11  ;;  %9064 = vrot.lane.b32.xlu1 %v8800_v40, %s12812_s27  ;;  %v6072_v50 = vrot.slane %v14207_v37, %v12982_v11  ;;  %v6068_v54 = vrot.slane %v4681_v57, %v12982_v11 }
 0x122   : > { %v2407_v28 = vcombine.high %v2397_v29, %v2397_v29  ;;  %v5524_v23 = vrot.slane %v3736_v38, %v12982_v11  ;;  %v6762_v53 = vsel %vm6697_vm8, %v1550_v16, %v5516_v44  ;;  %v6898_v40 = vsel %vm6697_vm8, %v2383_v58, %v6060_v7 }
 0x123   : > { %v6763_v49 = vsel %vm6697_vm8, %v1564_v2, %v5520_v20  ;;  %v6765_v45 = vsel %vm6697_vm8, %v1574_v55, %v5528_v35  ;;  %v6899_v56 = vsel %vm6697_vm8, %v2397_v29, %v6064_v4  ;;  %v14234_v16 = vmul.f32 0.25, %v14115_v60 }
 0x124   : > { %v7583_v15 = vcombine.low %v6762_v53, %v6763_v49  ;;  %v8801_v12 = vld [vmem:[#allocation2 + $0x1e9] sm:$0xff]  ;;  %v6764_v19 = vsel %vm6697_vm8, %v1572_v34, %v5524_v23  ;;  %v6901_v51 = vsel %vm6697_vm8, %v2407_v28, %v6072_v50  ;;  %v8161_v38 = vcombine.low %v6898_v40, %v6899_v56  ;;  %v14264_v23 = vpop.permute.xlu0 %9042 }
 0x125   : > { %v8872_v24 = vld [vmem:[#allocation2 + $0x1e2] sm:$0xff]  ;;  %9066 = vrot.lane.b32.xlu1 %v8801_v12, %s12812_s27  ;;  %v7584_v2 = vcombine.low %v6764_v19, %v6765_v45  ;;  %v6900_v58 = vsel %vm6697_vm8, %v2405_v26, %v6068_v54  ;;  %v14241_v29 = vmul.f32 0.75, %v14115_v60  ;;  %v924_v56 = vrot.slane %v14234_v16, 1 }
 0x126   : > { %9352 = vrot.lane.b32.xlu0 %v8872_v24, %s12813_s30  ;;  %v7591_v55 = vrot.slane %v7583_v15, %v13028_v32  ;;  %v8162_v4 = vcombine.low %v6900_v58, %v6901_v51  ;;  %v8169_v34 = vrot.slane %v8161_v38, %v13028_v32  ;;  %v1527_v44 = vcombine.high %v14174_v10, %v14174_v10 }
 0x127   : > { %v7598_v12 = vrot.slane %v7584_v2, %v13028_v32  ;;  %v3705_v20 = vcombine.high %v3703_v17, %v3703_v17  ;;  %v3735_v35 = vcombine.high %v3719_v22, %v3719_v22  ;;  %v690_v19 = vrot.slane %v14241_v29, 1 }
 0x128   : > { %v8176_v28 = vrot.slane %v8162_v4, %v13028_v32  ;;  %v17491_v60 = vrot.slane %v14124_v33, 1  ;;  %v1541_v26 = vrot.slane %v1527_v44, %v13025_v31  ;;  %v17492_v57 = vrot.slane %v14080_v46, 1 }
 0x129   : > { %v7599_v7 = vcombine.low %v7591_v55, %v7598_v12  ;;  %v3733_v22 = vrot.slane %v3705_v20, %v13025_v31  ;;  %v5536_v50 = vrot.slane %v3735_v35, %v12982_v11  ;;  %v17493_v15 = vrot.slane %v14144_v14, 1 }
 0x12a   : > { %v925_v51 = vsel %vm666_vm5, %v17491_v60, %v924_v56  ;;  %v14259_v10 = vadd.f32 %v17492_v57, %v14109_v0  ;;  %v8177_v53 = vcombine.low %v8169_v34, %v8176_v28  ;;  %v1543_v49 = vcombine.high %v1541_v26, %v1541_v26 }
 0x12b   : > { %v1058_v17 = vadd.f32 %v925_v51, %v14144_v14  ;;  %v1557_v45 = vrot.slane %v1541_v26, %v13025_v31  ;;  %v691_v54 = vsel %vm666_vm5, %v17493_v15, %v690_v19  ;;  %8624 = vst.msk [vmem:[#allocation2 + $0xa1] sm:$0xff] %vm8607_vm9, %v7599_v7  ;;  %v3737_v46 = vcombine.high %v3733_v22, %v3733_v22  ;;  %v9045_v51 = vpop.permute.xlu1 %9044  ;;  %v14291_v26 = vpop.permute.xlu0 %9330 }
 0x12c   : > { %v5532_v40 = vrot.slane %v3733_v22, %v12982_v11  ;;  %v14274_v24 = vadd.f32 %v691_v54, %v14124_v33  ;;  %8658 = vst.msk [vmem:[#allocation2 + $0x1f1] sm:$0xff] %vm8607_vm9, %v8177_v53  ;;  %v1571_v38 = vrot.slane %v1543_v49, %v13025_v31  ;;  %v2360_v14 = vcombine.high %v14190_v42, %v14190_v42 }
 0x12d   : > { %v3745_v0 = vrot.slane %v1058_v17, %v13025_v31  ;;  %v1573_v2 = vcombine.high %v1557_v45, %v1557_v45  ;;  %v3738_v55 = vcombine.high %v1058_v17, %v1058_v17  ;;  %v5540_v4 = vrot.slane %v3737_v46, %v12982_v11 }
 0x12e   : > { %v6766_v34 = vsel %vm6697_vm8, %v1557_v45, %v5532_v40  ;;  %v1583_v44 = vrot.slane %v14274_v24, %v13025_v31  ;;  %v1575_v33 = vcombine.high %v1571_v38, %v1571_v38  ;;  %v6767_v12 = vsel %vm6697_vm8, %v1571_v38, %v5536_v50 }
 0x12f   : > { %v3761_v58 = vrot.slane %v3745_v0, %v13025_v31  ;;  %v14287_v20 = vrot.slane %v3738_v55, %v13025_v31  ;;  %v3753_v35 = vcombine.high %v3745_v0, %v3745_v0  ;;  %v6768_v42 = vsel %vm6697_vm8, %v1573_v2, %v5540_v4 }
 0x130   : > { %v7600_v28 = vcombine.low %v6766_v34, %v6767_v12  ;;  %v1591_v60 = vcombine.high %v1583_v44, %v1583_v44  ;;  %v1599_v57 = vrot.slane %v1583_v44, %v13025_v31  ;;  %v2374_v45 = vrot.slane %v2360_v14, %v13025_v31 }
 0x131   : > { %v5544_v19 = vrot.slane %v3761_v58, %v12982_v11  ;;  %v14296_v7 = vrot.slane %v14287_v20, %v13025_v31  ;;  %v3775_v17 = vrot.slane %v3753_v35, %v13025_v31  ;;  %v3783_v22 = vcombine.high %v3761_v58, %v3761_v58 }
 0x132   : > { %v7608_v53 = vrot.slane %v7600_v28, %v13028_v32  ;;  %v1613_v49 = vrot.slane %v1591_v60, %v13025_v31  ;;  %v8768_v15 = vld [vmem:[#allocation2 + $0xa1] sm:$0xff]  ;;  %v1621_v46 = vcombine.high %v1599_v57, %v1599_v57  ;;  %v2376_v4 = vcombine.high %v2374_v45, %v2374_v45  ;;  %v8717_v28 = vld [vmem:[#allocation2 + $0x170] sm:$0xff]  ;;  %v8718_v60 = vld [vmem:[#allocation2 + $0x178] sm:$0xff] }
 0x133   : > { %v6769_v50 = vsel %vm6697_vm8, %v1575_v33, %v5544_v19  ;;  %v3785_v0 = vcombine.high %v3775_v17, %v3775_v17  ;;  %v5548_v40 = vrot.slane %v3775_v17, %v12982_v11  ;;  %9000 = vrot.lane.b32.xlu1 %v8768_v15, %s12812_s27  ;;  %v8873_v38 = vld [vmem:[#allocation2 + $0x1ea] sm:$0xff]  ;;  %v5552_v55 = vrot.slane %v3783_v22, %v12982_v11  ;;  %v14318_v17 = vpop.permute.xlu1 %8980  ;;  %v14320_v22 = vpop.permute.xlu0 %9264 }
 0x134   : > { %v7601_v54 = vcombine.low %v6768_v42, %v6769_v50  ;;  %v1623_v2 = vcombine.high %v1613_v49, %v1613_v49  ;;  %v5560_v58 = vrot.slane %v14296_v7, %v12982_v11  ;;  %9354 = vrot.lane.b32.xlu0 %v8873_v38, %s12813_s30  ;;  %v2390_v33 = vrot.slane %v2374_v45, %v13025_v31 }
 0x135   : > { %v5556_v34 = vrot.slane %v3785_v0, %v12982_v11  ;;  %v6770_v44 = vsel %vm6697_vm8, %v1599_v57, %v5548_v40  ;;  %v6771_v12 = vsel %vm6697_vm8, %v1613_v49, %v5552_v55  ;;  %v2404_v19 = vrot.slane %v2376_v4, %v13025_v31 }
 0x136   : > { %v7615_v14 = vrot.slane %v7601_v54, %v13028_v32  ;;  %v6773_v35 = vsel %vm6697_vm8, %v1623_v2, %v5560_v58  ;;  %v4650_v42 = vcombine.high %v14196_v27, %v14196_v27  ;;  %v7617_v15 = vcombine.low %v6770_v44, %v6771_v12 }
 0x137   : > { %v6772_v57 = vsel %vm6697_vm8, %v1621_v46, %v5556_v34  ;;  %v2406_v45 = vcombine.high %v2390_v33, %v2390_v33  ;;  %v2408_v49 = vcombine.high %v2404_v19, %v2404_v19  ;;  %v4680_v40 = vcombine.high %v14207_v37, %v14207_v37 }
 0x138   : > { %v7616_v50 = vcombine.low %v7608_v53, %v7615_v14  ;;  %v7618_v54 = vcombine.low %v6772_v57, %v6773_v35  ;;  %v4678_v0 = vrot.slane %v4650_v42, %v13025_v31  ;;  %v7625_v27 = vrot.slane %v7617_v15, %v13028_v32  ;;  %v9049_v35 = vpop.permute.xlu1 %9048  ;;  %v14349_v42 = vpop.permute.xlu0 %9266 }
 0x139   : > { %v4689_v38 = vrot.slane %v14259_v10, %v13025_v31  ;;  %v9509_v53 = vsel %vm8607_vm9, %v8717_v28, %v14264_v23  ;;  %v14333_v46 = vsel %vm8607_vm9, %v8718_v60, %v9045_v51  ;;  %v6080_v37 = vrot.slane %v4680_v40, %v12982_v11 }
 0x13a   : > { %8625 = vst.msk [vmem:[#allocation2 + $0xa9] sm:$0xff] %vm8607_vm9, %v7616_v50  ;;  %v7632_v2 = vrot.slane %v7618_v54, %v13028_v32  ;;  %v4682_v55 = vcombine.high %v4678_v0, %v4678_v0  ;;  %v6076_v58 = vrot.slane %v4678_v0, %v12982_v11  ;;  %v1059_v14 = vadd.f32 %v924_v56, %v14241_v29 }
 0x13b   : > { %v4696_v4 = vrot.slane %v4689_v38, %v13025_v31  ;;  %v1576_v10 = vcombine.high %v14274_v24, %v14274_v24  ;;  %v3754_v23 = vcombine.high %v14287_v20, %v14287_v20  ;;  %v6903_v12 = vsel %vm6697_vm8, %v2404_v19, %v6080_v37  ;;  %v8686_v38 = vld [vmem:[#allocation2 + $0x38] sm:$0xff] }
 0x13c   : > { %v7633_v51 = vcombine.low %v7625_v27, %v7632_v2  ;;  %v6084_v34 = vrot.slane %v4682_v55, %v12982_v11  ;;  %v6902_v44 = vsel %vm6697_vm8, %v2390_v33, %v6076_v58  ;;  %v3784_v20 = vcombine.high %v14296_v7, %v14296_v7  ;;  %v12736_v2 = vld [vmem:[%s12987_s24 + $0xa8] sm:$0xff]  ;;  %v8802_v58 = vld [vmem:[#allocation2 + $0x1f1] sm:$0xff] }
 0x13d   : > { %v6088_v28 = vrot.slane %v4696_v4, %v12982_v11  ;;  %v8178_v16 = vcombine.low %v6902_v44, %v6903_v12  ;;  %v1590_v29 = vrot.slane %v1576_v10, %v13025_v31  ;;  %v3782_v56 = vrot.slane %v3754_v23, %v13025_v31  ;;  %v8985_v23 = vpop.permute.xlu1 %8984 }
 0x13e   : > { %8626 = vst.msk [vmem:[#allocation2 + $0xb1] sm:$0xff] %vm8607_vm9, %v7633_v51  ;;  %v6904_v24 = vsel %vm6697_vm8, %v2406_v45, %v6084_v34  ;;  %v3793_v33 = vrot.slane %v1059_v14, %v13025_v31  ;;  %v14361_v19 = vsel %vm9544_vm15, %v9509_v53, %v14291_v26  ;;  %v5568_v53 = vrot.slane %v3784_v20, %v12982_v11  ;;  %v14379_v51 = vpop.permute.xlu0 %9332 }
 0x13f   : > { %17494 = vst [vmem:[#allocation24_spill] sm:$0xff] %v14361_v19  ;;  %v6905_v60 = vsel %vm6697_vm8, %v2408_v49, %v6088_v28  ;;  %v8186_v50 = vrot.slane %v8178_v16, %v13028_v32  ;;  %v1592_v57 = vcombine.high %v1590_v29, %v1590_v29  ;;  %v1606_v15 = vrot.slane %v1590_v29, %v13025_v31  ;;  %v8720_v16 = vld [vmem:[#allocation2 + $0x190] sm:$0xff] }
 0x140   : > { %v8179_v45 = vcombine.low %v6904_v24, %v6905_v60  ;;  %v3786_v40 = vcombine.high %v3782_v56, %v3782_v56  ;;  %v3800_v7 = vrot.slane %v3793_v33, %v13025_v31  ;;  %v5564_v27 = vrot.slane %v3782_v56, %v12982_v11 }
 0x141   : > { %v8769_v54 = vld [vmem:[#allocation2 + $0xa9] sm:$0xff]  ;;  %v1620_v26 = vrot.slane %v1592_v57, %v13025_v31  ;;  %v1622_v49 = vcombine.high %v1606_v15, %v1606_v15  ;;  %v14373_v55 = vmul.f32 0.75, %v12736_v2  ;;  %v14384_v12 = vsel %vm8607_vm9, %v8686_v38, %v14318_v17 }
 0x142   : > { %v8840_v0 = vld [vmem:[#allocation2 + $0xa2] sm:$0xff]  ;;  %9002 = vrot.lane.b32.xlu1 %v8769_v54, %s12812_s27  ;;  %v8193_v37 = vrot.slane %v8179_v45, %v13028_v32  ;;  %v5572_v4 = vrot.slane %v3786_v40, %v12982_v11  ;;  %v5576_v14 = vrot.slane %v3800_v7, %v12982_v11  ;;  %v6774_v10 = vsel %vm6697_vm8, %v1606_v15, %v5564_v27  ;;  %v9053_v40 = vpop.permute.xlu1 %9052  ;;  %v14425_v7 = vpop.permute.xlu0 %9334 }
 0x143   : > { %9288 = vrot.lane.b32.xlu0 %v8840_v0, %s12813_s30  ;;  %v1624_v34 = vcombine.high %v1620_v26, %v1620_v26  ;;  %v6775_v44 = vsel %vm6697_vm8, %v1620_v26, %v5568_v53  ;;  %v14387_v28 = vmul.f32 0.75, %v14007_v3  ;;  %v14391_v20 = vmul.f32 0.75, %v14018_v63 }
 0x144   : > { %v8194_v29 = vcombine.low %v8186_v50, %v8193_v37  ;;  %v6776_v56 = vsel %vm6697_vm8, %v1622_v49, %v5572_v4  ;;  %v7634_v24 = vcombine.low %v6774_v10, %v6775_v44  ;;  %v349_v17 = vadd.f32 %v13239_v18, %v14373_v55  ;;  %v8688_v50 = vld [vmem:[#allocation2 + $0x50] sm:$0xff] }
 0x145   : > { %v8841_v33 = vld [vmem:[#allocation2 + $0xaa] sm:$0xff]  ;;  %v6777_v60 = vsel %vm6697_vm8, %v1624_v34, %v5576_v14  ;;  %v350_v3 = vadd.f32 %v13251_v52, %v14387_v28  ;;  %v373_v57 = vadd.s32 13, %v12971_v6  ;;  %v351_v54 = vadd.f32 %v13254_v48, %v14391_v20 }
 0x146   : > { %9068 = vrot.lane.b32.xlu1 %v8802_v58, %s12812_s27  ;;  %8659 = vst.msk [vmem:[#allocation2 + $0x1f9] sm:$0xff] %vm8607_vm9, %v8194_v29  ;;  %v7635_v63 = vcombine.low %v6776_v56, %v6777_v60  ;;  %v7642_v15 = vrot.slane %v7634_v24, %v13028_v32  ;;  %v14406_v0 = vsel %vm8607_vm9, %v8720_v16, %v9049_v35  ;;  %v14420_v48 = vmul.f32 0.75, %v14044_v25  ;;  %v8722_v58 = vld [vmem:[#allocation2 + $0x1a0] sm:$0xff]  ;;  %v17497_v14 = vld [vmem:[#allocation19_spill] sm:$0xff]  ;;  %v17498_v44 = vld [vmem:[#allocation20_spill] sm:$0xff] }
 0x147   : > { %9290 = vrot.lane.b32.xlu0 %v8841_v33, %s12813_s30  ;;  %vm391_vm0 = vcmp.ge.s32.totalorder %v373_v57, 0  ;;  %vm409_vm1 = vcmp.lt.s32.totalorder %v373_v57, 32  ;;  %v14411_v18 = vsel %vm9544_vm15, %v14098_v21, %v14320_v22  ;;  %v14417_v45 = vsel %vm8607_vm9, %v8688_v50, %v8985_v23  ;;  %v11927_v29 = vld [vmem:[%s17353_s1 + $0x18] sm:$0xf] }
 0x148   : > { %17495 = vst [vmem:[#allocation25_spill] sm:$0xff] %v14411_v18  ;;  %v7649_v52 = vrot.slane %v7635_v63, %v13028_v32  ;;  %vm427_vm3 = vmand %vm391_vm0, %vm409_vm1  ;;  %12335 = vmatprep.mubr.msk.f32.mxu0 %vm9622_vm2, %v14411_v18  ;;  %v14423_v35 = vmul.f32 0.75, %v14047_v8  ;;  %v14428_v38 = vmul.f32 0.75, %v14053_v5  ;;  %v17496_v8 = vld [vmem:[#allocation18_spill] sm:$0xff]  ;;  %v14461_v50 = vsel %vm9544_vm15, %v14333_v46, %v14379_v51 }
 0x149   : > { %v507_v21 = vsel %vm427_vm3, %v349_v17, 0.0  ;;  %v508_v22 = vsel %vm427_vm3, %v350_v3, 0.0  ;;  %v509_v27 = vsel %vm427_vm3, %v351_v54, 0.0  ;;  %v337_v4 = vadd.f32 %v17496_v8, %v14420_v48  ;;  %17499 = vst [vmem:[#allocation18_spill] sm:$0xff] %v14461_v50  ;;  %v11926_v54 = vld [vmem:[%s17353_s1 + $0x10] sm:$0xff] }
 0x14a   : > { %v7650_v26 = vcombine.low %v7642_v15, %v7649_v52  ;;  %v548_v49 = vmul.f32 0.25, %v507_v21  ;;  %v14430_v53 = vmul.f32 0.25, %v508_v22  ;;  %v597_v2 = vmul.f32 0.75, %v507_v21  ;;  %v9329_v15 = vpop.permute.xlu1 %9328  ;;  %v9269_v52 = vpop.permute.xlu0 %9268 }
 0x14b   : > { %v14432_v25 = vmul.f32 0.75, %v508_v22  ;;  %v14434_v37 = vmul.f32 0.25, %v509_v27  ;;  %v338_v10 = vadd.f32 %v17497_v14, %v14423_v35  ;;  %v14444_v16 = vadd.f32 %v17498_v44, %v14428_v38 }
 0x14c   : > { %8627 = vst.msk [vmem:[#allocation2 + $0xb9] sm:$0xff] %vm8607_vm9, %v7650_v26  ;;  %v732_v5 = vrot.slane %v597_v2, 1  ;;  %v966_v23 = vrot.slane %v548_v49, 1  ;;  %v967_v34 = vrot.slane %v14430_v53, 1  ;;  %v365_v17 = vadd.s32 5, %v12971_v6 }
 0x14d   : > { %v8803_v56 = vld [vmem:[#allocation2 + $0x1f9] sm:$0xff]  ;;  %v17380_v33 = vrot.slane %v14432_v25, 1  ;;  %v17379_v60 = vrot.slane %v14434_v37, 1  ;;  %v14453_v3 = vsel %vm8607_vm9, %v8722_v58, %v9053_v40  ;;  %v14463_v63 = vmul.f32 0.75, %v509_v27  ;;  %v8770_v40 = vld [vmem:[#allocation2 + $0xb1] sm:$0xff] }
 0x14e   : > { %v8874_v24 = vld [vmem:[#allocation2 + $0x1f2] sm:$0xff]  ;;  %9070 = vrot.lane.b32.xlu1 %v8803_v56, %s12812_s27  ;;  %v968_v57 = vsel %vm666_vm5, %v966_v23, %v967_v34  ;;  %vm9815_vm4 = vcmask 1043456   ;;  %v8875_v21 = vld [vmem:[#allocation2 + $0x1fa] sm:$0xff]  ;;  %vm383_vm6 = vcmp.ge.s32.totalorder %v365_v17, 0  ;;  %vm401_vm7 = vcmp.lt.s32.totalorder %v365_v17, 32 }
 0x14f   : > { %9356 = vrot.lane.b32.xlu0 %v8874_v24, %s12813_s30  ;;  %v734_v22 = vsel %vm666_vm5, %v732_v5, %v17380_v33  ;;  %v1084_v26 = vadd.f32 %v968_v57, %v597_v2  ;;  %v970_v46 = vsel %vm666_vm5, %v967_v34, %v17379_v60  ;;  %12631 = vmatprep.subr.msk.mxu1 %vm9815_vm4, %v11927_v29  ;;  %vm14483_vm10 = vmand %vm383_vm6, %vm401_vm7 }
 0x150   : > { %12331 = vmatprep.subr.msk.mxu0 %vm9815_vm4, %v11927_v29  ;;  %v819_v51 = vadd.f32 %v734_v22, %v548_v49  ;;  %v14477_v27 = vadd.f32 %v970_v46, %v14432_v25  ;;  %12633 = vmatpush3.msk.msra.mxu1 %vm9815_vm4, %v11927_v29  ;;  %v14489_v49 = vsel %vm9544_vm15, %v14095_v43, %v9329_v15  ;;  %v484_v57 = vsel %vm14483_vm10, %v338_v10, 0.0 }
 0x151   : > { %12332 = vmatpush3.msk.msra.mxu0 %vm9815_vm4, %v11927_v29  ;;  %v4697_v2 = vcombine.high %v1084_v26, %v1084_v26  ;;  %v4704_v8 = vrot.slane %v1084_v26, %v13025_v31  ;;  %12632 = vmatprep.subr.mxu1 %v11926_v54  ;;  %17502 = vst [vmem:[#allocation19_spill] sm:$0xff] %v14489_v49  ;;  %v483_v29 = vsel %vm14483_vm10, %v337_v4, 0.0 }
 0x152   : > { %v14493_v5 = vsel %vm9544_vm15, %v14384_v12, %v9269_v52  ;;  %9004 = vrot.lane.b32.xlu1 %v8770_v40, %s12812_s27  ;;  %v2416_v23 = vrot.slane %v819_v51, %v13025_v31  ;;  %v2409_v34 = vcombine.high %v819_v51, %v819_v51  ;;  %v14500_v44 = vrot.slane %v14477_v27, %v13025_v31 }
 0x153   : > { %17503 = vst [vmem:[#allocation20_spill] sm:$0xff] %v14493_v5  ;;  %9358 = vrot.lane.b32.xlu0 %v8875_v21, %s12813_s30  ;;  %v8771_v43 = vld [vmem:[#allocation2 + $0xb9] sm:$0xff]  ;;  %v4711_v24 = vrot.slane %v4697_v2, %v13025_v31  ;;  %v4712_v12 = vcombine.high %v4704_v8, %v4704_v8  ;;  %v4720_v17 = vrot.slane %v4704_v8, %v13025_v31  ;;  %v14528_v8 = vsel %vm14483_vm10, %v14444_v16, 0.0 }
 0x154   : > { %v8842_v56 = vld [vmem:[#allocation2 + $0xb2] sm:$0xff]  ;;  %12634 = vmatpush3.msra.mxu1 %v11926_v54  ;;  %12383 = vmatprep.mubr.msk.f32.mxu1 %vm9622_vm2, %v14489_v49  ;;  %v2424_v15 = vcombine.high %v2416_v23, %v2416_v23  ;;  %v2432_v52 = vrot.slane %v2416_v23, %v13025_v31  ;;  %v2423_v40 = vrot.slane %v2409_v34, %v13025_v31 }
 0x155   : > { %v14514_v4 = vrot.slane %v14500_v44, %v13025_v31  ;;  %12384 = vmatmul.mubr.msk.f32.vlgmr.msra.gmra.mxu1 %vm9622_vm2, %v14361_v19  ;;  %v4727_v21 = vrot.slane %v4711_v24, %v13025_v31  ;;  %v4734_v10 = vrot.slane %v4712_v12, %v13025_v31  ;;  %v4742_v22 = vcombine.high %v4720_v17, %v4720_v17  ;;  %v8843_v17 = vld [vmem:[#allocation2 + $0xba] sm:$0xff] }
 0x156   : > { %v4713_v26 = vcombine.high %v4711_v24, %v4711_v24  ;;  %12386 = vmatprep.mubr.msk.f32.mxu1 %vm9622_vm2, %v14461_v50  ;;  %9006 = vrot.lane.b32.xlu1 %v8771_v43, %s12812_s27  ;;  %v2446_v46 = vrot.slane %v2424_v15, %v13025_v31  ;;  %v2454_v51 = vcombine.high %v2432_v52, %v2432_v52 }
 0x157   : > { %9292 = vrot.lane.b32.xlu0 %v8842_v56, %s12813_s30  ;;  %v2425_v2 = vcombine.high %v2423_v40, %v2423_v40  ;;  %v4744_v23 = vcombine.high %v4734_v10, %v4734_v10  ;;  %v6092_v34 = vrot.slane %v4734_v10, %v12982_v11  ;;  %v6096_v24 = vrot.slane %v4742_v22, %v12982_v11 }
 0x158   : > { %v6104_v12 = vrot.slane %v4727_v21, %v12982_v11  ;;  %12333 = vmatprep.subr.mxu0 %v11926_v54  ;;  %v2456_v43 = vcombine.high %v2446_v46, %v2446_v46  ;;  %v2439_v56 = vrot.slane %v2423_v40, %v13025_v31  ;;  %v4741_v60 = vrot.slane %v4713_v26, %v13025_v31 }
 0x159   : > { %v2453_v15 = vrot.slane %v2425_v2, %v13025_v31  ;;  %12334 = vmatpush3.msra.mxu0 %v11926_v54  ;;  %v6100_v16 = vrot.slane %v4744_v23, %v12982_v11  ;;  %v6906_v14 = vsel %vm6697_vm8, %v2432_v52, %v6092_v34  ;;  %v6907_v10 = vsel %vm6697_vm8, %v2446_v46, %v6096_v24 }
 0x15a   : > { %v4743_v33 = vcombine.high %v4727_v21, %v4727_v21  ;;  %v6909_v22 = vsel %vm6697_vm8, %v2456_v43, %v6104_v12  ;;  %v8195_v58 = vcombine.low %v6906_v14, %v6907_v10  ;;  %v2455_v50 = vcombine.high %v2439_v56, %v2439_v56 }
 0x15b   : > { %9294 = vrot.lane.b32.xlu0 %v8843_v17, %s12813_s30  ;;  %v2457_v19 = vcombine.high %v2453_v15, %v2453_v15  ;;  %v6908_v40 = vsel %vm6697_vm8, %v2454_v51, %v6100_v16  ;;  %v4745_v2 = vcombine.high %v4741_v60, %v4741_v60  ;;  %v6108_v26 = vrot.slane %v4741_v60, %v12982_v11 }
 0x15c   : > { %v6112_v54 = vrot.slane %v4743_v33, %v12982_v11  ;;  %v8196_v23 = vcombine.low %v6908_v40, %v6909_v22  ;;  %v8203_v52 = vrot.slane %v8195_v58, %v13028_v32  ;;  %v6120_v21 = vrot.slane %v14514_v4, %v12982_v11 }
 0x15d   : > { %v532_v46 = vmul.f32 0.25, %v483_v29  ;;  %v6116_v34 = vrot.slane %v4745_v2, %v12982_v11  ;;  %v6910_v24 = vsel %vm6697_vm8, %v2439_v56, %v6108_v26  ;;  %v14550_v17 = vmul.f32 0.25, %v484_v57 }
 0x15e   : > { %v6911_v12 = vsel %vm6697_vm8, %v2453_v15, %v6112_v54  ;;  %v8210_v51 = vrot.slane %v8196_v23, %v13028_v32  ;;  %v6913_v60 = vsel %vm6697_vm8, %v2457_v19, %v6120_v21  ;;  %v573_v43 = vmul.f32 0.75, %v483_v29 }
 0x15f   : > { %v8212_v33 = vcombine.low %v6910_v24, %v6911_v12  ;;  %v6912_v58 = vsel %vm6697_vm8, %v2455_v50, %v6116_v34  ;;  %v14555_v16 = vmul.f32 0.75, %v484_v57  ;;  %v926_v14 = vrot.slane %v532_v46, 1 }
 0x160   : > { %v17386_v10 = vrot.slane %v14550_v17, 1  ;;  %v8211_v22 = vcombine.low %v8203_v52, %v8210_v51  ;;  %v8213_v40 = vcombine.low %v6912_v58, %v6913_v60  ;;  %v692_v15 = vrot.slane %v573_v43, 1 }
 0x161   : > { %v8220_v56 = vrot.slane %v8212_v33, %v13028_v32  ;;  %v17385_v2 = vrot.slane %v14555_v16, 1  ;;  %v17504_v29 = vrot.slane %v14463_v63, 1  ;;  %v17505_v50 = vrot.slane %v14432_v25, 1 }
 0x162   : > { %v928_v19 = vsel %vm666_vm5, %v926_v14, %v17386_v10  ;;  %v4746_v26 = vcombine.high %v14477_v27, %v14477_v27  ;;  %8660 = vst.msk [vmem:[#allocation2 + $0x209] sm:$0xff] %vm8607_vm9, %v8211_v22  ;;  %v8227_v54 = vrot.slane %v8213_v40, %v13028_v32  ;;  %v4761_v21 = vcombine.high %v14500_v44, %v14500_v44 }
 0x163   : > { %v736_v57 = vsel %vm666_vm5, %v17505_v50, %v17504_v29  ;;  %v1060_v23 = vadd.f32 %v928_v19, %v573_v43  ;;  %v694_v25 = vsel %vm666_vm5, %v692_v15, %v17385_v2  ;;  %v4791_v27 = vcombine.high %v14514_v4, %v14514_v4 }
 0x164   : > { %v14573_v52 = vadd.f32 %v736_v57, %v14430_v53  ;;  %v14581_v34 = vrot.slane %v4746_v26, %v13025_v31  ;;  %v14586_v24 = vmul.f32 0.25, %v14528_v8  ;;  %v8228_v12 = vcombine.low %v8220_v56, %v8227_v54 }
 0x165   : > { %v14588_v51 = vadd.f32 %v694_v25, %v532_v46  ;;  %v3801_v53 = vcombine.high %v1060_v23, %v1060_v23  ;;  %v3808_v60 = vrot.slane %v1060_v23, %v13025_v31  ;;  %v4783_v43 = vrot.slane %v4761_v21, %v13025_v31 }
 0x166   : > { %v2465_v44 = vrot.slane %v14573_v52, %v13025_v31  ;;  %v14595_v33 = vrot.slane %v14581_v34, %v13025_v31  ;;  %v6128_v4 = vrot.slane %v4791_v27, %v12982_v11  ;;  %8661 = vst.msk [vmem:[#allocation2 + $0x211] sm:$0xff] %vm8607_vm9, %v8228_v12 }
 0x167   : > { %v1632_v46 = vrot.slane %v14588_v51, %v13025_v31  ;;  %v3815_v58 = vrot.slane %v3801_v53, %v13025_v31  ;;  %v3816_v14 = vcombine.high %v3808_v60, %v3808_v60  ;;  %v3824_v22 = vrot.slane %v3808_v60, %v13025_v31 }
 0x168   : > { %v2473_v40 = vcombine.high %v2465_v44, %v2465_v44  ;;  %v2481_v56 = vrot.slane %v2465_v44, %v13025_v31  ;;  %v4793_v15 = vcombine.high %v4783_v43, %v4783_v43  ;;  %v6124_v19 = vrot.slane %v4783_v43, %v12982_v11 }
 0x169   : > { %v1640_v29 = vcombine.high %v1632_v46, %v1632_v46  ;;  %v1648_v50 = vrot.slane %v1632_v46, %v13025_v31  ;;  %v3831_v57 = vrot.slane %v3815_v58, %v13025_v31  ;;  %v3838_v26 = vrot.slane %v3816_v14, %v13025_v31  ;;  %v8804_v54 = vld [vmem:[#allocation2 + $0x209] sm:$0xff] }
 0x16a   : > { %v3846_v23 = vcombine.high %v3824_v22, %v3824_v22  ;;  %v2495_v21 = vrot.slane %v2473_v40, %v13025_v31  ;;  %v2503_v25 = vcombine.high %v2481_v56, %v2481_v56  ;;  %v6132_v27 = vrot.slane %v4793_v15, %v12982_v11  ;;  %9072 = vrot.lane.b32.xlu1 %v8804_v54, %s12812_s27 }
 0x16b   : > { %v1662_v12 = vrot.slane %v1640_v29, %v13025_v31  ;;  %v1670_v53 = vcombine.high %v1648_v50, %v1648_v50  ;;  %v3848_v60 = vcombine.high %v3838_v26, %v3838_v26  ;;  %v5580_v44 = vrot.slane %v3838_v26, %v12982_v11 }
 0x16c   : > { %v5584_v43 = vrot.slane %v3846_v23, %v12982_v11  ;;  %v5592_v46 = vrot.slane %v3831_v57, %v12982_v11  ;;  %v2505_v14 = vcombine.high %v2495_v21, %v2495_v21  ;;  %v6136_v22 = vrot.slane %v14595_v33, %v12982_v11 }
 0x16d   : > { %v1672_v40 = vcombine.high %v1662_v12, %v1662_v12  ;;  %v5588_v2 = vrot.slane %v3848_v60, %v12982_v11  ;;  %v6778_v15 = vsel %vm6697_vm8, %v1648_v50, %v5580_v44  ;;  %v6914_v54 = vsel %vm6697_vm8, %v2481_v56, %v6124_v19  ;;  %v8805_v29 = vld [vmem:[#allocation2 + $0x211] sm:$0xff] }
 0x16e   : > { %v8876_v10 = vld [vmem:[#allocation2 + $0x20a] sm:$0xff]  ;;  %v6779_v49 = vsel %vm6697_vm8, %v1662_v12, %v5584_v43  ;;  %v6915_v26 = vsel %vm6697_vm8, %v2495_v21, %v6128_v4  ;;  %v6916_v23 = vsel %vm6697_vm8, %v2503_v25, %v6132_v27  ;;  %v6917_v18 = vsel %vm6697_vm8, %v2505_v14, %v6136_v22  ;;  %9074 = vrot.lane.b32.xlu1 %v8805_v29, %s12812_s27  ;;  %v8979_v21 = vpop.permute.xlu1 %8978 }
 0x16f   : > { %9360 = vrot.lane.b32.xlu0 %v8876_v10, %s12813_s30  ;;  %v6780_v60 = vsel %vm6697_vm8, %v1670_v53, %v5588_v2  ;;  %v6781_v50 = vsel %vm6697_vm8, %v1672_v40, %v5592_v46  ;;  %v7651_v44 = vcombine.low %v6778_v15, %v6779_v49  ;;  %v929_v56 = vrot.slane %v14586_v24, 1  ;;  %v8685_v25 = vld [vmem:[#allocation2 + $0x30] sm:$0xff] }
 0x170   : > { %v7652_v19 = vcombine.low %v6780_v60, %v6781_v50  ;;  %v8229_v13 = vcombine.low %v6914_v54, %v6915_v26  ;;  %v8230_v12 = vcombine.low %v6916_v23, %v6917_v18  ;;  %v1625_v4 = vcombine.high %v14588_v51, %v14588_v51 }
 0x171   : > { %v7659_v27 = vrot.slane %v7651_v44, %v13028_v32  ;;  %v17506_v10 = vrot.slane %v14550_v17, 1  ;;  %v3817_v53 = vcombine.high %v3815_v58, %v3815_v58  ;;  %v3847_v49 = vcombine.high %v3831_v57, %v3831_v57 }
 0x172   : > { %v7666_v43 = vrot.slane %v7652_v19, %v13028_v32  ;;  %v8237_v46 = vrot.slane %v8229_v13, %v13028_v32  ;;  %v8244_v18 = vrot.slane %v8230_v12, %v13028_v32  ;;  %v1639_v14 = vrot.slane %v1625_v4, %v13025_v31  ;;  %v14658_v4 = vpop.permute.xlu0 %9270 }
 0x173   : > { %v930_v2 = vsel %vm666_vm5, %v17506_v10, %v929_v56  ;;  %v3845_v22 = vrot.slane %v3817_v53, %v13025_v31  ;;  %v5600_v40 = vrot.slane %v3847_v49, %v12982_v11  ;;  %v14646_v15 = vsel %vm8607_vm9, %v8685_v25, %v8979_v21 }
 0x174   : > { %v1061_v51 = vadd.f32 %v930_v2, %v14555_v16  ;;  %v7667_v54 = vcombine.low %v7659_v27, %v7666_v43  ;;  %v8245_v58 = vcombine.low %v8237_v46, %v8244_v18  ;;  %v14650_v29 = vmul.f32 0.75, %v14528_v8 }
 0x175   : > { %v1641_v13 = vcombine.high %v1639_v14, %v1639_v14  ;;  %v1655_v26 = vrot.slane %v1639_v14, %v13025_v31  ;;  %v3849_v23 = vcombine.high %v3845_v22, %v3845_v22  ;;  %v5596_v60 = vrot.slane %v3845_v22, %v12982_v11 }
 0x176   : > { %v3857_v57 = vrot.slane %v1061_v51, %v13025_v31  ;;  %8628 = vst.msk [vmem:[#allocation2 + $0xc9] sm:$0xff] %vm8607_vm9, %v7667_v54  ;;  %8662 = vst.msk [vmem:[#allocation2 + $0x219] sm:$0xff] %vm8607_vm9, %v8245_v58  ;;  %v695_v44 = vrot.slane %v14650_v29, 1  ;;  %v3850_v19 = vcombine.high %v1061_v51, %v1061_v51  ;;  %v17507_v2 = vrot.slane %v14555_v16, 1 }
 0x177   : > { %v1669_v8 = vrot.slane %v1641_v13, %v13025_v31  ;;  %v1671_v21 = vcombine.high %v1655_v26, %v1655_v26  ;;  %v5604_v25 = vrot.slane %v3849_v23, %v12982_v11  ;;  %v6782_v27 = vsel %vm6697_vm8, %v1655_v26, %v5596_v60  ;;  %v14688_v60 = vld [vmem:[%s12987_s24 + $0xc0] sm:$0xff] }
 0x178   : > { %v3873_v50 = vrot.slane %v3857_v57, %v13025_v31  ;;  %v3865_v12 = vcombine.high %v3857_v57, %v3857_v57  ;;  %v696_v53 = vsel %vm666_vm5, %v17507_v2, %v695_v44  ;;  %v14668_v49 = vrot.slane %v3850_v19, %v13025_v31  ;;  %v9047_v57 = vpop.permute.xlu1 %9046 }
 0x179   : > { %v1673_v46 = vcombine.high %v1669_v8, %v1669_v8  ;;  %v6783_v18 = vsel %vm6697_vm8, %v1669_v8, %v5600_v40  ;;  %v6784_v51 = vsel %vm6697_vm8, %v1671_v21, %v5604_v25  ;;  %v14674_v14 = vadd.f32 %v696_v53, %v14550_v17  ;;  %v9337_v8 = vpop.permute.xlu0 %9336 }
 0x17a   : > { %v5608_v10 = vrot.slane %v3873_v50, %v12982_v11  ;;  %v3887_v43 = vrot.slane %v3865_v12, %v13025_v31  ;;  %v7668_v22 = vcombine.low %v6782_v27, %v6783_v18  ;;  %v14678_v16 = vrot.slane %v14668_v49, %v13025_v31 }
 0x17b   : > { %v3895_v54 = vcombine.high %v3873_v50, %v3873_v50  ;;  %v1681_v26 = vrot.slane %v14674_v14, %v13025_v31  ;;  %v17508_v23 = vrot.slane %v14434_v37, 1  ;;  %v2458_v37 = vcombine.high %v14573_v52, %v14573_v52 }
 0x17c   : > { %v3897_v58 = vcombine.high %v3887_v43, %v3887_v43  ;;  %v6785_v13 = vsel %vm6697_vm8, %v1673_v46, %v5608_v10  ;;  %v5612_v40 = vrot.slane %v3887_v43, %v12982_v11  ;;  %v7676_v19 = vrot.slane %v7668_v22, %v13028_v32 }
 0x17d   : > { %v1086_v17 = vadd.f32 %v17508_v23, %v14463_v63  ;;  %v7669_v44 = vcombine.low %v6784_v51, %v6785_v13  ;;  %v5616_v50 = vrot.slane %v3895_v54, %v12982_v11  ;;  %v8772_v21 = vld [vmem:[#allocation2 + $0xc9] sm:$0xff]  ;;  %v8877_v25 = vld [vmem:[#allocation2 + $0x212] sm:$0xff]  ;;  %v1689_v27 = vcombine.high %v1681_v26, %v1681_v26 }
 0x17e   : > { %v5620_v12 = vrot.slane %v3897_v58, %v12982_v11  ;;  %v1697_v10 = vrot.slane %v1681_v26, %v13025_v31  ;;  %v5624_v2 = vrot.slane %v14678_v16, %v12982_v11  ;;  %9008 = vrot.lane.b32.xlu1 %v8772_v21, %s12812_s27  ;;  %9362 = vrot.lane.b32.xlu0 %v8877_v25, %s12813_s30  ;;  %v14706_v46 = vmul.f32 0.25, %v14688_v60  ;;  %v8983_v26 = vpop.permute.xlu1 %8982 }
 0x17f   : > { %v7683_v63 = vrot.slane %v7669_v44, %v13028_v32  ;;  %v4762_v53 = vcombine.high %v14581_v34, %v14581_v34  ;;  %v4792_v43 = vcombine.high %v14595_v33, %v14595_v33  ;;  %v1711_v18 = vrot.slane %v1689_v27, %v13025_v31 }
 0x180   : > { %17509 = vst [vmem:[#allocation26_spill] sm:$0xff] %v14706_v46  ;;  %v1719_v51 = vcombine.high %v1697_v10, %v1697_v10  ;;  %v6786_v52 = vsel %vm6697_vm8, %v1697_v10, %v5612_v40  ;;  %v2472_v22 = vrot.slane %v2458_v37, %v13025_v31  ;;  %v4801_v13 = vrot.slane %v1086_v17, %v13025_v31  ;;  %v14719_v10 = vpop.permute.xlu0 %9338 }
 0x181   : > { %v7684_v54 = vcombine.low %v7676_v19, %v7683_v63  ;;  %v4790_v58 = vrot.slane %v4762_v53, %v13025_v31  ;;  %v6144_v34 = vrot.slane %v4792_v43, %v12982_v11  ;;  %v1721_v23 = vcombine.high %v1711_v18, %v1711_v18 }
 0x182   : > { %v6787_v33 = vsel %vm6697_vm8, %v1711_v18, %v5616_v50  ;;  %v6788_v44 = vsel %vm6697_vm8, %v1719_v51, %v5620_v12  ;;  %v2474_v21 = vcombine.high %v2472_v22, %v2472_v22  ;;  %v2488_v40 = vrot.slane %v2472_v22, %v13025_v31  ;;  %v8719_v12 = vld [vmem:[#allocation2 + $0x180] sm:$0xff] }
 0x183   : > { %8629 = vst.msk [vmem:[#allocation2 + $0xd1] sm:$0xff] %vm8607_vm9, %v7684_v54  ;;  %v7685_v25 = vcombine.low %v6786_v52, %v6787_v33  ;;  %v4794_v27 = vcombine.high %v4790_v58, %v4790_v58  ;;  %v4808_v19 = vrot.slane %v4801_v13, %v13025_v31  ;;  %v6789_v17 = vsel %vm6697_vm8, %v1721_v23, %v5624_v2  ;;  %v8687_v2 = vld [vmem:[#allocation2 + $0x40] sm:$0xff]  ;;  %v9051_v33 = vpop.permute.xlu1 %9050 }
 0x184   : > { %v2502_v37 = vrot.slane %v2474_v21, %v13025_v31  ;;  %v6140_v63 = vrot.slane %v4790_v58, %v12982_v11  ;;  %v14727_v50 = vsel %vm9544_vm15, %v14646_v15, %v14349_v42  ;;  %v7686_v53 = vcombine.low %v6788_v44, %v6789_v17 }
 0x185   : > { %17510 = vst [vmem:[#allocation27_spill] sm:$0xff] %v14727_v50  ;;  %v7693_v43 = vrot.slane %v7685_v25, %v13028_v32  ;;  %v2504_v18 = vcombine.high %v2488_v40, %v2488_v40  ;;  %v6148_v51 = vrot.slane %v4794_v27, %v12982_v11  ;;  %12336 = vmatmul.mubr.msk.f32.vlgmr.msra.gmra.mxu0 %vm9622_vm2, %v14727_v50  ;;  %v14752_v27 = vld [vmem:[%s12987_s24 + $0xc8] sm:$0xff] }
 0x186   : > { %v2506_v52 = vcombine.high %v2502_v37, %v2502_v37  ;;  %v6152_v22 = vrot.slane %v4808_v19, %v12982_v11  ;;  %v6918_v54 = vsel %vm6697_vm8, %v2488_v40, %v6140_v63  ;;  %v6919_v42 = vsel %vm6697_vm8, %v2502_v37, %v6144_v34  ;;  %12338 = vmatprep.mubr.msk.f32.mxu0 %vm9622_vm2, %v14493_v5  ;;  %v8721_v40 = vld [vmem:[#allocation2 + $0x198] sm:$0xff]  ;;  %v14761_v37 = vld [vmem:[%s12987_s24 + $0xd0] sm:$0x3] }
 0x187   : > { %v7700_v15 = vrot.slane %v7686_v53, %v13028_v32  ;;  %v6920_v58 = vsel %vm6697_vm8, %v2504_v18, %v6148_v51  ;;  %v8246_v13 = vcombine.low %v6918_v54, %v6919_v42  ;;  %v9511_v23 = vsel %vm8607_vm9, %v8719_v12, %v9047_v57  ;;  %v8987_v42 = vpop.permute.xlu1 %8986 }
 0x188   : > { %v6921_v44 = vsel %vm6697_vm8, %v2506_v52, %v6152_v22  ;;  %v14744_v21 = vsel %vm9544_vm15, %v9511_v23, %v14425_v7  ;;  %v14748_v34 = vsel %vm9544_vm15, %v14406_v0, %v9337_v8  ;;  %v9479_v25 = vsel %vm8607_vm9, %v8687_v2, %v8983_v26  ;;  %v9273_v0 = vpop.permute.xlu0 %9272 }
 0x189   : > { %17511 = vst [vmem:[#allocation28_spill] sm:$0xff] %v14744_v21  ;;  %17512 = vst [vmem:[#allocation29_spill] sm:$0xff] %v14748_v34  ;;  %v7701_v19 = vcombine.low %v7693_v43, %v7700_v15  ;;  %v8247_v17 = vcombine.low %v6920_v58, %v6921_v44  ;;  %v8254_v57 = vrot.slane %v8246_v13, %v13028_v32  ;;  %12387 = vmatmul.mubr.msk.f32.gmra.mxu1 %vm9622_vm2, %v14744_v21 }
 0x18a   : > { %v1062_v7 = vadd.f32 %v929_v56, %v14650_v29  ;;  %v8773_v8 = vld [vmem:[#allocation2 + $0xd1] sm:$0xff]  ;;  %v1674_v26 = vcombine.high %v14674_v14, %v14674_v14  ;;  %v3866_v12 = vcombine.high %v14668_v49, %v14668_v49  ;;  %v3896_v53 = vcombine.high %v14678_v16, %v14678_v16  ;;  %12389 = vmatprep.mubr.msk.f32.mxu1 %vm9622_vm2, %v14748_v34  ;;  %v8806_v16 = vld [vmem:[#allocation2 + $0x219] sm:$0xff] }
 0x18b   : > { %v8844_v63 = vld [vmem:[#allocation2 + $0xca] sm:$0xff]  ;;  %v14773_v24 = vsel %vm9544_vm15, %v9479_v25, %v14658_v4  ;;  %9010 = vrot.lane.b32.xlu1 %v8773_v8, %s12812_s27  ;;  %8630 = vst.msk [vmem:[#allocation2 + $0xd9] sm:$0xff] %vm8607_vm9, %v7701_v19  ;;  %v8261_v56 = vrot.slane %v8247_v17, %v13028_v32  ;;  %v9513_v49 = vsel %vm8607_vm9, %v8721_v40, %v9051_v33  ;;  %v14782_v14 = vmul.f32 0.25, %v14752_v27  ;;  %v8689_v33 = vld [vmem:[#allocation2 + $0x58] sm:$0xff] }
 0x18c   : > { %17513 = vst [vmem:[#allocation30_spill] sm:$0xff] %v14773_v24  ;;  %9296 = vrot.lane.b32.xlu0 %v8844_v63, %s12813_s30  ;;  %v3905_v29 = vrot.slane %v1062_v7, %v13025_v31  ;;  %v1688_v43 = vrot.slane %v1674_v26, %v13025_v31  ;;  %v3894_v4 = vrot.slane %v3866_v12, %v13025_v31  ;;  %v14790_v51 = vmul.f32 0.25, %v14761_v37  ;;  %v9275_v40 = vpop.permute.xlu0 %9274 }
 0x18d   : > { %17514 = vst [vmem:[#allocation31_spill] sm:$0xff] %v14782_v14  ;;  %v5632_v18 = vrot.slane %v3896_v53, %v12982_v11  ;;  %12339 = vmatmul.mubr.msk.f32.gmra.mxu0 %vm9622_vm2, %v14773_v24  ;;  %v8262_v2 = vcombine.low %v8254_v57, %v8261_v56  ;;  %v319_v22 = vadd.f32 %v14706_v46, %v14373_v55  ;;  %v374_v25 = vadd.s32 14, %v12971_v6 }
 0x18e   : > { %17515 = vst [vmem:[#allocation32_spill] sm:$0xff] %v14790_v51  ;;  %v3912_v52 = vrot.slane %v3905_v29, %v13025_v31  ;;  %v320_v54 = vadd.f32 %v14782_v14, %v14387_v28  ;;  %v1690_v15 = vcombine.high %v1688_v43, %v1688_v43  ;;  %v1704_v58 = vrot.slane %v1688_v43, %v13025_v31 }
 0x18f   : > { %v3898_v13 = vcombine.high %v3894_v4, %v3894_v4  ;;  %v5628_v23 = vrot.slane %v3894_v4, %v12982_v11  ;;  %9076 = vrot.lane.b32.xlu1 %v8806_v16, %s12812_s27  ;;  %8663 = vst.msk [vmem:[#allocation2 + $0x221] sm:$0xff] %vm8607_vm9, %v8262_v2  ;;  %v321_v55 = vadd.f32 %v14790_v51, %v14391_v20  ;;  %vm392_vm11 = vcmp.ge.s32.totalorder %v374_v25, 0  ;;  %v9055_v16 = vpop.permute.xlu1 %9054 }
 0x190   : > { %v5640_v44 = vrot.slane %v3912_v52, %v12982_v11  ;;  %v14807_v28 = vsel %vm9544_vm15, %v9513_v49, %v14719_v10  ;;  %v1718_v19 = vrot.slane %v1690_v15, %v13025_v31  ;;  %v1720_v17 = vcombine.high %v1704_v58, %v1704_v58  ;;  %v8723_v49 = vld [vmem:[#allocation2 + $0x1a8] sm:$0xff] }
 0x191   : > { %17516 = vst [vmem:[#allocation33_spill] sm:$0xff] %v14807_v28  ;;  %v5636_v57 = vrot.slane %v3898_v13, %v12982_v11  ;;  %v6790_v7 = vsel %vm6697_vm8, %v1704_v58, %v5628_v23  ;;  %12390 = vmatmul.mubr.msk.f32.gmra.mxu1 %vm9622_vm2, %v14807_v28  ;;  %vm410_vm12 = vcmp.lt.s32.totalorder %v374_v25, 32  ;;  %v14816_v20 = vsel %vm9544_vm15, %v14417_v45, %v9273_v0 }
 0x192   : > { %17517 = vst [vmem:[#allocation34_spill] sm:$0xff] %v14816_v20  ;;  %v9481_v10 = vsel %vm8607_vm9, %v8689_v33, %v8987_v42  ;;  %v8845_v8 = vld [vmem:[#allocation2 + $0xd2] sm:$0xff]  ;;  %v1722_v63 = vcombine.high %v1718_v19, %v1718_v19  ;;  %v6791_v26 = vsel %vm6697_vm8, %v1718_v19, %v5632_v18  ;;  %vm428_vm13 = vmand %vm392_vm11, %vm410_vm12  ;;  %12341 = vmatprep.mubr.msk.f32.mxu0 %vm9622_vm2, %v14816_v20  ;;  %v17519_v19 = vld [vmem:[#allocation11_spill] sm:$0xff] }
 0x193   : > { %v6792_v12 = vsel %vm6697_vm8, %v1720_v17, %v5636_v57  ;;  %v14824_v53 = vsel %vm9544_vm15, %v9481_v10, %v9275_v40  ;;  %9298 = vrot.lane.b32.xlu0 %v8845_v8, %s12813_s30  ;;  %v7702_v56 = vcombine.low %v6790_v7, %v6791_v26  ;;  %v510_v45 = vsel %vm428_vm13, %v319_v22, 0.0  ;;  %v8774_v57 = vld [vmem:[#allocation2 + $0xd9] sm:$0xff]  ;;  %v17520_v8 = vld [vmem:[#allocation12_spill] sm:$0xff] }
 0x194   : > { %17518 = vst [vmem:[#allocation35_spill] sm:$0xff] %v14824_v53  ;;  %v511_v0 = vsel %vm428_vm13, %v320_v54, 0.0  ;;  %v512_v29 = vsel %vm428_vm13, %v321_v55, 0.0  ;;  %12342 = vmatmul.mubr.msk.f32.gmra.mxu0 %vm9622_vm2, %v14824_v53  ;;  %v6793_v43 = vsel %vm6697_vm8, %v1722_v63, %v5640_v44  ;;  %v550_v4 = vmul.f32 0.25, %v510_v45  ;;  %v17521_v26 = vld [vmem:[#allocation13_spill] sm:$0xff] }
 0x195   : > { %v14830_v18 = vmul.f32 0.25, %v511_v0  ;;  %v600_v2 = vmul.f32 0.75, %v510_v45  ;;  %v7703_v52 = vcombine.low %v6792_v12, %v6793_v43  ;;  %v7710_v42 = vrot.slane %v7702_v56, %v13028_v32  ;;  %v9341_v45 = vpop.permute.xlu0 %9340 }
 0x196   : > { %v14833_v15 = vmul.f32 0.75, %v511_v0  ;;  %v14835_v58 = vmul.f32 0.25, %v512_v29  ;;  %v8807_v22 = vld [vmem:[#allocation2 + $0x221] sm:$0xff]  ;;  %v971_v23 = vrot.slane %v550_v4, 1  ;;  %v14839_v55 = vsel %vm8607_vm9, %v8723_v49, %v9055_v16 }
 0x197   : > { %v8878_v54 = vld [vmem:[#allocation2 + $0x21a] sm:$0xff]  ;;  %v737_v13 = vrot.slane %v600_v2, 1  ;;  %v972_v33 = vrot.slane %v14830_v18, 1  ;;  %9078 = vrot.lane.b32.xlu1 %v8807_v22, %s12812_s27  ;;  %v7717_v44 = vrot.slane %v7703_v52, %v13028_v32  ;;  %v307_v17 = vadd.f32 %v17519_v19, %v14420_v48  ;;  %v8879_v7 = vld [vmem:[#allocation2 + $0x222] sm:$0xff] }
 0x198   : > { %9364 = vrot.lane.b32.xlu0 %v8878_v54, %s12813_s30  ;;  %v17392_v25 = vrot.slane %v14833_v15, 1  ;;  %v17391_v40 = vrot.slane %v14835_v58, 1  ;;  %v308_v63 = vadd.f32 %v17520_v8, %v14423_v35  ;;  %v309_v12 = vadd.f32 %v17521_v26, %v14428_v38 }
 0x199   : > { %v973_v10 = vsel %vm666_vm5, %v971_v23, %v972_v33  ;;  %v366_v56 = vadd.s32 6, %v12971_v6  ;;  %v7718_v0 = vcombine.low %v7710_v42, %v7717_v44  ;;  %v14875_v42 = vmul.f32 0.75, %v512_v29 }
 0x19a   : > { %v739_v49 = vsel %vm666_vm5, %v737_v13, %v17392_v25  ;;  %v1087_v16 = vadd.f32 %v973_v10, %v600_v2  ;;  %v975_v48 = vsel %vm666_vm5, %v972_v33, %v17391_v40 }
 0x19b   : > { %v821_v43 = vadd.f32 %v739_v49, %v550_v4  ;;  %v14861_v52 = vadd.f32 %v975_v48, %v14833_v15  ;;  %vm384_vm14 = vcmp.ge.s32.totalorder %v366_v56, 0  ;;  %vm402_vm0 = vcmp.lt.s32.totalorder %v366_v56, 32  ;;  %9012 = vrot.lane.b32.xlu1 %v8774_v57, %s12812_s27  ;;  %8631 = vst.msk [vmem:[#allocation2 + $0xe1] sm:$0xff] %vm8607_vm9, %v7718_v0 }
 0x19c   : > { %9366 = vrot.lane.b32.xlu0 %v8879_v7, %s12813_s30  ;;  %v4809_v35 = vcombine.high %v1087_v16, %v1087_v16  ;;  %v4816_v38 = vrot.slane %v1087_v16, %v13025_v31  ;;  %vm14867_vm1 = vmand %vm384_vm14, %vm402_vm0  ;;  %v14873_v4 = vsel %vm9544_vm15, %v14453_v3, %v9341_v45 }
 0x19d   : > { %17524 = vst [vmem:[#allocation11_spill] sm:$0xff] %v14873_v4  ;;  %v2514_v22 = vrot.slane %v821_v43, %v13025_v31  ;;  %v2507_v54 = vcombine.high %v821_v43, %v821_v43  ;;  %v14880_v13 = vrot.slane %v14861_v52, %v13025_v31  ;;  %v486_v23 = vsel %vm14867_vm1, %v307_v17, 0.0  ;;  %12392 = vmatprep.mubr.msk.f32.mxu1 %vm9622_vm2, %v14873_v4 }
 0x19e   : > { %v4823_v33 = vrot.slane %v4809_v35, %v13025_v31  ;;  %v4824_v44 = vcombine.high %v4816_v38, %v4816_v38  ;;  %v4832_v3 = vrot.slane %v4816_v38, %v13025_v31  ;;  %v487_v29 = vsel %vm14867_vm1, %v308_v63, 0.0 }
 0x19f   : > { %v2522_v19 = vcombine.high %v2514_v22, %v2514_v22  ;;  %v2530_v57 = vrot.slane %v2514_v22, %v13025_v31  ;;  %v2521_v7 = vrot.slane %v2507_v54, %v13025_v31  ;;  %v14894_v10 = vrot.slane %v14880_v13, %v13025_v31 }
 0x1a0   : > { %v4839_v17 = vrot.slane %v4823_v33, %v13025_v31  ;;  %v4846_v8 = vrot.slane %v4824_v44, %v13025_v31  ;;  %v4854_v26 = vcombine.high %v4832_v3, %v4832_v3  ;;  %v4825_v56 = vcombine.high %v4823_v33, %v4823_v33 }
 0x1a1   : > { %v2544_v45 = vrot.slane %v2522_v19, %v13025_v31  ;;  %v2552_v0 = vcombine.high %v2530_v57, %v2530_v57  ;;  %v2523_v49 = vcombine.high %v2521_v7, %v2521_v7  ;;  %v2537_v63 = vrot.slane %v2521_v7, %v13025_v31 }
 0x1a2   : > { %v4856_v16 = vcombine.high %v4846_v8, %v4846_v8  ;;  %v6156_v48 = vrot.slane %v4846_v8, %v12982_v11  ;;  %v6160_v43 = vrot.slane %v4854_v26, %v12982_v11  ;;  %v6168_v35 = vrot.slane %v4839_v17, %v12982_v11  ;;  %v8775_v38 = vld [vmem:[#allocation2 + $0xe1] sm:$0xff] }
 0x1a3   : > { %v8846_v22 = vld [vmem:[#allocation2 + $0xda] sm:$0xff]  ;;  %v2554_v54 = vcombine.high %v2544_v45, %v2544_v45  ;;  %v2551_v44 = vrot.slane %v2523_v49, %v13025_v31  ;;  %v2553_v3 = vcombine.high %v2537_v63, %v2537_v63  ;;  %v4853_v33 = vrot.slane %v4825_v56, %v13025_v31  ;;  %9014 = vrot.lane.b32.xlu1 %v8775_v38, %s12812_s27  ;;  %v8847_v25 = vld [vmem:[#allocation2 + $0xe2] sm:$0xff] }
 0x1a4   : > { %9300 = vrot.lane.b32.xlu0 %v8846_v22, %s12813_s30  ;;  %v6164_v19 = vrot.slane %v4856_v16, %v12982_v11  ;;  %v6922_v7 = vsel %vm6697_vm8, %v2530_v57, %v6156_v48  ;;  %v6923_v8 = vsel %vm6697_vm8, %v2544_v45, %v6160_v43  ;;  %v14912_v26 = vsel %vm14867_vm1, %v309_v12, 0.0 }
 0x1a5   : > { %v6925_v40 = vsel %vm6697_vm8, %v2554_v54, %v6168_v35  ;;  %v8263_v49 = vcombine.low %v6922_v7, %v6923_v8  ;;  %v2555_v4 = vcombine.high %v2551_v44, %v2551_v44  ;;  %v4855_v56 = vcombine.high %v4839_v17, %v4839_v17  ;;  %v8989_v7 = vpop.permute.xlu1 %8988 }
 0x1a6   : > { %v6924_v38 = vsel %vm6697_vm8, %v2552_v0, %v6164_v19  ;;  %v4857_v28 = vcombine.high %v4853_v33, %v4853_v33  ;;  %v6172_v22 = vrot.slane %v4853_v33, %v12982_v11  ;;  %v6184_v57 = vrot.slane %v14894_v10, %v12982_v11  ;;  %v8690_v19 = vld [vmem:[#allocation2 + $0x60] sm:$0xff] }
 0x1a7   : > { %v8264_v16 = vcombine.low %v6924_v38, %v6925_v40  ;;  %v8271_v45 = vrot.slane %v8263_v49, %v13028_v32  ;;  %v6176_v12 = vrot.slane %v4855_v56, %v12982_v11  ;;  %v534_v2 = vmul.f32 0.25, %v486_v23 }
 0x1a8   : > { %9302 = vrot.lane.b32.xlu0 %v8847_v25, %s12813_s30  ;;  %v6180_v48 = vrot.slane %v4857_v28, %v12982_v11  ;;  %v6926_v17 = vsel %vm6697_vm8, %v2537_v63, %v6172_v22  ;;  %v6929_v0 = vsel %vm6697_vm8, %v2555_v4, %v6184_v57  ;;  %v14925_v43 = vmul.f32 0.25, %v487_v29 }
 0x1a9   : > { %v8278_v35 = vrot.slane %v8264_v16, %v13028_v32  ;;  %v6927_v54 = vsel %vm6697_vm8, %v2551_v44, %v6176_v12  ;;  %v576_v40 = vmul.f32 0.75, %v486_v23  ;;  %v14929_v33 = vmul.f32 0.75, %v487_v29 }
 0x1aa   : > { %v6928_v8 = vsel %vm6697_vm8, %v2553_v3, %v6180_v48  ;;  %v8280_v25 = vcombine.low %v6926_v17, %v6927_v54  ;;  %v931_v49 = vrot.slane %v534_v2, 1  ;;  %v17398_v28 = vrot.slane %v14925_v43, 1 }
 0x1ab   : > { %v8279_v63 = vcombine.low %v8271_v45, %v8278_v35  ;;  %v8281_v56 = vcombine.low %v6928_v8, %v6929_v0  ;;  %v697_v4 = vrot.slane %v576_v40, 1  ;;  %v17397_v38 = vrot.slane %v14929_v33, 1 }
 0x1ac   : > { %v8288_v22 = vrot.slane %v8280_v25, %v13028_v32  ;;  %v933_v23 = vsel %vm666_vm5, %v931_v49, %v17398_v28  ;;  %v14939_v29 = vsel %vm8607_vm9, %v8690_v19, %v8989_v7  ;;  %v740_v44 = vrot.slane %v14875_v42, 1 }
 0x1ad   : > { %8664 = vst.msk [vmem:[#allocation2 + $0x231] sm:$0xff] %vm8607_vm9, %v8279_v63  ;;  %v8295_v3 = vrot.slane %v8281_v56, %v13028_v32  ;;  %v699_v57 = vsel %vm666_vm5, %v697_v4, %v17397_v38  ;;  %v1063_v16 = vadd.f32 %v933_v23, %v576_v40  ;;  %v4858_v45 = vcombine.high %v14861_v52, %v14861_v52  ;;  %v8991_v38 = vpop.permute.xlu1 %8990 }
 0x1ae   : > { %v14949_v12 = vadd.f32 %v699_v57, %v534_v2  ;;  %v17525_v48 = vrot.slane %v14833_v15, 1  ;;  %v4873_v0 = vcombine.high %v14880_v13, %v14880_v13  ;;  %v4903_v35 = vcombine.high %v14894_v10, %v14894_v10 }
 0x1af   : > { %v8296_v54 = vcombine.low %v8288_v22, %v8295_v3  ;;  %v3913_v19 = vcombine.high %v1063_v16, %v1063_v16  ;;  %v3920_v7 = vrot.slane %v1063_v16, %v13025_v31  ;;  %v14965_v15 = vrot.slane %v4858_v45, %v13025_v31 }
 0x1b0   : > { %v741_v17 = vsel %vm666_vm5, %v17525_v48, %v740_v44  ;;  %v1730_v52 = vrot.slane %v14949_v12, %v13025_v31  ;;  %v4895_v2 = vrot.slane %v4873_v0, %v13025_v31  ;;  %v6192_v13 = vrot.slane %v4903_v35, %v12982_v11  ;;  %v9343_v0 = vpop.permute.xlu0 %9342 }
 0x1b1   : > { %v14960_v40 = vadd.f32 %v741_v17, %v14830_v18  ;;  %8665 = vst.msk [vmem:[#allocation2 + $0x239] sm:$0xff] %vm8607_vm9, %v8296_v54  ;;  %v14971_v10 = vrot.slane %v3913_v19, %v13025_v31  ;;  %v3928_v8 = vcombine.high %v3920_v7, %v3920_v7  ;;  %v3936_v25 = vrot.slane %v3920_v7, %v13025_v31 }
 0x1b2   : > { %v1738_v49 = vcombine.high %v1730_v52, %v1730_v52  ;;  %v1746_v63 = vrot.slane %v1730_v52, %v13025_v31  ;;  %v14979_v56 = vrot.slane %v14965_v15, %v13025_v31  ;;  %v4905_v4 = vcombine.high %v4895_v2, %v4895_v2 }
 0x1b3   : > { %v2563_v18 = vrot.slane %v14960_v40, %v13025_v31  ;;  %v3943_v22 = vrot.slane %v14971_v10, %v13025_v31  ;;  %v3950_v23 = vrot.slane %v3928_v8, %v13025_v31  ;;  %v3958_v44 = vcombine.high %v3936_v25, %v3936_v25 }
 0x1b4   : > { %v8808_v57 = vld [vmem:[#allocation2 + $0x231] sm:$0xff]  ;;  %v1760_v16 = vrot.slane %v1738_v49, %v13025_v31  ;;  %v1768_v45 = vcombine.high %v1746_v63, %v1746_v63  ;;  %v6188_v17 = vrot.slane %v4895_v2, %v12982_v11  ;;  %v6196_v49 = vrot.slane %v4905_v4, %v12982_v11 }
 0x1b5   : > { %v2571_v3 = vcombine.high %v2563_v18, %v2563_v18  ;;  %v2579_v48 = vrot.slane %v2563_v18, %v13025_v31  ;;  %9080 = vrot.lane.b32.xlu1 %v8808_v57, %s12812_s27  ;;  %v3960_v35 = vcombine.high %v3950_v23, %v3950_v23  ;;  %v5644_v54 = vrot.slane %v3950_v23, %v12982_v11 }
 0x1b6   : > { %v5648_v19 = vrot.slane %v3958_v44, %v12982_v11  ;;  %v5656_v7 = vrot.slane %v3943_v22, %v12982_v11  ;;  %v1770_v52 = vcombine.high %v1760_v16, %v1760_v16  ;;  %v6200_v23 = vrot.slane %v14979_v56, %v12982_v11 }
 0x1b7   : > { %v2593_v8 = vrot.slane %v2571_v3, %v13025_v31  ;;  %v2601_v25 = vcombine.high %v2579_v48, %v2579_v48  ;;  %v5652_v18 = vrot.slane %v3960_v35, %v12982_v11  ;;  %v6794_v2 = vsel %vm6697_vm8, %v1746_v63, %v5644_v54 }
 0x1b8   : > { %v6795_v57 = vsel %vm6697_vm8, %v1760_v16, %v5648_v19  ;;  %v8809_v28 = vld [vmem:[#allocation2 + $0x239] sm:$0xff]  ;;  %v6797_v34 = vsel %vm6697_vm8, %v1770_v52, %v5656_v7  ;;  %v6930_v3 = vsel %vm6697_vm8, %v2579_v48, %v6188_v17  ;;  %v15006_v35 = vmul.f32 0.25, %v14912_v26  ;;  %v9277_v48 = vpop.permute.xlu0 %9276 }
 0x1b9   : > { %v8880_v44 = vld [vmem:[#allocation2 + $0x232] sm:$0xff]  ;;  %v7719_v21 = vcombine.low %v6794_v2, %v6795_v57  ;;  %v2603_v24 = vcombine.high %v2593_v8, %v2593_v8  ;;  %9082 = vrot.lane.b32.xlu1 %v8809_v28, %s12812_s27  ;;  %v6796_v4 = vsel %vm6697_vm8, %v1768_v45, %v5652_v18  ;;  %v6931_v63 = vsel %vm6697_vm8, %v2593_v8, %v6192_v13  ;;  %v8691_v8 = vld [vmem:[#allocation2 + $0x68] sm:$0xff] }
 0x1ba   : > { %9368 = vrot.lane.b32.xlu0 %v8880_v44, %s12813_s30  ;;  %v6932_v16 = vsel %vm6697_vm8, %v2601_v25, %v6196_v49  ;;  %v7720_v54 = vcombine.low %v6796_v4, %v6797_v34  ;;  %v8297_v52 = vcombine.low %v6930_v3, %v6931_v63  ;;  %v17404_v28 = vrot.slane %v15006_v35, 1 }
 0x1bb   : > { %v7727_v19 = vrot.slane %v7719_v21, %v13028_v32  ;;  %v6933_v7 = vsel %vm6697_vm8, %v2603_v24, %v6200_v23  ;;  %v1723_v45 = vcombine.high %v14949_v12, %v14949_v12  ;;  %v3929_v13 = vcombine.high %v14971_v10, %v14971_v10  ;;  %v9057_v24 = vpop.permute.xlu1 %9056 }
 0x1bc   : > { %v8298_v17 = vcombine.low %v6932_v16, %v6933_v7  ;;  %v7734_v25 = vrot.slane %v7720_v54, %v13028_v32  ;;  %v8305_v34 = vrot.slane %v8297_v52, %v13028_v32  ;;  %v3959_v49 = vcombine.high %v3943_v22, %v3943_v22  ;;  %v8724_v22 = vld [vmem:[#allocation2 + $0x1b8] sm:$0xff] }
 0x1bd   : > { %v15019_v21 = vsel %vm9544_vm15, %v14839_v55, %v9343_v0  ;;  %v17527_v12 = vrot.slane %v14925_v43, 1  ;;  %v1737_v10 = vrot.slane %v1723_v45, %v13025_v31  ;;  %v3957_v57 = vrot.slane %v3929_v13, %v13025_v31 }
 0x1be   : > { %17526 = vst [vmem:[#allocation12_spill] sm:$0xff] %v15019_v21  ;;  %v8312_v18 = vrot.slane %v8298_v17, %v13028_v32  ;;  %12393 = vmatmul.mubr.msk.f32.gmra.mxu1 %vm9622_vm2, %v15019_v21  ;;  %v7735_v23 = vcombine.low %v7727_v19, %v7734_v25  ;;  %v5664_v0 = vrot.slane %v3959_v49, %v12982_v11 }
 0x1bf   : > { %v935_v2 = vsel %vm666_vm5, %v17527_v12, %v17404_v28  ;;  %v15034_v44 = vsel %vm8607_vm9, %v8691_v8, %v8991_v38  ;;  %v1739_v4 = vcombine.high %v1737_v10, %v1737_v10  ;;  %v1753_v63 = vrot.slane %v1737_v10, %v13025_v31  ;;  %v15047_v38 = vpop.permute.xlu0 %9278  ;;  %v15059_v49 = vpop.permute.xlu1 %9058  ;;  %v8692_v28 = vld [vmem:[#allocation2 + $0x78] sm:$0xff] }
 0x1c0   : > { %v1064_v55 = vadd.f32 %v935_v2, %v14929_v33  ;;  %v8313_v3 = vcombine.low %v8305_v34, %v8312_v18  ;;  %v3961_v16 = vcombine.high %v3957_v57, %v3957_v57  ;;  %8632 = vst.msk [vmem:[#allocation2 + $0xf1] sm:$0xff] %vm8607_vm9, %v7735_v23  ;;  %v5660_v7 = vrot.slane %v3957_v57, %v12982_v11 }
 0x1c1   : > { %v15042_v19 = vsel %vm9544_vm15, %v14939_v29, %v9277_v48  ;;  %v15045_v52 = vsel %vm8607_vm9, %v8724_v22, %v9057_v24  ;;  %v1767_v17 = vrot.slane %v1739_v4, %v13025_v31  ;;  %v1769_v45 = vcombine.high %v1753_v63, %v1753_v63 }
 0x1c2   : > { %v3969_v54 = vrot.slane %v1064_v55, %v13025_v31  ;;  %17528 = vst [vmem:[#allocation13_spill] sm:$0xff] %v15042_v19  ;;  %8666 = vst.msk [vmem:[#allocation2 + $0x241] sm:$0xff] %vm8607_vm9, %v8313_v3  ;;  %v5668_v13 = vrot.slane %v3961_v16, %v12982_v11  ;;  %v15053_v8 = vmul.f32 0.75, %v14912_v26  ;;  %12344 = vmatprep.mubr.msk.f32.mxu0 %vm9622_vm2, %v15042_v19  ;;  %v17529_v23 = vrot.slane %v14929_v33, 1 }
 0x1c3   : > { %v6798_v48 = vsel %vm6697_vm8, %v1753_v63, %v5660_v7  ;;  %v3962_v25 = vcombine.high %v1064_v55, %v1064_v55  ;;  %v1771_v24 = vcombine.high %v1767_v17, %v1767_v17  ;;  %v6799_v18 = vsel %vm6697_vm8, %v1767_v17, %v5664_v0  ;;  %v9345_v17 = vpop.permute.xlu0 %9344 }
 0x1c4   : > { %v3985_v29 = vrot.slane %v3969_v54, %v13025_v31  ;;  %v3977_v34 = vcombine.high %v3969_v54, %v3969_v54  ;;  %v6800_v12 = vsel %vm6697_vm8, %v1769_v45, %v5668_v13  ;;  %v700_v2 = vrot.slane %v15053_v8, 1 }
 0x1c5   : > { %v7736_v10 = vcombine.low %v6798_v48, %v6799_v18  ;;  %v15066_v57 = vrot.slane %v3962_v25, %v13025_v31  ;;  %v17530_v0 = vrot.slane %v14835_v58, 1  ;;  %v2556_v63 = vcombine.high %v14960_v40, %v14960_v40 }
 0x1c6   : > { %v5672_v26 = vrot.slane %v3985_v29, %v12982_v11  ;;  %v3999_v22 = vrot.slane %v3977_v34, %v13025_v31  ;;  %v701_v55 = vsel %vm666_vm5, %v17529_v23, %v700_v2  ;;  %v4007_v3 = vcombine.high %v3985_v29, %v3985_v29 }
 0x1c7   : > { %v1089_v4 = vadd.f32 %v17530_v0, %v14875_v42  ;;  %v7744_v54 = vrot.slane %v7736_v10, %v13028_v32  ;;  %v15080_v7 = vadd.f32 %v701_v55, %v14925_v43  ;;  %v15084_v33 = vrot.slane %v15066_v57, %v13025_v31  ;;  %v8776_v45 = vld [vmem:[#allocation2 + $0xf1] sm:$0xff] }
 0x1c8   : > { %v6801_v16 = vsel %vm6697_vm8, %v1771_v24, %v5672_v26  ;;  %v4009_v29 = vcombine.high %v3999_v22, %v3999_v22  ;;  %v5676_v58 = vrot.slane %v3999_v22, %v12982_v11  ;;  %v5680_v42 = vrot.slane %v4007_v3, %v12982_v11  ;;  %9016 = vrot.lane.b32.xlu1 %v8776_v45, %s12812_s27  ;;  %v8993_v24 = vpop.permute.xlu1 %8992 }
 0x1c9   : > { %v7737_v13 = vcombine.low %v6800_v12, %v6801_v16  ;;  %v8881_v40 = vld [vmem:[#allocation2 + $0x23a] sm:$0xff]  ;;  %v1779_v48 = vrot.slane %v15080_v7, %v13025_v31  ;;  %v5688_v43 = vrot.slane %v15084_v33, %v12982_v11  ;;  %v2570_v25 = vrot.slane %v2556_v63, %v13025_v31 }
 0x1ca   : > { %v4874_v34 = vcombine.high %v14965_v15, %v14965_v15  ;;  %9370 = vrot.lane.b32.xlu0 %v8881_v40, %s12813_s30  ;;  %v5684_v12 = vrot.slane %v4009_v29, %v12982_v11  ;;  %v4904_v2 = vcombine.high %v14979_v56, %v14979_v56  ;;  %v4913_v26 = vrot.slane %v1089_v4, %v13025_v31 }
 0x1cb   : > { %v7751_v18 = vrot.slane %v7737_v13, %v13028_v32  ;;  %v1787_v10 = vcombine.high %v1779_v48, %v1779_v48  ;;  %v1795_v22 = vrot.slane %v1779_v48, %v13025_v31  ;;  %v2572_v23 = vcombine.high %v2570_v25, %v2570_v25  ;;  %v9347_v13 = vpop.permute.xlu0 %9346 }
 0x1cc   : > { %v2586_v55 = vrot.slane %v2570_v25, %v13025_v31  ;;  %v4902_v15 = vrot.slane %v4874_v34, %v13025_v31  ;;  %v4920_v0 = vrot.slane %v4913_v26, %v13025_v31  ;;  %v6208_v63 = vrot.slane %v4904_v2, %v12982_v11  ;;  %v8725_v26 = vld [vmem:[#allocation2 + $0x1c0] sm:$0xff] }
 0x1cd   : > { %v7752_v3 = vcombine.low %v7744_v54, %v7751_v18  ;;  %v1809_v16 = vrot.slane %v1787_v10, %v13025_v31  ;;  %v1817_v45 = vcombine.high %v1795_v22, %v1795_v22  ;;  %v6802_v56 = vsel %vm6697_vm8, %v1795_v22, %v5676_v58  ;;  %v8995_v10 = vpop.permute.xlu1 %8994 }
 0x1ce   : > { %v2600_v4 = vrot.slane %v2572_v23, %v13025_v31  ;;  %v2602_v29 = vcombine.high %v2586_v55, %v2586_v55  ;;  %v4906_v40 = vcombine.high %v4902_v15, %v4902_v15  ;;  %v6204_v54 = vrot.slane %v4902_v15, %v12982_v11 }
 0x1cf   : > { %8633 = vst.msk [vmem:[#allocation2 + $0xf9] sm:$0xff] %vm8607_vm9, %v7752_v3  ;;  %v6216_v48 = vrot.slane %v4920_v0, %v12982_v11  ;;  %v1819_v25 = vcombine.high %v1809_v16, %v1809_v16  ;;  %v6803_v34 = vsel %vm6697_vm8, %v1809_v16, %v5680_v42  ;;  %v6804_v18 = vsel %vm6697_vm8, %v1817_v45, %v5684_v12 }
 0x1d0   : > { %v2604_v2 = vcombine.high %v2600_v4, %v2600_v4  ;;  %v7753_v58 = vcombine.low %v6802_v56, %v6803_v34  ;;  %v6212_v22 = vrot.slane %v4906_v40, %v12982_v11  ;;  %v6934_v23 = vsel %vm6697_vm8, %v2586_v55, %v6204_v54 }
 0x1d1   : > { %v6935_v3 = vsel %vm6697_vm8, %v2600_v4, %v6208_v63  ;;  %v6805_v15 = vsel %vm6697_vm8, %v1819_v25, %v5688_v43  ;;  %v15123_v42 = vsel %vm9544_vm15, %v15034_v44, %v15047_v38  ;;  %v9517_v55 = vsel %vm8607_vm9, %v8725_v26, %v15059_v49  ;;  %v8693_v43 = vld [vmem:[#allocation2 + $0x80] sm:$0xff]  ;;  %v9281_v38 = vpop.permute.xlu0 %9280 }
 0x1d2   : > { %v6937_v0 = vsel %vm6697_vm8, %v2604_v2, %v6216_v48  ;;  %v8314_v21 = vcombine.low %v6934_v23, %v6935_v3  ;;  %17531 = vst [vmem:[#allocation36_spill] sm:$0xff] %v15123_v42  ;;  %v7754_v12 = vcombine.low %v6804_v18, %v6805_v15  ;;  %v7761_v16 = vrot.slane %v7753_v58, %v13028_v32  ;;  %v8810_v18 = vld [vmem:[#allocation2 + $0x241] sm:$0xff] }
 0x1d3   : > { %v6936_v45 = vsel %vm6697_vm8, %v2602_v29, %v6212_v22  ;;  %12345 = vmatmul.mubr.msk.f32.gmra.mxu0 %vm9622_vm2, %v15123_v42  ;;  %v15134_v4 = vsel %vm9544_vm15, %v15045_v52, %v9345_v17  ;;  %v9484_v44 = vsel %vm8607_vm9, %v8692_v28, %v8993_v24  ;;  %v17533_v29 = vrot.slane %v15006_v35, 1 }
 0x1d4   : > { %v8315_v63 = vcombine.low %v6936_v45, %v6937_v0  ;;  %v8322_v56 = vrot.slane %v8314_v21, %v13028_v32  ;;  %17532 = vst [vmem:[#allocation37_spill] sm:$0xff] %v15134_v4  ;;  %v7768_v40 = vrot.slane %v7754_v12, %v13028_v32  ;;  %v1772_v54 = vcombine.high %v15080_v7, %v15080_v7  ;;  %v8726_v0 = vld [vmem:[#allocation2 + $0x1c8] sm:$0xff] }
 0x1d5   : > { %v1065_v49 = vadd.f32 %v17533_v29, %v15053_v8  ;;  %v3978_v48 = vcombine.high %v15066_v57, %v15066_v57  ;;  %12395 = vmatprep.mubr.msk.f32.mxu1 %vm9622_vm2, %v15134_v4  ;;  %v4008_v17 = vcombine.high %v15084_v33, %v15084_v33  ;;  %v15151_v24 = vsel %vm9544_vm15, %v9517_v55, %v9347_v13  ;;  %v9061_v8 = vpop.permute.xlu1 %9060  ;;  %v9283_v12 = vpop.permute.xlu0 %9282 }
 0x1d6   : > { %v8777_v21 = vld [vmem:[#allocation2 + $0xf9] sm:$0xff]  ;;  %v8329_v28 = vrot.slane %v8315_v63, %v13028_v32  ;;  %17534 = vst [vmem:[#allocation38_spill] sm:$0xff] %v15151_v24  ;;  %v9485_v35 = vsel %vm8607_vm9, %v8693_v43, %v8995_v10  ;;  %v7769_v57 = vcombine.low %v7761_v16, %v7768_v40  ;;  %v1786_v7 = vrot.slane %v1772_v54, %v13025_v31 }
 0x1d7   : > { %v8848_v52 = vld [vmem:[#allocation2 + $0xf2] sm:$0xff]  ;;  %9018 = vrot.lane.b32.xlu1 %v8777_v21, %s12812_s27  ;;  %v4006_v25 = vrot.slane %v3978_v48, %v13025_v31  ;;  %v15159_v34 = vmul.f32 0.75, %v14688_v60  ;;  %v4017_v13 = vrot.slane %v1065_v49, %v13025_v31  ;;  %v5696_v2 = vrot.slane %v4008_v17, %v12982_v11  ;;  %12396 = vmatmul.mubr.msk.f32.gmra.mxu1 %vm9622_vm2, %v15151_v24 }
 0x1d8   : > { %9304 = vrot.lane.b32.xlu0 %v8848_v52, %s12813_s30  ;;  %v8330_v33 = vcombine.low %v8322_v56, %v8329_v28  ;;  %v15164_v26 = vmul.f32 0.75, %v14752_v27  ;;  %8634 = vst.msk [vmem:[#allocation2 + $0x101] sm:$0xff] %vm8607_vm9, %v7769_v57  ;;  %v1788_v10 = vcombine.high %v1786_v7, %v1786_v7  ;;  %v1802_v58 = vrot.slane %v1786_v7, %v13025_v31  ;;  %v8727_v56 = vld [vmem:[#allocation2 + $0x1d0] sm:$0xff]  ;;  %v17537_v52 = vld [vmem:[#allocation15_spill] sm:$0xff]  ;;  %v17538_v17 = vld [vmem:[#allocation9_spill] sm:$0xff] }
 0x1d9   : > { %v4010_v22 = vcombine.high %v4006_v25, %v4006_v25  ;;  %v5692_v60 = vrot.slane %v4006_v25, %v12982_v11  ;;  %v4024_v23 = vrot.slane %v4017_v13, %v13025_v31  ;;  %v15174_v3 = vmul.f32 0.75, %v14761_v37  ;;  %v9063_v40 = vpop.permute.xlu1 %9062 }
 0x1da   : > { %8667 = vst.msk [vmem:[#allocation2 + $0x249] sm:$0xff] %vm8607_vm9, %v8330_v33  ;;  %v352_v27 = vadd.f32 %v13789_v36, %v15159_v34  ;;  %v353_v15 = vadd.f32 %v14023_v1, %v15164_v26  ;;  %v1816_v16 = vrot.slane %v1788_v10, %v13025_v31  ;;  %v1818_v45 = vcombine.high %v1802_v58, %v1802_v58  ;;  %v9349_v33 = vpop.permute.xlu0 %9348 }
 0x1db   : > { %9084 = vrot.lane.b32.xlu1 %v8810_v18, %s12812_s27  ;;  %v5700_v55 = vrot.slane %v4010_v22, %v12982_v11  ;;  %v6806_v43 = vsel %vm6697_vm8, %v1802_v58, %v5692_v60  ;;  %v5704_v37 = vrot.slane %v4024_v23, %v12982_v11  ;;  %v354_v63 = vadd.f32 %v14031_v47, %v15174_v3 }
 0x1dc   : > { %v375_v36 = vadd.s32 15, %v12971_v6  ;;  %v15189_v1 = vsel %vm9544_vm15, %v9484_v44, %v9281_v38  ;;  %v1820_v29 = vcombine.high %v1816_v16, %v1816_v16  ;;  %v6807_v49 = vsel %vm6697_vm8, %v1816_v16, %v5696_v2 }
 0x1dd   : > { %17535 = vst [vmem:[#allocation39_spill] sm:$0xff] %v15189_v1  ;;  %v6808_v54 = vsel %vm6697_vm8, %v1818_v45, %v5700_v55  ;;  %v9518_v48 = vsel %vm8607_vm9, %v8726_v0, %v9061_v8  ;;  %12347 = vmatprep.mubr.msk.f32.mxu0 %vm9622_vm2, %v15189_v1  ;;  %v7770_v21 = vcombine.low %v6806_v43, %v6807_v49  ;;  %v367_v55 = vadd.s32 7, %v12971_v6  ;;  %v8694_v43 = vld [vmem:[#allocation2 + $0x88] sm:$0xff] }
 0x1de   : > { %vm393_vm3 = vcmp.ge.s32.totalorder %v375_v36, 0  ;;  %vm411_vm6 = vcmp.lt.s32.totalorder %v375_v36, 32  ;;  %v15197_v47 = vsel %vm9544_vm15, %v9485_v35, %v9283_v12  ;;  %v6809_v44 = vsel %vm6697_vm8, %v1820_v29, %v5704_v37 }
 0x1df   : > { %17536 = vst [vmem:[#allocation40_spill] sm:$0xff] %v15197_v47  ;;  %vm429_vm7 = vmand %vm393_vm3, %vm411_vm6  ;;  %v15201_v38 = vsel %vm8607_vm9, %v8727_v56, %v9063_v40  ;;  %v340_v28 = vadd.f32 %v14062_v61, %v17537_v52  ;;  %v341_v8 = vadd.f32 %v14065_v41, %v17538_v17  ;;  %12348 = vmatmul.mubr.msk.f32.gmra.mxu0 %vm9622_vm2, %v15197_v47  ;;  %v8849_v57 = vld [vmem:[#allocation2 + $0xfa] sm:$0xff]  ;;  %vm385_vm10 = vcmp.ge.s32.totalorder %v367_v55, 0 }
 0x1e0   : > { %v7771_v7 = vcombine.low %v6808_v54, %v6809_v44  ;;  %v7778_v35 = vrot.slane %v7770_v21, %v13028_v32  ;;  %v513_v25 = vsel %vm429_vm7, %v352_v27, 0.0  ;;  %v514_v18 = vsel %vm429_vm7, %v353_v15, 0.0  ;;  %9306 = vrot.lane.b32.xlu0 %v8849_v57, %s12813_s30  ;;  %v17539_v61 = vld [vmem:[#allocation10_spill] sm:$0xff]  ;;  %v15243_v57 = vpop.permute.xlu0 %9350 }
 0x1e1   : > { %v8811_v13 = vld [vmem:[#allocation2 + $0x249] sm:$0xff]  ;;  %v515_v2 = vsel %vm429_vm7, %v354_v63, 0.0  ;;  %v552_v10 = vmul.f32 0.25, %v513_v25  ;;  %v15211_v58 = vmul.f32 0.25, %v514_v18  ;;  %v342_v41 = vadd.f32 %v14069_v9, %v17539_v61  ;;  %v8778_v15 = vld [vmem:[#allocation2 + $0x101] sm:$0xff]  ;;  %v8997_v9 = vpop.permute.xlu1 %8996 }
 0x1e2   : > { %9086 = vrot.lane.b32.xlu1 %v8811_v13, %s12812_s27  ;;  %v8882_v22 = vld [vmem:[#allocation2 + $0x242] sm:$0xff]  ;;  %v7785_v60 = vrot.slane %v7771_v7, %v13028_v32  ;;  %v603_v23 = vmul.f32 0.75, %v513_v25  ;;  %v15217_v0 = vmul.f32 0.75, %v514_v18  ;;  %v15219_v27 = vmul.f32 0.75, %v515_v2  ;;  %v8883_v49 = vld [vmem:[#allocation2 + $0x24a] sm:$0xff] }
 0x1e3   : > { %v976_v12 = vrot.slane %v552_v10, 1  ;;  %v977_v16 = vrot.slane %v15211_v58, 1  ;;  %v15222_v45 = vmul.f32 0.25, %v515_v2  ;;  %v15227_v56 = vsel %vm9544_vm15, %v9518_v48, %v9349_v33 }
 0x1e4   : > { %v7786_v37 = vcombine.low %v7778_v35, %v7785_v60  ;;  %v742_v63 = vrot.slane %v603_v23, 1  ;;  %v17408_v36 = vrot.slane %v15217_v0, 1  ;;  %17540 = vst [vmem:[#allocation15_spill] sm:$0xff] %v15227_v56  ;;  %9372 = vrot.lane.b32.xlu0 %v8882_v22, %s12813_s30  ;;  %vm403_vm11 = vcmp.lt.s32.totalorder %v367_v55, 32  ;;  %12398 = vmatprep.mubr.msk.f32.mxu1 %vm9622_vm2, %v15227_v56 }
 0x1e5   : > { %v978_v40 = vsel %vm666_vm5, %v976_v12, %v977_v16  ;;  %v17407_v29 = vrot.slane %v15222_v45, 1  ;;  %vm421_vm12 = vmand %vm385_vm10, %vm403_vm11  ;;  %v15240_v21 = vsel %vm8607_vm9, %v8694_v43, %v8997_v9  ;;  %vm396_vm7 = vcmp.lt.s32.totalorder %v12971_v6, 32 }
 0x1e6   : > { %9020 = vrot.lane.b32.xlu1 %v8778_v15, %s12812_s27  ;;  %8635 = vst.msk [vmem:[#allocation2 + $0x109] sm:$0xff] %vm8607_vm9, %v7786_v37  ;;  %v744_v54 = vsel %vm666_vm5, %v742_v63, %v17408_v36  ;;  %v1090_v48 = vadd.f32 %v978_v40, %v603_v23  ;;  %v489_v25 = vsel %vm421_vm12, %v340_v28, 0.0  ;;  %v490_v18 = vsel %vm421_vm12, %v341_v8, 0.0 }
 0x1e7   : > { %v823_v7 = vadd.f32 %v744_v54, %v552_v10  ;;  %v980_v35 = vsel %vm666_vm5, %v977_v16, %v17407_v29  ;;  %v15252_v22 = vsel %vm421_vm12, %v342_v41, 0.0  ;;  %v15256_v10 = vmul.f32 0.25, %v489_v25  ;;  %v15266_v41 = vpop.permute.xlu1 %8998 }
 0x1e8   : > { %v4921_v33 = vcombine.high %v1090_v48, %v1090_v48  ;;  %v4928_v13 = vrot.slane %v1090_v48, %v13025_v31  ;;  %v15250_v2 = vadd.f32 %v980_v35, %v15217_v0  ;;  %9374 = vrot.lane.b32.xlu0 %v8883_v49, %s12813_s30  ;;  %v15258_v15 = vmul.f32 0.25, %v490_v18  ;;  %v15272_v48 = vpop.permute.xlu0 %9284 }
 0x1e9   : > { %v2612_v60 = vrot.slane %v823_v7, %v13025_v31  ;;  %v2605_v23 = vcombine.high %v823_v7, %v823_v7  ;;  %v579_v37 = vmul.f32 0.75, %v489_v25 }
 0x1ea   : > { %v4935_v28 = vrot.slane %v4921_v33, %v13025_v31  ;;  %v4936_v8 = vcombine.high %v4928_v13, %v4928_v13  ;;  %v4944_v12 = vrot.slane %v4928_v13, %v13025_v31  ;;  %v15264_v16 = vrot.slane %v15250_v2, %v13025_v31 }
 0x1eb   : > { %v2620_v55 = vcombine.high %v2612_v60, %v2612_v60  ;;  %v2628_v43 = vrot.slane %v2612_v60, %v13025_v31  ;;  %v2619_v9 = vrot.slane %v2605_v23, %v13025_v31 }
 0x1ec   : > { %v4951_v63 = vrot.slane %v4935_v28, %v13025_v31  ;;  %v4958_v40 = vrot.slane %v4936_v8, %v13025_v31  ;;  %v4966_v49 = vcombine.high %v4944_v12, %v4944_v12  ;;  %v4937_v54 = vcombine.high %v4935_v28, %v4935_v28 }
 0x1ed   : > { %v8779_v7 = vld [vmem:[#allocation2 + $0x109] sm:$0xff]  ;;  %v2642_v33 = vrot.slane %v2620_v55, %v13025_v31  ;;  %v2650_v13 = vcombine.high %v2628_v43, %v2628_v43  ;;  %v2621_v29 = vcombine.high %v2619_v9, %v2619_v9  ;;  %v2635_v36 = vrot.slane %v2619_v9, %v13025_v31 }
 0x1ee   : > { %v8850_v35 = vld [vmem:[#allocation2 + $0x102] sm:$0xff]  ;;  %9022 = vrot.lane.b32.xlu1 %v8779_v7, %s12812_s27  ;;  %v4968_v25 = vcombine.high %v4958_v40, %v4958_v40  ;;  %v6220_v60 = vrot.slane %v4958_v40, %v12982_v11  ;;  %v6224_v23 = vrot.slane %v4966_v49, %v12982_v11  ;;  %v15280_v28 = vmul.f32 0.75, %v490_v18  ;;  %v8851_v44 = vld [vmem:[#allocation2 + $0x10a] sm:$0xff]  ;;  %v15288_v40 = vpop.permute.xlu1 %9064 }
 0x1ef   : > { %9308 = vrot.lane.b32.xlu0 %v8850_v35, %s12813_s30  ;;  %v2652_v8 = vcombine.high %v2642_v33, %v2642_v33  ;;  %v6232_v12 = vrot.slane %v4951_v63, %v12982_v11  ;;  %v2649_v55 = vrot.slane %v2621_v29, %v13025_v31  ;;  %v2651_v56 = vcombine.high %v2635_v36, %v2635_v36 }
 0x1f0   : > { %v6228_v9 = vrot.slane %v4968_v25, %v12982_v11  ;;  %v6938_v7 = vsel %vm6697_vm8, %v2628_v43, %v6220_v60  ;;  %v6939_v35 = vsel %vm6697_vm8, %v2642_v33, %v6224_v23  ;;  %v4965_v24 = vrot.slane %v4937_v54, %v13025_v31  ;;  %v15296_v33 = vpop.permute.xlu0 %9286 }
 0x1f1   : > { %v6941_v18 = vsel %vm6697_vm8, %v2652_v8, %v6232_v12  ;;  %v8331_v49 = vcombine.low %v6938_v7, %v6939_v35  ;;  %v2653_v4 = vcombine.high %v2649_v55, %v2649_v55  ;;  %v4967_v5 = vcombine.high %v4951_v63, %v4951_v63 }
 0x1f2   : > { %v6940_v50 = vsel %vm6697_vm8, %v2650_v13, %v6228_v9  ;;  %v4969_v29 = vcombine.high %v4965_v24, %v4965_v24  ;;  %v4993_v25 = vrot.slane %v15264_v16, %v13025_v31  ;;  %v6236_v43 = vrot.slane %v4965_v24, %v12982_v11 }
 0x1f3   : > { %9310 = vrot.lane.b32.xlu0 %v8851_v44, %s12813_s30  ;;  %v8332_v54 = vcombine.low %v6940_v50, %v6941_v18  ;;  %v8339_v60 = vrot.slane %v8331_v49, %v13028_v32  ;;  %v6240_v23 = vrot.slane %v4967_v5, %v12982_v11  ;;  %v702_v8 = vrot.slane %v579_v37, 1 }
 0x1f4   : > { %v6244_v63 = vrot.slane %v4969_v29, %v12982_v11  ;;  %v6248_v13 = vrot.slane %v4993_v25, %v12982_v11  ;;  %v6942_v44 = vsel %vm6697_vm8, %v2635_v36, %v6236_v43  ;;  %v17417_v12 = vrot.slane %v15280_v28, 1  ;;  %v15313_v36 = vpop.permute.xlu1 %9066 }
 0x1f5   : > { %v8346_v9 = vrot.slane %v8332_v54, %v13028_v32  ;;  %v6943_v24 = vsel %vm6697_vm8, %v2649_v55, %v6240_v23  ;;  %v936_v7 = vrot.slane %v15256_v10, 1  ;;  %v17418_v50 = vrot.slane %v15258_v15, 1 }
 0x1f6   : > { %v6944_v35 = vsel %vm6697_vm8, %v2651_v56, %v6244_v63  ;;  %v6945_v5 = vsel %vm6697_vm8, %v2653_v4, %v6248_v13  ;;  %v8348_v18 = vcombine.low %v6942_v44, %v6943_v24  ;;  %v704_v49 = vsel %vm666_vm5, %v702_v8, %v17417_v12  ;;  %v15329_v13 = vpop.permute.xlu0 %9352 }
 0x1f7   : > { %v8347_v29 = vcombine.low %v8339_v60, %v8346_v9  ;;  %v8349_v43 = vcombine.low %v6944_v35, %v6945_v5  ;;  %v15316_v54 = vadd.f32 %v704_v49, %v15256_v10  ;;  %v938_v55 = vsel %vm666_vm5, %v936_v7, %v17418_v50 }
 0x1f8   : > { %v8356_v56 = vrot.slane %v8348_v18, %v13028_v32  ;;  %v1066_v23 = vadd.f32 %v938_v55, %v579_v37  ;;  %v17541_v4 = vrot.slane %v15219_v27, 1  ;;  %v17542_v63 = vrot.slane %v15217_v0, 1  ;;  %v15355_v55 = vpop.permute.xlu1 %9000 }
 0x1f9   : > { %v4970_v60 = vcombine.high %v15250_v2, %v15250_v2  ;;  %8668 = vst.msk [vmem:[#allocation2 + $0x259] sm:$0xff] %vm8607_vm9, %v8347_v29  ;;  %v8363_v10 = vrot.slane %v8349_v43, %v13028_v32  ;;  %v1828_v44 = vrot.slane %v15316_v54, %v13025_v31  ;;  %v4985_v0 = vcombine.high %v15264_v16, %v15264_v16 }
 0x1fa   : > { %v746_v8 = vsel %vm666_vm5, %v17542_v63, %v17541_v4  ;;  %v4025_v9 = vcombine.high %v1066_v23, %v1066_v23  ;;  %v4032_v24 = vrot.slane %v1066_v23, %v13025_v31  ;;  %v5015_v7 = vcombine.high %v4993_v25, %v4993_v25 }
 0x1fb   : > { %v15336_v37 = vadd.f32 %v746_v8, %v15211_v58  ;;  %v15342_v2 = vrot.slane %v4970_v60, %v13025_v31  ;;  %v8364_v35 = vcombine.low %v8356_v56, %v8363_v10  ;;  %v1836_v5 = vcombine.high %v1828_v44, %v1828_v44 }
 0x1fc   : > { %v1844_v18 = vrot.slane %v1828_v44, %v13025_v31  ;;  %v15348_v58 = vrot.slane %v4025_v9, %v13025_v31  ;;  %v4040_v29 = vcombine.high %v4032_v24, %v4032_v24  ;;  %v4048_v16 = vrot.slane %v4032_v24, %v13025_v31  ;;  %v15364_v44 = vpop.permute.xlu0 %9354 }
 0x1fd   : > { %v2661_v49 = vrot.slane %v15336_v37, %v13025_v31  ;;  %v15353_v43 = vrot.slane %v15342_v2, %v13025_v31  ;;  %8669 = vst.msk [vmem:[#allocation2 + $0x261] sm:$0xff] %vm8607_vm9, %v8364_v35  ;;  %v1858_v25 = vrot.slane %v1836_v5, %v13025_v31  ;;  %v5007_v10 = vrot.slane %v4985_v0, %v13025_v31 }
 0x1fe   : > { %v1866_v56 = vcombine.high %v1844_v18, %v1844_v18  ;;  %v4055_v63 = vrot.slane %v15348_v58, %v13025_v31  ;;  %v4062_v8 = vrot.slane %v4040_v29, %v13025_v31  ;;  %v4070_v60 = vcombine.high %v4048_v16, %v4048_v16 }
 0x1ff   : > { %v2669_v23 = vcombine.high %v2661_v49, %v2661_v49  ;;  %v2677_v4 = vrot.slane %v2661_v49, %v13025_v31  ;;  %v1868_v9 = vcombine.high %v1858_v25, %v1858_v25  ;;  %v6256_v5 = vrot.slane %v5015_v7, %v12982_v11 }
 0x200   : > { %v8812_v12 = vld [vmem:[#allocation2 + $0x259] sm:$0xff]  ;;  %v4072_v50 = vcombine.high %v4062_v8, %v4062_v8  ;;  %v5708_v49 = vrot.slane %v4062_v8, %v12982_v11  ;;  %v5712_v47 = vrot.slane %v4070_v60, %v12982_v11  ;;  %v5720_v1 = vrot.slane %v4055_v63, %v12982_v11  ;;  %v15379_v60 = vpop.permute.xlu1 %9002 }
 0x201   : > { %v2691_v24 = vrot.slane %v2669_v23, %v13025_v31  ;;  %v2699_v35 = vcombine.high %v2677_v4, %v2677_v4  ;;  %9088 = vrot.lane.b32.xlu1 %v8812_v12, %s12812_s27  ;;  %v5017_v0 = vcombine.high %v5007_v10, %v5007_v10  ;;  %v6252_v16 = vrot.slane %v5007_v10, %v12982_v11 }
 0x202   : > { %v6264_v23 = vrot.slane %v15353_v43, %v12982_v11  ;;  %v5716_v42 = vrot.slane %v4072_v50, %v12982_v11  ;;  %v6810_v7 = vsel %vm6697_vm8, %v1844_v18, %v5708_v49  ;;  %v6811_v19 = vsel %vm6697_vm8, %v1858_v25, %v5712_v47 }
 0x203   : > { %v2701_v29 = vcombine.high %v2691_v24, %v2691_v24  ;;  %v6813_v8 = vsel %vm6697_vm8, %v1868_v9, %v5720_v1  ;;  %v7787_v53 = vcombine.low %v6810_v7, %v6811_v19  ;;  %v6260_v12 = vrot.slane %v5017_v0, %v12982_v11  ;;  %v15389_v1 = vpop.permute.xlu0 %9288  ;;  %v8695_v9 = vld [vmem:[#allocation2 + $0x90] sm:$0xff] }
 0x204   : > { %v6946_v20 = vsel %vm6697_vm8, %v2677_v4, %v6252_v16  ;;  %v6947_v10 = vsel %vm6697_vm8, %v2691_v24, %v6256_v5  ;;  %v8813_v51 = vld [vmem:[#allocation2 + $0x261] sm:$0xff]  ;;  %v6812_v46 = vsel %vm6697_vm8, %v1866_v56, %v5716_v42  ;;  %v15387_v47 = vmul.f32 0.25, %v15252_v22 }
 0x205   : > { %v8884_v14 = vld [vmem:[#allocation2 + $0x25a] sm:$0xff]  ;;  %v6949_v50 = vsel %vm6697_vm8, %v2701_v29, %v6264_v23  ;;  %v8365_v18 = vcombine.low %v6946_v20, %v6947_v10  ;;  %9090 = vrot.lane.b32.xlu1 %v8813_v51, %s12812_s27  ;;  %v7788_v19 = vcombine.low %v6812_v46, %v6813_v8  ;;  %v7795_v25 = vrot.slane %v7787_v53, %v13028_v32 }
 0x206   : > { %9376 = vrot.lane.b32.xlu0 %v8884_v14, %s12813_s30  ;;  %v6948_v4 = vsel %vm6697_vm8, %v2699_v35, %v6260_v12  ;;  %v15396_v42 = vmul.f32 0.75, %v15252_v22  ;;  %v939_v24 = vrot.slane %v15387_v47, 1  ;;  %v1821_v5 = vcombine.high %v15316_v54, %v15316_v54 }
 0x207   : > { %v8366_v56 = vcombine.low %v6948_v4, %v6949_v50  ;;  %v8373_v20 = vrot.slane %v8365_v18, %v13028_v32  ;;  %v7802_v51 = vrot.slane %v7788_v19, %v13028_v32  ;;  %v4041_v46 = vcombine.high %v15348_v58, %v15348_v58  ;;  %v8728_v58 = vld [vmem:[#allocation2 + $0x1e0] sm:$0xff]  ;;  %v15434_v12 = vpop.permute.xlu0 %9290 }
 0x208   : > { %v4071_v14 = vcombine.high %v4055_v63, %v4055_v63  ;;  %v15408_v53 = vsel %vm9544_vm15, %v15201_v38, %v15243_v57  ;;  %v17544_v35 = vrot.slane %v15258_v15, 1  ;;  %v1835_v54 = vrot.slane %v1821_v5, %v13025_v31  ;;  %v15423_v38 = vpop.permute.xlu1 %9068 }
 0x209   : > { %17543 = vst [vmem:[#allocation9_spill] sm:$0xff] %v15408_v53  ;;  %v8380_v22 = vrot.slane %v8366_v56, %v13028_v32  ;;  %v15419_v29 = vsel %vm8607_vm9, %v8695_v9, %v15266_v41  ;;  %12399 = vmatmul.mubr.msk.f32.gmra.mxu1 %vm9622_vm2, %v15408_v53  ;;  %v7803_v57 = vcombine.low %v7795_v25, %v7802_v51  ;;  %v705_v25 = vrot.slane %v15396_v42, 1 }
 0x20a   : > { %v940_v49 = vsel %vm666_vm5, %v17544_v35, %v939_v24  ;;  %v4069_v0 = vrot.slane %v4041_v46, %v13025_v31  ;;  %v5728_v16 = vrot.slane %v4071_v14, %v12982_v11  ;;  %v1837_v7 = vcombine.high %v1835_v54, %v1835_v54 }
 0x20b   : > { %v1067_v63 = vadd.f32 %v940_v49, %v15280_v28  ;;  %v8381_v23 = vcombine.low %v8373_v20, %v8380_v22  ;;  %v1851_v8 = vrot.slane %v1835_v54, %v13025_v31  ;;  %v15432_v41 = vsel %vm9544_vm15, %v15240_v21, %v15272_v48  ;;  %8636 = vst.msk [vmem:[#allocation2 + $0x119] sm:$0xff] %vm8607_vm9, %v7803_v57 }
 0x20c   : > { %v4073_v10 = vcombine.high %v4069_v0, %v4069_v0  ;;  %v5724_v18 = vrot.slane %v4069_v0, %v12982_v11  ;;  %v15441_v19 = vsel %vm8607_vm9, %v8728_v58, %v15288_v40  ;;  %12350 = vmatprep.mubr.msk.f32.mxu0 %vm9622_vm2, %v15432_v41  ;;  %v1865_v21 = vrot.slane %v1837_v7, %v13025_v31  ;;  %v15458_v35 = vpop.permute.xlu1 %9070  ;;  %v15473_v7 = vpop.permute.xlu0 %9356 }
 0x20d   : > { %v4081_v50 = vrot.slane %v1067_v63, %v13025_v31  ;;  %8670 = vst.msk [vmem:[#allocation2 + $0x269] sm:$0xff] %vm8607_vm9, %v8381_v23  ;;  %v1867_v48 = vcombine.high %v1851_v8, %v1851_v8  ;;  %v4074_v4 = vcombine.high %v1067_v63, %v1067_v63  ;;  %v17545_v46 = vrot.slane %v15280_v28, 1 }
 0x20e   : > { %v5732_v56 = vrot.slane %v4073_v10, %v12982_v11  ;;  %v6814_v20 = vsel %vm6697_vm8, %v1851_v8, %v5724_v18  ;;  %v1869_v40 = vcombine.high %v1865_v21, %v1865_v21  ;;  %v6815_v51 = vsel %vm6697_vm8, %v1865_v21, %v5728_v16 }
 0x20f   : > { %v4097_v9 = vrot.slane %v4081_v50, %v13025_v31  ;;  %v4089_v5 = vcombine.high %v4081_v50, %v4081_v50  ;;  %v706_v14 = vsel %vm666_vm5, %v17545_v46, %v705_v25  ;;  %v15456_v22 = vrot.slane %v4074_v4, %v13025_v31 }
 0x210   : > { %v6816_v54 = vsel %vm6697_vm8, %v1867_v48, %v5732_v56  ;;  %v7804_v58 = vcombine.low %v6814_v20, %v6815_v51  ;;  %v15463_v57 = vadd.f32 %v706_v14, %v15258_v15  ;;  %v17546_v16 = vrot.slane %v15222_v45, 1  ;;  %v15495_v46 = vpop.permute.xlu1 %9004 }
 0x211   : > { %v5736_v49 = vrot.slane %v4097_v9, %v12982_v11  ;;  %v15467_v63 = vrot.slane %v15456_v22, %v13025_v31  ;;  %v4111_v28 = vrot.slane %v4089_v5, %v13025_v31  ;;  %v4119_v0 = vcombine.high %v4097_v9, %v4097_v9 }
 0x212   : > { %v1092_v23 = vadd.f32 %v17546_v16, %v15219_v27  ;;  %v7812_v10 = vrot.slane %v7804_v58, %v13028_v32  ;;  %v1877_v15 = vrot.slane %v15463_v57, %v13025_v31  ;;  %v2654_v50 = vcombine.high %v15336_v37, %v15336_v37  ;;  %v8780_v18 = vld [vmem:[#allocation2 + $0x119] sm:$0xff] }
 0x213   : > { %v6817_v8 = vsel %vm6697_vm8, %v1869_v40, %v5736_v49  ;;  %v4121_v48 = vcombine.high %v4111_v28, %v4111_v28  ;;  %v5740_v25 = vrot.slane %v4111_v28, %v12982_v11  ;;  %v5744_v45 = vrot.slane %v4119_v0, %v12982_v11  ;;  %9024 = vrot.lane.b32.xlu1 %v8780_v18, %s12812_s27 }
 0x214   : > { %v7805_v21 = vcombine.low %v6816_v54, %v6817_v8  ;;  %v8885_v27 = vld [vmem:[#allocation2 + $0x262] sm:$0xff]  ;;  %v1885_v4 = vcombine.high %v1877_v15, %v1877_v15  ;;  %v1893_v9 = vrot.slane %v1877_v15, %v13025_v31  ;;  %v5752_v56 = vrot.slane %v15467_v63, %v12982_v11  ;;  %v15502_v15 = vpop.permute.xlu0 %9358 }
 0x215   : > { %v2668_v20 = vrot.slane %v2654_v50, %v13025_v31  ;;  %9378 = vrot.lane.b32.xlu0 %v8885_v27, %s12813_s30  ;;  %v5748_v5 = vrot.slane %v4121_v48, %v12982_v11  ;;  %v4986_v40 = vcombine.high %v15342_v2, %v15342_v2  ;;  %v5016_v51 = vcombine.high %v15353_v43, %v15353_v43  ;;  %v8729_v27 = vld [vmem:[#allocation2 + $0x1e8] sm:$0xff] }
 0x216   : > { %v7819_v37 = vrot.slane %v7805_v21, %v13028_v32  ;;  %v1907_v14 = vrot.slane %v1885_v4, %v13025_v31  ;;  %v1915_v49 = vcombine.high %v1893_v9, %v1893_v9  ;;  %v6818_v54 = vsel %vm6697_vm8, %v1893_v9, %v5740_v25 }
 0x217   : > { %v2670_v58 = vcombine.high %v2668_v20, %v2668_v20  ;;  %v2684_v0 = vrot.slane %v2668_v20, %v13025_v31  ;;  %v5014_v16 = vrot.slane %v4986_v40, %v13025_v31  ;;  %v5025_v8 = vrot.slane %v1092_v23, %v13025_v31 }
 0x218   : > { %v7820_v28 = vcombine.low %v7812_v10, %v7819_v37  ;;  %v1917_v2 = vcombine.high %v1907_v14, %v1907_v14  ;;  %v6819_v43 = vsel %vm6697_vm8, %v1907_v14, %v5744_v45  ;;  %v6820_v50 = vsel %vm6697_vm8, %v1915_v49, %v5748_v5  ;;  %v8696_v14 = vld [vmem:[#allocation2 + $0xa0] sm:$0xff]  ;;  %v15515_v49 = vpop.permute.xlu1 %9006 }
 0x219   : > { %v2698_v18 = vrot.slane %v2670_v58, %v13025_v31  ;;  %v7821_v21 = vcombine.low %v6818_v54, %v6819_v43  ;;  %v2700_v48 = vcombine.high %v2684_v0, %v2684_v0  ;;  %v5018_v10 = vcombine.high %v5014_v16, %v5014_v16 }
 0x21a   : > { %8637 = vst.msk [vmem:[#allocation2 + $0x121] sm:$0xff] %vm8607_vm9, %v7820_v28  ;;  %v5032_v25 = vrot.slane %v5025_v8, %v13025_v31  ;;  %v6821_v4 = vsel %vm6697_vm8, %v1917_v2, %v5752_v56  ;;  %v6268_v9 = vrot.slane %v5014_v16, %v12982_v11  ;;  %v6272_v20 = vrot.slane %v5016_v51, %v12982_v11 }
 0x21b   : > { %v2702_v23 = vcombine.high %v2698_v18, %v2698_v18  ;;  %v7822_v45 = vcombine.low %v6820_v50, %v6821_v4  ;;  %v7829_v37 = vrot.slane %v7821_v21, %v13028_v32  ;;  %v6276_v5 = vrot.slane %v5018_v10, %v12982_v11  ;;  %v8697_v50 = vld [vmem:[#allocation2 + $0xa8] sm:$0xff] }
 0x21c   : > { %v6280_v40 = vrot.slane %v5032_v25, %v12982_v11  ;;  %v6950_v54 = vsel %vm6697_vm8, %v2684_v0, %v6268_v9  ;;  %v6951_v56 = vsel %vm6697_vm8, %v2698_v18, %v6272_v20  ;;  %v15522_v58 = vsel %vm9544_vm15, %v15419_v29, %v15296_v33  ;;  %v15531_v0 = vpop.permute.xlu0 %9292  ;;  %v15544_v18 = vld [vmem:[%s12987_s24 + $0xd8] sm:$0xff]  ;;  %v15571_v9 = vpop.permute.xlu1 %9072 }
 0x21d   : > { %17547 = vst [vmem:[#allocation10_spill] sm:$0xff] %v15522_v58  ;;  %v9521_v51 = vsel %vm8607_vm9, %v8729_v27, %v15313_v36  ;;  %v7836_v28 = vrot.slane %v7822_v45, %v13028_v32  ;;  %v6952_v16 = vsel %vm6697_vm8, %v2700_v48, %v6276_v5  ;;  %v8382_v2 = vcombine.low %v6950_v54, %v6951_v56  ;;  %v8730_v56 = vld [vmem:[#allocation2 + $0x1f0] sm:$0xff] }
 0x21e   : > { %v6953_v8 = vsel %vm6697_vm8, %v2702_v23, %v6280_v40  ;;  %12351 = vmatmul.mubr.msk.f32.gmra.mxu0 %vm9622_vm2, %v15522_v58  ;;  %v15536_v33 = vsel %vm9544_vm15, %v15441_v19, %v15329_v13  ;;  %v9488_v36 = vsel %vm8607_vm9, %v8696_v14, %v15355_v55  ;;  %v1068_v29 = vadd.f32 %v939_v24, %v15396_v42  ;;  %v242_v55 = vld [vmem:[%s12987_s24 + $0xe0] sm:$0xff] }
 0x21f   : > { %v8383_v43 = vcombine.low %v6952_v16, %v6953_v8  ;;  %17548 = vst [vmem:[#allocation41_spill] sm:$0xff] %v15536_v33  ;;  %v7837_v21 = vcombine.low %v7829_v37, %v7836_v28  ;;  %v8390_v48 = vrot.slane %v8382_v2, %v13028_v32  ;;  %v1870_v10 = vcombine.high %v15463_v57, %v15463_v57 }
 0x220   : > { %v4090_v13 = vcombine.high %v15456_v22, %v15456_v22  ;;  %12401 = vmatprep.mubr.msk.f32.mxu1 %vm9622_vm2, %v15536_v33  ;;  %v4120_v24 = vcombine.high %v15467_v63, %v15467_v63  ;;  %v4129_v25 = vrot.slane %v1068_v29, %v13025_v31  ;;  %v15560_v57 = vsel %vm9544_vm15, %v9521_v51, %v15364_v44  ;;  %v243_v63 = vld [vmem:[%s12987_s24 + $0xe8] sm:$0x3]  ;;  %v15579_v51 = vpop.permute.xlu0 %9294 }
 0x221   : > { %v8781_v19 = vld [vmem:[#allocation2 + $0x121] sm:$0xff]  ;;  %v8397_v42 = vrot.slane %v8383_v43, %v13028_v32  ;;  %17549 = vst [vmem:[#allocation42_spill] sm:$0xff] %v15560_v57  ;;  %8638 = vst.msk [vmem:[#allocation2 + $0x129] sm:$0xff] %vm8607_vm9, %v7837_v21  ;;  %v1884_v22 = vrot.slane %v1870_v10, %v13025_v31  ;;  %v9489_v4 = vsel %vm8607_vm9, %v8697_v50, %v15379_v60  ;;  %v295_v23 = vmul.f32 0.25, %v15544_v18  ;;  %v8814_v44 = vld [vmem:[#allocation2 + $0x269] sm:$0xff] }
 0x222   : > { %v8852_v47 = vld [vmem:[#allocation2 + $0x11a] sm:$0xff]  ;;  %9026 = vrot.lane.b32.xlu1 %v8781_v19, %s12812_s27  ;;  %v4118_v27 = vrot.slane %v4090_v13, %v13025_v31  ;;  %v4136_v45 = vrot.slane %v4129_v25, %v13025_v31  ;;  %v5760_v37 = vrot.slane %v4120_v24, %v12982_v11  ;;  %v296_v5 = vmul.f32 0.25, %v242_v55  ;;  %12402 = vmatmul.mubr.msk.f32.gmra.mxu1 %vm9622_vm2, %v15560_v57 }
 0x223   : > { %9312 = vrot.lane.b32.xlu0 %v8852_v47, %s12813_s30  ;;  %v8398_v20 = vcombine.low %v8390_v48, %v8397_v42  ;;  %v1886_v40 = vcombine.high %v1884_v22, %v1884_v22  ;;  %v1900_v14 = vrot.slane %v1884_v22, %v13025_v31  ;;  %v297_v16 = vmul.f32 0.25, %v243_v63  ;;  %v8731_v48 = vld [vmem:[#allocation2 + $0x1f8] sm:$0xff]  ;;  %v15605_v42 = vpop.permute.xlu1 %9074 }
 0x224   : > { %v4122_v54 = vcombine.high %v4118_v27, %v4118_v27  ;;  %v5756_v60 = vrot.slane %v4118_v27, %v12982_v11  ;;  %v5768_v28 = vrot.slane %v4136_v45, %v12982_v11  ;;  %v322_v8 = vadd.f32 %v295_v23, %v15159_v34  ;;  %v15619_v27 = vpop.permute.xlu0 %9360 }
 0x225   : > { %8671 = vst.msk [vmem:[#allocation2 + $0x271] sm:$0xff] %vm8607_vm9, %v8398_v20  ;;  %v323_v2 = vadd.f32 %v296_v5, %v15164_v26  ;;  %v1914_v43 = vrot.slane %v1886_v40, %v13025_v31  ;;  %v1916_v29 = vcombine.high %v1900_v14, %v1900_v14  ;;  %v324_v10 = vadd.f32 %v297_v16, %v15174_v3 }
 0x226   : > { %9092 = vrot.lane.b32.xlu1 %v8814_v44, %s12812_s27  ;;  %v5764_v50 = vrot.slane %v4122_v54, %v12982_v11  ;;  %v6822_v21 = vsel %vm6697_vm8, %v1900_v14, %v5756_v60  ;;  %v376_v13 = vadd.s32 16, %v12971_v6  ;;  %v15593_v55 = vsel %vm9544_vm15, %v9488_v36, %v15389_v1  ;;  %v8698_v44 = vld [vmem:[#allocation2 + $0xb0] sm:$0xff] }
 0x227   : > { %17550 = vst [vmem:[#allocation43_spill] sm:$0xff] %v15593_v55  ;;  %v9522_v34 = vsel %vm8607_vm9, %v8730_v56, %v15423_v38  ;;  %v1918_v26 = vcombine.high %v1914_v43, %v1914_v43  ;;  %v6823_v19 = vsel %vm6697_vm8, %v1914_v43, %v5760_v37  ;;  %12353 = vmatprep.mubr.msk.f32.mxu0 %vm9622_vm2, %v15593_v55  ;;  %v15643_v56 = vpop.permute.xlu1 %9008 }
 0x228   : > { %v6824_v47 = vsel %vm6697_vm8, %v1916_v29, %v5764_v50  ;;  %v15603_v3 = vsel %vm9544_vm15, %v9489_v4, %v15434_v12  ;;  %v8853_v24 = vld [vmem:[#allocation2 + $0x122] sm:$0xff]  ;;  %v7838_v1 = vcombine.low %v6822_v21, %v6823_v19  ;;  %vm394_vm13 = vcmp.ge.s32.totalorder %v376_v13, 0 }
 0x229   : > { %17551 = vst [vmem:[#allocation44_spill] sm:$0xff] %v15603_v3  ;;  %vm412_vm14 = vcmp.lt.s32.totalorder %v376_v13, 32  ;;  %v9523_v38 = vsel %vm8607_vm9, %v8731_v48, %v15458_v35  ;;  %12354 = vmatmul.mubr.msk.f32.gmra.mxu0 %vm9622_vm2, %v15603_v3  ;;  %9314 = vrot.lane.b32.xlu0 %v8853_v24, %s12813_s30  ;;  %v6825_v36 = vsel %vm6697_vm8, %v1918_v26, %v5768_v28  ;;  %v9618_v28 = vld [vmem:[%s17353_s1 + $0x8] sm:$0xf]  ;;  %v15657_v48 = vpop.permute.xlu0 %9362 }
 0x22a   : > { %vm430_vm0 = vmand %vm394_vm13, %vm412_vm14  ;;  %v310_v12 = vadd.f32 %v13673_v59, %v17537_v52  ;;  %v311_v25 = vadd.f32 %v13688_v62, %v17538_v17  ;;  %v312_v22 = vadd.f32 %v13709_v30, %v17539_v61  ;;  %v7839_v35 = vcombine.low %v6824_v47, %v6825_v36  ;;  %v8782_v61 = vld [vmem:[#allocation2 + $0x129] sm:$0xff]  ;;  %12431 = vmatprep.subr.msk.mxu1 %vm9815_vm4, %v9618_v28 }
 0x22b   : > { %v7846_v4 = vrot.slane %v7838_v1, %v13028_v32  ;;  %v516_v63 = vsel %vm430_vm0, %v322_v8, 0.0  ;;  %v517_v23 = vsel %vm430_vm0, %v323_v2, 0.0  ;;  %v518_v37 = vsel %vm430_vm0, %v324_v10, 0.0  ;;  %12432 = vmatpush3.msk.msra.mxu1 %vm9815_vm4, %v9618_v28 }
 0x22c   : > { %v8815_v20 = vld [vmem:[#allocation2 + $0x271] sm:$0xff]  ;;  %v554_v5 = vmul.f32 0.25, %v516_v63  ;;  %v15622_v40 = vmul.f32 0.25, %v517_v23  ;;  %v15626_v59 = vsel %vm9544_vm15, %v9522_v34, %v15473_v7  ;;  %v7853_v62 = vrot.slane %v7839_v35, %v13028_v32 }
 0x22d   : > { %v8886_v45 = vld [vmem:[#allocation2 + $0x26a] sm:$0xff]  ;;  %17552 = vst [vmem:[#allocation45_spill] sm:$0xff] %v15626_v59  ;;  %9094 = vrot.lane.b32.xlu1 %v8815_v20, %s12812_s27  ;;  %v606_v30 = vmul.f32 0.75, %v516_v63  ;;  %v15630_v52 = vmul.f32 0.75, %v517_v23  ;;  %v15632_v17 = vmul.f32 0.25, %v518_v37  ;;  %12404 = vmatprep.mubr.msk.f32.mxu1 %vm9622_vm2, %v15626_v59  ;;  %v368_v7 = vadd.s32 8, %v12971_v6 }
 0x22e   : > { %9380 = vrot.lane.b32.xlu0 %v8886_v45, %s12813_s30  ;;  %v981_v14 = vrot.slane %v554_v5, 1  ;;  %v982_v54 = vrot.slane %v15622_v40, 1  ;;  %v15641_v60 = vsel %vm8607_vm9, %v8698_v44, %v15495_v46  ;;  %v8887_v16 = vld [vmem:[#allocation2 + $0x272] sm:$0xff]  ;;  %v7854_v8 = vcombine.low %v7846_v4, %v7853_v62  ;;  %v12059_v46 = vld [vmem:[%s17353_s1 + $0x28] sm:$0xf] }
 0x22f   : > { %v747_v2 = vrot.slane %v606_v30, 1  ;;  %v17435_v43 = vrot.slane %v15630_v52, 1  ;;  %v17434_v29 = vrot.slane %v15632_v17, 1  ;;  %vm386_vm1 = vcmp.ge.s32.totalorder %v368_v7, 0  ;;  %12531 = vmatprep.subr.msk.mxu0 %vm9815_vm4, %v12059_v46 }
 0x230   : > { %v983_v50 = vsel %vm666_vm5, %v981_v14, %v982_v54  ;;  %vm404_vm3 = vcmp.lt.s32.totalorder %v368_v7, 32  ;;  %v15655_v21 = vmul.f32 0.75, %v518_v37  ;;  %8639 = vst.msk [vmem:[#allocation2 + $0x131] sm:$0xff] %vm8607_vm9, %v7854_v8  ;;  %v15671_v26 = vsel %vm9544_vm15, %v9523_v38, %v15502_v15  ;;  %12532 = vmatpush3.msk.msra.mxu0 %vm9815_vm4, %v12059_v46 }
 0x231   : > { %9028 = vrot.lane.b32.xlu1 %v8782_v61, %s12812_s27  ;;  %v749_v10 = vsel %vm666_vm5, %v747_v2, %v17435_v43  ;;  %v1093_v13 = vadd.f32 %v983_v50, %v606_v30  ;;  %v985_v34 = vsel %vm666_vm5, %v982_v54, %v17434_v29  ;;  %vm422_vm6 = vmand %vm386_vm1, %vm404_vm3  ;;  %17553 = vst [vmem:[#allocation46_spill] sm:$0xff] %v15671_v26  ;;  %v15704_v61 = vpop.permute.xlu0 %9296  ;;  %vm378_vm4 = vcmp.ge.s32.totalorder %v12971_v6, 0 }
 0x232   : > { %9382 = vrot.lane.b32.xlu0 %v8887_v16, %s12813_s30  ;;  %v825_v19 = vadd.f32 %v749_v10, %v554_v5  ;;  %v15675_v47 = vadd.f32 %v985_v34, %v15630_v52  ;;  %v492_v24 = vsel %vm422_vm6, %v310_v12, 0.0  ;;  %v493_v1 = vsel %vm422_vm6, %v311_v25, 0.0  ;;  %12405 = vmatmul.mubr.msk.f32.gmra.mxu1 %vm9622_vm2, %v15671_v26  ;;  %v15692_v25 = vpop.permute.xlu1 %9010  ;;  %vm414_vm10 = vmand %vm378_vm4, %vm396_vm7 }
 0x233   : > { %v5033_v36 = vcombine.high %v1093_v13, %v1093_v13  ;;  %v5040_v35 = vrot.slane %v1093_v13, %v13025_v31  ;;  %v15680_v4 = vsel %vm422_vm6, %v312_v22, 0.0  ;;  %v15682_v63 = vmul.f32 0.25, %v492_v24 }
 0x234   : > { %v2710_v15 = vrot.slane %v825_v19, %v13025_v31  ;;  %v2703_v38 = vcombine.high %v825_v19, %v825_v19  ;;  %v15688_v23 = vrot.slane %v15675_v47, %v13025_v31  ;;  %v15690_v12 = vmul.f32 0.25, %v493_v1 }
 0x235   : > { %v5047_v44 = vrot.slane %v5033_v36, %v13025_v31  ;;  %v5048_v20 = vcombine.high %v5040_v35, %v5040_v35  ;;  %v5056_v22 = vrot.slane %v5040_v35, %v13025_v31  ;;  %v15696_v45 = vmul.f32 0.75, %v492_v24  ;;  %v15725_v29 = vpop.permute.xlu0 %9298 }
 0x236   : > { %v2718_v37 = vcombine.high %v2710_v15, %v2710_v15  ;;  %v2726_v5 = vrot.slane %v2710_v15, %v13025_v31  ;;  %v2717_v62 = vrot.slane %v2703_v38, %v13025_v31  ;;  %v15702_v30 = vrot.slane %v15688_v23, %v13025_v31 }
 0x237   : > { %v5063_v14 = vrot.slane %v5047_v44, %v13025_v31  ;;  %v5070_v54 = vrot.slane %v5048_v20, %v13025_v31  ;;  %v5078_v7 = vcombine.high %v5056_v22, %v5056_v22  ;;  %v5049_v28 = vcombine.high %v5047_v44, %v5047_v44  ;;  %v8783_v16 = vld [vmem:[#allocation2 + $0x131] sm:$0xff]  ;;  %v15718_v20 = vpop.permute.xlu1 %9076 }
 0x238   : > { %v8854_v8 = vld [vmem:[#allocation2 + $0x12a] sm:$0xff]  ;;  %v2740_v2 = vrot.slane %v2718_v37, %v13025_v31  ;;  %v2748_v46 = vcombine.high %v2726_v5, %v2726_v5  ;;  %v2719_v50 = vcombine.high %v2717_v62, %v2717_v62  ;;  %v2733_v10 = vrot.slane %v2717_v62, %v13025_v31  ;;  %9030 = vrot.lane.b32.xlu1 %v8783_v16, %s12812_s27  ;;  %v8855_v15 = vld [vmem:[#allocation2 + $0x132] sm:$0xff] }
 0x239   : > { %9316 = vrot.lane.b32.xlu0 %v8854_v8, %s12813_s30  ;;  %v5080_v13 = vcombine.high %v5070_v54, %v5070_v54  ;;  %v6284_v34 = vrot.slane %v5070_v54, %v12982_v11  ;;  %v6288_v19 = vrot.slane %v5078_v7, %v12982_v11  ;;  %v15714_v24 = vmul.f32 0.75, %v493_v1 }
 0x23a   : > { %v2750_v36 = vcombine.high %v2740_v2, %v2740_v2  ;;  %v6296_v35 = vrot.slane %v5063_v14, %v12982_v11  ;;  %v2747_v38 = vrot.slane %v2719_v50, %v13025_v31  ;;  %v2749_v44 = vcombine.high %v2733_v10, %v2733_v10 }
 0x23b   : > { %v6292_v22 = vrot.slane %v5080_v13, %v12982_v11  ;;  %v6954_v37 = vsel %vm6697_vm8, %v2726_v5, %v6284_v34  ;;  %v6955_v62 = vsel %vm6697_vm8, %v2740_v2, %v6288_v19  ;;  %v5077_v54 = vrot.slane %v5049_v28, %v13025_v31 }
 0x23c   : > { %v6957_v1 = vsel %vm6697_vm8, %v2750_v36, %v6296_v35  ;;  %v8399_v7 = vcombine.low %v6954_v37, %v6955_v62  ;;  %v2751_v16 = vcombine.high %v2747_v38, %v2747_v38  ;;  %v5079_v8 = vcombine.high %v5063_v14, %v5063_v14 }
 0x23d   : > { %v6956_v50 = vsel %vm6697_vm8, %v2748_v46, %v6292_v22  ;;  %9318 = vrot.lane.b32.xlu0 %v8855_v15, %s12813_s30  ;;  %v5081_v43 = vcombine.high %v5077_v54, %v5077_v54  ;;  %v6300_v13 = vrot.slane %v5077_v54, %v12982_v11  ;;  %v6312_v5 = vrot.slane %v15702_v30, %v12982_v11  ;;  %v15743_v54 = vpop.permute.xlu1 %9078 }
 0x23e   : > { %v8400_v2 = vcombine.low %v6956_v50, %v6957_v1  ;;  %v8407_v28 = vrot.slane %v8399_v7, %v13028_v32  ;;  %v6304_v34 = vrot.slane %v5079_v8, %v12982_v11  ;;  %v707_v19 = vrot.slane %v15696_v45, 1 }
 0x23f   : > { %v6308_v14 = vrot.slane %v5081_v43, %v12982_v11  ;;  %v6958_v36 = vsel %vm6697_vm8, %v2733_v10, %v6300_v13  ;;  %v6961_v46 = vsel %vm6697_vm8, %v2751_v16, %v6312_v5  ;;  %v17436_v35 = vrot.slane %v15714_v24, 1  ;;  %v15756_v13 = vpop.permute.xlu0 %9364 }
 0x240   : > { %v8414_v15 = vrot.slane %v8400_v2, %v13028_v32  ;;  %v6959_v22 = vsel %vm6697_vm8, %v2747_v38, %v6304_v34  ;;  %v941_v37 = vrot.slane %v15682_v63, 1  ;;  %v17437_v62 = vrot.slane %v15690_v12, 1 }
 0x241   : > { %v6960_v1 = vsel %vm6697_vm8, %v2749_v44, %v6308_v14  ;;  %v8416_v7 = vcombine.low %v6958_v36, %v6959_v22  ;;  %v709_v43 = vsel %vm666_vm5, %v707_v19, %v17436_v35  ;;  %v750_v10 = vrot.slane %v15655_v21, 1 }
 0x242   : > { %v8415_v16 = vcombine.low %v8407_v28, %v8414_v15  ;;  %v8417_v8 = vcombine.low %v6960_v1, %v6961_v46  ;;  %v15751_v50 = vadd.f32 %v709_v43, %v15682_v63  ;;  %v943_v38 = vsel %vm666_vm5, %v941_v37, %v17437_v62  ;;  %v15783_v1 = vpop.permute.xlu1 %9012 }
 0x243   : > { %v8424_v44 = vrot.slane %v8416_v7, %v13028_v32  ;;  %v1069_v5 = vadd.f32 %v943_v38, %v15696_v45  ;;  %v17554_v2 = vrot.slane %v15630_v52, 1  ;;  %v5082_v28 = vcombine.high %v15675_v47, %v15675_v47 }
 0x244   : > { %8672 = vst.msk [vmem:[#allocation2 + $0x281] sm:$0xff] %vm8607_vm9, %v8415_v16  ;;  %v8431_v63 = vrot.slane %v8417_v8, %v13028_v32  ;;  %v1926_v19 = vrot.slane %v15751_v50, %v13025_v31  ;;  %v5097_v45 = vcombine.high %v15688_v23, %v15688_v23  ;;  %v5127_v47 = vcombine.high %v15702_v30, %v15702_v30 }
 0x245   : > { %v751_v34 = vsel %vm666_vm5, %v17554_v2, %v750_v10  ;;  %v4137_v36 = vcombine.high %v1069_v5, %v1069_v5  ;;  %v4144_v52 = vrot.slane %v1069_v5, %v13025_v31  ;;  %v15776_v46 = vrot.slane %v5082_v28, %v13025_v31 }
 0x246   : > { %v15770_v14 = vadd.f32 %v751_v34, %v15622_v40  ;;  %v8432_v15 = vcombine.low %v8424_v44, %v8431_v63  ;;  %v1934_v22 = vcombine.high %v1926_v19, %v1926_v19  ;;  %v1942_v37 = vrot.slane %v1926_v19, %v13025_v31  ;;  %v15796_v44 = vpop.permute.xlu0 %9366  ;;  %v15811_v26 = vpop.permute.xlu1 %9014 }
 0x247   : > { %v15786_v23 = vrot.slane %v4137_v36, %v13025_v31  ;;  %v4152_v7 = vcombine.high %v4144_v52, %v4144_v52  ;;  %v4160_v43 = vrot.slane %v4144_v52, %v13025_v31  ;;  %v15791_v10 = vrot.slane %v15776_v46, %v13025_v31 }
 0x248   : > { %v2759_v40 = vrot.slane %v15770_v14, %v13025_v31  ;;  %8673 = vst.msk [vmem:[#allocation2 + $0x289] sm:$0xff] %vm8607_vm9, %v8432_v15  ;;  %v1956_v30 = vrot.slane %v1934_v22, %v13025_v31  ;;  %v1964_v16 = vcombine.high %v1942_v37, %v1942_v37  ;;  %v5119_v28 = vrot.slane %v5097_v45, %v13025_v31 }
 0x249   : > { %v4167_v5 = vrot.slane %v15786_v23, %v13025_v31  ;;  %v4174_v2 = vrot.slane %v4152_v7, %v13025_v31  ;;  %v4182_v34 = vcombine.high %v4160_v43, %v4160_v43  ;;  %v6320_v52 = vrot.slane %v5127_v47, %v12982_v11 }
 0x24a   : > { %v2767_v8 = vcombine.high %v2759_v40, %v2759_v40  ;;  %v2775_v38 = vrot.slane %v2759_v40, %v13025_v31  ;;  %v1966_v63 = vcombine.high %v1956_v30, %v1956_v30  ;;  %v5129_v43 = vcombine.high %v5119_v28, %v5119_v28  ;;  %v15820_v53 = vpop.permute.xlu0 %9300 }
 0x24b   : > { %v8816_v15 = vld [vmem:[#allocation2 + $0x281] sm:$0xff]  ;;  %v4184_v22 = vcombine.high %v4174_v2, %v4174_v2  ;;  %v5772_v40 = vrot.slane %v4174_v2, %v12982_v11  ;;  %v5776_v35 = vrot.slane %v4182_v34, %v12982_v11  ;;  %v5784_v62 = vrot.slane %v4167_v5, %v12982_v11 }
 0x24c   : > { %v2789_v19 = vrot.slane %v2767_v8, %v13025_v31  ;;  %v2797_v36 = vcombine.high %v2775_v38, %v2775_v38  ;;  %9096 = vrot.lane.b32.xlu1 %v8816_v15, %s12812_s27  ;;  %v6316_v45 = vrot.slane %v5119_v28, %v12982_v11  ;;  %v6328_v8 = vrot.slane %v15791_v10, %v12982_v11 }
 0x24d   : > { %v5780_v47 = vrot.slane %v4184_v22, %v12982_v11  ;;  %v6826_v59 = vsel %vm6697_vm8, %v1942_v37, %v5772_v40  ;;  %v6827_v2 = vsel %vm6697_vm8, %v1956_v30, %v5776_v35  ;;  %v6829_v34 = vsel %vm6697_vm8, %v1966_v63, %v5784_v62  ;;  %v8699_v62 = vld [vmem:[#allocation2 + $0xb8] sm:$0xff]  ;;  %v15848_v40 = vpop.permute.xlu1 %9080 }
 0x24e   : > { %v2799_v7 = vcombine.high %v2789_v19, %v2789_v19  ;;  %v7855_v57 = vcombine.low %v6826_v59, %v6827_v2  ;;  %v6324_v15 = vrot.slane %v5129_v43, %v12982_v11  ;;  %v6962_v33 = vsel %vm6697_vm8, %v2775_v38, %v6316_v45  ;;  %v15867_v2 = vpop.permute.xlu0 %9302 }
 0x24f   : > { %v6963_v28 = vsel %vm6697_vm8, %v2789_v19, %v6320_v52  ;;  %v8817_v3 = vld [vmem:[#allocation2 + $0x289] sm:$0xff]  ;;  %v6828_v58 = vsel %vm6697_vm8, %v1964_v16, %v5780_v47  ;;  %v15825_v35 = vmul.f32 0.25, %v15680_v4  ;;  %v15832_v63 = vmul.f32 0.75, %v15680_v4 }
 0x250   : > { %v8888_v55 = vld [vmem:[#allocation2 + $0x282] sm:$0xff]  ;;  %v6965_v22 = vsel %vm6697_vm8, %v2799_v7, %v6328_v8  ;;  %v8433_v37 = vcombine.low %v6962_v33, %v6963_v28  ;;  %9098 = vrot.lane.b32.xlu1 %v8817_v3, %s12812_s27  ;;  %v7856_v59 = vcombine.low %v6828_v58, %v6829_v34  ;;  %v7863_v30 = vrot.slane %v7855_v57, %v13028_v32 }
 0x251   : > { %9384 = vrot.lane.b32.xlu0 %v8888_v55, %s12813_s30  ;;  %v6964_v38 = vsel %vm6697_vm8, %v2797_v36, %v6324_v15  ;;  %v944_v33 = vrot.slane %v15825_v35, 1  ;;  %v1919_v52 = vcombine.high %v15751_v50, %v15751_v50  ;;  %v9617_v55 = vld [vmem:[%s17353_s1] sm:$0xff]  ;;  %v4153_v57 = vcombine.high %v15786_v23, %v15786_v23  ;;  %v8732_v36 = vld [vmem:[#allocation2 + $0x208] sm:$0xff] }
 0x252   : > { %v8434_v16 = vcombine.low %v6964_v38, %v6965_v22  ;;  %v8441_v19 = vrot.slane %v8433_v37, %v13028_v32  ;;  %v7870_v58 = vrot.slane %v7856_v59, %v13028_v32  ;;  %v4183_v3 = vcombine.high %v4167_v5, %v4167_v5  ;;  %12433 = vmatprep.subr.mxu1 %v9617_v55 }
 0x253   : > { %v15846_v4 = vsel %vm8607_vm9, %v8699_v62, %v15515_v49  ;;  %v17555_v7 = vrot.slane %v15690_v12, 1  ;;  %v1933_v45 = vrot.slane %v1919_v52, %v13025_v31  ;;  %v15860_v23 = vsel %vm9544_vm15, %v15641_v60, %v15531_v0  ;;  %12434 = vmatpush3.msra.mxu1 %v9617_v55 }
 0x254   : > { %v8448_v50 = vrot.slane %v8434_v16, %v13028_v32  ;;  %v7871_v49 = vcombine.low %v7863_v30, %v7870_v58  ;;  %v4181_v8 = vrot.slane %v4153_v57, %v13025_v31  ;;  %v5792_v47 = vrot.slane %v4183_v3, %v12982_v11  ;;  %12356 = vmatprep.mubr.msk.f32.mxu0 %vm9622_vm2, %v15860_v23  ;;  %v15891_v3 = vpop.permute.xlu1 %9082 }
 0x255   : > { %v945_v43 = vsel %vm666_vm5, %v17555_v7, %v944_v33  ;;  %v1935_v15 = vcombine.high %v1933_v45, %v1933_v45  ;;  %v1949_v28 = vrot.slane %v1933_v45, %v13025_v31  ;;  %v15872_v0 = vsel %vm8607_vm9, %v8732_v36, %v15571_v9 }
 0x256   : > { %v1070_v5 = vadd.f32 %v945_v43, %v15714_v24  ;;  %v8449_v34 = vcombine.low %v8441_v19, %v8448_v50  ;;  %8640 = vst.msk [vmem:[#allocation2 + $0x141] sm:$0xff] %vm8607_vm9, %v7871_v49  ;;  %v4185_v60 = vcombine.high %v4181_v8, %v4181_v8  ;;  %v5788_v37 = vrot.slane %v4181_v8, %v12982_v11 }
 0x257   : > { %v710_v62 = vrot.slane %v15832_v63, 1  ;;  %v1963_v59 = vrot.slane %v1935_v15, %v13025_v31  ;;  %v1965_v30 = vcombine.high %v1949_v28, %v1949_v28  ;;  %v17556_v16 = vrot.slane %v15632_v17, 1 }
 0x258   : > { %v4193_v22 = vrot.slane %v1070_v5, %v13025_v31  ;;  %8674 = vst.msk [vmem:[#allocation2 + $0x291] sm:$0xff] %vm8607_vm9, %v8449_v34  ;;  %v4186_v38 = vcombine.high %v1070_v5, %v1070_v5  ;;  %v5796_v52 = vrot.slane %v4185_v60, %v12982_v11  ;;  %v6830_v55 = vsel %vm6697_vm8, %v1949_v28, %v5788_v37 }
 0x259   : > { %v15883_v9 = vadd.f32 %v17556_v16, %v15655_v21  ;;  %v17557_v58 = vrot.slane %v15714_v24, 1  ;;  %v1967_v36 = vcombine.high %v1963_v59, %v1963_v59  ;;  %v6831_v50 = vsel %vm6697_vm8, %v1963_v59, %v5792_v47  ;;  %v15902_v24 = vpop.permute.xlu0 %9368 }
 0x25a   : > { %v4209_v19 = vrot.slane %v4193_v22, %v13025_v31  ;;  %v15898_v17 = vrot.slane %v4186_v38, %v13025_v31  ;;  %v6832_v43 = vsel %vm6697_vm8, %v1965_v30, %v5796_v52  ;;  %v7872_v45 = vcombine.low %v6830_v55, %v6831_v50  ;;  %v15924_v55 = vpop.permute.xlu1 %9016 }
 0x25b   : > { %v711_v57 = vsel %vm666_vm5, %v17557_v58, %v710_v62  ;;  %v4201_v49 = vcombine.high %v4193_v22, %v4193_v22  ;;  %v2752_v47 = vcombine.high %v15770_v14, %v15770_v14  ;;  %v5098_v60 = vcombine.high %v15776_v46, %v15776_v46  ;;  %v12058_v46 = vld [vmem:[%s17353_s1 + $0x20] sm:$0xff] }
 0x25c   : > { %v15895_v7 = vadd.f32 %v711_v57, %v15690_v12  ;;  %v5800_v21 = vrot.slane %v4209_v19, %v12982_v11  ;;  %v15908_v8 = vrot.slane %v15898_v17, %v13025_v31  ;;  %v4231_v12 = vcombine.high %v4209_v19, %v4209_v19  ;;  %12533 = vmatprep.subr.mxu0 %v12058_v46 }
 0x25d   : > { %v7880_v15 = vrot.slane %v7872_v45, %v13028_v32  ;;  %v4223_v28 = vrot.slane %v4201_v49, %v13025_v31  ;;  %v8784_v22 = vld [vmem:[#allocation2 + $0x141] sm:$0xff]  ;;  %v2766_v52 = vrot.slane %v2752_v47, %v13025_v31  ;;  %v5126_v50 = vrot.slane %v5098_v60, %v13025_v31  ;;  %12534 = vmatpush3.msra.mxu0 %v12058_v46 }
 0x25e   : > { %v1975_v5 = vrot.slane %v15895_v7, %v13025_v31  ;;  %v6833_v34 = vsel %vm6697_vm8, %v1967_v36, %v5800_v21  ;;  %v5808_v30 = vrot.slane %v4231_v12, %v12982_v11  ;;  %9032 = vrot.lane.b32.xlu1 %v8784_v22, %s12812_s27  ;;  %v5816_v19 = vrot.slane %v15908_v8, %v12982_v11 }
 0x25f   : > { %v7873_v37 = vcombine.low %v6832_v43, %v6833_v34  ;;  %v8889_v38 = vld [vmem:[#allocation2 + $0x28a] sm:$0xff]  ;;  %v4233_v14 = vcombine.high %v4223_v28, %v4223_v28  ;;  %v5804_v16 = vrot.slane %v4223_v28, %v12982_v11  ;;  %v2768_v45 = vcombine.high %v2766_v52, %v2766_v52 }
 0x260   : > { %v1983_v62 = vcombine.high %v1975_v5, %v1975_v5  ;;  %v1991_v59 = vrot.slane %v1975_v5, %v13025_v31  ;;  %9386 = vrot.lane.b32.xlu0 %v8889_v38, %s12813_s30  ;;  %v2782_v49 = vrot.slane %v2766_v52, %v13025_v31  ;;  %v15936_v5 = vpop.permute.xlu0 %9370  ;;  %v5128_v28 = vcombine.high %v15791_v10, %v15791_v10 }
 0x261   : > { %v7887_v58 = vrot.slane %v7873_v37, %v13028_v32  ;;  %v5812_v21 = vrot.slane %v4233_v14, %v12982_v11  ;;  %v2796_v37 = vrot.slane %v2768_v45, %v13025_v31  ;;  %v5130_v38 = vcombine.high %v5126_v50, %v5126_v50  ;;  %v8733_v14 = vld [vmem:[#allocation2 + $0x210] sm:$0xff] }
 0x262   : > { %v2005_v57 = vrot.slane %v1983_v62, %v13025_v31  ;;  %v2013_v36 = vcombine.high %v1991_v59, %v1991_v59  ;;  %v6834_v43 = vsel %vm6697_vm8, %v1991_v59, %v5804_v16  ;;  %v2798_v62 = vcombine.high %v2782_v49, %v2782_v49 }
 0x263   : > { %v7888_v12 = vcombine.low %v7880_v15, %v7887_v58  ;;  %v5137_v15 = vrot.slane %v15883_v9, %v13025_v31  ;;  %v2800_v52 = vcombine.high %v2796_v37, %v2796_v37  ;;  %v6336_v46 = vrot.slane %v5128_v28, %v12982_v11  ;;  %v8700_v58 = vld [vmem:[#allocation2 + $0xc8] sm:$0xff] }
 0x264   : > { %v2015_v47 = vcombine.high %v2005_v57, %v2005_v57  ;;  %v6835_v34 = vsel %vm6697_vm8, %v2005_v57, %v5808_v30  ;;  %v6836_v60 = vsel %vm6697_vm8, %v2013_v36, %v5812_v21  ;;  %v6332_v30 = vrot.slane %v5126_v50, %v12982_v11  ;;  %v15950_v57 = vpop.permute.xlu1 %9018 }
 0x265   : > { %v7889_v22 = vcombine.low %v6834_v43, %v6835_v34  ;;  %8641 = vst.msk [vmem:[#allocation2 + $0x149] sm:$0xff] %vm8607_vm9, %v7888_v12  ;;  %v5144_v36 = vrot.slane %v5137_v15, %v13025_v31  ;;  %v15958_v9 = vsel %vm9544_vm15, %v15846_v4, %v15579_v51  ;;  %v6967_v43 = vsel %vm6697_vm8, %v2796_v37, %v6336_v46  ;;  %v17558_v15 = vld [vmem:[#allocation21_spill] sm:$0xff] }
 0x266   : > { %v6837_v59 = vsel %vm6697_vm8, %v2015_v47, %v5816_v19  ;;  %v6340_v19 = vrot.slane %v5130_v38, %v12982_v11  ;;  %v6966_v21 = vsel %vm6697_vm8, %v2782_v49, %v6332_v30  ;;  %v9525_v45 = vsel %vm8607_vm9, %v8733_v14, %v15605_v42  ;;  %12357 = vmatmul.mubr.msk.f32.gmra.mxu0 %vm9622_vm2, %v15958_v9  ;;  %v15971_v49 = vpop.permute.xlu0 %9304  ;;  %v8818_v14 = vld [vmem:[#allocation2 + $0x291] sm:$0xff] }
 0x267   : > { %v7890_v16 = vcombine.low %v6836_v60, %v6837_v59  ;;  %v7897_v10 = vrot.slane %v7889_v22, %v13028_v32  ;;  %v15969_v12 = vsel %vm9544_vm15, %v15872_v0, %v15619_v27  ;;  %v6344_v51 = vrot.slane %v5144_v36, %v12982_v11  ;;  %v8701_v60 = vld [vmem:[#allocation2 + $0xd0] sm:$0xff] }
 0x268   : > { %v6968_v4 = vsel %vm6697_vm8, %v2798_v62, %v6340_v19  ;;  %v8450_v47 = vcombine.low %v6966_v21, %v6967_v43  ;;  %v9492_v34 = vsel %vm8607_vm9, %v8700_v58, %v15643_v56  ;;  %12407 = vmatprep.mubr.msk.f32.mxu1 %vm9622_vm2, %v15969_v12  ;;  %v1071_v28 = vadd.f32 %v944_v33, %v15832_v63  ;;  %v16000_v38 = vpop.permute.xlu1 %9084  ;;  %v17559_v21 = vld [vmem:[#allocation16_spill] sm:$0xff]  ;;  %v17561_v43 = vld [vmem:[#allocation17_spill] sm:$0xff] }
 0x269   : > { %v7904_v50 = vrot.slane %v7890_v16, %v13028_v32  ;;  %v1968_v27 = vcombine.high %v15895_v7, %v15895_v7  ;;  %v4202_v0 = vcombine.high %v15898_v17, %v15898_v17  ;;  %v6969_v22 = vsel %vm6697_vm8, %v2800_v52, %v6344_v51  ;;  %v8734_v51 = vld [vmem:[#allocation2 + $0x218] sm:$0xff] }
 0x26a   : > { %v8458_v37 = vrot.slane %v8450_v47, %v13028_v32  ;;  %v4232_v56 = vcombine.high %v15908_v8, %v15908_v8  ;;  %v15992_v62 = vsel %vm9544_vm15, %v9525_v45, %v15657_v48  ;;  %v8451_v33 = vcombine.low %v6968_v4, %v6969_v22  ;;  %v16012_v58 = vpop.permute.xlu0 %9306 }
 0x26b   : > { %v7905_v42 = vcombine.low %v7897_v10, %v7904_v50  ;;  %v1982_v7 = vrot.slane %v1968_v27, %v13025_v31  ;;  %v4230_v17 = vrot.slane %v4202_v0, %v13025_v31  ;;  %v4241_v59 = vrot.slane %v1071_v28, %v13025_v31  ;;  %12408 = vmatmul.mubr.msk.f32.gmra.mxu1 %vm9622_vm2, %v15992_v62 }
 0x26c   : > { %v8785_v35 = vld [vmem:[#allocation2 + $0x149] sm:$0xff]  ;;  %v5824_v48 = vrot.slane %v4232_v56, %v12982_v11  ;;  %v9493_v8 = vsel %vm8607_vm9, %v8701_v60, %v15692_v25  ;;  %v298_v30 = vadd.f32 %v17558_v15, %v14090_v39  ;;  %v8465_v16 = vrot.slane %v8451_v33, %v13028_v32  ;;  %v17560_v25 = vld [vmem:[#allocation22_spill] sm:$0xff] }
 0x26d   : > { %v8856_v63 = vld [vmem:[#allocation2 + $0x142] sm:$0xff]  ;;  %8642 = vst.msk [vmem:[#allocation2 + $0x151] sm:$0xff] %vm8607_vm9, %v7905_v42  ;;  %9034 = vrot.lane.b32.xlu1 %v8785_v35, %s12812_s27  ;;  %v1984_v10 = vcombine.high %v1982_v7, %v1982_v7  ;;  %v1998_v52 = vrot.slane %v1982_v7, %v13025_v31  ;;  %v4234_v46 = vcombine.high %v4230_v17, %v4230_v17 }
 0x26e   : > { %9320 = vrot.lane.b32.xlu0 %v8856_v63, %s12813_s30  ;;  %v4248_v36 = vrot.slane %v4241_v59, %v13025_v31  ;;  %v5820_v19 = vrot.slane %v4230_v17, %v12982_v11  ;;  %v299_v50 = vadd.f32 %v17560_v25, %v17559_v21  ;;  %v17562_v39 = vld [vmem:[#allocation23_spill] sm:$0xff]  ;;  %v8466_v4 = vcombine.low %v8458_v37, %v8465_v16  ;;  %v16039_v63 = vpop.permute.xlu1 %9086  ;;  %v8735_v16 = vld [vmem:[#allocation2 + $0x220] sm:$0xff] }
 0x26f   : > { %v300_v45 = vadd.f32 %v17562_v39, %v17561_v43  ;;  %v2012_v47 = vrot.slane %v1984_v10, %v13025_v31  ;;  %v2014_v42 = vcombine.high %v1998_v52, %v1998_v52  ;;  %v5828_v28 = vrot.slane %v4234_v46, %v12982_v11  ;;  %v16043_v10 = vpop.permute.xlu0 %9372 }
 0x270   : > { %v5832_v27 = vrot.slane %v4248_v36, %v12982_v11  ;;  %v6838_v0 = vsel %vm6697_vm8, %v1998_v52, %v5820_v19  ;;  %v16028_v60 = vsel %vm9544_vm15, %v9492_v34, %v15704_v61  ;;  %8675 = vst.msk [vmem:[#allocation2 + $0x299] sm:$0xff] %vm8607_vm9, %v8466_v4  ;;  %v9526_v35 = vsel %vm8607_vm9, %v8734_v51, %v15718_v20  ;;  %v8702_v19 = vld [vmem:[#allocation2 + $0xd8] sm:$0xff] }
 0x271   : > { %9100 = vrot.lane.b32.xlu1 %v8818_v14, %s12812_s27  ;;  %v2016_v22 = vcombine.high %v2012_v47, %v2012_v47  ;;  %v6839_v37 = vsel %vm6697_vm8, %v2012_v47, %v5824_v48  ;;  %v6840_v56 = vsel %vm6697_vm8, %v2014_v42, %v5828_v28  ;;  %12359 = vmatprep.mubr.msk.f32.mxu0 %vm9622_vm2, %v16028_v60  ;;  %v468_v33 = vsel %vm414_vm10, %v298_v30, 0.0 }
 0x272   : > { %v7906_v34 = vcombine.low %v6838_v0, %v6839_v37  ;;  %v469_v7 = vsel %vm414_vm10, %v299_v50, 0.0  ;;  %v470_v17 = vsel %vm414_vm10, %v300_v45, 0.0  ;;  %v522_v48 = vmul.f32 0.25, %v468_v33  ;;  %v16064_v28 = vpop.permute.xlu1 %9020 }
 0x273   : > { %v6841_v59 = vsel %vm6697_vm8, %v2016_v22, %v5832_v27  ;;  %v523_v15 = vmul.f32 0.25, %v469_v7  ;;  %v558_v14 = vmul.f32 0.75, %v468_v33  ;;  %v559_v46 = vmul.f32 0.75, %v469_v7 }
 0x274   : > { %v8857_v61 = vld [vmem:[#allocation2 + $0x14a] sm:$0xff]  ;;  %v7907_v20 = vcombine.low %v6840_v56, %v6841_v59  ;;  %v7914_v52 = vrot.slane %v7906_v34, %v13028_v32  ;;  %v829_v36 = vmul.f32 0.25, %v470_v17  ;;  %v901_v30 = vrot.slane %v522_v48, 1  ;;  %v16076_v34 = vpop.permute.xlu0 %9374 }
 0x275   : > { %9322 = vrot.lane.b32.xlu0 %v8857_v61, %s12813_s30  ;;  %v667_v21 = vrot.slane %v558_v14, 1  ;;  %v902_v25 = vrot.slane %v523_v15, 1  ;;  %v16048_v50 = vsel %vm9544_vm15, %v9493_v8, %v15725_v29  ;;  %v668_v39 = vrot.slane %v559_v46, 1  ;;  %v8703_v8 = vld [vmem:[#allocation2 + $0xe0] sm:$0xff]  ;;  %v8786_v33 = vld [vmem:[#allocation2 + $0x151] sm:$0xff] }
 0x276   : > { %v7921_v43 = vrot.slane %v7907_v20, %v13028_v32  ;;  %v904_v45 = vrot.slane %v829_v36, 1  ;;  %v9527_v51 = vsel %vm8607_vm9, %v8735_v16, %v15743_v54  ;;  %12360 = vmatmul.mubr.msk.f32.gmra.mxu0 %vm9622_vm2, %v16048_v50  ;;  %v560_v47 = vmul.f32 0.75, %v470_v17 }
 0x277   : > { %v903_v4 = vsel %vm666_vm5, %v901_v30, %v902_v25  ;;  %v16058_v42 = vsel %vm9544_vm15, %v9526_v35, %v15756_v13  ;;  %v16062_v29 = vsel %vm8607_vm9, %v8702_v19, %v15783_v1  ;;  %v8819_v27 = vld [vmem:[#allocation2 + $0x299] sm:$0xff]  ;;  %v669_v22 = vsel %vm666_vm5, %v667_v21, %v668_v39 }
 0x278   : > { %v8890_v0 = vld [vmem:[#allocation2 + $0x292] sm:$0xff]  ;;  %v7922_v54 = vcombine.low %v7914_v52, %v7921_v43  ;;  %v1045_v37 = vadd.f32 %v903_v4, %v558_v14  ;;  %v905_v56 = vsel %vm666_vm5, %v902_v25, %v904_v45  ;;  %12410 = vmatprep.mubr.msk.f32.mxu1 %vm9622_vm2, %v16058_v42  ;;  %9102 = vrot.lane.b32.xlu1 %v8819_v27, %s12812_s27  ;;  %v670_v35 = vrot.slane %v560_v47, 1  ;;  %v8891_v7 = vld [vmem:[#allocation2 + $0x29a] sm:$0xff]  ;;  %v16104_v43 = vpop.permute.xlu1 %9022 }
 0x279   : > { %9388 = vrot.lane.b32.xlu0 %v8890_v0, %s12813_s30  ;;  %v793_v13 = vadd.f32 %v669_v22, %v522_v48  ;;  %v16072_v1 = vadd.f32 %v905_v56, %v559_v46  ;;  %v16074_v61 = vadd.f32 %v904_v45, %v560_v47  ;;  %v16082_v14 = vsel %vm9544_vm15, %v9527_v51, %v15796_v44 }
 0x27a   : > { %8643 = vst.msk [vmem:[#allocation2 + $0x159] sm:$0xff] %vm8607_vm9, %v7922_v54  ;;  %v3241_v17 = vcombine.high %v1045_v37, %v1045_v37  ;;  %v3248_v59 = vrot.slane %v1045_v37, %v13025_v31  ;;  %v16086_v48 = vsel %vm8607_vm9, %v8703_v8, %v15811_v26  ;;  %v671_v46 = vsel %vm666_vm5, %v668_v39, %v670_v35  ;;  %v16113_v54 = vpop.permute.xlu0 %9308 }
 0x27b   : > { %v1142_v16 = vrot.slane %v793_v13, %v13025_v31  ;;  %v1135_v20 = vcombine.high %v793_v13, %v793_v13  ;;  %v16091_v52 = vrot.slane %v16072_v1, %v13025_v31  ;;  %12411 = vmatmul.mubr.msk.f32.gmra.mxu1 %vm9622_vm2, %v16082_v14  ;;  %v16098_v21 = vadd.f32 %v671_v46, %v523_v15 }
 0x27c   : > { %v3255_v36 = vrot.slane %v3241_v17, %v13025_v31  ;;  %v3256_v44 = vcombine.high %v3248_v59, %v3248_v59  ;;  %v3264_v19 = vrot.slane %v3248_v59, %v13025_v31  ;;  %9036 = vrot.lane.b32.xlu1 %v8786_v33, %s12812_s27  ;;  %v16107_v39 = vmul.f32 0.75, %v15544_v18 }
 0x27d   : > { %9390 = vrot.lane.b32.xlu0 %v8891_v7, %s12813_s30  ;;  %v1150_v26 = vcombine.high %v1142_v16, %v1142_v16  ;;  %v1158_v30 = vrot.slane %v1142_v16, %v13025_v31  ;;  %v1149_v25 = vrot.slane %v1135_v20, %v13025_v31 }
 0x27e   : > { %v3271_v45 = vrot.slane %v3255_v36, %v13025_v31  ;;  %v3278_v51 = vrot.slane %v3256_v44, %v13025_v31  ;;  %v3286_v15 = vcombine.high %v3264_v19, %v3264_v19  ;;  %v3257_v4 = vcombine.high %v3255_v36, %v3255_v36  ;;  %v12737_v36 = vld [vmem:[%s12987_s24 + $0xe0] sm:$0xff] }
 0x27f   : > { %v1172_v47 = vrot.slane %v1150_v26, %v13025_v31  ;;  %v1180_v8 = vcombine.high %v1158_v30, %v1158_v30  ;;  %v1151_v27 = vcombine.high %v1149_v25, %v1149_v25  ;;  %v1165_v0 = vrot.slane %v1149_v25, %v13025_v31 }
 0x280   : > { %v3288_v22 = vcombine.high %v3278_v51, %v3278_v51  ;;  %v5260_v37 = vrot.slane %v3278_v51, %v12982_v11  ;;  %v5264_v18 = vrot.slane %v3286_v15, %v12982_v11  ;;  %v5272_v56 = vrot.slane %v3271_v45, %v12982_v11 }
 0x281   : > { %v8787_v13 = vld [vmem:[#allocation2 + $0x159] sm:$0xff]  ;;  %v1182_v33 = vcombine.high %v1172_v47, %v1172_v47  ;;  %v1179_v7 = vrot.slane %v1151_v27, %v13025_v31  ;;  %v1181_v17 = vcombine.high %v1165_v0, %v1165_v0  ;;  %v3285_v59 = vrot.slane %v3257_v4, %v13025_v31  ;;  %v16129_v4 = vpop.permute.xlu1 %9088 }
 0x282   : > { %v8858_v35 = vld [vmem:[#allocation2 + $0x152] sm:$0xff]  ;;  %9038 = vrot.lane.b32.xlu1 %v8787_v13, %s12812_s27  ;;  %v5268_v16 = vrot.slane %v3288_v22, %v12982_v11  ;;  %v6698_v20 = vsel %vm6697_vm8, %v1158_v30, %v5260_v37  ;;  %v6699_v46 = vsel %vm6697_vm8, %v1172_v47, %v5264_v18  ;;  %v16126_v44 = vmul.f32 0.75, %v12737_v36  ;;  %v8859_v25 = vld [vmem:[#allocation2 + $0x15a] sm:$0xff] }
 0x283   : > { %9324 = vrot.lane.b32.xlu0 %v8858_v35, %s12813_s30  ;;  %v6701_v19 = vsel %vm6697_vm8, %v1182_v33, %v5272_v56  ;;  %v7311_v26 = vcombine.low %v6698_v20, %v6699_v46  ;;  %v1183_v51 = vcombine.high %v1179_v7, %v1179_v7  ;;  %v3287_v15 = vcombine.high %v3271_v45, %v3271_v45  ;;  %v16139_v35 = vpop.permute.xlu0 %9310 }
 0x284   : > { %v6700_v27 = vsel %vm6697_vm8, %v1180_v8, %v5268_v16  ;;  %v3289_v13 = vcombine.high %v3285_v59, %v3285_v59  ;;  %v3313_v22 = vrot.slane %v16091_v52, %v13025_v31  ;;  %v5276_v30 = vrot.slane %v3285_v59, %v12982_v11 }
 0x285   : > { %v7312_v47 = vcombine.low %v6700_v27, %v6701_v19  ;;  %v7319_v37 = vrot.slane %v7311_v26, %v13028_v32  ;;  %v5280_v18 = vrot.slane %v3287_v15, %v12982_v11  ;;  %v1191_v56 = vrot.slane %v16098_v21, %v13025_v31 }
 0x286   : > { %v5284_v45 = vrot.slane %v3289_v13, %v12982_v11  ;;  %v5288_v8 = vrot.slane %v3313_v22, %v12982_v11  ;;  %v6702_v33 = vsel %vm6697_vm8, %v1165_v0, %v5276_v30  ;;  %v3290_v59 = vcombine.high %v16072_v1, %v16072_v1  ;;  %v16154_v1 = vpop.permute.xlu1 %9090 }
 0x287   : > { %9326 = vrot.lane.b32.xlu0 %v8859_v25, %s12813_s30  ;;  %v7326_v16 = vrot.slane %v7312_v47, %v13028_v32  ;;  %v6703_v20 = vsel %vm6697_vm8, %v1179_v7, %v5280_v18  ;;  %v1199_v46 = vcombine.high %v1191_v56, %v1191_v56  ;;  %v1207_v36 = vrot.slane %v1191_v56, %v13025_v31 }
 0x288   : > { %v6704_v19 = vsel %vm6697_vm8, %v1181_v17, %v5284_v45  ;;  %v6705_v26 = vsel %vm6697_vm8, %v1183_v51, %v5288_v8  ;;  %v7328_v25 = vcombine.low %v6702_v33, %v6703_v20  ;;  %v3304_v15 = vrot.slane %v3290_v59, %v13025_v31  ;;  %v16164_v8 = vpop.permute.xlu0 %9376 }
 0x289   : > { %v7327_v27 = vcombine.low %v7319_v37, %v7326_v16  ;;  %v7329_v13 = vcombine.low %v6704_v19, %v6705_v26  ;;  %v1221_v0 = vrot.slane %v1199_v46, %v13025_v31  ;;  %v1229_v30 = vcombine.high %v1207_v36, %v1207_v36 }
 0x28a   : > { %v7336_v47 = vrot.slane %v7328_v25, %v13028_v32  ;;  %v3305_v7 = vcombine.high %v16091_v52, %v16091_v52  ;;  %v3320_v18 = vrot.slane %v3304_v15, %v13025_v31  ;;  %v3335_v17 = vcombine.high %v3313_v22, %v3313_v22 }
 0x28b   : > { %8608 = vst.msk [vmem:[#allocation2 + $0x1] sm:$0xff] %vm8607_vm9, %v7327_v27  ;;  %v7343_v51 = vrot.slane %v7329_v13, %v13028_v32  ;;  %v1231_v56 = vcombine.high %v1221_v0, %v1221_v0  ;;  %v1184_v37 = vcombine.high %v16098_v21, %v16098_v21  ;;  %v3306_v45 = vcombine.high %v3304_v15, %v3304_v15 }
 0x28c   : > { %v3327_v33 = vrot.slane %v3305_v7, %v13025_v31  ;;  %v5296_v59 = vrot.slane %v3335_v17, %v12982_v11  ;;  %v5304_v52 = vrot.slane %v3320_v18, %v12982_v11  ;;  %v3336_v16 = vcombine.high %v3320_v18, %v3320_v18  ;;  %v16179_v18 = vpop.permute.xlu1 %9024 }
 0x28d   : > { %v7344_v20 = vcombine.low %v7336_v47, %v7343_v51  ;;  %v1198_v22 = vrot.slane %v1184_v37, %v13025_v31  ;;  %v3334_v46 = vrot.slane %v3306_v45, %v13025_v31  ;;  %v3345_v19 = vrot.slane %v16074_v61, %v13025_v31 }
 0x28e   : > { %v3337_v26 = vcombine.high %v3327_v33, %v3327_v33  ;;  %v5292_v21 = vrot.slane %v3327_v33, %v12982_v11  ;;  %v6707_v25 = vsel %vm6697_vm8, %v1221_v0, %v5296_v59  ;;  %v6709_v15 = vsel %vm6697_vm8, %v1231_v56, %v5304_v52  ;;  %v8736_v59 = vld [vmem:[#allocation2 + $0x230] sm:$0xff]  ;;  %v16187_v52 = vpop.permute.xlu0 %9378 }
 0x28f   : > { %8609 = vst.msk [vmem:[#allocation2 + $0x9] sm:$0xff] %vm8607_vm9, %v7344_v20  ;;  %v1200_v27 = vcombine.high %v1198_v22, %v1198_v22  ;;  %v1214_v13 = vrot.slane %v1198_v22, %v13025_v31  ;;  %v3338_v47 = vcombine.high %v3334_v46, %v3334_v46  ;;  %v3352_v7 = vrot.slane %v3345_v19, %v13025_v31 }
 0x290   : > { %v5300_v17 = vrot.slane %v3337_v26, %v12982_v11  ;;  %v6706_v61 = vsel %vm6697_vm8, %v1207_v36, %v5292_v21  ;;  %v5308_v51 = vrot.slane %v3334_v46, %v12982_v11  ;;  %v5312_v0 = vrot.slane %v3336_v16, %v12982_v11  ;;  %v8737_v46 = vld [vmem:[#allocation2 + $0x238] sm:$0xff] }
 0x291   : > { %v7345_v37 = vcombine.low %v6706_v61, %v6707_v25  ;;  %v1228_v56 = vrot.slane %v1200_v27, %v13025_v31  ;;  %v1230_v45 = vcombine.high %v1214_v13, %v1214_v13  ;;  %v5316_v33 = vrot.slane %v3338_v47, %v12982_v11  ;;  %v8704_v47 = vld [vmem:[#allocation2 + $0xf0] sm:$0xff] }
 0x292   : > { %v8752_v20 = vld [vmem:[#allocation2 + $0x1] sm:$0xff]  ;;  %v6708_v22 = vsel %vm6697_vm8, %v1229_v30, %v5300_v17  ;;  %v5320_v19 = vrot.slane %v3352_v7, %v12982_v11  ;;  %v6710_v36 = vsel %vm6697_vm8, %v1214_v13, %v5308_v51  ;;  %v16195_v16 = vsel %vm9544_vm15, %v16062_v29, %v15820_v53  ;;  %v8705_v29 = vld [vmem:[#allocation2 + $0xf8] sm:$0xff] }
 0x293   : > { %8968 = vrot.lane.b32.xlu1 %v8752_v20, %s12812_s27  ;;  %v7346_v26 = vcombine.low %v6708_v22, %v6709_v15  ;;  %v7353_v21 = vrot.slane %v7345_v37, %v13028_v32  ;;  %v1232_v25 = vcombine.high %v1228_v56, %v1228_v56  ;;  %v6711_v27 = vsel %vm6697_vm8, %v1228_v56, %v5312_v0  ;;  %v8738_v51 = vld [vmem:[#allocation2 + $0x240] sm:$0xff]  ;;  %v8739_v0 = vld [vmem:[#allocation2 + $0x248] sm:$0xff] }
 0x294   : > { %v6712_v30 = vsel %vm6697_vm8, %v1230_v45, %v5316_v33  ;;  %v7362_v7 = vcombine.low %v6710_v36, %v6711_v27  ;;  %v9528_v13 = vsel %vm8607_vm9, %v8736_v59, %v15848_v40  ;;  %12362 = vmatprep.mubr.msk.f32.mxu0 %vm9622_vm2, %v16195_v16  ;;  %v16208_v53 = vsel %vm9544_vm15, %v16086_v48, %v15867_v2  ;;  %v8706_v37 = vld [vmem:[#allocation2 + $0x100] sm:$0xff]  ;;  %v9027_v2 = vpop.permute.xlu1 %9026  ;;  %v8707_v59 = vld [vmem:[#allocation2 + $0x108] sm:$0xff] }
 0x295   : > { %v7360_v15 = vrot.slane %v7346_v26, %v13028_v32  ;;  %v6713_v17 = vsel %vm6697_vm8, %v1232_v25, %v5320_v19  ;;  %v9529_v61 = vsel %vm8607_vm9, %v8737_v46, %v15891_v3  ;;  %12363 = vmatmul.mubr.msk.f32.gmra.mxu0 %vm9622_vm2, %v16208_v53  ;;  %v16218_v40 = vsel %vm9544_vm15, %v9528_v13, %v15902_v24  ;;  %v9313_v36 = vpop.permute.xlu0 %9312  ;;  %v12738_v46 = vld [vmem:[%s12987_s24 + $0xe8] sm:$0x3]  ;;  %s17248_s24 = scalar_lea.vmem [#allocation3], %s11920_s6 }
 0x296   : > { %v8753_v48 = vld [vmem:[#allocation2 + $0x9] sm:$0xff]  ;;  %v7363_v45 = vcombine.low %v6712_v30, %v6713_v17  ;;  %v7370_v33 = vrot.slane %v7362_v7, %v13028_v32  ;;  %v9496_v3 = vsel %vm8607_vm9, %v8704_v47, %v15924_v55  ;;  %12413 = vmatprep.mubr.msk.f32.mxu1 %vm9622_vm2, %v16218_v40  ;;  %v16227_v24 = vsel %vm9544_vm15, %v9529_v61, %v15936_v5  ;;  %v8740_v55 = vld [vmem:[#allocation2 + $0x258] sm:$0xff] }
 0x297   : > { %v8824_v56 = vld [vmem:[#allocation2 + $0x2] sm:$0xff]  ;;  %8970 = vrot.lane.b32.xlu1 %v8753_v48, %s12812_s27  ;;  %v7361_v20 = vcombine.low %v7353_v21, %v7360_v15  ;;  %v9497_v22 = vsel %vm8607_vm9, %v8705_v29, %v15950_v57  ;;  %v16235_v19 = vsel %vm9544_vm15, %v9496_v3, %v15971_v49  ;;  %v330_v26 = vmul.f32 0.75, %v12738_v46  ;;  %12414 = vmatmul.mubr.msk.f32.gmra.mxu1 %vm9622_vm2, %v16227_v24  ;;  %v8708_v21 = vld [vmem:[#allocation2 + $0x118] sm:$0xff]  ;;  %v17565_v61 = vld [vmem:[#allocation32_spill] sm:$0xff] }
 0x298   : > { %9256 = vrot.lane.b32.xlu0 %v8824_v56, %s12813_s30  ;;  %v7377_v5 = vrot.slane %v7363_v45, %v13028_v32  ;;  %v9530_v25 = vsel %vm8607_vm9, %v8738_v51, %v16000_v38  ;;  %12365 = vmatprep.mubr.msk.f32.mxu0 %vm9622_vm2, %v16235_v19  ;;  %v16247_v57 = vsel %vm9544_vm15, %v9497_v22, %v16012_v58  ;;  %v8741_v49 = vld [vmem:[#allocation2 + $0x260] sm:$0xff]  ;;  %v377_v27 = vadd.s32 17, %v12971_v6  ;;  %v9093_v13 = vpop.permute.xlu1 %9092  ;;  %v17564_v15 = vld [vmem:[#allocation31_spill] sm:$0xff] }
 0x299   : > { %8610 = vst.msk [vmem:[#allocation2 + $0x11] sm:$0xff] %vm8607_vm9, %v7361_v20  ;;  %v9531_v47 = vsel %vm8607_vm9, %v8739_v0, %v16039_v63  ;;  %12366 = vmatmul.mubr.msk.f32.gmra.mxu0 %vm9622_vm2, %v16247_v57  ;;  %v16257_v38 = vsel %vm9544_vm15, %v9530_v25, %v16043_v10  ;;  %v9498_v58 = vsel %vm8607_vm9, %v8706_v37, %v16064_v28  ;;  %v8709_v29 = vld [vmem:[#allocation2 + $0x120] sm:$0xff]  ;;  %v8742_v0 = vld [vmem:[#allocation2 + $0x268] sm:$0xff] }
 0x29a   : > { %v9499_v30 = vsel %vm8607_vm9, %v8707_v59, %v16104_v43  ;;  %v7378_v7 = vcombine.low %v7370_v33, %v7377_v5  ;;  %12416 = vmatprep.mubr.msk.f32.mxu1 %vm9622_vm2, %v16257_v38  ;;  %v16267_v6 = vsel %vm9544_vm15, %v9531_v47, %v16076_v34  ;;  %v16271_v63 = vsel %vm9544_vm15, %v9498_v58, %v16113_v54  ;;  %v8710_v58 = vld [vmem:[#allocation2 + $0x128] sm:$0xff] }
 0x29b   : > { %v9532_v10 = vsel %vm8607_vm9, %v8740_v55, %v16129_v4  ;;  %12368 = vmatprep.mubr.msk.f32.mxu0 %vm9622_vm2, %v16271_v63  ;;  %v16279_v28 = vsel %vm9544_vm15, %v9499_v30, %v16139_v35  ;;  %v9533_v43 = vsel %vm8607_vm9, %v8741_v49, %v16154_v1  ;;  %v9500_v54 = vsel %vm8607_vm9, %v8708_v21, %v16179_v18  ;;  %v9315_v1 = vpop.permute.xlu0 %9314  ;;  %v8743_v55 = vld [vmem:[#allocation2 + $0x270] sm:$0xff] }
 0x29c   : > { %v16285_v34 = vsel %vm9544_vm15, %v9532_v10, %v16164_v8  ;;  %8611 = vst.msk [vmem:[#allocation2 + $0x19] sm:$0xff] %vm8607_vm9, %v7378_v7  ;;  %12417 = vmatmul.mubr.msk.f32.gmra.mxu1 %vm9622_vm2, %v16267_v6  ;;  %v16294_v4 = vsel %vm9544_vm15, %v9533_v43, %v16187_v52  ;;  %v16297_v35 = vsel %vm9544_vm15, %v9500_v54, %v9313_v36  ;;  %v17563_v8 = vld [vmem:[#allocation26_spill] sm:$0xff]  ;;  %vm395_vm11 = vcmp.ge.s32.totalorder %v377_v27, 0 }
 0x29d   : > { %12369 = vmatmul.mubr.msk.f32.gmra.mxu0 %vm9622_vm2, %v16279_v28  ;;  %12419 = vmatprep.mubr.msk.f32.mxu1 %vm9622_vm2, %v16285_v34  ;;  %v355_v18 = vadd.f32 %v16107_v39, %v17563_v8  ;;  %v356_v17 = vadd.f32 %v16126_v44, %v17564_v15  ;;  %v357_v51 = vadd.f32 %v330_v26, %v17565_v61  ;;  %vm413_vm12 = vcmp.lt.s32.totalorder %v377_v27, 32 }
 0x29e   : > { %v9501_v52 = vsel %vm8607_vm9, %v8709_v29, %v9027_v2  ;;  %12371 = vmatprep.mubr.msk.f32.mxu0 %vm9622_vm2, %v16297_v35  ;;  %vm431_vm13 = vmand %vm395_vm11, %vm413_vm12  ;;  %v9534_v2 = vsel %vm8607_vm9, %v8742_v0, %v9093_v13 }
 0x29f   : > { %v16312_v37 = vsel %vm9544_vm15, %v9501_v52, %v9315_v1  ;;  %v9095_v39 = vpop.permute.xlu1 %9094  ;;  %v519_v44 = vsel %vm431_vm13, %v355_v18, 0.0  ;;  %v520_v45 = vsel %vm431_vm13, %v356_v17, 0.0  ;;  %v521_v33 = vsel %vm431_vm13, %v357_v51, 0.0 }
 0x2a0   : > { %v8825_v48 = vld [vmem:[#allocation2 + $0xa] sm:$0xff]  ;;  %12420 = vmatmul.mubr.msk.f32.gmra.mxu1 %vm9622_vm2, %v16294_v4  ;;  %v9381_v3 = vpop.permute.xlu0 %9380  ;;  %v556_v59 = vmul.f32 0.25, %v519_v44  ;;  %v557_v20 = vmul.f32 0.25, %v520_v45  ;;  %v609_v22 = vmul.f32 0.75, %v519_v44  ;;  %v610_v46 = vmul.f32 0.75, %v520_v45 }
 0x2a1   : > { %v8754_v56 = vld [vmem:[#allocation2 + $0x11] sm:$0xff]  ;;  %9258 = vrot.lane.b32.xlu1 %v8825_v48, %s12813_s30  ;;  %12372 = vmatmul.mubr.msk.f32.gmra.mxu0 %vm9622_vm2, %v16312_v37  ;;  %v16322_v36 = vsel %vm9544_vm15, %v9534_v2, %v9381_v3  ;;  %v846_v26 = vmul.f32 0.25, %v521_v33  ;;  %v611_v5 = vmul.f32 0.75, %v521_v33  ;;  %v9535_v43 = vsel %vm8607_vm9, %v8743_v55, %v9095_v39 }
 0x2a2   : > { %8972 = vrot.lane.b32.xlu0 %v8754_v56, %s12812_s27  ;;  %12422 = vmatprep.mubr.msk.f32.mxu1 %vm9622_vm2, %v16322_v36  ;;  %v752_v21 = vrot.slane %v609_v22, 1  ;;  %v986_v27 = vrot.slane %v556_v59, 1  ;;  %v987_v47 = vrot.slane %v557_v20, 1  ;;  %v753_v7 = vrot.slane %v610_v46, 1 }
 0x2a3   : > { %v8755_v25 = vld [vmem:[#allocation2 + $0x19] sm:$0xff]  ;;  %v9029_v30 = vpop.permute.xlu1 %9028  ;;  %v989_v10 = vrot.slane %v846_v26, 1  ;;  %v755_v13 = vrot.slane %v611_v5, 1 }
 0x2a4   : > { %v8826_v49 = vld [vmem:[#allocation2 + $0x12] sm:$0xff]  ;;  %v9383_v54 = vpop.permute.xlu0 %9382  ;;  %v988_v29 = vsel %vm666_vm5, %v986_v27, %v987_v47  ;;  %v8827_v1 = vld [vmem:[#allocation2 + $0x1a] sm:$0xff]  ;;  %v754_v18 = vsel %vm666_vm5, %v752_v21, %v753_v7  ;;  %v9502_v61 = vsel %vm8607_vm9, %v8710_v58, %v9029_v30 }
 0x2a5   : > { %8974 = vrot.lane.b32.xlu1 %v8755_v25, %s12812_s27  ;;  %v16331_v8 = vsel %vm9544_vm15, %v9535_v43, %v9383_v54  ;;  %v1096_v15 = vadd.f32 %v988_v29, %v609_v22  ;;  %v990_v17 = vsel %vm666_vm5, %v987_v47, %v989_v10  ;;  %v827_v51 = vadd.f32 %v754_v18, %v556_v59  ;;  %v8711_v59 = vld [vmem:[#allocation2 + $0x130] sm:$0xff] }
 0x2a6   : > { %9260 = vrot.lane.b32.xlu0 %v8826_v49, %s12813_s30  ;;  %12423 = vmatmul.mubr.msk.f32.gmra.mxu1 %vm9622_vm2, %v16331_v8  ;;  %v16338_v52 = vadd.f32 %v990_v17, %v610_v46  ;;  %v756_v0 = vsel %vm666_vm5, %v753_v7, %v755_v13  ;;  %v16344_v44 = vadd.f32 %v989_v10, %v611_v5 }
 0x2a7   : > { %v5145_v48 = vcombine.high %v1096_v15, %v1096_v15  ;;  %v5152_v56 = vrot.slane %v1096_v15, %v13025_v31  ;;  %v16342_v39 = vadd.f32 %v756_v0, %v557_v20  ;;  %v2808_v45 = vrot.slane %v827_v51, %v13025_v31 }
 0x2a8   : > { %v2801_v33 = vcombine.high %v827_v51, %v827_v51  ;;  %v16350_v2 = vrot.slane %v16338_v52, %v13025_v31  ;;  %v5194_v3 = vcombine.high %v16338_v52, %v16338_v52 }
 0x2a9   : > { %9262 = vrot.lane.b32.xlu1 %v8827_v1, %s12813_s30  ;;  %v5159_v22 = vrot.slane %v5145_v48, %v13025_v31  ;;  %v5160_v55 = vcombine.high %v5152_v56, %v5152_v56  ;;  %v5168_v20 = vrot.slane %v5152_v56, %v13025_v31  ;;  %v2857_v46 = vrot.slane %v16342_v39, %v13025_v31 }
 0x2aa   : > { %v2816_v26 = vcombine.high %v2808_v45, %v2808_v45  ;;  %v2824_v5 = vrot.slane %v2808_v45, %v13025_v31  ;;  %v2815_v25 = vrot.slane %v2801_v33, %v13025_v31  ;;  %v16362_v49 = vrot.slane %v16350_v2, %v13025_v31  ;;  %v9031_v21 = vpop.permute.xlu1 %9030 }
 0x2ab   : > { %v9317_v27 = vpop.permute.xlu0 %9316  ;;  %v5175_v47 = vrot.slane %v5159_v22, %v13025_v31  ;;  %v5182_v58 = vrot.slane %v5160_v55, %v13025_v31  ;;  %v5190_v30 = vcombine.high %v5168_v20, %v5168_v20  ;;  %v5161_v7 = vcombine.high %v5159_v22, %v5159_v22 }
 0x2ac   : > { %v9503_v10 = vsel %vm8607_vm9, %v8711_v59, %v9031_v21  ;;  %v16368_v13 = vsel %vm9544_vm15, %v9502_v61, %v9317_v27  ;;  %v2838_v43 = vrot.slane %v2816_v26, %v13025_v31  ;;  %v2846_v54 = vcombine.high %v2824_v5, %v2824_v5 }
 0x2ad   : > { %12374 = vmatprep.mubr.msk.f32.mxu0 %vm9622_vm2, %v16368_v13  ;;  %v5192_v29 = vcombine.high %v5182_v58, %v5182_v58  ;;  %v6348_v1 = vrot.slane %v5182_v58, %v12982_v11  ;;  %v6352_v18 = vrot.slane %v5190_v30, %v12982_v11  ;;  %v6360_v15 = vrot.slane %v5175_v47, %v12982_v11 }
 0x2ae   : > { %v2848_v17 = vcombine.high %v2838_v43, %v2838_v43  ;;  %v2817_v51 = vcombine.high %v2815_v25, %v2815_v25  ;;  %v2831_v52 = vrot.slane %v2815_v25, %v13025_v31  ;;  %v5189_v61 = vrot.slane %v5161_v7, %v13025_v31 }
 0x2af   : > { %v9319_v0 = vpop.permute.xlu0 %9318  ;;  %v6356_v48 = vrot.slane %v5192_v29, %v12982_v11  ;;  %v6970_v56 = vsel %vm6697_vm8, %v2824_v5, %v6348_v1  ;;  %v6971_v45 = vsel %vm6697_vm8, %v2838_v43, %v6352_v18  ;;  %v5191_v33 = vcombine.high %v5175_v47, %v5175_v47 }
 0x2b0   : > { %v16382_v59 = vsel %vm9544_vm15, %v9503_v10, %v9319_v0  ;;  %v6973_v22 = vsel %vm6697_vm8, %v2848_v17, %v6360_v15  ;;  %v8467_v55 = vcombine.low %v6970_v56, %v6971_v45  ;;  %v2845_v20 = vrot.slane %v2817_v51, %v13025_v31 }
 0x2b1   : > { %12375 = vmatmul.mubr.msk.f32.gmra.mxu0 %vm9622_vm2, %v16382_v59  ;;  %v6972_v26 = vsel %vm6697_vm8, %v2846_v54, %v6356_v48  ;;  %v2847_v25 = vcombine.high %v2831_v52, %v2831_v52  ;;  %v5193_v21 = vcombine.high %v5189_v61, %v5189_v61  ;;  %v6364_v5 = vrot.slane %v5189_v61, %v12982_v11 }
 0x2b2   : > { %v8468_v27 = vcombine.low %v6972_v26, %v6973_v22  ;;  %v8475_v47 = vrot.slane %v8467_v55, %v13028_v32  ;;  %v2849_v58 = vcombine.high %v2845_v20, %v2845_v20  ;;  %v6368_v30 = vrot.slane %v5191_v33, %v12982_v11 }
 0x2b3   : > { %v6372_v7 = vrot.slane %v5193_v21, %v12982_v11  ;;  %v6376_v10 = vrot.slane %v16362_v49, %v12982_v11  ;;  %v6974_v43 = vsel %vm6697_vm8, %v2831_v52, %v6364_v5  ;;  %v2865_v29 = vcombine.high %v2857_v46, %v2857_v46 }
 0x2b4   : > { %v8482_v54 = vrot.slane %v8468_v27, %v13028_v32  ;;  %v6975_v1 = vsel %vm6697_vm8, %v2845_v20, %v6368_v30  ;;  %v2873_v18 = vrot.slane %v2857_v46, %v13025_v31  ;;  %v5208_v15 = vrot.slane %v5194_v3, %v13025_v31 }
 0x2b5   : > { %v6976_v17 = vsel %vm6697_vm8, %v2847_v25, %v6372_v7  ;;  %v6977_v51 = vsel %vm6697_vm8, %v2849_v58, %v6376_v10  ;;  %v8484_v61 = vcombine.low %v6974_v43, %v6975_v1  ;;  %v2887_v0 = vrot.slane %v2865_v29, %v13025_v31 }
 0x2b6   : > { %v8483_v48 = vcombine.low %v8475_v47, %v8482_v54  ;;  %v8485_v56 = vcombine.low %v6976_v17, %v6977_v51  ;;  %v2895_v45 = vcombine.high %v2873_v18, %v2873_v18  ;;  %v5209_v52 = vcombine.high %v16350_v2, %v16350_v2 }
 0x2b7   : > { %v8492_v33 = vrot.slane %v8484_v61, %v13028_v32  ;;  %v2897_v22 = vcombine.high %v2887_v0, %v2887_v0  ;;  %v5224_v46 = vrot.slane %v5208_v15, %v13025_v31  ;;  %v5239_v3 = vcombine.high %v16362_v49, %v16362_v49 }
 0x2b8   : > { %8676 = vst.msk [vmem:[#allocation2 + $0x2a9] sm:$0xff] %vm8607_vm9, %v8483_v48  ;;  %v8499_v55 = vrot.slane %v8485_v56, %v13028_v32  ;;  %v5231_v20 = vrot.slane %v5209_v52, %v13025_v31  ;;  %v2850_v26 = vcombine.high %v16342_v39, %v16342_v39  ;;  %v5210_v25 = vcombine.high %v5208_v15, %v5208_v15 }
 0x2b9   : > { %v6384_v2 = vrot.slane %v5239_v3, %v12982_v11  ;;  %v6392_v21 = vrot.slane %v5224_v46, %v12982_v11  ;;  %v5240_v5 = vcombine.high %v5224_v46, %v5224_v46  ;;  %v5249_v27 = vrot.slane %v16344_v44, %v13025_v31 }
 0x2ba   : > { %v8500_v47 = vcombine.low %v8492_v33, %v8499_v55  ;;  %v5241_v49 = vcombine.high %v5231_v20, %v5231_v20  ;;  %v6380_v58 = vrot.slane %v5231_v20, %v12982_v11  ;;  %v2864_v30 = vrot.slane %v2850_v26, %v13025_v31  ;;  %v8744_v33 = vld [vmem:[#allocation2 + $0x280] sm:$0xff] }
 0x2bb   : > { %v6979_v7 = vsel %vm6697_vm8, %v2887_v0, %v6384_v2  ;;  %v6981_v10 = vsel %vm6697_vm8, %v2897_v22, %v6392_v21  ;;  %v5238_v39 = vrot.slane %v5210_v25, %v13025_v31  ;;  %v5256_v43 = vrot.slane %v5249_v27, %v13025_v31 }
 0x2bc   : > { %8677 = vst.msk [vmem:[#allocation2 + $0x2b1] sm:$0xff] %vm8607_vm9, %v8500_v47  ;;  %v6388_v29 = vrot.slane %v5241_v49, %v12982_v11  ;;  %v6978_v44 = vsel %vm6697_vm8, %v2873_v18, %v6380_v58  ;;  %v2866_v54 = vcombine.high %v2864_v30, %v2864_v30  ;;  %v2880_v1 = vrot.slane %v2864_v30, %v13025_v31 }
 0x2bd   : > { %v8501_v15 = vcombine.low %v6978_v44, %v6979_v7  ;;  %v5242_v17 = vcombine.high %v5238_v39, %v5238_v39  ;;  %v6396_v51 = vrot.slane %v5238_v39, %v12982_v11  ;;  %v6400_v61 = vrot.slane %v5240_v5, %v12982_v11  ;;  %v8745_v44 = vld [vmem:[#allocation2 + $0x288] sm:$0xff] }
 0x2be   : > { %v6980_v0 = vsel %vm6697_vm8, %v2895_v45, %v6388_v29  ;;  %v2894_v48 = vrot.slane %v2866_v54, %v13025_v31  ;;  %v2896_v56 = vcombine.high %v2880_v1, %v2880_v1  ;;  %v6408_v52 = vrot.slane %v5256_v43, %v12982_v11  ;;  %v9097_v22 = vpop.permute.xlu1 %9096 }
 0x2bf   : > { %v8820_v46 = vld [vmem:[#allocation2 + $0x2a9] sm:$0xff]  ;;  %v8502_v18 = vcombine.low %v6980_v0, %v6981_v10  ;;  %v8509_v3 = vrot.slane %v8501_v15, %v13028_v32  ;;  %v6404_v55 = vrot.slane %v5242_v17, %v12982_v11  ;;  %v6982_v26 = vsel %vm6697_vm8, %v2880_v1, %v6396_v51 }
 0x2c0   : > { %9104 = vrot.lane.b32.xlu0 %v8820_v46, %s12812_s27  ;;  %v2898_v20 = vcombine.high %v2894_v48, %v2894_v48  ;;  %v6983_v45 = vsel %vm6697_vm8, %v2894_v48, %v6400_v61  ;;  %v9536_v21 = vsel %vm8607_vm9, %v8744_v33, %v9097_v22 }
 0x2c1   : > { %v8516_v31 = vrot.slane %v8502_v18, %v13028_v32  ;;  %v6984_v25 = vsel %vm6697_vm8, %v2896_v56, %v6404_v55  ;;  %v8518_v2 = vcombine.low %v6982_v26, %v6983_v45  ;;  %v8712_v56 = vld [vmem:[#allocation2 + $0x140] sm:$0xff]  ;;  %v8713_v18 = vld [vmem:[#allocation2 + $0x148] sm:$0xff]  ;;  %v8746_v45 = vld [vmem:[#allocation2 + $0x290] sm:$0xff] }
 0x2c2   : > { %v6985_v27 = vsel %vm6697_vm8, %v2898_v20, %v6408_v52  ;;  %v9099_v54 = vpop.permute.xlu1 %9098 }
 0x2c3   : > { %v9385_v5 = vpop.permute.xlu0 %9384  ;;  %v8821_v11 = vld [vmem:[#allocation2 + $0x2b1] sm:$0xff]  ;;  %v8517_v58 = vcombine.low %v8509_v3, %v8516_v31  ;;  %v8519_v30 = vcombine.low %v6984_v25, %v6985_v27  ;;  %v8526_v7 = vrot.slane %v8518_v2, %v13028_v32  ;;  %v9537_v17 = vsel %vm8607_vm9, %v8745_v44, %v9099_v54 }
 0x2c4   : > { %v16443_v47 = vsel %vm9544_vm15, %v9536_v21, %v9385_v5  ;;  %v8892_v49 = vld [vmem:[#allocation2 + $0x2aa] sm:$0xff]  ;;  %9106 = vrot.lane.b32.xlu1 %v8821_v11, %s12812_s27  ;;  %v8747_v21 = vld [vmem:[#allocation2 + $0x298] sm:$0xff] }
 0x2c5   : > { %12425 = vmatprep.mubr.msk.f32.mxu1 %vm9622_vm2, %v16443_v47  ;;  %9392 = vrot.lane.b32.xlu0 %v8892_v49, %s12813_s30  ;;  %8678 = vst.msk [vmem:[#allocation2 + $0x2b9] sm:$0xff] %vm8607_vm9, %v8517_v58  ;;  %v8533_v10 = vrot.slane %v8519_v30, %v13028_v32  ;;  %v8714_v30 = vld [vmem:[#allocation2 + $0x150] sm:$0xff] }
 0x2c7   : > { %v8534_v39 = vcombine.low %v8526_v7, %v8533_v10 }
 0x2c9   : > { %8679 = vst.msk [vmem:[#allocation2 + $0x2c1] sm:$0xff] %vm8607_vm9, %v8534_v39  ;;  %v8715_v39 = vld [vmem:[#allocation2 + $0x158] sm:$0xff] }
 0x2cc   : > { %v8893_v43 = vld [vmem:[#allocation2 + $0x2b2] sm:$0xff] }
 0x2cd   : > { %v8822_v29 = vld [vmem:[#allocation2 + $0x2b9] sm:$0xff]  ;;  %9394 = vrot.lane.b32.xlu1 %v8893_v43, %s12813_s30 }
 0x2ce   : > { %9108 = vrot.lane.b32.xlu0 %v8822_v29, %s12812_s27 }
 0x2d0   : > { %v8823_v1 = vld [vmem:[#allocation2 + $0x2c1] sm:$0xff]  ;;  %v9033_v48 = vpop.permute.xlu1 %9032 }
 0x2d1   : > { %v8894_v15 = vld [vmem:[#allocation2 + $0x2ba] sm:$0xff]  ;;  %9110 = vrot.lane.b32.xlu1 %v8823_v1, %s12812_s27  ;;  %v8895_v0 = vld [vmem:[#allocation2 + $0x2c2] sm:$0xff]  ;;  %v9504_v52 = vsel %vm8607_vm9, %v8712_v56, %v9033_v48  ;;  %s11799_s27 = scalar_lea.sflag [#allocation4], %s202_s5 }
 0x2d2   : > { %v9387_v51 = vpop.permute.xlu0 %9386  ;;  %9396 = vrot.lane.b32.xlu0 %v8894_v15, %s12813_s30  ;;  %v17566_v15 = vld [vmem:[#allocation34_spill] sm:$0xff]  ;;  %v17570_v48 = vld [vmem:[#allocation39_spill] sm:$0xff] }
 0x2d3   : > { %v16459_v61 = vsel %vm9544_vm15, %v9537_v17, %v9387_v51  ;;  %v17567_v17 = vld [vmem:[#allocation35_spill] sm:$0xff]  ;;  %v17568_v51 = vld [vmem:[#allocation13_spill] sm:$0xff] }
 0x2d4   : > { %12426 = vmatmul.mubr.msk.f32.gmra.mxu1 %vm9622_vm2, %v16459_v61 }
 0x2d5   : > { %9398 = vrot.lane.b32.xlu1 %v8895_v0, %s12813_s30  ;;  %v17569_v0 = vld [vmem:[#allocation36_spill] sm:$0xff] }
 0x2df   : > { %v9035_v22 = vpop.permute.xlu1 %9034 }
 0x2e0   : > { %v9321_v33 = vpop.permute.xlu0 %9320  ;;  %v9505_v3 = vsel %vm8607_vm9, %v8713_v18, %v9035_v22 }
 0x2e1   : > { %v16466_v46 = vsel %vm9544_vm15, %v9504_v52, %v9321_v33  ;;  %v8680_v52 = vld [vmem:[#allocation2] sm:$0xff]  ;;  %v17571_v33 = vld [vmem:[#allocation40_spill] sm:$0xff] }
 0x2e2   : > { %12377 = vmatprep.mubr.msk.f32.mxu0 %vm9622_vm2, %v16466_v46 }
 0x2e3   : > { %v9101_v55 = vpop.permute.xlu1 %9100 }
 0x2e4   : > { %v9538_v31 = vsel %vm8607_vm9, %v8746_v45, %v9101_v55  ;;  %v17572_v55 = vld [vmem:[#allocation10_spill] sm:$0xff] }
 0x2e7   : > { %v9323_v20 = vpop.permute.xlu0 %9322 }
 0x2e8   : > { %v16472_v26 = vsel %vm9544_vm15, %v9505_v3, %v9323_v20  ;;  %v17573_v20 = vld [vmem:[#allocation43_spill] sm:$0xff] }
 0x2e9   : > { %12378 = vmatmul.mubr.msk.f32.gmra.mxu0 %vm9622_vm2, %v16472_v26 }
 0x2ea   : > { %v9103_v25 = vpop.permute.xlu1 %9102 }
 0x2eb   : > { %v9389_v2 = vpop.permute.xlu0 %9388  ;;  %v9539_v27 = vsel %vm8607_vm9, %v8747_v21, %v9103_v25  ;;  %v8681_v25 = vld [vmem:[#allocation2 + $0x8] sm:$0xff] }
 0x2ec   : > { %v16478_v5 = vsel %vm9544_vm15, %v9538_v31, %v9389_v2  ;;  %v17574_v31 = vld [vmem:[#allocation44_spill] sm:$0xff] }
 0x2ed   : > { %12428 = vmatprep.mubr.msk.f32.mxu1 %vm9622_vm2, %v16478_v5 }
 0x2ee   : > { %v9037_v11 = vpop.permute.xlu1 %9036 }
 0x2ef   : > { %v9391_v49 = vpop.permute.xlu0 %9390  ;;  %v9506_v7 = vsel %vm8607_vm9, %v8714_v30, %v9037_v11 }
 0x2f0   : > { %v16484_v58 = vsel %vm9544_vm15, %v9539_v27, %v9391_v49  ;;  %v8682_v49 = vld [vmem:[#allocation2 + $0x10] sm:$0xff] }
 0x2f1   : > { %12429 = vmatmul.mubr.msk.f32.gmra.mxu1 %vm9622_vm2, %v16484_v58 }
 0x2f4   : > { %v9039_v43 = vpop.permute.xlu1 %9038 }
 0x2f5   : > { %v9325_v10 = vpop.permute.xlu0 %9324  ;;  %v9507_v44 = vsel %vm8607_vm9, %v8715_v39, %v9039_v43  ;;  %v8683_v39 = vld [vmem:[#allocation2 + $0x18] sm:$0xff] }
 0x2f6   : > { %v16490_v29 = vsel %vm9544_vm15, %v9506_v7, %v9325_v10 }
 0x2f7   : > { %12380 = vmatprep.mubr.msk.f32.mxu0 %vm9622_vm2, %v16490_v29 }
 0x2f9   : > { %v9327_v54 = vpop.permute.xlu0 %9326 }
 0x2fa   : > { %v16496_v1 = vsel %vm9544_vm15, %v9507_v44, %v9327_v54 }
 0x2fb   : > { %12381 = vmatmul.mubr.msk.f32.gmra.mxu0 %vm9622_vm2, %v16496_v1 }
 0x2fc   : > { %12535 = vmatprep.mubr.msk.f32.mxu0 %vm9622_vm2, %v17566_v15 }
 0x2ff   : > { %12536 = vmatmul.mubr.msk.f32.vlgmr.msra.gmra.mxu0 %vm9622_vm2, %v17567_v17 }
 0x300   : > { %12538 = vmatprep.mubr.msk.f32.mxu0 %vm9622_vm2, %v17568_v51 }
 0x303   : > { %12539 = vmatmul.mubr.msk.f32.gmra.mxu0 %vm9622_vm2, %v17569_v0 }
 0x304   : > { %12541 = vmatprep.mubr.msk.f32.mxu0 %vm9622_vm2, %v17570_v48 }
 0x305   : > { %v8969_v56 = vpop.permute.xlu1 %8968 }
 0x306   : > { %v9472_v22 = vsel %vm8607_vm9, %v8680_v52, %v8969_v56  ;;  %v17575_v52 = vld [vmem:[#allocation25_spill] sm:$0xff] }
 0x307   : > { %12542 = vmatmul.mubr.msk.f32.gmra.mxu0 %vm9622_vm2, %v17571_v33 }
 0x308   : > { %12544 = vmatprep.mubr.msk.f32.mxu0 %vm9622_vm2, %v15432_v41 }
 0x309   : > { %v8971_v45 = vpop.permute.xlu1 %8970 }
 0x30a   : > { %v9257_v18 = vpop.permute.xlu0 %9256  ;;  %v9473_v2 = vsel %vm8607_vm9, %v8681_v25, %v8971_v45  ;;  %v8750_v25 = vld [vmem:[#allocation2 + $0x2b8] sm:$0xff] }
 0x30b   : > { %v9545_v3 = vsel %vm9544_vm15, %v9472_v22, %v9257_v18  ;;  %12545 = vmatmul.mubr.msk.f32.gmra.mxu0 %vm9622_vm2, %v17572_v55  ;;  %v17576_v22 = vld [vmem:[#allocation27_spill] sm:$0xff]  ;;  %v17577_v18 = vld [vmem:[#allocation20_spill] sm:$0xff] }
 0x30c   : > { %12435 = vmatprep.mubr.msk.f32.mxu1 %vm9622_vm2, %v9545_v3  ;;  %12547 = vmatprep.mubr.msk.f32.mxu0 %vm9622_vm2, %v17573_v20  ;;  %v17578_v3 = vld [vmem:[#allocation30_spill] sm:$0xff] }
 0x30f   : > { %12548 = vmatmul.mubr.msk.f32.gmra.mxu0 %vm9622_vm2, %v17574_v31 }
 0x310   : > { %12550 = vmatprep.mubr.msk.f32.mxu0 %vm9622_vm2, %v15860_v23 }
 0x313   : > { %12551 = vmatmul.mubr.msk.f32.gmra.mxu0 %vm9622_vm2, %v15958_v9  ;;  %v9259_v21 = vpop.permute.xlu1 %9258 }
 0x314   : > { %v8973_v27 = vpop.permute.xlu0 %8972  ;;  %12553 = vmatprep.mubr.msk.f32.mxu0 %vm9622_vm2, %v16028_v60  ;;  %v9546_v11 = vsel %vm9544_vm15, %v9473_v2, %v9259_v21 }
 0x315   : > { %12436 = vmatmul.mubr.msk.f32.vlgmr.msra.gmra.mxu1 %vm9622_vm2, %v9546_v11  ;;  %v9474_v30 = vsel %vm8607_vm9, %v8682_v49, %v8973_v27  ;;  %v8751_v49 = vld [vmem:[#allocation2 + $0x2c0] sm:$0xff] }
 0x317   : > { %12554 = vmatmul.mubr.msk.f32.gmra.mxu0 %vm9622_vm2, %v16048_v50  ;;  %v8975_v7 = vpop.permute.xlu1 %8974 }
 0x318   : > { %v9261_v10 = vpop.permute.xlu0 %9260  ;;  %12556 = vmatprep.mubr.msk.f32.mxu0 %vm9622_vm2, %v16195_v16  ;;  %v9475_v44 = vsel %vm8607_vm9, %v8683_v39, %v8975_v7 }
 0x319   : > { %v9547_v43 = vsel %vm9544_vm15, %v9474_v30, %v9261_v10 }
 0x31a   : > { %12438 = vmatprep.mubr.msk.f32.mxu1 %vm9622_vm2, %v9547_v43  ;;  %v16740_v43 = vpop.f32.mrf.mxu1 }
 0x31b   : > { %12557 = vmatmul.mubr.msk.f32.gmra.mxu0 %vm9622_vm2, %v16208_v53  ;;  %v9263_v54 = vpop.permute.xlu1 %9262 }
 0x31c   : > { %12559 = vmatprep.mubr.msk.f32.mxu0 %vm9622_vm2, %v16235_v19  ;;  %v9548_v56 = vsel %vm9544_vm15, %v9475_v44, %v9263_v54 }
 0x31d   : > { %12439 = vmatmul.mubr.msk.f32.gmra.mxu1 %vm9622_vm2, %v9548_v56  ;;  %v16753_v56 = vpop.f32.mrf.mxu1 }
 0x31e   : > { %12441 = vmatprep.mubr.msk.f32.mxu1 %vm9622_vm2, %v17575_v52 }
 0x31f   : > { %12560 = vmatmul.mubr.msk.f32.gmra.mxu0 %vm9622_vm2, %v16247_v57  ;;  %v16760_v52 = vpop.f32.mrf.mxu1 }
 0x320   : > { %12562 = vmatprep.mubr.msk.f32.mxu0 %vm9622_vm2, %v16271_v63 }
 0x321   : > { %12442 = vmatmul.mubr.msk.f32.gmra.mxu1 %vm9622_vm2, %v17576_v22 }
 0x322   : > { %12444 = vmatprep.mubr.msk.f32.mxu1 %vm9622_vm2, %v17577_v18 }
 0x323   : > { %12563 = vmatmul.mubr.msk.f32.gmra.mxu0 %vm9622_vm2, %v16279_v28 }
 0x324   : > { %12565 = vmatprep.mubr.msk.f32.mxu0 %vm9622_vm2, %v16297_v35 }
 0x325   : > { %12445 = vmatmul.mubr.msk.f32.gmra.mxu1 %vm9622_vm2, %v17578_v3  ;;  %v16770_v3 = vpop.f32.mrf.mxu1 }
 0x326   : > { %12447 = vmatprep.mubr.msk.f32.mxu1 %vm9622_vm2, %v17566_v15  ;;  %v17579_v15 = vld [vmem:[#allocation19_spill] sm:$0xff] }
 0x327   : > { %12566 = vmatmul.mubr.msk.f32.gmra.mxu0 %vm9622_vm2, %v16312_v37 }
 0x328   : > { %12568 = vmatprep.mubr.msk.f32.mxu0 %vm9622_vm2, %v16368_v13 }
 0x329   : > { %12448 = vmatmul.mubr.msk.f32.gmra.mxu1 %vm9622_vm2, %v17567_v17  ;;  %v17580_v17 = vld [vmem:[#allocation24_spill] sm:$0xff] }
 0x32a   : > { %12450 = vmatprep.mubr.msk.f32.mxu1 %vm9622_vm2, %v17568_v51  ;;  %v17581_v51 = vld [vmem:[#allocation18_spill] sm:$0xff] }
 0x32b   : > { %12569 = vmatmul.mubr.msk.f32.gmra.mxu0 %vm9622_vm2, %v16382_v59 }
 0x32c   : > { %12571 = vmatprep.mubr.msk.f32.mxu0 %vm9622_vm2, %v16466_v46 }
 0x32d   : > { %12451 = vmatmul.mubr.msk.f32.gmra.mxu1 %vm9622_vm2, %v17569_v0  ;;  %v17583_v0 = vld [vmem:[#allocation29_spill] sm:$0xff] }
 0x32e   : > { %12453 = vmatprep.mubr.msk.f32.mxu1 %vm9622_vm2, %v17570_v48  ;;  %v17584_v48 = vld [vmem:[#allocation33_spill] sm:$0xff] }
 0x32f   : > { %12572 = vmatmul.mubr.msk.f32.gmra.mxu0 %vm9622_vm2, %v16472_v26 }
 0x330   : > { %12574 = vmatprep.mubr.msk.f32.mxu0 %vm9622_vm2, %v16490_v29 }
 0x331   : > { %12454 = vmatmul.mubr.msk.f32.gmra.mxu1 %vm9622_vm2, %v17571_v33  ;;  %v17585_v33 = vld [vmem:[#allocation11_spill] sm:$0xff] }
 0x332   : > { %12456 = vmatprep.mubr.msk.f32.mxu1 %vm9622_vm2, %v15432_v41  ;;  %v17582_v41 = vld [vmem:[#allocation28_spill] sm:$0xff] }
 0x333   : > { %12575 = vmatmul.mubr.msk.f32.gmra.mxu0 %vm9622_vm2, %v16496_v1 }
 0x334   : > { %12577 = vmatprep.mubr.msk.f32.mxu0 %vm9622_vm2, %v17579_v15 }
 0x335   : > { %12457 = vmatmul.mubr.msk.f32.gmra.mxu1 %vm9622_vm2, %v17572_v55  ;;  %v17587_v55 = vld [vmem:[#allocation37_spill] sm:$0xff] }
 0x336   : > { %12459 = vmatprep.mubr.msk.f32.mxu1 %vm9622_vm2, %v17573_v20 }
 0x337   : > { %12578 = vmatmul.mubr.msk.f32.gmra.mxu0 %vm9622_vm2, %v17580_v17 }
 0x338   : > { %12580 = vmatprep.mubr.msk.f32.mxu0 %vm9622_vm2, %v17581_v51 }
 0x339   : > { %12460 = vmatmul.mubr.msk.f32.gmra.mxu1 %vm9622_vm2, %v17574_v31  ;;  %v8749_v31 = vld [vmem:[#allocation2 + $0x2b0] sm:$0xff] }
 0x33a   : > { %12462 = vmatprep.mubr.msk.f32.mxu1 %vm9622_vm2, %v15860_v23  ;;  %v17586_v23 = vld [vmem:[#allocation12_spill] sm:$0xff] }
 0x33b   : > { %12581 = vmatmul.mubr.msk.f32.gmra.mxu0 %vm9622_vm2, %v17582_v41 }
 0x33c   : > { %12583 = vmatprep.mubr.msk.f32.mxu0 %vm9622_vm2, %v17583_v0 }
 0x33d   : > { %12463 = vmatmul.mubr.msk.f32.gmra.mxu1 %vm9622_vm2, %v15958_v9  ;;  %v17588_v9 = vld [vmem:[#allocation38_spill] sm:$0xff] }
 0x33e   : > { %12465 = vmatprep.mubr.msk.f32.mxu1 %vm9622_vm2, %v16028_v60  ;;  %v17589_v60 = vld [vmem:[#allocation15_spill] sm:$0xff] }
 0x33f   : > { %12584 = vmatmul.mubr.msk.f32.gmra.mxu0 %vm9622_vm2, %v17584_v48 }
 0x340   : > { %12586 = vmatprep.mubr.msk.f32.mxu0 %vm9622_vm2, %v17585_v33 }
 0x341   : > { %12466 = vmatmul.mubr.msk.f32.gmra.mxu1 %vm9622_vm2, %v16048_v50  ;;  %v17590_v50 = vld [vmem:[#allocation9_spill] sm:$0xff] }
 0x342   : > { %12468 = vmatprep.mubr.msk.f32.mxu1 %vm9622_vm2, %v16195_v16  ;;  %v17591_v16 = vld [vmem:[#allocation41_spill] sm:$0xff] }
 0x343   : > { %12587 = vmatmul.mubr.msk.f32.gmra.mxu0 %vm9622_vm2, %v17586_v23 }
 0x344   : > { %12589 = vmatprep.mubr.msk.f32.mxu0 %vm9622_vm2, %v17587_v55 }
 0x345   : > { %12469 = vmatmul.mubr.msk.f32.gmra.mxu1 %vm9622_vm2, %v16208_v53  ;;  %v17592_v53 = vld [vmem:[#allocation42_spill] sm:$0xff] }
 0x346   : > { %12471 = vmatprep.mubr.msk.f32.mxu1 %vm9622_vm2, %v16235_v19  ;;  %v17593_v19 = vld [vmem:[#allocation45_spill] sm:$0xff] }
 0x347   : > { %12590 = vmatmul.mubr.msk.f32.gmra.mxu0 %vm9622_vm2, %v17588_v9 }
 0x348   : > { %12592 = vmatprep.mubr.msk.f32.mxu0 %vm9622_vm2, %v17589_v60 }
 0x349   : > { %12472 = vmatmul.mubr.msk.f32.gmra.mxu1 %vm9622_vm2, %v16247_v57  ;;  %v17594_v57 = vld [vmem:[#allocation46_spill] sm:$0xff] }
 0x34a   : > { %12474 = vmatprep.mubr.msk.f32.mxu1 %vm9622_vm2, %v16271_v63  ;;  %v9105_v63 = vpop.permute.xlu0 %9104 }
 0x34b   : > { %12593 = vmatmul.mubr.msk.f32.gmra.mxu0 %vm9622_vm2, %v17590_v50 }
 0x34c   : > { %12595 = vmatprep.mubr.msk.f32.mxu0 %vm9622_vm2, %v17591_v16 }
 0x34d   : > { %12475 = vmatmul.mubr.msk.f32.gmra.mxu1 %vm9622_vm2, %v16279_v28  ;;  %v16680_v28 = vpop.f32.mrf.mxu0 }
 0x34e   : > { %12477 = vmatprep.mubr.msk.f32.mxu1 %vm9622_vm2, %v16297_v35  ;;  %v9107_v35 = vpop.permute.xlu1 %9106 }
 0x34f   : > { %12596 = vmatmul.mubr.msk.f32.gmra.mxu0 %vm9622_vm2, %v17592_v53  ;;  %v9541_v21 = vsel %vm8607_vm9, %v8749_v31, %v9107_v35 }
 0x350   : > { %12598 = vmatprep.mubr.msk.f32.mxu0 %vm9622_vm2, %v17593_v19 }
 0x351   : > { %12478 = vmatmul.mubr.msk.f32.gmra.mxu1 %vm9622_vm2, %v16312_v37  ;;  %v16690_v37 = vpop.f32.mrf.mxu0 }
 0x352   : > { %12480 = vmatprep.mubr.msk.f32.mxu1 %vm9622_vm2, %v16368_v13  ;;  %v9393_v13 = vpop.permute.xlu0 %9392 }
 0x353   : > { %12599 = vmatmul.mubr.msk.f32.gmra.mxu0 %vm9622_vm2, %v17594_v57 }
 0x354   : > { %12601 = vmatprep.mubr.msk.f32.mxu0 %vm9622_vm2, %v15969_v12 }
 0x355   : > { %12481 = vmatmul.mubr.msk.f32.gmra.mxu1 %vm9622_vm2, %v16382_v59  ;;  %v16694_v59 = vpop.f32.mrf.mxu0 }
 0x356   : > { %12483 = vmatprep.mubr.msk.f32.mxu1 %vm9622_vm2, %v16466_v46  ;;  %v9395_v46 = vpop.permute.xlu1 %9394 }
 0x357   : > { %12602 = vmatmul.mubr.msk.f32.gmra.mxu0 %vm9622_vm2, %v15992_v62 }
 0x358   : > { %12604 = vmatprep.mubr.msk.f32.mxu0 %vm9622_vm2, %v16058_v42 }
 0x359   : > { %12484 = vmatmul.mubr.msk.f32.gmra.mxu1 %vm9622_vm2, %v16472_v26  ;;  %v16704_v26 = vpop.f32.mrf.mxu0 }
 0x35a   : > { %12486 = vmatprep.mubr.msk.f32.mxu1 %vm9622_vm2, %v16490_v29  ;;  %v8748_v29 = vld [vmem:[#allocation2 + $0x2a8] sm:$0xff]  ;;  %v9111_v2 = vpop.permute.xlu1 %9110 }
 0x35b   : > { %12605 = vmatmul.mubr.msk.f32.gmra.mxu0 %vm9622_vm2, %v16082_v14  ;;  %v16712_v20 = vpop.f32.mrf.mxu0  ;;  %v9540_v45 = vsel %vm8607_vm9, %v8748_v29, %v9105_v63 }
 0x35c   : > { %12607 = vmatprep.mubr.msk.f32.mxu0 %vm9622_vm2, %v16218_v40  ;;  %v9613_v27 = vsel %vm9544_vm15, %v9540_v45, %v9393_v13 }
 0x35d   : > { %12487 = vmatmul.mubr.msk.f32.gmra.mxu1 %vm9622_vm2, %v16496_v1  ;;  %v9109_v1 = vpop.permute.xlu0 %9108 }
 0x35e   : > { %12489 = vmatprep.mubr.msk.f32.mxu1 %vm9622_vm2, %v17579_v15  ;;  %v9542_v11 = vsel %vm8607_vm9, %v8750_v25, %v9109_v1  ;;  %v9399_v39 = vpop.permute.xlu1 %9398  ;;  %v16772_v15 = vpop.f32.mrf.mxu1 }
 0x35f   : > { %12608 = vmatmul.mubr.msk.f32.gmra.mxu0 %vm9622_vm2, %v16227_v24  ;;  %17595 = vst [vmem:[#allocation21_spill] sm:$0xff] %v16772_v15 }
 0x360   : > { %12610 = vmatprep.mubr.msk.f32.mxu0 %vm9622_vm2, %v16257_v38 }
 0x361   : > { %12490 = vmatmul.mubr.msk.f32.gmra.mxu1 %vm9622_vm2, %v17580_v17  ;;  %v9397_v30 = vpop.permute.xlu0 %9396 }
 0x362   : > { %12492 = vmatprep.mubr.msk.f32.mxu1 %vm9622_vm2, %v17581_v51  ;;  %v9615_v10 = vsel %vm9544_vm15, %v9542_v11, %v9397_v30 }
 0x363   : > { %12611 = vmatmul.mubr.msk.f32.gmra.mxu0 %vm9622_vm2, %v16267_v6 }
 0x364   : > { %12613 = vmatprep.mubr.msk.f32.mxu0 %vm9622_vm2, %v16285_v34 }
 0x365   : > { %12493 = vmatmul.mubr.msk.f32.gmra.mxu1 %vm9622_vm2, %v17582_v41  ;;  %v16782_v41 = vpop.f32.mrf.mxu1 }
 0x366   : > { %12495 = vmatprep.mubr.msk.f32.mxu1 %vm9622_vm2, %v17583_v0  ;;  %17596 = vst [vmem:[#allocation16_spill] sm:$0xff] %v16782_v41 }
 0x367   : > { %12614 = vmatmul.mubr.msk.f32.gmra.mxu0 %vm9622_vm2, %v16294_v4 }
 0x368   : > { %12616 = vmatprep.mubr.msk.f32.mxu0 %vm9622_vm2, %v16322_v36 }
 0x369   : > { %12496 = vmatmul.mubr.msk.f32.gmra.mxu1 %vm9622_vm2, %v17584_v48 }
 0x36a   : > { %12498 = vmatprep.mubr.msk.f32.mxu1 %vm9622_vm2, %v17585_v33 }
 0x36b   : > { %12617 = vmatmul.mubr.msk.f32.gmra.mxu0 %vm9622_vm2, %v16331_v8 }
 0x36c   : > { %12619 = vmatprep.mubr.msk.f32.mxu0 %vm9622_vm2, %v16443_v47  ;;  %v16723_v47 = vpop.f32.mrf.mxu0 }
 0x36d   : > { %12499 = vmatmul.mubr.msk.f32.gmra.mxu1 %vm9622_vm2, %v17586_v23 }
 0x36e   : > { %12501 = vmatprep.mubr.msk.f32.mxu1 %vm9622_vm2, %v17587_v55  ;;  %v16730_v7 = vpop.f32.mrf.mxu0 }
 0x36f   : > { %12620 = vmatmul.mubr.msk.f32.gmra.mxu0 %vm9622_vm2, %v16459_v61  ;;  %v9614_v61 = vsel %vm9544_vm15, %v9541_v21, %v9395_v46 }
 0x370   : > { %12622 = vmatprep.mubr.msk.f32.mxu0 %vm9622_vm2, %v16478_v5  ;;  %v9543_v5 = vsel %vm8607_vm9, %v8751_v49, %v9111_v2  ;;  %v16744_v44 = vpop.f32.mrf.mxu0 }
 0x371   : > { %12502 = vmatmul.mubr.msk.f32.gmra.mxu1 %vm9622_vm2, %v17588_v9 }
 0x372   : > { %12504 = vmatprep.mubr.msk.f32.mxu1 %vm9622_vm2, %v17589_v60  ;;  %v16751_v54 = vpop.f32.mrf.mxu0 }
 0x373   : > { %12623 = vmatmul.mubr.msk.f32.gmra.mxu0 %vm9622_vm2, %v16484_v58  ;;  %v9616_v58 = vsel %vm9544_vm15, %v9543_v5, %v9399_v39 }
 0x374   : > { %12625 = vmatprep.mubr.msk.f32.mxu0 %vm9622_vm2, %v9613_v27  ;;  %v16762_v22 = vpop.f32.mrf.mxu0 }
 0x375   : > { %12505 = vmatmul.mubr.msk.f32.gmra.mxu1 %vm9622_vm2, %v17590_v50 }
 0x376   : > { %12507 = vmatprep.mubr.msk.f32.mxu1 %vm9622_vm2, %v17591_v16  ;;  %v16766_v18 = vpop.f32.mrf.mxu0 }
 0x377   : > { %12626 = vmatmul.mubr.msk.f32.gmra.mxu0 %vm9622_vm2, %v9614_v61 }
 0x378   : > { %12628 = vmatprep.mubr.msk.f32.mxu0 %vm9622_vm2, %v9615_v10  ;;  %v16776_v17 = vpop.f32.mrf.mxu0 }
 0x379   : > { %12508 = vmatmul.mubr.msk.f32.gmra.mxu1 %vm9622_vm2, %v17592_v53 }
 0x37a   : > { %12510 = vmatprep.mubr.msk.f32.mxu1 %vm9622_vm2, %v17593_v19  ;;  %v16780_v51 = vpop.f32.mrf.mxu0 }
 0x37b   : > { %12629 = vmatmul.mubr.msk.f32.gmra.mxu0 %vm9622_vm2, %v9616_v58 }
 0x37c   : > { %v16790_v0 = vpop.f32.mrf.mxu0 }
 0x37d   : > { %12511 = vmatmul.mubr.msk.f32.gmra.mxu1 %vm9622_vm2, %v17594_v57 }
 0x37e   : > { %12513 = vmatprep.mubr.msk.f32.mxu1 %vm9622_vm2, %v15969_v12  ;;  %v16788_v12 = vpop.f32.mrf.mxu1 }
 0x37f   : > { %17597 = vst [vmem:[#allocation22_spill] sm:$0xff] %v16788_v12 }
 0x381   : > { %12514 = vmatmul.mubr.msk.f32.gmra.mxu1 %vm9622_vm2, %v15992_v62  ;;  %v16794_v62 = vpop.f32.mrf.mxu0 }
 0x382   : > { %12516 = vmatprep.mubr.msk.f32.mxu1 %vm9622_vm2, %v16058_v42  ;;  %v16798_v42 = vpop.f32.mrf.mxu1 }
 0x383   : > { %17598 = vst [vmem:[#allocation17_spill] sm:$0xff] %v16798_v42 }
 0x384   : > { %v16800_v48 = vpop.f32.mrf.mxu1 }
 0x385   : > { %12517 = vmatmul.mubr.msk.f32.gmra.mxu1 %vm9622_vm2, %v16082_v14  ;;  %17599 = vst [vmem:[#allocation23_spill] sm:$0xff] %v16800_v48  ;;  %v16804_v14 = vpop.f32.mrf.mxu0 }
 0x386   : > { %12519 = vmatprep.mubr.msk.f32.mxu1 %vm9622_vm2, %v16218_v40 }
 0x387   : > { %v16808_v40 = vpop.f32.mrf.mxu0 }
 0x389   : > { %12520 = vmatmul.mubr.msk.f32.gmra.mxu1 %vm9622_vm2, %v16227_v24  ;;  %v16810_v24 = vpop.f32.mrf.mxu1  ;;  %v16818_v33 = vpop.f32.mrf.mxu0 }
 0x38a   : > { %12522 = vmatprep.mubr.msk.f32.mxu1 %vm9622_vm2, %v16257_v38  ;;  %17600 = vst [vmem:[#allocation26_spill] sm:$0xff] %v16810_v24 }
 0x38b   : > { %v16816_v38 = vpop.f32.mrf.mxu1 }
 0x38c   : > { %17601 = vst [vmem:[#allocation31_spill] sm:$0xff] %v16816_v38 }
 0x38d   : > { %12523 = vmatmul.mubr.msk.f32.gmra.mxu1 %vm9622_vm2, %v16267_v6  ;;  %v16822_v6 = vpop.f32.mrf.mxu0 }
 0x38e   : > { %12525 = vmatprep.mubr.msk.f32.mxu1 %vm9622_vm2, %v16285_v34  ;;  %v16824_v34 = vpop.f32.mrf.mxu1 }
 0x38f   : > { %17602 = vst [vmem:[#allocation32_spill] sm:$0xff] %v16824_v34  ;;  %v16828_v55 = vpop.f32.mrf.mxu0 }
 0x390   : > { %v16826_v23 = vpop.f32.mrf.mxu1 }
 0x391   : > { %12526 = vmatmul.mubr.msk.f32.gmra.mxu1 %vm9622_vm2, %v16294_v4  ;;  %17603 = vst [vmem:[#allocation34_spill] sm:$0xff] %v16826_v23  ;;  %v16830_v9 = vpop.f32.mrf.mxu0 }
 0x392   : > { %12528 = vmatprep.mubr.msk.f32.mxu1 %vm9622_vm2, %v16322_v36  ;;  %v16832_v4 = vpop.f32.mrf.mxu1 }
 0x393   : > { %17604 = vst [vmem:[#allocation35_spill] sm:$0xff] %v16832_v4  ;;  %v16836_v60 = vpop.f32.mrf.mxu0 }
 0x394   : > { %v16834_v36 = vpop.f32.mrf.mxu1 }
 0x395   : > { %12529 = vmatmul.mubr.msk.f32.gmra.mxu1 %vm9622_vm2, %v16331_v8  ;;  %17605 = vst [vmem:[#allocation13_spill] sm:$0xff] %v16834_v36  ;;  %v16838_v50 = vpop.f32.mrf.mxu0 }
 0x396   : > { %v16840_v16 = vpop.f32.mrf.mxu1 }
 0x397   : > { %17606 = vst [vmem:[#allocation36_spill] sm:$0xff] %v16840_v16  ;;  %v16844_v53 = vpop.f32.mrf.mxu0 }
 0x398   : > { %v16842_v8 = vpop.f32.mrf.mxu1 }
 0x399   : > { %17607 = vst [vmem:[#allocation39_spill] sm:$0xff] %v16842_v8  ;;  %v16846_v19 = vpop.f32.mrf.mxu0 }
 0x39a   : > { %v16848_v57 = vpop.f32.mrf.mxu1 }
 0x39b   : > { %17608 = vst [vmem:[#allocation40_spill] sm:$0xff] %v16848_v57  ;;  %v16852_v35 = vpop.f32.mrf.mxu0 }
 0x39c   : > { %v16850_v63 = vpop.f32.mrf.mxu1 }
 0x39d   : > { %17609 = vst [vmem:[#allocation10_spill] sm:$0xff] %v16850_v63  ;;  %v16854_v13 = vpop.f32.mrf.mxu0 }
 0x39e   : > { %v16856_v46 = vpop.f32.mrf.mxu1 }
 0x39f   : > { %17610 = vst [vmem:[#allocation43_spill] sm:$0xff] %v16856_v46  ;;  %v16860_v1 = vpop.f32.mrf.mxu0 }
 0x3a0   : > { %v16858_v29 = vpop.f32.mrf.mxu1 }
 0x3a1   : > { %17611 = vst [vmem:[#allocation44_spill] sm:$0xff] %v16858_v29 }
 0x3a2   : > { %v16864_v31 = vpop.f32.mrf.mxu1 }
 0x3a3   : > { %17613 = vst [vmem:[#allocation27_spill] sm:$0xff] %v16864_v31 }
 0x3a4   : > { %v16866_v25 = vpop.f32.mrf.mxu1 }
 0x3a5   : > { %17614 = vst [vmem:[#allocation20_spill] sm:$0xff] %v16866_v25 }
 0x3a6   : > { %v16872_v27 = vpop.f32.mrf.mxu1 }
 0x3a7   : > { %17616 = vst [vmem:[#allocation19_spill] sm:$0xff] %v16872_v27 }
 0x3a8   : > { %v16876_v49 = vpop.f32.mrf.mxu1 }
 0x3a9   : > { %v16862_v45 = vpop.f32.mrf.mxu0  ;;  %17618 = vst [vmem:[#allocation18_spill] sm:$0xff] %v16876_v49 }
 0x3aa   : > { %17612 = vst [vmem:[#allocation25_spill] sm:$0xff] %v16862_v45  ;;  %v16878_v5 = vpop.f32.mrf.mxu1 }
 0x3ab   : > { %v16868_v2 = vpop.f32.mrf.mxu0  ;;  %17619 = vst [vmem:[#allocation28_spill] sm:$0xff] %v16878_v5 }
 0x3ac   : > { %v16880_v39 = vpop.f32.mrf.mxu1 }
 0x3ad   : > { %17620 = vst [vmem:[#allocation29_spill] sm:$0xff] %v16880_v39 }
 0x3ae   : > { %v16882_v25 = vpop.f32.mrf.mxu1 }
 0x3af   : > { %17621 = vst [vmem:[#allocation33_spill] sm:$0xff] %v16882_v25 }
 0x3b0   : > { %v16884_v31 = vpop.f32.mrf.mxu1 }
 0x3b1   : > { %17622 = vst [vmem:[#allocation11_spill] sm:$0xff] %v16884_v31 }
 0x3b2   : > { %v16890_v46 = vpop.f32.mrf.mxu1 }
 0x3b3   : > { %17623 = vst [vmem:[#allocation12_spill] sm:$0xff] %v16890_v46 }
 0x3b4   : > { %v16894_v8 = vpop.f32.mrf.mxu1 }
 0x3b5   : > { %17624 = vst [vmem:[#allocation37_spill] sm:$0xff] %v16894_v8  ;;  %v16913_v8 = vld [vmem:[%s17354_s2] ss:$0 sm:$0xff] }
 0x3b6   : > { %v16900_v57 = vpop.f32.mrf.mxu1 }
 0x3b7   : > { %17625 = vst [vmem:[#allocation38_spill] sm:$0xff] %v16900_v57 }
 0x3bb   : > { %v16870_v21 = vpop.f32.mrf.mxu0 }
 0x3bc   : > { %17615 = vst [vmem:[#allocation30_spill] sm:$0xff] %v16870_v21 }
 0x3bd   : > { %v16874_v11 = vpop.f32.mrf.mxu0 }
 0x3be   : > { %17617 = vst [vmem:[#allocation24_spill] sm:$0xff] %v16874_v11 }
 0x3bf   : > { %v12537_v30 = vpop.f32.mrf.mxu0 }
 0x3c1   : > { %v10688_v61 = vpop.f32.mrf.mxu0 }
 0x3c3   : > { %v12540_v10 = vpop.f32.mrf.mxu0 }
 0x3c5   : > { %v10698_v58 = vpop.f32.mrf.mxu0 }
 0x3c7   : > { %v12543_v32 = vpop.f32.mrf.mxu0 }
 0x3c9   : > { %v10708_v29 = vpop.f32.mrf.mxu0 }
 0x3cb   : > { %v16886_v63 = vpop.f32.mrf.mxu0 }
 0x3cd   : > { %v16888_v27 = vpop.f32.mrf.mxu0 }
 0x3cf   : > { %v16892_v49 = vpop.f32.mrf.mxu0 }
 0x3d1   : > { %v16896_v5 = vpop.f32.mrf.mxu0 }
 0x3d3   : > { %v16898_v39 = vpop.f32.mrf.mxu0 }
 0x3d5   : > { %v16902_v25 = vpop.f32.mrf.mxu0  ;;  %v12437_v36 = vpop.f32.mrf.mxu1 }
 0x3d6   : > { %v10291_v31 = vadd.f32 %v12437_v36, %v16680_v28 }
 0x3d7   : > { %v16905_v16 = vpop.f32.mrf.mxu0  ;;  %v10285_v23 = vpop.f32.mrf.mxu1 }
 0x3d8   : > { %v11008_v4 = vadd.f32 %v12537_v30, %v10291_v31  ;;  %v10286_v46 = vadd.f32 %v10285_v23, %v16690_v37  ;;  %v16924_v37 = vld [vmem:[%s17355_s3] ss:$0 sm:$0xff] }
 0x3d9   : > { %v16908_v38 = vpop.f32.mrf.mxu0 }
 0x3da   : > { %v11007_v34 = vadd.f32 %v10688_v61, %v10286_v46  ;;  %v11079_v48 = vadd.f32 %v16913_v8, %v11008_v4 }
 0x3db   : > { %v16915_v57 = vpop.f32.mrf.mxu0 }
 0x3dc   : > { %v11078_v28 = vadd.f32 %v16913_v8, %v11007_v34  ;;  %v11214_v34 = vmul.f32 %v16924_v37, %v11079_v48  ;;  %vm11143_vm8 = vcmp.gt.f32.partialorder %v11079_v48, 0.0 }
 0x3dd   : > { %v16919_v36 = vpop.f32.mrf.mxu0  ;;  %v12440_v24 = vpop.f32.mrf.mxu1 }
 0x3de   : > { %v10301_v23 = vadd.f32 %v12440_v24, %v16694_v59  ;;  %vm11142_vm5 = vcmp.gt.f32.partialorder %v11078_v28, 0.0  ;;  %v11213_v31 = vmul.f32 %v16924_v37, %v11078_v28 }
 0x3df   : > { %v16928_v46 = vpop.f32.mrf.mxu0  ;;  %v10295_v30 = vpop.f32.mrf.mxu1 }
 0x3e0   : > { %v10296_v4 = vadd.f32 %v10295_v30, %v16704_v26  ;;  %v11277_v61 = vsel %vm11142_vm5, %v11078_v28, %v11213_v31  ;;  %v11010_v21 = vadd.f32 %v12540_v10, %v10301_v23  ;;  %v11278_v26 = vsel %vm11143_vm8, %v11079_v48, %v11214_v34 }
 0x3e1   : > { %v16932_v12 = vpop.f32.mrf.mxu0  ;;  %v12443_v42 = vpop.f32.mrf.mxu1  ;;  %11341 = vxpose.xlu0.b32.start [1/16] (narrow) %v11277_v61, 8 }
 0x3e2   : > { %v11009_v11 = vadd.f32 %v10698_v58, %v10296_v4  ;;  %v10311_v45 = vadd.f32 %v12443_v42, %v16712_v20  ;;  %v11081_v31 = vadd.f32 %v16913_v8, %v11010_v21 }
 0x3e3   : > { %v16934_v15 = vpop.f32.mrf.mxu0  ;;  %v10305_v59 = vpop.f32.mrf.mxu1 }
 0x3e4   : > { %v11080_v24 = vadd.f32 %v16913_v8, %v11009_v11  ;;  %v10306_v41 = vadd.f32 %v10305_v59, %v16723_v47  ;;  %v11012_v61 = vadd.f32 %v12543_v32, %v10311_v45  ;;  %v11216_v21 = vmul.f32 %v16924_v37, %v11081_v31 }
 0x3e5   : > { %v16939_v28 = vpop.f32.mrf.mxu0  ;;  %v12446_v30 = vpop.f32.mrf.mxu1  ;;  %11342 = vxpose.xlu0.b32.cont [2/16] (narrow) %v11278_v26, 8  ;;  %vm11145_vm15 = vcmp.gt.f32.partialorder %v11081_v31, 0.0 }
 0x3e6   : > { %v11011_v10 = vadd.f32 %v10708_v29, %v10306_v41  ;;  %vm11144_vm9 = vcmp.gt.f32.partialorder %v11080_v24, 0.0  ;;  %v11215_v4 = vmul.f32 %v16924_v37, %v11080_v24  ;;  %v10321_v29 = vadd.f32 %v12446_v30, %v16730_v7 }
 0x3e7   : > { %v16942_v23 = vpop.f32.mrf.mxu0  ;;  %v10315_v58 = vpop.f32.mrf.mxu1  ;;  %v11083_v59 = vadd.f32 %v16913_v8, %v11012_v61  ;;  %v11280_v26 = vsel %vm11145_vm15, %v11081_v31, %v11216_v21 }
 0x3e8   : > { %v11082_v20 = vadd.f32 %v16913_v8, %v11011_v10  ;;  %v10316_v47 = vadd.f32 %v10315_v58, %v16744_v44  ;;  %v11279_v48 = vsel %vm11144_vm9, %v11080_v24, %v11215_v4  ;;  %v11014_v24 = vadd.f32 %v16886_v63, %v10321_v29 }
 0x3e9   : > { %v16945_v11 = vpop.f32.mrf.mxu0  ;;  %v12449_v42 = vpop.f32.mrf.mxu1  ;;  %11343 = vxpose.xlu0.b32.cont [3/16] (narrow) %v11279_v48, 8  ;;  %v11218_v61 = vmul.f32 %v16924_v37, %v11083_v59  ;;  %vm11147_vm14 = vcmp.gt.f32.partialorder %v11083_v59, 0.0 }
 0x3ea   : > { %v11013_v32 = vadd.f32 %v16888_v27, %v10316_v47  ;;  %v11217_v10 = vmul.f32 %v16924_v37, %v11082_v20  ;;  %vm11146_vm2 = vcmp.gt.f32.partialorder %v11082_v20, 0.0  ;;  %v10331_v27 = vadd.f32 %v12449_v42, %v16751_v54 }
 0x3eb   : > { %v10325_v41 = vpop.f32.mrf.mxu1  ;;  %v16951_v34 = vpop.f32.mrf.mxu0  ;;  %v11085_v21 = vadd.f32 %v16913_v8, %v11014_v24 }
 0x3ec   : > { %v11084_v4 = vadd.f32 %v16913_v8, %v11013_v32  ;;  %v10326_v7 = vadd.f32 %v10325_v41, %v16762_v22  ;;  %v11281_v48 = vsel %vm11146_vm2, %v11082_v20, %v11217_v10  ;;  %v11282_v32 = vsel %vm11147_vm14, %v11083_v59, %v11218_v61 }
 0x3ed   : > { %v12452_v45 = vpop.f32.mrf.mxu1  ;;  %11344 = vxpose.xlu0.b32.cont [4/16] (narrow) %v11280_v26, 8  ;;  %v16957_v58 = vpop.f32.mrf.mxu0  ;;  %v11016_v20 = vadd.f32 %v16892_v49, %v10331_v27  ;;  %vm11149_vm1 = vcmp.gt.f32.partialorder %v11085_v21, 0.0 }
 0x3ee   : > { %v11015_v63 = vadd.f32 %v16896_v5, %v10326_v7  ;;  %v11219_v22 = vmul.f32 %v16924_v37, %v11084_v4  ;;  %vm11148_vm0 = vcmp.gt.f32.partialorder %v11084_v4, 0.0  ;;  %v11220_v5 = vmul.f32 %v16924_v37, %v11085_v21 }
 0x3ef   : > { %v10335_v44 = vpop.f32.mrf.mxu1  ;;  %v16963_v47 = vpop.f32.mrf.mxu0  ;;  %v11087_v59 = vadd.f32 %v16913_v8, %v11016_v20 }
 0x3f0   : > { %v10336_v41 = vadd.f32 %v10335_v44, %v16776_v17  ;;  %v11086_v42 = vadd.f32 %v16913_v8, %v11015_v63  ;;  %v11283_v24 = vsel %vm11148_vm0, %v11084_v4, %v11219_v22  ;;  %v11284_v63 = vsel %vm11149_vm1, %v11085_v21, %v11220_v5 }
 0x3f1   : > { %v12455_v30 = vpop.f32.mrf.mxu1  ;;  %11345 = vxpose.xlu0.b32.cont [5/16] (narrow) %v11281_v48, 8  ;;  %v16972_v54 = vpop.f32.mrf.mxu0  ;;  %v10341_v48 = vadd.f32 %v12452_v45, %v16766_v18  ;;  %vm11151_vm6 = vcmp.gt.f32.partialorder %v11087_v59, 0.0 }
 0x3f2   : > { %v11017_v49 = vadd.f32 %v16902_v25, %v10336_v41  ;;  %vm11150_vm3 = vcmp.gt.f32.partialorder %v11086_v42, 0.0 }
 0x3f3   : > { %v10345_v31 = vpop.f32.mrf.mxu1  ;;  %v16981_v61 = vpop.f32.mrf.mxu0  ;;  %v11018_v22 = vadd.f32 %v16898_v39, %v10341_v48 }
 0x3f4   : > { %v11088_v18 = vadd.f32 %v16913_v8, %v11017_v49  ;;  %v10346_v45 = vadd.f32 %v10345_v31, %v16790_v0  ;;  %v10351_v0 = vadd.f32 %v12455_v30, %v16780_v51 }
 0x3f5   : > { %v16967_v29 = vpop.f32.mrf.mxu1  ;;  %11346 = vxpose.xlu0.b32.cont [6/16] (narrow) %v11282_v32, 8  ;;  %v11221_v32 = vmul.f32 %v16924_v37, %v11086_v42  ;;  %v16993_v41 = vpop.f32.mrf.mxu0  ;;  %v11089_v5 = vadd.f32 %v16913_v8, %v11018_v22 }
 0x3f6   : > { %vm11152_vm7 = vcmp.gt.f32.partialorder %v11088_v18, 0.0 }
 0x3f7   : > { %v10355_v26 = vpop.f32.mrf.mxu1  ;;  %v11285_v39 = vsel %vm11150_vm3, %v11086_v42, %v11221_v32  ;;  %v11223_v42 = vmul.f32 %v16924_v37, %v11088_v18  ;;  %v17004_v49 = vpop.f32.mrf.mxu0  ;;  %vm11153_vm11 = vcmp.gt.f32.partialorder %v11089_v5, 0.0 }
 0x3f9   : > { %v12461_v10 = vpop.f32.mrf.mxu1  ;;  %11347 = vxpose.xlu0.b32.cont [7/16] (narrow) %v11283_v24, 8  ;;  %v17015_v32 = vpop.f32.mrf.mxu0 }
 0x3fa   : > { %v10371_v7 = vadd.f32 %v12461_v10, %v16808_v40 }
 0x3fb   : > { %v10365_v17 = vpop.f32.mrf.mxu1 }
 0x3fc   : > { %v10366_v44 = vadd.f32 %v10365_v17, %v16818_v33  ;;  %v11024_v27 = vadd.f32 %v16928_v46, %v10371_v7  ;;  %v11222_v33 = vmul.f32 %v16924_v37, %v11087_v59 }
 0x3fd   : > { %v12464_v4 = vpop.f32.mrf.mxu1  ;;  %11348 = vxpose.xlu0.b32.cont [8/16] (narrow) %v11284_v63, 8 }
 0x3fe   : > { %v11023_v40 = vadd.f32 %v16932_v12, %v10366_v44  ;;  %v10381_v21 = vadd.f32 %v12464_v4, %v16822_v6  ;;  %v11095_v12 = vadd.f32 %v16913_v8, %v11024_v27  ;;  %v11286_v6 = vsel %vm11151_vm6, %v11087_v59, %v11222_v33 }
 0x3ff   : > { %v10375_v25 = vpop.f32.mrf.mxu1  ;;  %v10356_v4 = vadd.f32 %v10355_v26, %v16804_v14  ;;  %v10361_v14 = vadd.f32 %v16967_v29, %v16794_v62 }
 0x400   : > { %v11094_v46 = vadd.f32 %v16913_v8, %v11023_v40  ;;  %v10376_v20 = vadd.f32 %v10375_v25, %v16828_v55  ;;  %v11019_v55 = vadd.f32 %v16908_v38, %v10346_v45  ;;  %v11026_v48 = vadd.f32 %v16934_v15, %v10381_v21 }
 0x401   : > { %v12467_v10 = vpop.f32.mrf.mxu1  ;;  %11349 = vxpose.xlu0.b32.cont [9/16] (narrow) %v11285_v39, 8  ;;  %v11230_v30 = vmul.f32 %v16924_v37, %v11095_v12  ;;  %vm11159_vm10 = vcmp.gt.f32.partialorder %v11095_v12, 0.0  ;;  %v11020_v38 = vadd.f32 %v16905_v16, %v10351_v0  ;;  %v11224_v15 = vmul.f32 %v16924_v37, %v11089_v5 }
 0x402   : > { %v11025_v24 = vadd.f32 %v16939_v28, %v10376_v20  ;;  %vm11158_vm4 = vcmp.gt.f32.partialorder %v11094_v46, 0.0  ;;  %v11229_v7 = vmul.f32 %v16924_v37, %v11094_v46  ;;  %v11090_v27 = vadd.f32 %v16913_v8, %v11019_v55 }
 0x403   : > { %v10385_v31 = vpop.f32.mrf.mxu1  ;;  %v10391_v63 = vadd.f32 %v12467_v10, %v16830_v9  ;;  %v11097_v40 = vadd.f32 %v16913_v8, %v11026_v48  ;;  %v11294_v16 = vsel %vm11159_vm10, %v11095_v12, %v11230_v30  ;;  %v11091_v45 = vadd.f32 %v16913_v8, %v11020_v38 }
 0x404   : > { %v11096_v28 = vadd.f32 %v16913_v8, %v11025_v24  ;;  %v10386_v17 = vadd.f32 %v10385_v31, %v16836_v60  ;;  %v11293_v51 = vsel %vm11158_vm4, %v11094_v46, %v11229_v7  ;;  %v11287_v60 = vsel %vm11152_vm7, %v11088_v18, %v11223_v42 }
 0x405   : > { %v12470_v44 = vpop.f32.mrf.mxu1  ;;  %11373 = vxpose.xlu1.b32.start [1/16] (narrow) %v11293_v51, 8  ;;  %11350 = vxpose.xlu0.b32.cont [10/16] (narrow) %v11286_v6, 8  ;;  %v11288_v26 = vsel %vm11153_vm11, %v11089_v5, %v11224_v15  ;;  %v11021_v18 = vadd.f32 %v16919_v36, %v10356_v4  ;;  %v11028_v46 = vadd.f32 %v16942_v23, %v10391_v63  ;;  %vm11154_vm13 = vcmp.gt.f32.partialorder %v11090_v27, 0.0 }
 0x406   : > { %v11027_v22 = vadd.f32 %v16945_v11, %v10386_v17  ;;  %v11231_v33 = vmul.f32 %v16924_v37, %v11096_v28  ;;  %vm11160_vm12 = vcmp.gt.f32.partialorder %v11096_v28, 0.0  ;;  %v17026_v11 = vpop.f32.mrf.mxu0  ;;  %v11225_v21 = vmul.f32 %v16924_v37, %v11090_v27 }
 0x407   : > { %v10395_v59 = vpop.f32.mrf.mxu1  ;;  %v11232_v62 = vmul.f32 %v16924_v37, %v11097_v40  ;;  %vm11161_vm5 = vcmp.gt.f32.partialorder %v11097_v40, 0.0  ;;  %v11022_v36 = vadd.f32 %v16915_v57, %v10361_v14  ;;  %vm11155_vm8 = vcmp.gt.f32.partialorder %v11091_v45, 0.0 }
 0x408   : > { %v11098_v20 = vadd.f32 %v16913_v8, %v11027_v22  ;;  %v10396_v12 = vadd.f32 %v10395_v59, %v16844_v53  ;;  %v11295_v39 = vsel %vm11160_vm12, %v11096_v28, %v11231_v33  ;;  %v11092_v29 = vadd.f32 %v16913_v8, %v11021_v18  ;;  %v17037_v0 = vpop.f32.mrf.mxu0 }
 0x409   : > { %v12473_v25 = vpop.f32.mrf.mxu1  ;;  %11374 = vxpose.xlu1.b32.cont [2/16] (narrow) %v11294_v16, 8  ;;  %11351 = vxpose.xlu0.b32.cont [11/16] (narrow) %v11287_v60, 8  ;;  %v11099_v24 = vadd.f32 %v16913_v8, %v11028_v46  ;;  %v11289_v5 = vsel %vm11154_vm13, %v11090_v27, %v11225_v21  ;;  %v11226_v53 = vmul.f32 %v16924_v37, %v11091_v45 }
 0x40a   : > { %v10401_v31 = vadd.f32 %v12470_v44, %v16838_v50  ;;  %v11029_v7 = vadd.f32 %v16957_v58, %v10396_v12  ;;  %v11296_v55 = vsel %vm11161_vm5, %v11097_v40, %v11232_v62  ;;  %v11233_v57 = vmul.f32 %v16924_v37, %v11098_v20  ;;  %v12585_v17 = vpop.f32.mrf.mxu0 }
 0x40b   : > { %v10405_v9 = vpop.f32.mrf.mxu1  ;;  %vm11162_vm9 = vcmp.gt.f32.partialorder %v11098_v20, 0.0  ;;  %v11093_v42 = vadd.f32 %v16913_v8, %v11022_v36  ;;  %v11290_v51 = vsel %vm11155_vm8, %v11091_v45, %v11226_v53  ;;  %v11227_v50 = vmul.f32 %v16924_v37, %v11092_v29 }
 0x40c   : > { %v10406_v28 = vadd.f32 %v10405_v9, %v16852_v35  ;;  %v11030_v58 = vadd.f32 %v16951_v34, %v10401_v31  ;;  %v11100_v44 = vadd.f32 %v16913_v8, %v11029_v7  ;;  %v11297_v38 = vsel %vm11162_vm9, %v11098_v20, %v11233_v57  ;;  %v10848_v4 = vpop.f32.mrf.mxu0 }
 0x40d   : > { %v17031_v10 = vpop.f32.mrf.mxu1  ;;  %11375 = vxpose.xlu1.b32.cont [3/16] (narrow) %v11295_v39, 8  ;;  %11352 = vxpose.xlu0.b32.cont [12/16] (narrow) %v11288_v26, 8  ;;  %v11234_v59 = vmul.f32 %v16924_v37, %v11099_v24  ;;  %vm11163_vm15 = vcmp.gt.f32.partialorder %v11099_v24, 0.0  ;;  %vm11156_vm2 = vcmp.gt.f32.partialorder %v11092_v29, 0.0  ;;  %v10411_v35 = vadd.f32 %v12473_v25, %v16846_v19 }
 0x40e   : > { %v11031_v27 = vadd.f32 %v16972_v54, %v10406_v28  ;;  %v11228_v34 = vmul.f32 %v16924_v37, %v11093_v42  ;;  %v11101_v63 = vadd.f32 %v16913_v8, %v11030_v58  ;;  %v11291_v22 = vsel %vm11156_vm2, %v11092_v29, %v11227_v50  ;;  %v12588_v14 = vpop.f32.mrf.mxu0 }
 0x40f   : > { %v10415_v23 = vpop.f32.mrf.mxu1  ;;  %v11298_v40 = vsel %vm11163_vm15, %v11099_v24, %v11234_v59  ;;  %v11235_v16 = vmul.f32 %v16924_v37, %v11100_v44  ;;  %vm11164_vm14 = vcmp.gt.f32.partialorder %v11100_v44, 0.0  ;;  %vm11157_vm0 = vcmp.gt.f32.partialorder %v11093_v42, 0.0 }
 0x410   : > { %v11032_v19 = vadd.f32 %v16963_v47, %v10411_v35  ;;  %v10416_v54 = vadd.f32 %v10415_v23, %v16860_v1  ;;  %v11102_v45 = vadd.f32 %v16913_v8, %v11031_v27  ;;  %v11292_v21 = vsel %vm11157_vm0, %v11093_v42, %v11228_v34  ;;  %v10858_v62 = vpop.f32.mrf.mxu0  ;;  %v17628_v27 = vld [vmem:[#allocation21_spill] sm:$0xff] }
 0x411   : > { %v17042_v6 = vpop.f32.mrf.mxu1  ;;  %11376 = vxpose.xlu1.b32.cont [4/16] (narrow) %v11296_v55, 8  ;;  %11353 = vxpose.xlu0.b32.cont [13/16] (narrow) %v11289_v5, 8  ;;  %v11299_v46 = vsel %vm11164_vm14, %v11100_v44, %v11235_v16  ;;  %vm11165_vm1 = vcmp.gt.f32.partialorder %v11101_v63, 0.0  ;;  %v10421_v1 = vadd.f32 %v17031_v10, %v16854_v13 }
 0x412   : > { %v11103_v47 = vadd.f32 %v16913_v8, %v11032_v19  ;;  %v11033_v12 = vadd.f32 %v16993_v41, %v10416_v54  ;;  %v11237_v29 = vmul.f32 %v16924_v37, %v11102_v45  ;;  %vm11166_vm3 = vcmp.gt.f32.partialorder %v11102_v45, 0.0  ;;  %v12591_v55 = vpop.f32.mrf.mxu0  ;;  %v17629_v19 = vld [vmem:[#allocation24_spill] sm:$0xff] }
 0x413   : > { %v17045_v48 = vpop.f32.mrf.mxu1  ;;  %v11034_v13 = vadd.f32 %v16981_v61, %v10421_v1 }
 0x414   : > { %vm11167_vm4 = vcmp.gt.f32.partialorder %v11103_v47, 0.0  ;;  %v10426_v7 = vadd.f32 %v17045_v48, %v16868_v2  ;;  %v11301_v42 = vsel %vm11166_vm3, %v11102_v45, %v11237_v29  ;;  %v10868_v35 = vpop.f32.mrf.mxu0 }
 0x415   : > { %v17053_v30 = vpop.f32.mrf.mxu1  ;;  %11377 = vxpose.xlu1.b32.cont [5/16] (narrow) %v11297_v38, 8  ;;  %11354 = vxpose.xlu0.b32.cont [14/16] (narrow) %v11290_v51, 8  ;;  %v11105_v44 = vadd.f32 %v16913_v8, %v11034_v13  ;;  %v17627_v38 = vld [vmem:[#allocation25_spill] sm:$0xff] }
 0x416   : > { %v10431_v59 = vadd.f32 %v17042_v6, %v17627_v38  ;;  %v11035_v48 = vadd.f32 %v17015_v32, %v10426_v7 }
 0x417   : > { %v17057_v15 = vpop.f32.mrf.mxu1  ;;  %vm11169_vm12 = vcmp.gt.f32.partialorder %v11105_v44, 0.0  ;;  %v11240_v32 = vmul.f32 %v16924_v37, %v11105_v44 }
 0x418   : > { %v11036_v6 = vadd.f32 %v17004_v49, %v10431_v59  ;;  %v10436_v54 = vadd.f32 %v17057_v15, %v17629_v19 }
 0x419   : > { %v12485_v60 = vpop.f32.mrf.mxu1  ;;  %11378 = vxpose.xlu1.b32.cont [6/16] (narrow) %v11298_v40, 8  ;;  %11355 = vxpose.xlu0.b32.cont [15/16] (narrow) %v11291_v22, 8 }
 0x41a   : > { %v10451_v33 = vadd.f32 %v12485_v60, %v16740_v43  ;;  %v11236_v43 = vmul.f32 %v16924_v37, %v11101_v63  ;;  %v11037_v1 = vadd.f32 %v17037_v0, %v10436_v54 }
 0x41b   : > { %v10445_v25 = vpop.f32.mrf.mxu1 }
 0x41c   : > { %v10446_v9 = vadd.f32 %v10445_v25, %v16753_v56  ;;  %v11040_v26 = vadd.f32 %v12585_v17, %v10451_v33  ;;  %v11300_v53 = vsel %vm11165_vm1, %v11101_v63, %v11236_v43  ;;  %v17626_v17 = vld [vmem:[#allocation16_spill] sm:$0xff]  ;;  %v11106_v33 = vadd.f32 %v16913_v8, %v11035_v48  ;;  %v12594_v25 = vpop.f32.mrf.mxu0 }
 0x41d   : > { %v12488_v18 = vpop.f32.mrf.mxu1  ;;  %11379 = vxpose.xlu1.b32.cont [7/16] (narrow) %v11299_v46, 8  ;;  %11356 = vxpose.xlu0.b32.end [16/16] (narrow) %v11292_v21, 8  ;;  %v11107_v43 = vadd.f32 %v16913_v8, %v11036_v6  ;;  %v11108_v0 = vadd.f32 %v16913_v8, %v11037_v1  ;;  %v17636_v6 = vld [vmem:[#allocation31_spill] sm:$0xff] }
 0x41e   : > { %v11039_v20 = vadd.f32 %v10848_v4, %v10446_v9  ;;  %v10461_v36 = vadd.f32 %v12488_v18, %v16760_v52  ;;  %v11111_v24 = vadd.f32 %v16913_v8, %v11040_v26  ;;  %v11238_v52 = vmul.f32 %v16924_v37, %v11103_v47  ;;  %v17630_v26 = vld [vmem:[#allocation17_spill] sm:$0xff] }
 0x41f   : > { %v10455_v39 = vpop.f32.mrf.mxu1  ;;  %vm11170_vm5 = vcmp.gt.f32.partialorder %v11106_v33, 0.0  ;;  %vm11171_vm9 = vcmp.gt.f32.partialorder %v11107_v43, 0.0  ;;  %vm11172_vm2 = vcmp.gt.f32.partialorder %v11108_v0, 0.0 }
 0x420   : > { %v11110_v56 = vadd.f32 %v16913_v8, %v11039_v20  ;;  %v10456_v23 = vadd.f32 %v10455_v39, %v16770_v3  ;;  %v11104_v3 = vadd.f32 %v16913_v8, %v11033_v12  ;;  %v11042_v57 = vadd.f32 %v12588_v14, %v10461_v36  ;;  %v17631_v20 = vld [vmem:[#allocation30_spill] sm:$0xff]  ;;  %v10878_v12 = vpop.f32.mrf.mxu0 }
 0x421   : > { %v12491_v5 = vpop.f32.mrf.mxu1  ;;  %11380 = vxpose.xlu1.b32.cont [8/16] (narrow) %v11300_v53, 8  ;;  %v11246_v61 = vmul.f32 %v16924_v37, %v11111_v24  ;;  %vm11175_vm7 = vcmp.gt.f32.partialorder %v11111_v24, 0.0  ;;  %v11302_v2 = vsel %vm11167_vm4, %v11103_v47, %v11238_v52  ;;  %v10441_v15 = vadd.f32 %v17053_v30, %v17631_v20  ;;  %v17632_v39 = vld [vmem:[#allocation22_spill] sm:$0xff] }
 0x422   : > { %v11041_v31 = vadd.f32 %v10858_v62, %v10456_v23  ;;  %vm11174_vm6 = vcmp.gt.f32.partialorder %v11110_v56, 0.0  ;;  %v11245_v10 = vmul.f32 %v16924_v37, %v11110_v56  ;;  %v10471_v4 = vadd.f32 %v12491_v5, %v17628_v27  ;;  %v12597_v53 = vpop.f32.mrf.mxu0  ;;  %v17633_v52 = vld [vmem:[#allocation26_spill] sm:$0xff] }
 0x423   : > { %v10465_v41 = vpop.f32.mrf.mxu1  ;;  %vm11168_vm10 = vcmp.gt.f32.partialorder %v11104_v3, 0.0  ;;  %v11239_v34 = vmul.f32 %v16924_v37, %v11104_v3  ;;  %v11113_v63 = vadd.f32 %v16913_v8, %v11042_v57  ;;  %v11310_v40 = vsel %vm11175_vm7, %v11111_v24, %v11246_v61 }
 0x424   : > { %v11112_v28 = vadd.f32 %v16913_v8, %v11041_v31  ;;  %v10466_v51 = vadd.f32 %v10465_v41, %v17626_v17  ;;  %v11309_v50 = vsel %vm11174_vm6, %v11110_v56, %v11245_v10  ;;  %v11044_v45 = vadd.f32 %v12591_v55, %v10471_v4 }
 0x425   : > { %v12494_v58 = vpop.f32.mrf.mxu1  ;;  %11381 = vxpose.xlu1.b32.cont [9/16] (narrow) %v11301_v42, 8  ;;  %11405 = vxpose.xlu0.b32.start [1/16] (narrow) %v11309_v50, 8  ;;  %v11303_v14 = vsel %vm11168_vm10, %v11104_v3, %v11239_v34  ;;  %v11248_v21 = vmul.f32 %v16924_v37, %v11113_v63  ;;  %vm11177_vm13 = vcmp.gt.f32.partialorder %v11113_v63, 0.0  ;;  %v11304_v47 = vsel %vm11169_vm12, %v11105_v44, %v11240_v32  ;;  %v10888_v42 = vpop.f32.mrf.mxu0  ;;  %v17635_v34 = vld [vmem:[#allocation32_spill] sm:$0xff] }
 0x426   : > { %v11043_v60 = vadd.f32 %v10868_v35, %v10466_v51  ;;  %v11247_v22 = vmul.f32 %v16924_v37, %v11112_v28  ;;  %vm11176_vm11 = vcmp.gt.f32.partialorder %v11112_v28, 0.0  ;;  %v10481_v62 = vadd.f32 %v12494_v58, %v17632_v39 }
 0x427   : > { %v10475_v16 = vpop.f32.mrf.mxu1  ;;  %v11241_v56 = vmul.f32 %v16924_v37, %v11106_v33  ;;  %v11115_v36 = vadd.f32 %v16913_v8, %v11044_v45  ;;  %v11312_v29 = vsel %vm11177_vm13, %v11113_v63, %v11248_v21  ;;  %v11038_v30 = vadd.f32 %v17026_v11, %v10441_v15 }
 0x428   : > { %v11114_v9 = vadd.f32 %v16913_v8, %v11043_v60  ;;  %v10476_v18 = vadd.f32 %v10475_v16, %v17630_v26  ;;  %v11311_v46 = vsel %vm11176_vm11, %v11112_v28, %v11247_v22  ;;  %v11046_v31 = vadd.f32 %v12594_v25, %v10481_v62  ;;  %v17634_v28 = vld [vmem:[#allocation23_spill] sm:$0xff] }
 0x429   : > { %11382 = vxpose.xlu1.b32.cont [10/16] (narrow) %v11302_v2, 8  ;;  %11406 = vxpose.xlu0.b32.cont [2/16] (narrow) %v11310_v40, 8  ;;  %v12497_v49 = vpop.f32.mrf.mxu1  ;;  %v11305_v13 = vsel %vm11170_vm5, %v11106_v33, %v11241_v56  ;;  %v11242_v41 = vmul.f32 %v16924_v37, %v11107_v43  ;;  %v11250_v55 = vmul.f32 %v16924_v37, %v11115_v36  ;;  %vm11179_vm15 = vcmp.gt.f32.partialorder %v11115_v36, 0.0  ;;  %v12600_v2 = vpop.f32.mrf.mxu0 }
 0x42a   : > { %v11045_v23 = vadd.f32 %v10878_v12, %v10476_v18  ;;  %v11249_v24 = vmul.f32 %v16924_v37, %v11114_v9  ;;  %vm11178_vm8 = vcmp.gt.f32.partialorder %v11114_v9, 0.0  ;;  %v11109_v11 = vadd.f32 %v16913_v8, %v11038_v30 }
 0x42b   : > { %v10485_v5 = vpop.f32.mrf.mxu1  ;;  %v10491_v17 = vadd.f32 %v12497_v49, %v17634_v28  ;;  %v11306_v51 = vsel %vm11171_vm9, %v11107_v43, %v11242_v41  ;;  %v11243_v50 = vmul.f32 %v16924_v37, %v11108_v0  ;;  %v11117_v61 = vadd.f32 %v16913_v8, %v11046_v31  ;;  %v10898_v16 = vpop.f32.mrf.mxu0  ;;  %v17640_v41 = vld [vmem:[#allocation13_spill] sm:$0xff] }
 0x42c   : > { %v11116_v10 = vadd.f32 %v16913_v8, %v11045_v23  ;;  %v10486_v3 = vadd.f32 %v10485_v5, %v17633_v52  ;;  %v11313_v7 = vsel %vm11178_vm8, %v11114_v9, %v11249_v24  ;;  %v11314_v44 = vsel %vm11179_vm15, %v11115_v36, %v11250_v55  ;;  %v17639_v5 = vld [vmem:[#allocation36_spill] sm:$0xff] }
 0x42d   : > { %11383 = vxpose.xlu1.b32.cont [11/16] (narrow) %v11303_v14, 8  ;;  %11407 = vxpose.xlu0.b32.cont [3/16] (narrow) %v11311_v46, 8  ;;  %v12500_v57 = vpop.f32.mrf.mxu1  ;;  %v11048_v48 = vadd.f32 %v12597_v53, %v10491_v17  ;;  %v11307_v35 = vsel %vm11172_vm2, %v11108_v0, %v11243_v50  ;;  %vm11173_vm0 = vcmp.gt.f32.partialorder %v11109_v11, 0.0  ;;  %v11244_v27 = vmul.f32 %v16924_v37, %v11109_v11  ;;  %v12603_v9 = vpop.f32.mrf.mxu0  ;;  %v17637_v46 = vld [vmem:[#allocation35_spill] sm:$0xff] }
 0x42e   : > { %v11047_v58 = vadd.f32 %v10888_v42, %v10486_v3  ;;  %v11251_v38 = vmul.f32 %v16924_v37, %v11116_v10  ;;  %vm11180_vm14 = vcmp.gt.f32.partialorder %v11116_v10, 0.0  ;;  %v11252_v40 = vmul.f32 %v16924_v37, %v11117_v61 }
 0x42f   : > { %v10495_v59 = vpop.f32.mrf.mxu1  ;;  %vm11181_vm1 = vcmp.gt.f32.partialorder %v11117_v61, 0.0  ;;  %v10501_v32 = vadd.f32 %v12500_v57, %v17636_v6  ;;  %v11308_v33 = vsel %vm11173_vm0, %v11109_v11, %v11244_v27  ;;  %v11119_v19 = vadd.f32 %v16913_v8, %v11048_v48  ;;  %v10908_v15 = vpop.f32.mrf.mxu0  ;;  %v17641_v48 = vld [vmem:[#allocation40_spill] sm:$0xff] }
 0x430   : > { %v11118_v4 = vadd.f32 %v16913_v8, %v11047_v58  ;;  %v10496_v63 = vadd.f32 %v10495_v59, %v17635_v34  ;;  %v11315_v60 = vsel %vm11180_vm14, %v11116_v10, %v11251_v38  ;;  %v11316_v25 = vsel %vm11181_vm1, %v11117_v61, %v11252_v40  ;;  %v17642_v34 = vld [vmem:[#allocation39_spill] sm:$0xff] }
 0x431   : > { %11384 = vxpose.xlu1.b32.cont [12/16] (narrow) %v11304_v47, 8  ;;  %11408 = vxpose.xlu0.b32.cont [4/16] (narrow) %v11312_v29, 8  ;;  %v12503_v22 = vpop.f32.mrf.mxu1  ;;  %v11050_v26 = vadd.f32 %v12600_v2, %v10501_v32  ;;  %v11254_v43 = vmul.f32 %v16924_v37, %v11119_v19  ;;  %vm11183_vm6 = vcmp.gt.f32.partialorder %v11119_v19, 0.0  ;;  %v17638_v47 = vld [vmem:[#allocation34_spill] sm:$0xff]  ;;  %v12606_v23 = vpop.f32.mrf.mxu0  ;;  %v17643_v32 = vld [vmem:[#allocation43_spill] sm:$0xff] }
 0x432   : > { %v11049_v54 = vadd.f32 %v10898_v16, %v10496_v63  ;;  %v11253_v45 = vmul.f32 %v16924_v37, %v11118_v4  ;;  %vm11182_vm3 = vcmp.gt.f32.partialorder %v11118_v4, 0.0  ;;  %v10511_v1 = vadd.f32 %v12503_v22, %v17638_v47 }
 0x433   : > { %v10505_v14 = vpop.f32.mrf.mxu1  ;;  %v11121_v12 = vadd.f32 %v16913_v8, %v11050_v26  ;;  %v11318_v62 = vsel %vm11183_vm6, %v11119_v19, %v11254_v43  ;;  %v17645_v43 = vld [vmem:[#allocation27_spill] sm:$0xff] }
 0x434   : > { %v11120_v18 = vadd.f32 %v16913_v8, %v11049_v54  ;;  %v10506_v21 = vadd.f32 %v10505_v14, %v17637_v46  ;;  %v11317_v49 = vsel %vm11182_vm3, %v11118_v4, %v11253_v45  ;;  %v11052_v29 = vadd.f32 %v12603_v9, %v10511_v1 }
 0x435   : > { %11385 = vxpose.xlu1.b32.cont [13/16] (narrow) %v11305_v13, 8  ;;  %11409 = vxpose.xlu0.b32.cont [5/16] (narrow) %v11313_v7, 8  ;;  %v12506_v20 = vpop.f32.mrf.mxu1  ;;  %v11256_v53 = vmul.f32 %v16924_v37, %v11121_v12  ;;  %vm11185_vm7 = vcmp.gt.f32.partialorder %v11121_v12, 0.0  ;;  %v10918_v13 = vpop.f32.mrf.mxu0 }
 0x436   : > { %v11051_v39 = vadd.f32 %v10908_v15, %v10506_v21  ;;  %v11255_v56 = vmul.f32 %v16924_v37, %v11120_v18  ;;  %vm11184_vm4 = vcmp.gt.f32.partialorder %v11120_v18, 0.0  ;;  %v11123_v31 = vadd.f32 %v16913_v8, %v11052_v29 }
 0x437   : > { %v10515_v36 = vpop.f32.mrf.mxu1  ;;  %v10521_v10 = vadd.f32 %v12506_v20, %v17640_v41  ;;  %v11320_v3 = vsel %vm11185_vm7, %v11121_v12, %v11256_v53  ;;  %v12609_v2 = vpop.f32.mrf.mxu0  ;;  %v17647_v53 = vld [vmem:[#allocation19_spill] sm:$0xff] }
 0x438   : > { %v11122_v24 = vadd.f32 %v16913_v8, %v11051_v39  ;;  %v10516_v30 = vadd.f32 %v10515_v36, %v17639_v5  ;;  %v11319_v0 = vsel %vm11184_vm4, %v11120_v18, %v11255_v56  ;;  %v11258_v42 = vmul.f32 %v16924_v37, %v11123_v31  ;;  %v17646_v39 = vld [vmem:[#allocation44_spill] sm:$0xff] }
 0x439   : > { %11386 = vxpose.xlu1.b32.cont [14/16] (narrow) %v11306_v51, 8  ;;  %11410 = vxpose.xlu0.b32.cont [6/16] (narrow) %v11314_v44, 8  ;;  %v11054_v55 = vadd.f32 %v12606_v23, %v10521_v10  ;;  %vm11187_vm11 = vcmp.gt.f32.partialorder %v11123_v31, 0.0  ;;  %v12509_v38 = vpop.f32.mrf.mxu1  ;;  %v10928_v4 = vpop.f32.mrf.mxu0 }
 0x43a   : > { %v11053_v52 = vadd.f32 %v10918_v13, %v10516_v30  ;;  %v11257_v7 = vmul.f32 %v16924_v37, %v11122_v24  ;;  %vm11186_vm10 = vcmp.gt.f32.partialorder %v11122_v24, 0.0  ;;  %v11322_v17 = vsel %vm11187_vm11, %v11123_v31, %v11258_v42 }
 0x43b   : > { %v11125_v28 = vadd.f32 %v16913_v8, %v11054_v55  ;;  %v10525_v59 = vpop.f32.mrf.mxu1  ;;  %v10531_v63 = vadd.f32 %v12509_v38, %v17642_v34  ;;  %v12612_v22 = vpop.f32.mrf.mxu0 }
 0x43c   : > { %v11124_v57 = vadd.f32 %v16913_v8, %v11053_v52  ;;  %v11321_v11 = vsel %vm11186_vm10, %v11122_v24, %v11257_v7  ;;  %v17648_v7 = vld [vmem:[#allocation20_spill] sm:$0xff] }
 0x43d   : > { %11387 = vxpose.xlu1.b32.cont [15/16] (narrow) %v11307_v35, 8  ;;  %11411 = vxpose.xlu0.b32.cont [7/16] (narrow) %v11315_v60, 8  ;;  %v11260_v61 = vmul.f32 %v16924_v37, %v11125_v28  ;;  %vm11189_vm13 = vcmp.gt.f32.partialorder %v11125_v28, 0.0  ;;  %v10526_v35 = vadd.f32 %v10525_v59, %v17641_v48  ;;  %v12512_v27 = vpop.f32.mrf.mxu1  ;;  %v11056_v16 = vadd.f32 %v12609_v2, %v10531_v63  ;;  %v10938_v54 = vpop.f32.mrf.mxu0 }
 0x43e   : > { %v11259_v51 = vmul.f32 %v16924_v37, %v11124_v57  ;;  %vm11188_vm12 = vcmp.gt.f32.partialorder %v11124_v57, 0.0 }
 0x43f   : > { %v11324_v44 = vsel %vm11189_vm13, %v11125_v28, %v11260_v61  ;;  %v11055_v60 = vadd.f32 %v10928_v4, %v10526_v35  ;;  %v10535_v40 = vpop.f32.mrf.mxu1  ;;  %v11127_v14 = vadd.f32 %v16913_v8, %v11056_v16  ;;  %v12615_v46 = vpop.f32.mrf.mxu0 }
 0x440   : > { %v11323_v50 = vsel %vm11188_vm12, %v11124_v57, %v11259_v51 }
 0x441   : > { %11388 = vxpose.xlu1.b32.end [16/16] (narrow) %v11308_v33, 8  ;;  %11412 = vxpose.xlu0.b32.cont [8/16] (narrow) %v11316_v25, 8  ;;  %v11126_v6 = vadd.f32 %v16913_v8, %v11055_v60  ;;  %v10536_v33 = vadd.f32 %v10535_v40, %v17643_v32  ;;  %v12515_v19 = vpop.f32.mrf.mxu1  ;;  %v17644_v25 = vld [vmem:[#allocation10_spill] sm:$0xff]  ;;  %v11262_v47 = vmul.f32 %v16924_v37, %v11127_v14  ;;  %vm11191_vm8 = vcmp.gt.f32.partialorder %v11127_v14, 0.0  ;;  %v10948_v12 = vpop.f32.mrf.mxu0 }
 0x442   : > { %v10541_v45 = vadd.f32 %v12512_v27, %v17644_v25  ;;  %v17650_v27 = vld [vmem:[#allocation18_spill] sm:$0xff] }
 0x443   : > { %v11057_v9 = vadd.f32 %v10938_v54, %v10536_v33  ;;  %v11261_v26 = vmul.f32 %v16924_v37, %v11126_v6  ;;  %v10545_v18 = vpop.f32.mrf.mxu1  ;;  %vm11190_vm5 = vcmp.gt.f32.partialorder %v11126_v6, 0.0  ;;  %v11326_v23 = vsel %vm11191_vm8, %v11127_v14, %v11262_v47  ;;  %v12618_v5 = vpop.f32.mrf.mxu0  ;;  %v17651_v33 = vld [vmem:[#allocation33_spill] sm:$0xff] }
 0x444   : > { %v11058_v21 = vadd.f32 %v12612_v22, %v10541_v45  ;;  %v10546_v20 = vadd.f32 %v10545_v18, %v17645_v43 }
 0x445   : > { %11413 = vxpose.xlu0.b32.cont [9/16] (narrow) %v11317_v49, 8  ;;  %v11128_v49 = vadd.f32 %v16913_v8, %v11057_v9  ;;  %v11325_v15 = vsel %vm11190_vm5, %v11126_v6, %v11261_v26  ;;  %v12518_v1 = vpop.f32.mrf.mxu1  ;;  %v17652_v26 = vld [vmem:[#allocation29_spill] sm:$0xff]  ;;  %vm11781_vm5 = vcmask 261120  }
 0x446   : > { %v11129_v56 = vadd.f32 %v16913_v8, %v11058_v21  ;;  %v11059_v36 = vadd.f32 %v10948_v12, %v10546_v20  ;;  %v10561_v55 = vadd.f32 %v12518_v1, %v17648_v7  ;;  %v17653_v12 = vld [vmem:[#allocation12_spill] sm:$0xff] }
 0x447   : > { %v11263_v29 = vmul.f32 %v16924_v37, %v11128_v49  ;;  %v10555_v24 = vpop.f32.mrf.mxu1  ;;  %vm11192_vm9 = vcmp.gt.f32.partialorder %v11128_v49, 0.0 }
 0x448   : > { %v10556_v31 = vadd.f32 %v10555_v24, %v17647_v53  ;;  %v11264_v10 = vmul.f32 %v16924_v37, %v11129_v56  ;;  %vm11193_vm15 = vcmp.gt.f32.partialorder %v11129_v56, 0.0 }
 0x449   : > { %11414 = vxpose.xlu0.b32.cont [10/16] (narrow) %v11318_v62, 8  ;;  %v10551_v62 = vadd.f32 %v12515_v19, %v17646_v39  ;;  %v11327_v13 = vsel %vm11192_vm9, %v11128_v49, %v11263_v29  ;;  %v12521_v52 = vpop.f32.mrf.mxu1 }
 0x44a   : > { %v11328_v42 = vsel %vm11193_vm15, %v11129_v56, %v11264_v10  ;;  %v10571_v4 = vadd.f32 %v12521_v52, %v17650_v27  ;;  %v12740_v56 = vld [vmem:[%s17355_s3] ss:$0 sm:$0xff] }
 0x44b   : > { %v11060_v30 = vadd.f32 %v12615_v46, %v10551_v62 }
 0x44d   : > { %11415 = vxpose.xlu0.b32.cont [11/16] (narrow) %v11319_v0, 8  ;;  %v11130_v0 = vadd.f32 %v16913_v8, %v11059_v36  ;;  %v11131_v57 = vadd.f32 %v16913_v8, %v11060_v30 }
 0x44f   : > { %v11265_v28 = vmul.f32 %v16924_v37, %v11130_v0  ;;  %vm11194_vm2 = vcmp.gt.f32.partialorder %v11130_v0, 0.0  ;;  %v11266_v2 = vmul.f32 %v16924_v37, %v11131_v57  ;;  %vm11195_vm14 = vcmp.gt.f32.partialorder %v11131_v57, 0.0 }
 0x451   : > { %11416 = vxpose.xlu0.b32.cont [12/16] (narrow) %v11320_v3, 8  ;;  %v10958_v3 = vpop.f32.mrf.mxu0  ;;  %v11329_v59 = vsel %vm11194_vm2, %v11130_v0, %v11265_v28  ;;  %v11330_v60 = vsel %vm11195_vm14, %v11131_v57, %v11266_v2  ;;  %v17656_v28 = vld [vmem:[#allocation37_spill] sm:$0xff] }
 0x453   : > { %v12621_v51 = vpop.f32.mrf.mxu0 }
 0x454   : > { %v11064_v6 = vadd.f32 %v12621_v51, %v10571_v4 }
 0x455   : > { %11417 = vxpose.xlu0.b32.cont [13/16] (narrow) %v11321_v11, 8  ;;  %v11061_v11 = vadd.f32 %v10958_v3, %v10556_v31  ;;  %v10968_v35 = vpop.f32.mrf.mxu0  ;;  %v17655_v3 = vld [vmem:[#allocation38_spill] sm:$0xff] }
 0x457   : > { %v11132_v61 = vadd.f32 %v16913_v8, %v11061_v11  ;;  %v12624_v16 = vpop.f32.mrf.mxu0 }
 0x459   : > { %11418 = vxpose.xlu0.b32.cont [14/16] (narrow) %v11322_v17, 8  ;;  %v10565_v17 = vpop.f32.mrf.mxu1  ;;  %v11267_v40 = vmul.f32 %v16924_v37, %v11132_v61  ;;  %vm11196_vm0 = vcmp.gt.f32.partialorder %v11132_v61, 0.0  ;;  %v10978_v9 = vpop.f32.mrf.mxu0 }
 0x45b   : > { %v12524_v48 = vpop.f32.mrf.mxu1  ;;  %v11331_v54 = vsel %vm11196_vm0, %v11132_v61, %v11267_v40 }
 0x45c   : > { %v10581_v18 = vadd.f32 %v12524_v48, %v17652_v26 }
 0x45d   : > { %11419 = vxpose.xlu0.b32.cont [15/16] (narrow) %v11323_v50, 8  ;;  %v17150_v58 = vpop.trf.xlu0  ;;  %v11062_v50 = vadd.f32 %v12618_v5, %v10561_v55  ;;  %v10575_v22 = vpop.f32.mrf.mxu1 }
 0x45e   : > { %v10576_v19 = vadd.f32 %v10575_v22, %v17651_v33  ;;  %v11066_v47 = vadd.f32 %v12624_v16, %v10581_v18  ;;  %v17657_v18 = vld [vmem:[#allocation14_spill] sm:$0xff] }
 0x45f   : > { %11473 = vrot.lane.b32.xlu1 %v17150_v58, %s12814_s9  ;;  %v11133_v34 = vadd.f32 %v16913_v8, %v11062_v50  ;;  %v12527_v45 = vpop.f32.mrf.mxu1 }
 0x460   : > { %v11065_v21 = vadd.f32 %v10978_v9, %v10576_v19 }
 0x461   : > { %11420 = vxpose.xlu0.b32.end [16/16] (narrow) %v11324_v44, 8  ;;  %v17649_v44 = vld [vmem:[#allocation28_spill] sm:$0xff]  ;;  %v11268_v25 = vmul.f32 %v16924_v37, %v11133_v34  ;;  %vm11197_vm1 = vcmp.gt.f32.partialorder %v11133_v34, 0.0  ;;  %v10585_v20 = vpop.f32.mrf.mxu1 }
 0x462   : > { %v10566_v38 = vadd.f32 %v10565_v17, %v17649_v44  ;;  %v10586_v39 = vadd.f32 %v10585_v20, %v17653_v12  ;;  %v17658_v12 = vld [vmem:[#allocation8_spill] sm:$0xff] }
 0x463   : > { %v11332_v49 = vsel %vm11197_vm1, %v11133_v34, %v11268_v25 }
 0x464   : > { %v11063_v63 = vadd.f32 %v10968_v35, %v10566_v38 }
 0x466   : > { %v11134_v32 = vadd.f32 %v16913_v8, %v11063_v63  ;;  %v12739_v8 = vld [vmem:[%s17354_s2] ss:$0 sm:$0xff] }
 0x467   : > { %v11135_v46 = vadd.f32 %v12739_v8, %v11064_v6  ;;  %v11136_v1 = vadd.f32 %v12739_v8, %v11065_v21  ;;  %v11137_v5 = vadd.f32 %v12739_v8, %v11066_v47  ;;  %v12817_v6 = vmov 1934713408  }
 0x468   : > { %v11269_v43 = vmul.f32 %v16924_v37, %v11134_v32  ;;  %vm11198_vm3 = vcmp.gt.f32.partialorder %v11134_v32, 0.0  ;;  %v17654_v37 = vld [vmem:[#allocation11_spill] sm:$0xff] }
 0x469   : > { %v11270_v36 = vmul.f32 %v12740_v56, %v11135_v46  ;;  %vm11199_vm6 = vcmp.gt.f32.partialorder %v11135_v46, 0.0  ;;  %v10591_v24 = vadd.f32 %v12527_v45, %v17654_v37  ;;  %v11271_v53 = vmul.f32 %v12740_v56, %v11136_v1 }
 0x46a   : > { %v11333_v62 = vsel %vm11198_vm3, %v11134_v32, %v11269_v43  ;;  %vm11200_vm4 = vcmp.gt.f32.partialorder %v11136_v1, 0.0  ;;  %v11272_v57 = vmul.f32 %v12740_v56, %v11137_v5  ;;  %vm11201_vm7 = vcmp.gt.f32.partialorder %v11137_v5, 0.0 }
 0x46b   : > { %v11334_v0 = vsel %vm11199_vm6, %v11135_v46, %v11270_v36  ;;  %v11335_v55 = vsel %vm11200_vm4, %v11136_v1, %v11271_v53  ;;  %v11576_v32 = vunpack.c.l.s4 %v12817_v6 }
 0x46c   : > { %v11336_v61 = vsel %vm11201_vm7, %v11137_v5, %v11272_v57 }
 0x46d   : > { %v11577_v26 = vunpack.c.0.s8 %v11576_v32 }
 0x481   : > { %v17173_v41 = vpop.trf.xlu1 }
 0x488   : > { %11437 = vxpose.xlu1.b32.start [1/16] (narrow) %v11325_v15, 8  ;;  %v12627_v15 = vpop.f32.mrf.mxu0 }
 0x489   : > { %v11068_v10 = vadd.f32 %v12627_v15, %v10591_v24 }
 0x48a   : > { %11470 = vrot.lane.b32.xlu0 %v17150_v58, %s12815_s10  ;;  %v10988_v29 = vpop.f32.mrf.mxu0 }
 0x48b   : > { %v11067_v30 = vadd.f32 %v10988_v29, %v10586_v39  ;;  %v17232_v39 = vsub.s32 %v11577_v26, %v17658_v12 }
 0x48c   : > { %11438 = vxpose.xlu1.b32.cont [2/16] (narrow) %v11326_v23, 8  ;;  %v12530_v23 = vpop.f32.mrf.mxu1 }
 0x48d   : > { %v11138_v52 = vadd.f32 %v12739_v8, %v11067_v30  ;;  %v10601_v17 = vadd.f32 %v12530_v23, %v17656_v28 }
 0x48e   : > { %11476 = vrot.lane.b32.xlu0 %v17150_v58, %s12816_s11  ;;  %v10595_v31 = vpop.f32.mrf.mxu1 }
 0x48f   : > { %v10596_v7 = vadd.f32 %v10595_v31, %v17655_v3  ;;  %v11273_v51 = vmul.f32 %v12740_v56, %v11138_v52  ;;  %vm11202_vm10 = vcmp.gt.f32.partialorder %v11138_v52, 0.0 }
 0x490   : > { %11439 = vxpose.xlu1.b32.cont [3/16] (narrow) %v11327_v13, 8  ;;  %v12630_v13 = vpop.f32.mrf.mxu0 }
 0x491   : > { %v11070_v38 = vadd.f32 %v12630_v13, %v10601_v17  ;;  %v11337_v2 = vsel %vm11202_vm10, %v11138_v52, %v11273_v51 }
 0x492   : > { %11483 = vrot.lane.b32.xlu0 %v17173_v41, %s12814_s9  ;;  %v10998_v11 = vpop.f32.mrf.mxu0 }
 0x493   : > { %v11069_v50 = vadd.f32 %v10998_v11, %v10596_v7  ;;  %v11141_v48 = vadd.f32 %v12739_v8, %v11070_v38 }
 0x494   : > { %11440 = vxpose.xlu1.b32.cont [4/16] (narrow) %v11328_v42, 8  ;;  %v11139_v42 = vadd.f32 %v12739_v8, %v11068_v10 }
 0x495   : > { %v11276_v4 = vmul.f32 %v12740_v56, %v11141_v48  ;;  %vm11205_vm13 = vcmp.gt.f32.partialorder %v11141_v48, 0.0 }
 0x496   : > { %v11274_v44 = vmul.f32 %v12740_v56, %v11139_v42  ;;  %vm11203_vm11 = vcmp.gt.f32.partialorder %v11139_v42, 0.0 }
 0x497   : > { %v11340_v63 = vsel %vm11205_vm13, %v11141_v48, %v11276_v4 }
 0x498   : > { %11441 = vxpose.xlu1.b32.cont [5/16] (narrow) %v11329_v59, 8  ;;  %v11140_v59 = vadd.f32 %v12739_v8, %v11069_v50  ;;  %v11338_v27 = vsel %vm11203_vm11, %v11139_v42, %v11274_v44 }
 0x49a   : > { %v11275_v35 = vmul.f32 %v12740_v56, %v11140_v59  ;;  %vm11204_vm12 = vcmp.gt.f32.partialorder %v11140_v59, 0.0 }
 0x49c   : > { %11442 = vxpose.xlu1.b32.cont [6/16] (narrow) %v11330_v60, 8  ;;  %v11339_v34 = vsel %vm11204_vm12, %v11140_v59, %v11275_v35 }
 0x4a0   : > { %11443 = vxpose.xlu1.b32.cont [7/16] (narrow) %v11331_v54, 8 }
 0x4a1   : > { %v17190_v14 = vpop.trf.xlu0 }
 0x4a2   : > { %11490 = vrot.lane.b32.xlu0 %v17190_v14, %s12815_s10 }
 0x4a4   : > { %11444 = vxpose.xlu1.b32.cont [8/16] (narrow) %v11332_v49, 8 }
 0x4a6   : > { %11496 = vrot.lane.b32.xlu0 %v17190_v14, %s12816_s11 }
 0x4a8   : > { %11445 = vxpose.xlu1.b32.cont [9/16] (narrow) %v11333_v62, 8 }
 0x4ac   : > { %11446 = vxpose.xlu1.b32.cont [10/16] (narrow) %v11334_v0, 8 }
 0x4b0   : > { %11447 = vxpose.xlu1.b32.cont [11/16] (narrow) %v11335_v55, 8 }
 0x4b4   : > { %11448 = vxpose.xlu1.b32.cont [12/16] (narrow) %v11336_v61, 8 }
 0x4b8   : > { %11449 = vxpose.xlu1.b32.cont [13/16] (narrow) %v11337_v2, 8 }
 0x4bc   : > { %11450 = vxpose.xlu1.b32.cont [14/16] (narrow) %v11338_v27, 8 }
 0x4c0   : > { %11451 = vxpose.xlu1.b32.cont [15/16] (narrow) %v11339_v34, 8 }
 0x4c4   : > { %11452 = vxpose.xlu1.b32.end [16/16] (narrow) %v11340_v63, 8 }
 0x4d1   : > { %v11474_v60 = vpop.permute.xlu1 %11473 }
 0x4d2   : > { %v11509_v19 = vcombine.low %v17150_v58, %v11474_v60  ;;  %v11510_v9 = vcombine.high %v17150_v58, %v11474_v60 }
 0x4d4   : > { %v11517_v49 = vrot.slane %v11509_v19, %v17657_v18  ;;  %v11524_v1 = vrot.slane %v11510_v9, %v17657_v18 }
 0x4e2   : > { %11480 = vrot.lane.b32.xlu1 %v17173_v41, %s12815_s10 }
 0x4e6   : > { %11486 = vrot.lane.b32.xlu1 %v17173_v41, %s12816_s11 }
 0x4ea   : > { %11493 = vrot.lane.b32.xlu1 %v17190_v14, %s12814_s9 }
 0x4fc   : > { %v11471_v22 = vpop.permute.xlu0 %11470 }
 0x500   : > { %v11477_v16 = vpop.permute.xlu0 %11476 }
 0x501   : > { %v11525_v33 = vcombine.low %v11471_v22, %v11477_v16  ;;  %v11526_v54 = vcombine.high %v11471_v22, %v11477_v16 }
 0x503   : > { %v11533_v8 = vrot.slane %v11525_v33, %v17657_v18  ;;  %v11540_v43 = vrot.slane %v11526_v54, %v17657_v18 }
 0x504   : > { %v17215_v40 = vpop.trf.xlu1  ;;  %v11484_v25 = vpop.permute.xlu0 %11483 }
 0x505   : > { %11500 = vrot.lane.b32.xlu1 %v17215_v40, %s12815_s10  ;;  %11503 = vrot.lane.b32.xlu0 %v17215_v40, %s12814_s9  ;;  %v11541_v46 = vcombine.low %v17173_v41, %v11484_v25  ;;  %v11542_v21 = vcombine.high %v17173_v41, %v11484_v25  ;;  %v11573_v58 = vcombine.low %v11517_v49, %v11533_v8 }
 0x506   : > { %v11574_v62 = vcombine.high %v11517_v49, %v11533_v8  ;;  %v11589_v29 = vcombine.low %v11524_v1, %v11540_v43  ;;  %v11590_v37 = vcombine.high %v11524_v1, %v11540_v43 }
 0x507   : > { %v11549_v56 = vrot.slane %v11541_v46, %v17657_v18  ;;  %v11556_v36 = vrot.slane %v11542_v21, %v17657_v18  ;;  %v11581_v53 = vrot.slane %v11573_v58, %v17232_v39 }
 0x508   : > { %v11588_v31 = vrot.slane %v11574_v62, %v17232_v39  ;;  %v11597_v7 = vrot.slane %v11589_v29, %v17232_v39  ;;  %v11604_v55 = vrot.slane %v11590_v37, %v17232_v39 }
 0x509   : > { %11506 = vrot.lane.b32.xlu1 %v17215_v40, %s12816_s11 }
 0x514   : > { %v11491_v44 = vpop.permute.xlu0 %11490 }
 0x518   : > { %v11497_v59 = vpop.permute.xlu0 %11496 }
 0x519   : > { %v11661_v48 = vcombine.low %v11491_v44, %v11497_v59  ;;  %v11662_v27 = vcombine.high %v11491_v44, %v11497_v59 }
 0x51b   : > { %v11669_v60 = vrot.slane %v11661_v48, %v17657_v18  ;;  %v11676_v32 = vrot.slane %v11662_v27, %v17657_v18 }
 0x554   : > { %v11481_v45 = vpop.permute.xlu1 %11480 }
 0x558   : > { %v11487_v20 = vpop.permute.xlu1 %11486 }
 0x559   : > { %v11557_v15 = vcombine.low %v11481_v45, %v11487_v20  ;;  %v11558_v47 = vcombine.high %v11481_v45, %v11487_v20 }
 0x55b   : > { %v11565_v41 = vrot.slane %v11557_v15, %v17657_v18  ;;  %v11572_v23 = vrot.slane %v11558_v47, %v17657_v18 }
 0x55c   : > { %v11494_v38 = vpop.permute.xlu1 %11493 }
 0x55d   : > { %v11605_v24 = vcombine.low %v11549_v56, %v11565_v41  ;;  %v11606_v5 = vcombine.high %v11549_v56, %v11565_v41  ;;  %v11621_v30 = vcombine.low %v11556_v36, %v11572_v23  ;;  %v11622_v0 = vcombine.high %v11556_v36, %v11572_v23 }
 0x55e   : > { %v11645_v2 = vcombine.low %v17190_v14, %v11494_v38  ;;  %v11646_v35 = vcombine.high %v17190_v14, %v11494_v38 }
 0x55f   : > { %v11613_v13 = vrot.slane %v11605_v24, %v17232_v39  ;;  %v11620_v10 = vrot.slane %v11606_v5, %v17232_v39  ;;  %v11629_v52 = vrot.slane %v11621_v30, %v17232_v39  ;;  %v11636_v3 = vrot.slane %v11622_v0, %v17232_v39 }
 0x560   : > { %v11653_v63 = vrot.slane %v11645_v2, %v17657_v18  ;;  %v11660_v6 = vrot.slane %v11646_v35, %v17657_v18 }
 0x561   : > { %v11637_v57 = vcombine.low %v11581_v53, %v11613_v13  ;;  %v11638_v11 = vcombine.high %v11581_v53, %v11613_v13  ;;  %v11639_v42 = vcombine.low %v11588_v31, %v11620_v10  ;;  %v11640_v28 = vcombine.high %v11588_v31, %v11620_v10 }
 0x562   : > { %v11641_v17 = vcombine.low %v11597_v7, %v11629_v52  ;;  %v11642_v51 = vcombine.high %v11597_v7, %v11629_v52  ;;  %v11643_v50 = vcombine.low %v11604_v55, %v11636_v3  ;;  %v11644_v61 = vcombine.high %v11604_v55, %v11636_v3 }
 0x563   : > { %11782 = vst.msk [vmem:[%s17248_s24] sm:$0xff] %vm11781_vm5, %v11637_v57  ;;  %11784 = vst.msk [vmem:[%s17248_s24 + $0x10] sm:$0xff] %vm11781_vm5, %v11638_v11  ;;  %v11709_v25 = vcombine.low %v11653_v63, %v11669_v60  ;;  %v11710_v14 = vcombine.high %v11653_v63, %v11669_v60  ;;  %v11725_v46 = vcombine.low %v11660_v6, %v11676_v32 }
 0x564   : > { %11786 = vst.msk [vmem:[%s17248_s24 + $0x20] sm:$0xff] %vm11781_vm5, %v11639_v42  ;;  %11788 = vst.msk [vmem:[%s17248_s24 + $0x30] sm:$0xff] %vm11781_vm5, %v11640_v28  ;;  %v11726_v21 = vcombine.high %v11660_v6, %v11676_v32 }
 0x565   : > { %11790 = vst.msk [vmem:[%s17248_s24 + $0x40] sm:$0xff] %vm11781_vm5, %v11641_v17  ;;  %11792 = vst.msk [vmem:[%s17248_s24 + $0x50] sm:$0xff] %vm11781_vm5, %v11642_v51  ;;  %v11717_v15 = vrot.slane %v11709_v25, %v17232_v39  ;;  %v11724_v47 = vrot.slane %v11710_v14, %v17232_v39  ;;  %v11733_v62 = vrot.slane %v11725_v46, %v17232_v39 }
 0x566   : > { %11794 = vst.msk [vmem:[%s17248_s24 + $0x60] sm:$0xff] %vm11781_vm5, %v11643_v50  ;;  %11796 = vst.msk [vmem:[%s17248_s24 + $0x70] sm:$0xff] %vm11781_vm5, %v11644_v61  ;;  %v11740_v56 = vrot.slane %v11726_v21, %v17232_v39 }
 0x577   : > { %v11501_v4 = vpop.permute.xlu1 %11500  ;;  %v11504_v34 = vpop.permute.xlu0 %11503 }
 0x578   : > { %v11677_v22 = vcombine.low %v17215_v40, %v11504_v34  ;;  %v11678_v16 = vcombine.high %v17215_v40, %v11504_v34 }
 0x57a   : > { %v11685_v45 = vrot.slane %v11677_v22, %v17657_v18  ;;  %v11692_v9 = vrot.slane %v11678_v16, %v17657_v18 }
 0x57b   : > { %v11507_v33 = vpop.permute.xlu1 %11506 }
 0x57c   : > { %v11693_v19 = vcombine.low %v11501_v4, %v11507_v33  ;;  %v11694_v54 = vcombine.high %v11501_v4, %v11507_v33 }
 0x57e   : > { %v11701_v26 = vrot.slane %v11693_v19, %v17657_v18  ;;  %v11708_v8 = vrot.slane %v11694_v54, %v17657_v18 }
 0x580   : > { %v11741_v40 = vcombine.low %v11685_v45, %v11701_v26  ;;  %v11742_v49 = vcombine.high %v11685_v45, %v11701_v26  ;;  %v11757_v43 = vcombine.low %v11692_v9, %v11708_v8  ;;  %v11758_v20 = vcombine.high %v11692_v9, %v11708_v8 }
 0x582   : > { %v11749_v1 = vrot.slane %v11741_v40, %v17232_v39  ;;  %v11756_v12 = vrot.slane %v11742_v49, %v17232_v39  ;;  %v11765_v18 = vrot.slane %v11757_v43, %v17232_v39  ;;  %v11772_v58 = vrot.slane %v11758_v20, %v17232_v39 }
 0x584   : > { %v11773_v36 = vcombine.low %v11717_v15, %v11749_v1  ;;  %v11774_v41 = vcombine.high %v11717_v15, %v11749_v1  ;;  %v11775_v23 = vcombine.low %v11724_v47, %v11756_v12  ;;  %v11776_v29 = vcombine.high %v11724_v47, %v11756_v12 }
 0x585   : > { %v11777_v37 = vcombine.low %v11733_v62, %v11765_v18  ;;  %v11778_v24 = vcombine.high %v11733_v62, %v11765_v18  ;;  %v11779_v5 = vcombine.low %v11740_v56, %v11772_v58  ;;  %v11780_v30 = vcombine.high %v11740_v56, %v11772_v58 }
 0x586   : > { %11783 = vst.msk [vmem:[%s17248_s24 + $0x8] sm:$0xff] %vm11781_vm5, %v11773_v36  ;;  %11785 = vst.msk [vmem:[%s17248_s24 + $0x18] sm:$0xff] %vm11781_vm5, %v11774_v41 }
 0x587   : > { %11787 = vst.msk [vmem:[%s17248_s24 + $0x28] sm:$0xff] %vm11781_vm5, %v11775_v23  ;;  %11789 = vst.msk [vmem:[%s17248_s24 + $0x38] sm:$0xff] %vm11781_vm5, %v11776_v29 }
 0x588   : > { %11791 = vst.msk [vmem:[%s17248_s24 + $0x48] sm:$0xff] %vm11781_vm5, %v11777_v37  ;;  %11793 = vst.msk [vmem:[%s17248_s24 + $0x58] sm:$0xff] %vm11781_vm5, %v11778_v24 }
 0x589   : > { %11795 = vst.msk [vmem:[%s17248_s24 + $0x68] sm:$0xff] %vm11781_vm5, %v11779_v5  ;;  %11797 = vst.msk [vmem:[%s17248_s24 + $0x78] sm:$0xff] %vm11781_vm5, %v11780_v30 }
 0x58a   : > { %s12128_s30 = sshll.u32 %s12791_s18, 1  ;;  %s12129_s8 = sshll.u32 %s12795_s19, 5 }
 0x58b   : > { %s11811_s9 = sadd.s32 %s12129_s8, %s12128_s30  ;;  %s11824_s10 = sshll.u32 %s17248_s24, 4  ;;  %s11825_s10 = int_to_ptr.vmem [resolvable:$true] %s11824_s10 }
 0x58c   : > { %s12130_s11 = sshll.u32 %s11811_s9, 7  ;;  %s12818_s23 = smov 256  }
 0x58d   : > { %s11813_s14 = scalar_lea.hbm %s17356_s4, %s12130_s11  ;;  %12636 = sst [smem:[#allocation6]] (%p12901_p3), %s12818_s23 }
 0x58e   : > { %s12819_s5 = smov 512   ;;  %s12820_s6 = smov 2  }
 0x58f   : > { %12637 = sst [smem:[#allocation6 + $0x1]] (%p12901_p3), %s12819_s5  ;;  %s12821_s18 = smov 128  }
 0x590   : > { %12638 = sst [smem:[#allocation6 + $0x2]] (%p12901_p3), %s12820_s6  ;;  %s12822_s19 = smov 8  }
 0x591   : > { %12639 = sst [smem:[#allocation6 + $0x3]] (%p12901_p3), %s12821_s18  ;;  %s12823_s24 = smov 131072  }
 0x592   : > { %12640 = sst [smem:[#allocation6 + $0x4]] (%p12901_p3), %s12821_s18  ;;  %s12824_s30 = smov 0  }
 0x593   : > { %12641 = sst [smem:[#allocation6 + $0x5]] (%p12901_p3), %s12822_s19 }
 0x594   : > { %12642 = dma.general (%p12901_p3), %s11825_s10, 2048, %s11813_s14, %s11799_s27, %s12823_s24, [#allocation6], %s12824_s30, 0  }
 0x595 PF: > { %p12648_p13 = scmp.ge.s32.totalorder %s12807_s22, 2  ;;  %s11852_s8 = sand.u32 1, %s12779_s15  }
 0x596   : > { %s11853_s9 = scalar_lea.sflag [#allocation4], %s11852_s8 }
 0x597   : > { %p12645_p0 = pnand %p12648_p13, %p12910_p8 }
 0x599   : > { %p12646_p1 = pneg %p12645_p0 }
 0x59b   : > { %12774 = dma.done.wait (%p12646_p1), %s11853_s9, 2048  }
 0x59c   : > { %12776 = vsyncadd (%p12646_p1), %s11853_s9, 4294965248  ;;  %s17_s22 = sadd.s32 1, %s12807_s22   ;;  %s17659_s15 = smov %s12783_s16 }
 0x59d   : > { %p14_p2 = scmp.ge.s32.totalorder %s17_s22, 6   ;;  %s17660_s16 = smov %s12787_s17 }
 0x59e   : > { %s17661_s17 = smov %s12919_s7  ;;  %s17662_s18 = smov %s12799_s20 }
 0x59f   : > { %s17663_s19 = smov %s12803_s21  ;;  %s17664_s20 = smov %s17667_s25 }
 0x5a0   : > { %s17665_s21 = smov %s17671_s26  ;;  %16 = sbr.rel (!%p14_p2) target bundleno = 5 (0x5), region = 79 }
 0x5a5   :  { %11858 = vsyncpa [#allocation4], 1 }
 0x5a6   :  { %11860 = vsyncpa [#allocation4 + $0x1], 1 }

</bundles_post_ra>
